<compile_context>
chip_gen: v6e
topology: v6e:2x2x1
jax: 0.10.0
libtpu: 0.0.40
codegen_flags: <defaults>
</compile_context>

<pallas_src>
import jax
import jax.numpy as jnp
from jax.experimental import pallas as pl
from jax.experimental.pallas import tpu as pltpu


def _round_up(x, m):
    return (x + m - 1) // m * m


def _cdiv(a, b):
    return (a + b - 1) // b


def _choose_tile_m(n, tile_m, min_grid_steps):
    """Round tile_m to a lane multiple, never exceed the (128-padded) batch,
    and cap it so the 1-D grid has at least `min_grid_steps` steps (v7x has 2
    TensorCores; a 1-step grid would leave one idle)."""
    n128 = _round_up(n, 128)
    tile_m = max(128, _round_up(tile_m, 128))
    tile_m = min(tile_m, n128)
    cap = max(128, _round_up(_cdiv(n128, min_grid_steps), 128))
    return min(tile_m, cap)


def _make_siren_kernel(num_linear):
    """num_linear = number of Linear layers (sine layers + final linear).
    Layer 0's bias is folded into its weight (the x block carries a ones row);
    omega_0 is folded into the sine layers' weights/biases, so the kernel only
    applies a plain sin() to every non-final layer."""

    def kernel(x_ref, *refs):
        out_ref = refs[-1]
        params = refs[:-1]  # w0_aug, w1, b1, ..., w_{L-1}, b_{L-1}

        # Layer 0 entirely on the MXU: z0 = W0_aug @ [x; 1].
        z = jnp.dot(params[0][...], x_ref[...],
                    preferred_element_type=jnp.float32)   # (out0, tile_m)
        h = jnp.sin(z) if num_linear > 1 else z

        pi = 1
        for l in range(1, num_linear):
            w = params[pi][...]        # (out_l, in_l)
            b = params[pi + 1][...]    # (out_l, 1) -> broadcasts over lanes
            pi += 2
            z = jnp.dot(w, h, preferred_element_type=jnp.float32) + b
            h = jnp.sin(z) if l < num_linear - 1 else z

        out_ref[...] = h.astype(out_ref.dtype)

    return kernel


def siren_forward(x, weights, biases, omegas, *, tile_m=2048, min_grid_steps=2):
    """Fused SIREN forward.

    x:        (N, n_in) array (cast to f32 like torch's input.float()).
    weights:  list of (out_l, in_l) f32 arrays (torch nn.Linear layout).
    biases:   list of (out_l,) f32 arrays.
    omegas:   per-layer omega_0 (last entry unused: final layer is linear).
    Returns (y, coordinates) mirroring Siren.forward; y has shape (N, n_out).
    """
    N, n_in = x.shape
    num_linear = len(weights)
    n_out = weights[-1].shape[0]

    # ---- one-time parameter transforms (wrapper-side, negligible) ---------
    # sin(omega*(Wx+b)) == sin((omega*W)x + omega*b): fold omega into W/b.
    # Layer 0 additionally folds its bias as an extra weight column; the
    # matching ones row is appended to the transposed input below.
    w0 = jnp.asarray(weights[0], jnp.float32)
    b0 = jnp.asarray(biases[0], jnp.float32)
    if num_linear > 1:
        w0 = w0 * omegas[0]
        b0 = b0 * omegas[0]
    w0_aug = jnp.concatenate([w0, b0[:, None]], axis=1)   # (out0, n_in + 1)

    rest = []
    for l in range(1, num_linear):
        w = jnp.asarray(weights[l], jnp.float32)
        b = jnp.asarray(biases[l], jnp.float32).reshape(-1, 1)
        if l < num_linear - 1:
            w = w * omegas[l]
            b = b * omegas[l]
        rest.append((w, b))

    # ---- batch on the lane axis, padded to a multiple of tile_m -----------
    tile_m = _choose_tile_m(N, tile_m, min_grid_steps)
    n_pad = _round_up(N, tile_m)
    x_t = jnp.concatenate(
        [x.astype(jnp.float32).T, jnp.ones((1, N), jnp.float32)],
        axis=0)                                            # (n_in + 1, N)
    if n_pad != N:
        x_t = jnp.pad(x_t, ((0, 0), (0, n_pad - N)))

    kernel = _make_siren_kernel(num_linear)

    in_specs = [pl.BlockSpec((n_in + 1, tile_m), lambda i: (0, i)),
                pl.BlockSpec(w0_aug.shape, lambda i: (0, 0))]
    args = [x_t, w0_aug]
    for w, b in rest:
        # Full-array blocks + constant index_map: params stay VMEM-resident.
        in_specs.append(pl.BlockSpec(w.shape, lambda i: (0, 0)))
        in_specs.append(pl.BlockSpec(b.shape, lambda i: (0, 0)))
        args.append(w)
        args.append(b)

    y_t = pl.pallas_call(
        kernel,
        out_shape=jax.ShapeDtypeStruct((n_out, n_pad), jnp.float32),
        grid_spec=pltpu.PrefetchScalarGridSpec(
            num_scalar_prefetch=0,
            grid=(n_pad // tile_m,),
            in_specs=in_specs,
            out_specs=pl.BlockSpec((n_out, tile_m), lambda i: (0, i)),
        ),
        compiler_params=pltpu.CompilerParams(
            dimension_semantics=("parallel",),
            vmem_limit_bytes=32 * 1024 * 1024),
    )(*args)

    y = y_t[:, :N].T   # back to (N, n_out), drop the padded tail
    # TODO(synk): clone().detach().requires_grad_(True) is torch autograd
    # bookkeeping with no Pallas meaning; gradients are handled by JAX
    # autodiff outside the kernel.
    coordinates = x.astype(jnp.float32)
    return y, coordinates


def init_siren_params(key, n_in, n_hidden, n_out, first_omega_0, hidden_omega_0):
    """Mirror SineLayer.init_weights / nn.Linear defaults.
    Weights are stored in torch (out_features, in_features) layout."""
    dims = [n_in] + list(n_hidden) + [n_out]
    weights, biases, omegas = [], [], []
    for l in range(len(dims) - 1):
        fan_in, fan_out = dims[l], dims[l + 1]
        key, kw, kb = jax.random.split(key, 3)
        if l == 0:
            w_bound = 1.0 / fan_in
            omegas.append(first_omega_0)
        else:
            w_bound = (6.0 / fan_in) ** 0.5 / hidden_omega_0
            omegas.append(hidden_omega_0)  # unused for the final linear layer
        w = jax.random.uniform(kw, (fan_out, fan_in), jnp.float32,
                               minval=-w_bound, maxval=w_bound)
        b_bound = 1.0 / (fan_in ** 0.5)
        b = jax.random.uniform(kb, (fan_out,), jnp.float32,
                               minval=-b_bound, maxval=b_bound)
        weights.append(w)
        biases.append(b)
    return weights, biases, omegas


def siren_reference(x, weights, biases, omegas):
    """Plain-JAX reference with the ORIGINAL (un-folded) formulation."""
    h = x.astype(jnp.float32)
    num_linear = len(weights)
    for l in range(num_linear):
        z = jnp.dot(h, weights[l].T,
                    precision=jax.lax.Precision.HIGHEST) + biases[l]
        h = jnp.sin(omegas[l] * z) if l < num_linear - 1 else z
    return h


if __name__ == "__main__":
    # Small SIREN: n_in=2 coordinates, hidden [32, 64, 32], n_out=1.
    n_in, n_hidden, n_out = 2, [32, 64, 32], 1
    first_omega_0, hidden_omega_0 = 30.0, 30.0
    N = 1024  # number of coordinate samples (grid of 2 steps after clamping)

    key = jax.random.PRNGKey(0)
    key, kx = jax.random.split(key)
    x = jax.random.uniform(kx, (N, n_in), jnp.float32, minval=-1.0, maxval=1.0)

    weights, biases, omegas = init_siren_params(
        key, n_in, n_hidden, n_out, first_omega_0, hidden_omega_0)

    y, coords = siren_forward(x, weights, biases, omegas, tile_m=2048)
    y = jax.block_until_ready(y)
    coords = jax.block_until_ready(coords)

    y_ref = siren_reference(x, weights, biases, omegas)
    assert y.shape == (N, n_out)
    assert coords.shape == (N, n_in)
    assert jnp.allclose(y, y_ref, atol=5e-4, rtol=5e-4), (
        "mismatch vs reference: max abs diff "
        f"{float(jnp.max(jnp.abs(y - y_ref)))}")
    print("KERNEL_OK")
</pallas_src>

<mosaic_0001>
module attributes {stable_mosaic.version = 11 : i64} {
  func.func @kernel(%arg0: i32, %arg1: memref<3x512xf32, #tpu.memory_space<vmem>>, %arg2: memref<32x3xf32, #tpu.memory_space<vmem>>, %arg3: memref<64x32xf32, #tpu.memory_space<vmem>>, %arg4: memref<64x1xf32, #tpu.memory_space<vmem>>, %arg5: memref<32x64xf32, #tpu.memory_space<vmem>>, %arg6: memref<32x1xf32, #tpu.memory_space<vmem>>, %arg7: memref<1x32xf32, #tpu.memory_space<vmem>>, %arg8: memref<1x1xf32, #tpu.memory_space<vmem>>, %arg9: memref<1x512xf32, #tpu.memory_space<vmem>>) attributes {dimension_semantics = [#tpu.dimension_semantics<parallel>], iteration_bounds = array<i64: 2>, scalar_prefetch = 0 : i64, scratch_operands = 0 : i64, tpu.core_type = #tpu.core_type<tc>, window_params = [{transform_indices = @transform_0, window_bounds = array<i64: 3, 512>}, {pipeline_mode = #tpu.pipeline_mode<synchronous>, transform_indices = @transform_1, window_bounds = array<i64: 32, 3>}, {pipeline_mode = #tpu.pipeline_mode<synchronous>, transform_indices = @transform_2, window_bounds = array<i64: 64, 32>}, {pipeline_mode = #tpu.pipeline_mode<synchronous>, transform_indices = @transform_3, window_bounds = array<i64: 64, 1>}, {pipeline_mode = #tpu.pipeline_mode<synchronous>, transform_indices = @transform_4, window_bounds = array<i64: 32, 64>}, {pipeline_mode = #tpu.pipeline_mode<synchronous>, transform_indices = @transform_5, window_bounds = array<i64: 32, 1>}, {pipeline_mode = #tpu.pipeline_mode<synchronous>, transform_indices = @transform_6, window_bounds = array<i64: 1, 32>}, {pipeline_mode = #tpu.pipeline_mode<synchronous>, transform_indices = @transform_7, window_bounds = array<i64: 1, 1>}, {transform_indices = @transform_8, window_bounds = array<i64: 1, 512>}]} {
    %c0 = arith.constant 0 : index
    %c0_0 = arith.constant 0 : index
    %0 = vector.load %arg2[%c0, %c0_0] : memref<32x3xf32, #tpu.memory_space<vmem>>, vector<32x3xf32>
    %c0_1 = arith.constant 0 : index
    %c0_2 = arith.constant 0 : index
    %1 = vector.load %arg1[%c0_1, %c0_2] : memref<3x512xf32, #tpu.memory_space<vmem>>, vector<3x512xf32>
    %cst = arith.constant dense<0.000000e+00> : vector<32x512xf32>
    %2 = tpu.matmul %0, %1, %cst {dimension_numbers = #tpu.dot_dimension_numbers<[1], [0], [0], [1], [0, 0, 1, 1], [], []>} : vector<32x3xf32>, vector<3x512xf32>, vector<32x512xf32> -> vector<32x512xf32>
    %3 = math.sin %2 : vector<32x512xf32>
    %c0_3 = arith.constant 0 : index
    %c0_4 = arith.constant 0 : index
    %4 = vector.load %arg3[%c0_3, %c0_4] : memref<64x32xf32, #tpu.memory_space<vmem>>, vector<64x32xf32>
    %c0_5 = arith.constant 0 : index
    %c0_6 = arith.constant 0 : index
    %5 = vector.load %arg4[%c0_5, %c0_6] : memref<64x1xf32, #tpu.memory_space<vmem>>, vector<64x1xf32>
    %cst_7 = arith.constant dense<0.000000e+00> : vector<64x512xf32>
    %6 = tpu.matmul %4, %3, %cst_7 {dimension_numbers = #tpu.dot_dimension_numbers<[1], [0], [0], [1], [0, 0, 1, 1], [], []>} : vector<64x32xf32>, vector<32x512xf32>, vector<64x512xf32> -> vector<64x512xf32>
    %7 = vector.broadcast %5 : vector<64x1xf32> to vector<64x512xf32>
    %8 = arith.addf %6, %7 : vector<64x512xf32>
    %9 = math.sin %8 : vector<64x512xf32>
    %c0_8 = arith.constant 0 : index
    %c0_9 = arith.constant 0 : index
    %10 = vector.load %arg5[%c0_8, %c0_9] : memref<32x64xf32, #tpu.memory_space<vmem>>, vector<32x64xf32>
    %c0_10 = arith.constant 0 : index
    %c0_11 = arith.constant 0 : index
    %11 = vector.load %arg6[%c0_10, %c0_11] : memref<32x1xf32, #tpu.memory_space<vmem>>, vector<32x1xf32>
    %cst_12 = arith.constant dense<0.000000e+00> : vector<32x512xf32>
    %12 = tpu.matmul %10, %9, %cst_12 {dimension_numbers = #tpu.dot_dimension_numbers<[1], [0], [0], [1], [0, 0, 1, 1], [], []>} : vector<32x64xf32>, vector<64x512xf32>, vector<32x512xf32> -> vector<32x512xf32>
    %13 = vector.broadcast %11 : vector<32x1xf32> to vector<32x512xf32>
    %14 = arith.addf %12, %13 : vector<32x512xf32>
    %15 = math.sin %14 : vector<32x512xf32>
    %c0_13 = arith.constant 0 : index
    %c0_14 = arith.constant 0 : index
    %16 = vector.load %arg7[%c0_13, %c0_14] : memref<1x32xf32, #tpu.memory_space<vmem>>, vector<1x32xf32>
    %c0_15 = arith.constant 0 : index
    %c0_16 = arith.constant 0 : index
    %17 = vector.load %arg8[%c0_15, %c0_16] : memref<1x1xf32, #tpu.memory_space<vmem>>, vector<1x1xf32>
    %cst_17 = arith.constant dense<0.000000e+00> : vector<1x512xf32>
    %18 = tpu.matmul %16, %15, %cst_17 {dimension_numbers = #tpu.dot_dimension_numbers<[1], [0], [0], [1], [0, 0, 1, 1], [], []>} : vector<1x32xf32>, vector<32x512xf32>, vector<1x512xf32> -> vector<1x512xf32>
    %19 = vector.broadcast %17 : vector<1x1xf32> to vector<1x512xf32>
    %20 = arith.addf %18, %19 : vector<1x512xf32>
    %c0_18 = arith.constant 0 : index
    %c0_19 = arith.constant 0 : index
    %21 = vector.load %arg9[%c0_18, %c0_19] : memref<1x512xf32, #tpu.memory_space<vmem>>, vector<1x512xf32>
    tpu.vector_store %arg9[%c0_18, %c0_19], %20 {strides = array<i32>} : memref<1x512xf32, #tpu.memory_space<vmem>>, vector<1x512xf32>,
    return
  }
  func.func @transform_0(%arg0: i32) -> (i32, i32) {
    %c0_i32 = arith.constant 0 : i32
    %c0_i32_0 = arith.constant 0 : i32
    return %c0_i32, %arg0 : i32, i32
  }
  func.func @transform_1(%arg0: i32) -> (i32, i32) {
    %c0_i32 = arith.constant 0 : i32
    %c0_i32_0 = arith.constant 0 : i32
    %c0_i32_1 = arith.constant 0 : i32
    return %c0_i32, %c0_i32_0 : i32, i32
  }
  func.func @transform_2(%arg0: i32) -> (i32, i32) {
    %c0_i32 = arith.constant 0 : i32
    %c0_i32_0 = arith.constant 0 : i32
    %c0_i32_1 = arith.constant 0 : i32
    return %c0_i32, %c0_i32_0 : i32, i32
  }
  func.func @transform_3(%arg0: i32) -> (i32, i32) {
    %c0_i32 = arith.constant 0 : i32
    %c0_i32_0 = arith.constant 0 : i32
    %c0_i32_1 = arith.constant 0 : i32
    return %c0_i32, %c0_i32_0 : i32, i32
  }
  func.func @transform_4(%arg0: i32) -> (i32, i32) {
    %c0_i32 = arith.constant 0 : i32
    %c0_i32_0 = arith.constant 0 : i32
    %c0_i32_1 = arith.constant 0 : i32
    return %c0_i32, %c0_i32_0 : i32, i32
  }
  func.func @transform_5(%arg0: i32) -> (i32, i32) {
    %c0_i32 = arith.constant 0 : i32
    %c0_i32_0 = arith.constant 0 : i32
    %c0_i32_1 = arith.constant 0 : i32
    return %c0_i32, %c0_i32_0 : i32, i32
  }
  func.func @transform_6(%arg0: i32) -> (i32, i32) {
    %c0_i32 = arith.constant 0 : i32
    %c0_i32_0 = arith.constant 0 : i32
    %c0_i32_1 = arith.constant 0 : i32
    return %c0_i32, %c0_i32_0 : i32, i32
  }
  func.func @transform_7(%arg0: i32) -> (i32, i32) {
    %c0_i32 = arith.constant 0 : i32
    %c0_i32_0 = arith.constant 0 : i32
    %c0_i32_1 = arith.constant 0 : i32
    return %c0_i32, %c0_i32_0 : i32, i32
  }
  func.func @transform_8(%arg0: i32) -> (i32, i32) {
    %c0_i32 = arith.constant 0 : i32
    %c0_i32_0 = arith.constant 0 : i32
    return %c0_i32, %arg0 : i32, i32
  }
}

</mosaic_0001>

<bundles_post_ra>
// kernel: tpu_custom_call.1
= control target key start
LH: loop header
LB: loop body
LE: loop exit
PB: predicated region body
PF: predicated region fallthrough
CT: control target
= control target key end

     0   :  { %s15487_s0 = inlined_call_operand.vmem [shape: f32[3,1024], index: 0, kind: input, shape index: {}]   ;;  %s15488_s1 = inlined_call_operand.vmem [shape: f32[32,3], index: 1, kind: input, shape index: {}]   ;;  %s15489_s2 = inlined_call_operand.vmem [shape: f32[64,32], index: 2, kind: input, shape index: {}]   ;;  %s15490_s3 = inlined_call_operand.vmem [shape: f32[64,1], index: 3, kind: input, shape index: {}]   ;;  %s15491_s4 = inlined_call_operand.vmem [shape: f32[32,64], index: 4, kind: input, shape index: {}]   ;;  %s15492_s5 = inlined_call_operand.vmem [shape: f32[32,1], index: 5, kind: input, shape index: {}]   ;;  %s15493_s6 = inlined_call_operand.vmem [shape: f32[1,32], index: 6, kind: input, shape index: {}]   ;;  %s15494_s7 = inlined_call_operand.<no memory space> [shape: f32[1,1], index: 7, kind: input, shape index: {}]   ;;  %s15495_s8 = inlined_call_operand.hbm [shape: f32[1,1024], index: 8, kind: output, shape index: {}]  }
   0x1   :  { %v13_v0 = vstv %s15494_s7 }
   0x2   :  { %14 = vst [vmem:[#allocation2] sm:$0x1] %v13_v0 }
   0x3   :  { %15 = vsyncpa [#allocation4], 0 }
   0x4   :  { %17 = vsyncpa [#allocation4 + $0x1], 0  ;;  %s8956_s29 = smov 0   ;;  %s8958_s30 = smov 0  }
   0x5   :  { %s8960_s9 = smov 0   ;;  %s8962_s10 = smov 0  }
   0x6 LB: > { %s8977_s7 = sadd.s32 4294967295, %s8896_s10   ;;  %s7965_s11 = sadd.s32 4294967294, %s8896_s10   ;;  %s8896_s10 = sphi %s8962_s10, %s16471_s10   ;;  %s8892_s9 = sphi %s8960_s9, %s16470_s9   ;;  %s8888_s30 = sphi %s8958_s30, %s16469_s30   ;;  %s8884_s29 = sphi %s8956_s29, %s16468_s29  }
   0x7   : > { %s8981_s12 = sadd.s32 1, %s8896_s10   ;;  %s203_s13 = sadd.s32 1, %s8892_s9 }
   0x8   : > { %s200_s14 = ssub.s32 %s8896_s10, %s8981_s12  ;;  %p213_p0 = scmp.ne.s32.totalorder %s8892_s9, %s8888_s30 }
   0x9   : > { %p201_p1 = scmp.eq.s32.totalorder %s200_s14, 0  ;;  %p214_p2 = scmp.eq.s32.totalorder %s8977_s7, 1 }
   0xa   : > { %p219_p3 = scmp.ne.s32.totalorder %s8888_s30, %s8884_s29  ;;  %p220_p4 = scmp.eq.s32.totalorder %s7965_s11, 1 }
   0xb   : > { %s8992_s15 = scalar_select %p201_p1, %s8892_s9, %s203_s13  }
   0xc   : > { %p8994_p5 = por %p214_p2, %p213_p0  ;;  %p8998_p6 = por %p220_p4, %p219_p3 }
   0xd   : > { %p7968_p7 = scmp.ge.s32.totalorder %s8896_s10, 1  ;;  %p268_p8 = scmp.lt.s32.totalorder %s8896_s10, 3 }
   0xf   : > { %p269_p9 = pnand %p7968_p7, %p268_p8 }
  0x11   : > { %272 = sbr.rel (%p269_p9) target bundleno = 2463 (0x99f), region = 52 }
  0x16   : > { %s7970_s18 = sshll.u32 %s8977_s7, 2  ;;  %v15496_v1 = vmov 0.0   ;;  %vm332_vm0 = vcmask 1042432   ;;  %v309_v6 = vld [vmem:[%s15488_s1] sm:$0xff]  ;;  %vm319_vm1 = vcmask 23552   ;;  %v310_v7 = vld [vmem:[%s15488_s1 + $0x8] sm:$0xff] }
  0x17   : > { %p303_p10 = scmp.lt.s32.totalorder %s7970_s18, 7  ;;  %405 = vmatprep.mubr.f32.mxu0 %v15496_v1  ;;  %494 = vmatprep.mubr.f32.mxu1 %v15496_v1  ;;  %v311_v8 = vld [vmem:[%s15488_s1 + $0x10] sm:$0xff]  ;;  %v312_v9 = vld [vmem:[%s15488_s1 + $0x18] sm:$0xff]  ;;  %v15510_v39 = vmov 683565275   ;;  %s299_s25 = sand.u32 1, %s8888_s30  }
  0x18   : > { %v15512_v43 = vmov 2475754826   ;;  %v15505_v45 = vmov 2131351028   ;;  %v15503_v47 = vmov 2102212464  }
  0x19   : > { %s16473_s18 = smov (!%p303_p10, %s7970_s18), 7  ;;  %v15517_v49 = vmov 920167782   ;;  %v15507_v56 = vmov 1326507024   ;;  %s7969_s26 = sshll.u32 %s299_s25, 2 }
  0x1a   : > { %s7971_s19 = sshll.u32 %s16473_s18, 2  ;;  %s8271_s27 = sshll.u32 %s8977_s7, 6 }
  0x1b   : > { %s306_s22 = scalar_lea.vmem %s15487_s0, %s7971_s19  ;;  %s301_s28 = scalar_lea.vmem [#allocation3], %s7969_s26 }
  0x1c   : > { %v313_v2 = vld [vmem:[%s306_s22] sm:$0x77]  ;;  %v314_v3 = vld [vmem:[%s306_s22 + $0x8] sm:$0x77]  ;;  %s7906_s11 = sshll.u32 %s301_s28, 4  ;;  %s7904_s18 = scalar_lea.hbm %s15495_s8, %s8271_s27  ;;  %s7907_s11 = int_to_ptr.vmem [resolvable:$true] %s7906_s11 }
  0x1d   : > { %v317_v4 = vcombine.high %v313_v2, %v313_v2  ;;  %v318_v5 = vcombine.high %v314_v3, %v314_v3  ;;  %s7892_s19 = scalar_lea.sflag [#allocation4], %s299_s25  ;;  %s8836_s20 = scalar_lea.vmem %s7907_s11, 64 }
  0x1e   : > { %p8837_p11 = scmp.ne.s32.totalorder %s7907_s11, %s8836_s20  ;;  %s8907_s21 = smov [#allocation3]  }
  0x1f   : > { %7972 = vmatprep.subr.msk.mxu0 %vm332_vm0, %v317_v4  ;;  %7978 = vmatprep.subr.msk.mxu1 %vm332_vm0, %v318_v5  ;;  %s8840_s22 = sshll.u32 %s8907_s21, 4  ;;  %s8841_s22 = int_to_ptr.vmem [resolvable:$false] %s8840_s22 }
  0x20   : > { %7973 = vmatpush1.msk.msra.mxu0 %vm332_vm0, %v313_v2  ;;  %7979 = vmatpush1.msk.msra.mxu1 %vm332_vm0, %v314_v3  ;;  %p8838_p12 = pnand %p8837_p11, %p8994_p5  ;;  %s8842_s7 = scalar_lea.vmem %s8841_s22, 128 }
  0x21   : > { %7974 = vmatmul.mubr.msk.f32.vlgmr.msra.gmra.mxu0 %vm319_vm1, %v309_v6  ;;  %7980 = vmatmul.mubr.msk.f32.vlgmr.msra.gmra.mxu1 %vm319_vm1, %v309_v6  ;;  %p8843_p0 = scmp.lt.s32.totalorder %s7907_s11, %s8841_s22  ;;  %p8844_p1 = scmp.lt.s32.totalorder %s8842_s7, %s8836_s20 }
  0x22   : > { %411 = vmatprep.mubr.f32.mxu0 %v15496_v1  ;;  %500 = vmatprep.mubr.f32.mxu1 %v15496_v1  ;;  %p8839_p13 = pneg %p8838_p12 }
  0x23   : > { %p8845_p2 = por %p8844_p1, %p8843_p0 }
  0x25   : > { %7975 = vmatmul.mubr.msk.f32.gmra.mxu0 %vm319_vm1, %v310_v7  ;;  %7981 = vmatmul.mubr.msk.f32.gmra.mxu1 %vm319_vm1, %v310_v7  ;;  %p8846_p3 = pnand %p8845_p2, %p8839_p13 }
  0x26   : > { %417 = vmatprep.mubr.f32.mxu0 %v15496_v1  ;;  %506 = vmatprep.mubr.f32.mxu1 %v15496_v1 }
  0x29   : > { %7976 = vmatmul.mubr.msk.f32.gmra.mxu0 %vm319_vm1, %v311_v8  ;;  %7982 = vmatmul.mubr.msk.f32.gmra.mxu1 %vm319_vm1, %v311_v8 }
  0x2a   : > { %423 = vmatprep.mubr.f32.mxu0 %v15496_v1  ;;  %512 = vmatprep.mubr.f32.mxu1 %v15496_v1 }
  0x2d   : > { %7977 = vmatmul.mubr.msk.f32.gmra.mxu0 %vm319_vm1, %v312_v9  ;;  %7983 = vmatmul.mubr.msk.f32.gmra.mxu1 %vm319_vm1, %v312_v9 }
  0x2e   : > { %2328 = vmatprep.mubr.f32.mxu0 %v15496_v1  ;;  %2441 = vmatprep.mubr.f32.mxu1 %v15496_v1 }
  0xe1   : > { %v9038_v10 = vpop.f32.mrf.mxu0  ;;  %v9040_v11 = vpop.f32.mrf.mxu1 }
  0xe2   : > { %15814 = vst [vmem:[#allocation6_spill] sm:$0xff] %v9038_v10  ;;  %15815 = vst [vmem:[#allocation7_spill] sm:$0xff] %v9040_v11  ;;  %v519_v12 = vand.u32 2147483647, %v9038_v10  ;;  %v522_v13 = vand.u32 2139095040, %v9038_v10  ;;  %v730_v15 = vand.u32 2139095040, %v9040_v11 }
  0xe3   : > { %v727_v14 = vand.u32 2147483647, %v9040_v11  ;;  %v9046_v16 = vpop.f32.mrf.mxu0 }
  0xe4   : > { %15816 = vst [vmem:[#allocation8_spill] sm:$0xff] %v9046_v16  ;;  %v523_v17 = vshrl.u32 %v522_v13, 23  ;;  %v526_v18 = vand.u32 8388607, %v519_v12  ;;  %v731_v19 = vshrl.u32 %v730_v15, 23  ;;  %v626_v21 = vand.u32 2139095040, %v9046_v16 }
  0xe5   : > { %v734_v20 = vand.u32 8388607, %v727_v14  ;;  %v623_v36 = vand.u32 2147483647, %v9046_v16 }
  0xe6   : > { %v7984_v22 = vadd.s32 4294967169, %v523_v17  ;;  %v7992_v23 = vadd.s32 4294967169, %v731_v19  ;;  %v627_v24 = vshrl.u32 %v626_v21, 23  ;;  %v527_v26 = vor.u32 8388608, %v526_v18 }
  0xe7   : > { %v735_v27 = vor.u32 8388608, %v734_v20 }
  0xe8   : > { %v529_v25 = vadd.s32 1, %v7984_v22  ;;  %v737_v28 = vadd.s32 1, %v7992_v23  ;;  %v7988_v29 = vadd.s32 4294967169, %v627_v24  ;;  %v9053_v34 = vshll.u32 %v527_v26, 8 }
  0xe9   : > { %v9055_v35 = vshll.u32 %v735_v27, 8 }
  0xea   : > { %vm530_vm2 = vcmp.gt.s32.totalorder %v529_v25, 0  ;;  %vm738_vm3 = vcmp.gt.s32.totalorder %v737_v28, 0  ;;  %v9058_v37 = vadd.s32 1, %v7988_v29 }
  0xeb   : > { %v531_v30 = vsel %vm530_vm2, %v529_v25, 0  ;;  %v739_v33 = vsel %vm738_vm3, %v737_v28, 0 }
  0xec   : > { %v532_v31 = vshrl.u32 %v531_v30, 5  ;;  %v533_v32 = vand.u32 31, %v531_v30  ;;  %v9061_v41 = vshrl.u32 %v739_v33, 5  ;;  %v741_v42 = vand.u32 31, %v739_v33 }
  0xed   : > { %vm634_vm8 = vcmp.gt.s32.totalorder %v9058_v37, 0 }
  0xee   : > { %v534_v38 = vsub.s32 32, %v533_v32  ;;  %v536_v40 = vshll.u32 %v15510_v39, %v533_v32  ;;  %v539_v44 = vshll.u32 %v15512_v43, %v533_v32  ;;  %v542_v46 = vshll.u32 %v15505_v45, %v533_v32 }
  0xef   : > { %v545_v48 = vshll.u32 %v15503_v47, %v533_v32  ;;  %v548_v50 = vshll.u32 %v15517_v49, %v533_v32  ;;  %vm551_vm4 = vcmp.lt.s32.totalorder %v532_v31, 1  ;;  %vm552_vm5 = vcmp.lt.s32.totalorder %v532_v31, 2 }
  0xf0   : > { %v537_v51 = vshrl.u32 %v15512_v43, %v534_v38  ;;  %v540_v52 = vshrl.u32 %v15505_v45, %v534_v38  ;;  %v543_v53 = vshrl.u32 %v15503_v47, %v534_v38  ;;  %v535_v54 = vshrl.u32 %v15510_v39, %v534_v38 }
  0xf1   : > { %v546_v55 = vshrl.u32 %v15517_v49, %v534_v38  ;;  %v549_v57 = vshrl.u32 %v15507_v56, %v534_v38  ;;  %v742_v61 = vsub.s32 32, %v741_v42  ;;  %vm553_vm6 = vcmp.lt.s32.totalorder %v532_v31, 3 }
  0xf2   : > { %v538_v58 = vor.u32 %v537_v51, %v536_v40  ;;  %v541_v59 = vor.u32 %v540_v52, %v539_v44  ;;  %v544_v60 = vor.u32 %v543_v53, %v542_v46  ;;  %vm554_vm7 = vcmp.lt.s32.totalorder %v532_v31, 4 }
  0xf3   : > { %v547_v62 = vor.u32 %v546_v55, %v545_v48  ;;  %v550_v63 = vor.u32 %v549_v57, %v548_v50  ;;  %v744_v8 = vshll.u32 %v15510_v39, %v741_v42  ;;  %v745_v15 = vshrl.u32 %v15512_v43, %v742_v61 }
  0xf4   : > { %v555_v0 = vsel %vm551_vm4, %v535_v54, %v538_v58  ;;  %v556_v2 = vsel %vm554_vm7, %v544_v60, 2102212464  ;;  %v559_v3 = vsel %vm551_vm4, %v538_v58, %v541_v59  ;;  %v563_v4 = vsel %vm551_vm4, %v541_v59, %v544_v60 }
  0xf5   : > { %v557_v5 = vsel %vm553_vm6, %v541_v59, %v556_v2  ;;  %v560_v6 = vsel %vm554_vm7, %v547_v62, 920167782  ;;  %v564_v7 = vsel %vm554_vm7, %v550_v63, 1326507024  ;;  %v747_v17 = vshll.u32 %v15512_v43, %v741_v42 }
  0xf6   : > { %v561_v9 = vsel %vm553_vm6, %v544_v60, %v560_v6  ;;  %v565_v13 = vsel %vm553_vm6, %v547_v62, %v564_v7  ;;  %v558_v18 = vsel %vm552_vm5, %v555_v0, %v557_v5  ;;  %v748_v21 = vshrl.u32 %v15505_v45, %v742_v61  ;;  %v9125_v6 = vpop.f32.mrf.mxu1 }
  0xf7   : > { %v562_v19 = vsel %vm552_vm5, %v559_v3, %v561_v9  ;;  %v566_v20 = vsel %vm552_vm5, %v563_v4, %v565_v13  ;;  %v746_v26 = vor.u32 %v745_v15, %v744_v8  ;;  %v750_v28 = vshll.u32 %v15505_v45, %v741_v42  ;;  %15817 = vst [vmem:[#allocation9_spill] sm:$0xff] %v9125_v6 }
  0xf8   : > { %v9085_v22 = vmul.u32.u64.low %v9053_v34, %v566_v20  ;;  %v9086_v23 = vmul.u32.u64.high %v9053_v34, %v566_v20, %v9085_v22  ;;  %v9089_v24 = vmul.u32.u64.low %v9053_v34, %v562_v19  ;;  %v9090_v25 = vmul.u32.u64.high %v9053_v34, %v562_v19, %v9089_v24 }
  0xf9   : > { %v749_v27 = vor.u32 %v748_v21, %v747_v17  ;;  %v751_v29 = vshrl.u32 %v15503_v47, %v742_v61  ;;  %v743_v30 = vshrl.u32 %v15510_v39, %v742_v61  ;;  %v753_v31 = vshll.u32 %v15503_v47, %v741_v42 }
  0xfa   : > { %v754_v32 = vshrl.u32 %v15517_v49, %v742_v61  ;;  %v757_v33 = vshrl.u32 %v15507_v56, %v742_v61  ;;  %v574_v38 = vmul.u32 %v9053_v34, %v558_v18  ;;  %v756_v44 = vshll.u32 %v15517_v49, %v741_v42 }
  0xfb   : > { %v752_v40 = vor.u32 %v751_v29, %v750_v28  ;;  %vm759_vm9 = vcmp.lt.s32.totalorder %v9061_v41, 1  ;;  %vm576_vm10 = vc.u32 %v9086_v23, %v9089_v24  ;;  %v577_v46 = vadd.s32 1, %v9090_v25 }
  0xfc   : > { %v755_v48 = vor.u32 %v754_v32, %v753_v31  ;;  %vm760_vm11 = vcmp.lt.s32.totalorder %v9061_v41, 2  ;;  %v758_v50 = vor.u32 %v757_v33, %v756_v44  ;;  %vm761_vm12 = vcmp.lt.s32.totalorder %v9061_v41, 3 }
  0xfd   : > { %vm762_vm13 = vcmp.lt.s32.totalorder %v9061_v41, 4  ;;  %v767_v51 = vsel %vm759_vm9, %v746_v26, %v749_v27  ;;  %v578_v34 = vsel %vm576_vm10, %v577_v46, %v9090_v25  ;;  %v771_v53 = vsel %vm759_vm9, %v749_v27, %v752_v40 }
  0xfe   : > { %v764_v52 = vsel %vm762_vm13, %v752_v40, 2102212464  ;;  %v768_v42 = vsel %vm762_vm13, %v755_v48, 920167782  ;;  %v579_v54 = vadd.s32 %v578_v34, %v574_v38  ;;  %v763_v55 = vsel %vm759_vm9, %v743_v30, %v746_v26 }
  0xff   : > { %v769_v57 = vsel %vm761_vm12, %v752_v40, %v768_v42  ;;  %v772_v58 = vsel %vm762_vm13, %v758_v50, 1326507024  ;;  %v765_v59 = vsel %vm761_vm12, %v749_v27, %v764_v52  ;;  %v635_v62 = vsel %vm634_vm8, %v9058_v37, 0 }
 0x100   : > { %v770_v60 = vsel %vm760_vm11, %v767_v51, %v769_v57  ;;  %v773_v61 = vsel %vm761_vm12, %v755_v48, %v772_v58  ;;  %v580_v63 = vadd.s32 536870912, %v579_v54  ;;  %v766_v37 = vsel %vm760_vm11, %v763_v55, %v765_v59 }
 0x101   : > { %v774_v0 = vsel %vm760_vm11, %v771_v53, %v773_v61  ;;  %v9117_v2 = vmul.u32.u64.low %v9055_v35, %v770_v60  ;;  %v9118_v3 = vmul.u32.u64.high %v9055_v35, %v770_v60, %v9117_v2  ;;  %v630_v8 = vand.u32 8388607, %v623_v36 }
 0x102   : > { %v9122_v4 = vmul.u32.u64.low %v9055_v35, %v774_v0  ;;  %v9123_v5 = vmul.u32.u64.high %v9055_v35, %v774_v0, %v9122_v4  ;;  %v9127_v7 = vshrl.u32 %v580_v63, 30  ;;  %v637_v9 = vand.u32 31, %v635_v62 }
 0x103   : > { %v785_v15 = vadd.s32 1, %v9118_v3  ;;  %v834_v18 = vand.u32 2139095040, %v9125_v6  ;;  %v782_v19 = vmul.u32 %v9055_v35, %v766_v37  ;;  %v631_v41 = vor.u32 8388608, %v630_v8 }
 0x104   : > { %v582_v13 = vshll.u32 %v9127_v7, 30  ;;  %v638_v17 = vsub.s32 32, %v637_v9  ;;  %vm784_vm14 = vc.u32 %v9123_v5, %v9117_v2  ;;  %v640_v21 = vshll.u32 %v15510_v39, %v637_v9 }
 0x105   : > { %v786_v20 = vsel %vm784_vm14, %v785_v15, %v9118_v3  ;;  %v643_v22 = vshll.u32 %v15512_v43, %v637_v9  ;;  %v636_v29 = vshrl.u32 %v635_v62, 5  ;;  %v646_v35 = vshll.u32 %v15505_v45, %v637_v9 }
 0x106   : > { %v9142_v25 = vsub.s32 %v579_v54, %v582_v13  ;;  %v787_v26 = vadd.s32 %v786_v20, %v782_v19  ;;  %v641_v27 = vshrl.u32 %v15512_v43, %v638_v17  ;;  %v644_v28 = vshrl.u32 %v15505_v45, %v638_v17 }
 0x107   : > { %v647_v30 = vshrl.u32 %v15503_v47, %v638_v17  ;;  %v835_v31 = vshrl.u32 %v834_v18, 23  ;;  %v649_v38 = vshll.u32 %v15503_v47, %v637_v9  ;;  %v650_v40 = vshrl.u32 %v15517_v49, %v638_v17 }
 0x108   : > { %v642_v32 = vor.u32 %v641_v27, %v640_v21  ;;  %v645_v33 = vor.u32 %v644_v28, %v643_v22  ;;  %v788_v44 = vadd.s32 536870912, %v787_v26  ;;  %v652_v48 = vshll.u32 %v15517_v49, %v637_v9 }
 0x109   : > { %v648_v46 = vor.u32 %v647_v30, %v646_v35  ;;  %v653_v50 = vshrl.u32 %v15507_v56, %v638_v17  ;;  %v585_v51 = vsub.s32 0, %v9142_v25  ;;  %v651_v34 = vor.u32 %v650_v40, %v649_v38 }
 0x10a   : > { %vm655_vm15 = vcmp.lt.s32.totalorder %v636_v29, 1  ;;  %vm658_vm0 = vcmp.lt.s32.totalorder %v636_v29, 4  ;;  %v671_v42 = vshll.u32 %v631_v41, 8  ;;  %vm657_vm1 = vcmp.lt.s32.totalorder %v636_v29, 3 }
 0x10b   : > { %v654_v52 = vor.u32 %v653_v50, %v652_v48  ;;  %v663_v53 = vsel %vm655_vm15, %v642_v32, %v645_v33  ;;  %v664_v54 = vsel %vm658_vm0, %v651_v34, 920167782  ;;  %v667_v55 = vsel %vm655_vm15, %v645_v33, %v648_v46 }
 0x10c   : > { %v9155_v57 = vshrl.u32 %v788_v44, 30  ;;  %v665_v58 = vsel %vm657_vm1, %v648_v46, %v664_v54  ;;  %v7996_v60 = vadd.s32 4294967169, %v835_v31  ;;  %v7985_v61 = vmin.u32 %v585_v51, %v9142_v25 }
 0x10d   : > { %v668_v59 = vsel %vm658_vm0, %v654_v52, 1326507024  ;;  %vm656_vm2 = vcmp.lt.s32.totalorder %v636_v29, 2  ;;  %v660_v62 = vsel %vm658_vm0, %v648_v46, 2102212464  ;;  %v639_v0 = vshrl.u32 %v15510_v39, %v638_v17 }
 0x10e   : > { %v669_v63 = vsel %vm657_vm1, %v651_v34, %v668_v59  ;;  %v666_v3 = vsel %vm656_vm2, %v663_v53, %v665_v58  ;;  %v790_v9 = vshll.u32 %v9155_v57, 30  ;;  %v661_v15 = vsel %vm657_vm1, %v645_v33, %v660_v62 }
 0x10f   : > { %v670_v4 = vsel %vm656_vm2, %v667_v55, %v669_v63  ;;  %v659_v13 = vsel %vm655_vm15, %v639_v0, %v642_v32  ;;  %v841_v18 = vadd.s32 1, %v7996_v60  ;;  %v587_v19 = vclz %v7985_v61 }
 0x110   : > { %v9161_v37 = vmul.u32.u64.low %v671_v42, %v670_v4  ;;  %v9162_v8 = vmul.u32.u64.high %v671_v42, %v670_v4, %v9161_v37  ;;  %v9167_v20 = vmul.u32.u64.low %v671_v42, %v666_v3  ;;  %v9168_v41 = vmul.u32.u64.high %v671_v42, %v666_v3, %v9167_v20 }
 0x111   : > { %vm842_vm3 = vcmp.gt.s32.totalorder %v841_v18, 0  ;;  %v662_v21 = vsel %vm656_vm2, %v659_v13, %v661_v15  ;;  %v15502_v17 = vand.u32 2147483647, %v9125_v6  ;;  %v9172_v27 = vsub.s32 %v787_v26, %v790_v9  ;;  %v9199_v13 = vpop.f32.mrf.mxu0 }
 0x112   : > { %v843_v22 = vsel %vm842_vm3, %v841_v18, 0  ;;  %vm680_vm4 = vc.u32 %v9162_v8, %v9167_v20  ;;  %v7986_v35 = vadd.s32 4294967294, %v587_v19  ;;  %v681_v29 = vadd.s32 1, %v9168_v41  ;;  %15818 = vst [vmem:[#allocation10_spill] sm:$0xff] %v9199_v13 }
 0x113   : > { %v845_v28 = vand.u32 31, %v843_v22  ;;  %v678_v30 = vmul.u32 %v671_v42, %v662_v21  ;;  %v838_v32 = vand.u32 8388607, %v15502_v17  ;;  %v793_v38 = vsub.s32 0, %v9172_v27 }
 0x114   : > { %v682_v31 = vsel %vm680_vm4, %v681_v29, %v9168_v41  ;;  %vm7987_vm5 = vcmp.lt.s32.totalorder %v7986_v35, 0  ;;  %v844_v59 = vshrl.u32 %v843_v22, 5  ;;  %v575_v4 = vadd.s32 %v9089_v24, %v9086_v23 }
 0x115   : > { %v846_v33 = vsub.s32 32, %v845_v28  ;;  %v683_v40 = vadd.s32 %v682_v31, %v678_v30  ;;  %v839_v44 = vor.u32 8388608, %v838_v32  ;;  %v590_v50 = vsel %vm7987_vm5, 0, %v7986_v35 }
 0x116   : > { %v7993_v51 = vmin.u32 %v793_v38, %v9172_v27  ;;  %v848_v42 = vshll.u32 %v15510_v39, %v845_v28  ;;  %v851_v53 = vshll.u32 %v15512_v43, %v845_v28  ;;  %v857_v54 = vshll.u32 %v15503_v47, %v845_v28 }
 0x117   : > { %v684_v26 = vadd.s32 536870912, %v683_v40  ;;  %v849_v46 = vshrl.u32 %v15512_v43, %v846_v33  ;;  %v852_v48 = vshrl.u32 %v15505_v45, %v846_v33  ;;  %v855_v52 = vshrl.u32 %v15503_v47, %v846_v33 }
 0x118   : > { %v858_v55 = vshrl.u32 %v15517_v49, %v846_v33  ;;  %v854_v60 = vshll.u32 %v15505_v45, %v845_v28  ;;  %v861_v61 = vshrl.u32 %v15507_v56, %v846_v33  ;;  %v860_v3 = vshll.u32 %v15517_v49, %v845_v28 }
 0x119   : > { %v9184_v34 = vshrl.u32 %v684_v26, 30  ;;  %v850_v62 = vor.u32 %v849_v46, %v848_v42  ;;  %v853_v63 = vor.u32 %v852_v48, %v851_v53  ;;  %v591_v15 = vsub.s32 32, %v590_v50 }
 0x11a   : > { %v859_v0 = vor.u32 %v858_v55, %v857_v54  ;;  %v856_v9 = vor.u32 %v855_v52, %v854_v60  ;;  %v595_v18 = vsub.s32 4294967266, %v590_v50  ;;  %v795_v19 = vclz %v7993_v51 }
 0x11b   : > { %v686_v58 = vshll.u32 %v9184_v34, 30  ;;  %v862_v41 = vor.u32 %v861_v61, %v860_v3  ;;  %vm863_vm6 = vcmp.lt.s32.totalorder %v844_v59, 1  ;;  %vm866_vm7 = vcmp.lt.s32.totalorder %v844_v59, 4 }
 0x11c   : > { %v879_v22 = vshll.u32 %v839_v44, 8  ;;  %vm865_vm8 = vcmp.lt.s32.totalorder %v844_v59, 3  ;;  %v871_v28 = vsel %vm863_vm6, %v850_v62, %v853_v63  ;;  %v872_v35 = vsel %vm866_vm7, %v859_v0, 920167782 }
 0x11d   : > { %v9197_v37 = vsub.s32 %v683_v40, %v686_v58  ;;  %v938_v23 = vand.u32 2139095040, %v9199_v13  ;;  %vm864_vm9 = vcmp.lt.s32.totalorder %v844_v59, 2  ;;  %v868_v24 = vsel %vm866_vm7, %v856_v9, 2102212464 }
 0x11e   : > { %v873_v29 = vsel %vm865_vm8, %v856_v9, %v872_v35  ;;  %v875_v30 = vsel %vm863_vm6, %v853_v63, %v856_v9  ;;  %v7994_v31 = vadd.s32 4294967294, %v795_v19  ;;  %v847_v32 = vshrl.u32 %v15510_v39, %v846_v33 }
 0x11f   : > { %v689_v21 = vsub.s32 0, %v9197_v37  ;;  %v874_v38 = vsel %vm864_vm9, %v871_v28, %v873_v29  ;;  %v876_v40 = vsel %vm866_vm7, %v862_v41, 1326507024  ;;  %v869_v52 = vsel %vm865_vm8, %v853_v63, %v868_v24 }
 0x120   : > { %v877_v44 = vsel %vm865_vm8, %v859_v0, %v876_v40  ;;  %v9210_v46 = vmul.u32.u64.low %v879_v22, %v874_v38  ;;  %v9211_v48 = vmul.u32.u64.high %v879_v22, %v874_v38, %v9210_v46  ;;  %v867_v51 = vsel %vm863_vm6, %v847_v32, %v850_v62  ;;  %v9238_v32 = vpop.f32.mrf.mxu1 }
 0x121   : > { %v7989_v26 = vmin.u32 %v689_v21, %v9197_v37  ;;  %v878_v42 = vsel %vm864_vm9, %v875_v30, %v877_v44  ;;  %v939_v53 = vshrl.u32 %v938_v23, 23  ;;  %v593_v54 = vshrl.u32 %v575_v4, %v591_v15  ;;  %15819 = vst [vmem:[#allocation11_spill] sm:$0xff] %v9238_v32 }
 0x122   : > { %v9217_v33 = vmul.u32.u64.low %v879_v22, %v878_v42  ;;  %v9218_v55 = vmul.u32.u64.high %v879_v22, %v878_v42, %v9217_v33  ;;  %v596_v58 = vadd.s32 127, %v595_v18  ;;  %v592_v61 = vshll.u32 %v9142_v25, %v590_v50 }
 0x123   : > { %v8000_v60 = vadd.s32 4294967169, %v939_v53  ;;  %v691_v0 = vclz %v7989_v26  ;;  %v870_v3 = vsel %vm864_vm9, %v867_v51, %v869_v52  ;;  %v889_v9 = vadd.s32 1, %v9211_v48 }
 0x124   : > { %vm7995_vm10 = vcmp.lt.s32.totalorder %v7994_v31, 0  ;;  %v9223_v19 = vor.u32 %v593_v54, %v592_v61  ;;  %v15500_v63 = vand.u32 2147483647, %v9199_v13  ;;  %v597_v41 = vshll.u32 %v596_v58, 23 }
 0x125   : > { %v945_v62 = vadd.s32 1, %v8000_v60  ;;  %v886_v4 = vmul.u32 %v879_v22, %v870_v3  ;;  %vm888_vm11 = vc.u32 %v9218_v55, %v9210_v46  ;;  %v9228_v15 = vsel %vm7995_vm10, 0, %v7994_v31 }
 0x126   : > { %v7990_v25 = vadd.s32 4294967294, %v691_v0  ;;  %v890_v50 = vsel %vm888_vm11, %v889_v9, %v9211_v48  ;;  %v783_v28 = vadd.s32 %v9117_v2, %v9123_v5  ;;  %v598_v35 = vor.u32 4788187, %v597_v41 }
 0x127   : > { %vm946_vm12 = vcmp.gt.s32.totalorder %v945_v62, 0  ;;  %v891_v18 = vadd.s32 %v890_v50, %v886_v4  ;;  %v601_v23 = vcvt.s32.f32 %v9223_v19  ;;  %v799_v22 = vsub.s32 32, %v9228_v15 }
 0x128   : > { %v947_v59 = vsel %vm946_vm12, %v945_v62, 0  ;;  %v803_v29 = vsub.s32 4294967266, %v9228_v15  ;;  %vm7991_vm13 = vcmp.lt.s32.totalorder %v7990_v25, 0  ;;  %v942_v31 = vand.u32 8388607, %v15500_v63 }
 0x129   : > { %v949_v21 = vand.u32 31, %v947_v59  ;;  %v892_v30 = vadd.s32 536870912, %v891_v18  ;;  %v948_v26 = vshrl.u32 %v947_v59, 5  ;;  %v1146_v54 = vand.u32 2139095040, %v9238_v32 }
 0x12a   : > { %v599_v0 = vand.u32 2147483647, %v598_v35  ;;  %v800_v3 = vshll.u32 %v9172_v27, %v9228_v15  ;;  %v801_v9 = vshrl.u32 %v783_v28, %v799_v22  ;;  %v804_v19 = vadd.s32 127, %v803_v29 }
 0x12b   : > { %v950_v24 = vsub.s32 32, %v949_v21  ;;  %v952_v38 = vshll.u32 %v15510_v39, %v949_v21  ;;  %v955_v2 = vshll.u32 %v15512_v43, %v949_v21  ;;  %v961_v48 = vshll.u32 %v15503_v47, %v949_v21 }
 0x12c   : > { %v958_v53 = vshll.u32 %v15505_v45, %v949_v21  ;;  %v9249_v33 = vshrl.u32 %v892_v30, 30  ;;  %v964_v60 = vshll.u32 %v15517_v49, %v949_v21  ;;  %v943_v41 = vor.u32 8388608, %v942_v31 }
 0x12d   : > { %v953_v40 = vshrl.u32 %v15512_v43, %v950_v24  ;;  %v956_v5 = vshrl.u32 %v15505_v45, %v950_v24  ;;  %v959_v44 = vshrl.u32 %v15503_v47, %v950_v24  ;;  %v962_v51 = vshrl.u32 %v15517_v49, %v950_v24 }
 0x12e   : > { %v965_v61 = vshrl.u32 %v15507_v56, %v950_v24  ;;  %vm967_vm14 = vcmp.lt.s32.totalorder %v948_v26, 1  ;;  %v9256_v50 = vsel %vm7991_vm13, 0, %v7990_v25  ;;  %vm970_vm15 = vcmp.lt.s32.totalorder %v948_v26, 4 }
 0x12f   : > { %v954_v52 = vor.u32 %v953_v40, %v952_v38  ;;  %v957_v42 = vor.u32 %v956_v5, %v955_v2  ;;  %v963_v58 = vor.u32 %v962_v51, %v961_v48  ;;  %v960_v62 = vor.u32 %v959_v44, %v958_v53 }
 0x130   : > { %v966_v4 = vor.u32 %v965_v61, %v964_v60  ;;  %v1147_v30 = vshrl.u32 %v1146_v54, 23  ;;  %v894_v21 = vshll.u32 %v9249_v33, 30  ;;  %v951_v35 = vshrl.u32 %v15510_v39, %v950_v24 }
 0x131   : > { %v975_v59 = vsel %vm967_vm14, %v954_v52, %v957_v42  ;;  %vm969_vm0 = vcmp.lt.s32.totalorder %v948_v26, 3  ;;  %v976_v38 = vsel %vm970_vm15, %v963_v58, 920167782  ;;  %vm968_vm1 = vcmp.lt.s32.totalorder %v948_v26, 2  ;;  %v9283_v26 = vpop.f32.mrf.mxu0 }
 0x132   : > { %v972_v27 = vsel %vm970_vm15, %v960_v62, 2102212464  ;;  %v977_v15 = vsel %vm969_vm0, %v960_v62, %v976_v38  ;;  %v979_v28 = vsel %vm967_vm14, %v957_v42, %v960_v62  ;;  %v805_v22 = vshll.u32 %v804_v19, 23  ;;  %15820 = vst [vmem:[#allocation12_spill] sm:$0xff] %v9283_v26 }
 0x133   : > { %v978_v29 = vsel %vm968_vm1, %v975_v59, %v977_v15  ;;  %v980_v25 = vsel %vm970_vm15, %v966_v4, 1326507024  ;;  %v983_v31 = vshll.u32 %v943_v41, 8  ;;  %v699_v40 = vsub.s32 4294967266, %v9256_v50 }
 0x134   : > { %v971_v2 = vsel %vm967_vm14, %v951_v35, %v954_v52  ;;  %v981_v5 = vsel %vm969_vm0, %v963_v58, %v980_v25  ;;  %v8008_v44 = vadd.s32 4294967169, %v1147_v30  ;;  %v973_v48 = vsel %vm969_vm0, %v957_v42, %v972_v27 }
 0x135   : > { %v982_v24 = vsel %vm968_vm1, %v979_v28, %v981_v5  ;;  %v9266_v51 = vmul.u32.u64.low %v983_v31, %v978_v29  ;;  %v9267_v53 = vmul.u32.u64.high %v983_v31, %v978_v29, %v9266_v51  ;;  %v9270_v54 = vsub.s32 %v891_v18, %v894_v21 }
 0x136   : > { %v9272_v60 = vmul.u32.u64.low %v983_v31, %v982_v24  ;;  %v9273_v61 = vmul.u32.u64.high %v983_v31, %v982_v24, %v9272_v60  ;;  %v1153_v62 = vadd.s32 1, %v8008_v44  ;;  %v602_v19 = vmul.f32 %v601_v23, %v599_v0 }
 0x137   : > { %v802_v41 = vor.u32 %v801_v9, %v800_v3  ;;  %v974_v4 = vsel %vm968_vm1, %v971_v2, %v973_v48  ;;  %v806_v52 = vor.u32 4788187, %v805_v22  ;;  %v993_v42 = vadd.s32 1, %v9267_v53 }
 0x138   : > { %vm1154_vm2 = vcmp.gt.s32.totalorder %v1153_v62, 0  ;;  %v15498_v58 = vand.u32 2147483647, %v9238_v32  ;;  %vm521_vm3 = vcmp.lt.s32.totalorder %v9038_v10, 0  ;;  %v700_v30 = vadd.s32 127, %v699_v40 }
 0x139   : > { %v1155_v59 = vsel %vm1154_vm2, %v1153_v62, 0  ;;  %v897_v18 = vsub.s32 0, %v9270_v54  ;;  %v605_v21 = vsub.s32 4, %v9127_v7  ;;  %v990_v35 = vmul.u32 %v983_v31, %v974_v4 }
 0x13a   : > { %vm992_vm4 = vc.u32 %v9273_v61, %v9266_v51  ;;  %v1157_v23 = vand.u32 31, %v1155_v59  ;;  %v603_v0 = vxor.u32 2147483648, %v602_v19  ;;  %v809_v3 = vcvt.s32.f32 %v802_v41 }
 0x13b   : > { %v679_v9 = vadd.s32 %v9167_v20, %v9162_v8  ;;  %v994_v38 = vsel %vm992_vm4, %v993_v42, %v9267_v53  ;;  %v807_v27 = vand.u32 2147483647, %v806_v52  ;;  %v1150_v28 = vand.u32 8388607, %v15498_v58 }
 0x13c   : > { %v995_v15 = vadd.s32 %v994_v38, %v990_v35  ;;  %v1158_v22 = vsub.s32 32, %v1157_v23  ;;  %v695_v29 = vsub.s32 32, %v9256_v50  ;;  %v701_v25 = vshll.u32 %v700_v30, 23 }
 0x13d   : > { %v7997_v31 = vmin.u32 %v897_v18, %v9270_v54  ;;  %v1042_v40 = vand.u32 2139095040, %v9283_v26  ;;  %v1160_v5 = vshll.u32 %v15510_v39, %v1157_v23  ;;  %v1163_v44 = vshll.u32 %v15512_v43, %v1157_v23 }
 0x13e   : > { %v996_v2 = vadd.s32 536870912, %v995_v15  ;;  %v1161_v8 = vshrl.u32 %v15512_v43, %v1158_v22  ;;  %v1164_v20 = vshrl.u32 %v15505_v45, %v1158_v22  ;;  %v1166_v48 = vshll.u32 %v15505_v45, %v1157_v23 }
 0x13f   : > { %v1167_v24 = vshrl.u32 %v15503_v47, %v1158_v22  ;;  %v1170_v53 = vshrl.u32 %v15517_v49, %v1158_v22  ;;  %v1151_v60 = vor.u32 8388608, %v1150_v28  ;;  %v1156_v62 = vshrl.u32 %v1155_v59, 5 }
 0x140   : > { %v1162_v41 = vor.u32 %v1161_v8, %v1160_v5  ;;  %v1169_v4 = vshll.u32 %v15503_v47, %v1157_v23  ;;  %v1165_v52 = vor.u32 %v1164_v20, %v1163_v44  ;;  %v1172_v30 = vshll.u32 %v15517_v49, %v1157_v23 }
 0x141   : > { %v1168_v42 = vor.u32 %v1167_v24, %v1166_v48  ;;  %v1173_v18 = vshrl.u32 %v15507_v56, %v1158_v22  ;;  %v604_v35 = vsel %vm521_vm3, %v603_v0, %v602_v19  ;;  %vm729_vm5 = vcmp.lt.s32.totalorder %v9040_v11, 0 }
 0x142   : > { %v813_v38 = vsub.s32 4, %v9155_v57  ;;  %v9307_v1 = vshrl.u32 %v996_v2, 30  ;;  %v1171_v28 = vor.u32 %v1170_v53, %v1169_v4  ;;  %vm9311_vm6 = vcmp.le.f32.partialorder %v519_v12, 0.7853982 }
 0x143   : > { %v15821_v59 = vmov 0  ;;  %v810_v5 = vmul.f32 %v809_v3, %v807_v27  ;;  %v697_v23 = vshrl.u32 %v679_v9, %v695_v29  ;;  %v1174_v8 = vor.u32 %v1173_v18, %v1172_v30 }
 0x144   : > { %v15822_v59 = vsel %vm9311_vm6, 4294967295, %v15821_v59  ;;  %v1043_v20 = vshrl.u32 %v1042_v40, 23  ;;  %v702_v44 = vor.u32 4788187, %v701_v25  ;;  %v899_v48 = vclz %v7997_v31 }
 0x145   : > { %15823 = vst [vmem:[#allocation13_spill] sm:$0xff] %v15822_v59  ;;  %vm1175_vm7 = vcmp.lt.s32.totalorder %v1156_v62, 1  ;;  %vm1178_vm8 = vcmp.lt.s32.totalorder %v1156_v62, 4  ;;  %v1159_v19 = vshrl.u32 %v15510_v39, %v1158_v22  ;;  %v1191_v24 = vshll.u32 %v1151_v60, 8 }
 0x146   : > { %v1180_v0 = vsel %vm1178_vm8, %v1168_v42, 2102212464  ;;  %v1183_v2 = vsel %vm1175_vm7, %v1162_v41, %v1165_v52  ;;  %v998_v53 = vshll.u32 %v9307_v1, 30  ;;  %vm1177_vm9 = vcmp.lt.s32.totalorder %v1156_v62, 3 }
 0x147   : > { %v1184_v12 = vsel %vm1178_vm8, %v1171_v28, 920167782  ;;  %v1187_v4 = vsel %vm1175_vm7, %v1165_v52, %v1168_v42  ;;  %vm1176_vm10 = vcmp.lt.s32.totalorder %v1156_v62, 2  ;;  %v1188_v3 = vsel %vm1178_vm8, %v1174_v8, 1326507024 }
 0x148   : > { %v1185_v58 = vsel %vm1177_vm9, %v1168_v42, %v1184_v12  ;;  %v8004_v9 = vadd.s32 4294967169, %v1043_v20  ;;  %vm625_vm11 = vcmp.lt.s32.totalorder %v9046_v16, 0  ;;  %v1179_v27 = vsel %vm1175_vm7, %v1159_v19, %v1162_v41 }
 0x149   : > { %v1181_v29 = vsel %vm1177_vm9, %v1165_v52, %v1180_v0  ;;  %v1186_v25 = vsel %vm1176_vm10, %v1183_v2, %v1185_v58  ;;  %v1189_v31 = vsel %vm1177_vm9, %v1171_v28, %v1188_v3  ;;  %v7998_v22 = vadd.s32 4294967294, %v899_v48 }
 0x14a   : > { %v1190_v40 = vsel %vm1176_vm10, %v1187_v4, %v1189_v31  ;;  %v9320_v60 = vmul.u32.u64.low %v1191_v24, %v1186_v25  ;;  %v9321_v30 = vmul.u32.u64.high %v1191_v24, %v1186_v25, %v9320_v60  ;;  %v696_v18 = vshll.u32 %v9197_v37, %v9256_v50 }
 0x14b   : > { %v9326_v42 = vsub.s32 %v995_v15, %v998_v53  ;;  %v9328_v8 = vmul.u32.u64.low %v1191_v24, %v1190_v40  ;;  %v9329_v20 = vmul.u32.u64.high %v1191_v24, %v1190_v40, %v9328_v8  ;;  %v9336_v58 = vsel %vm521_vm3, %v605_v21, %v9127_v7 }
 0x14c   : > { %15824 = vst [vmem:[#allocation14_spill] sm:$0xff] %v9336_v58  ;;  %v9341_v41 = vsel %vm729_vm5, %v813_v38, %v9155_v57  ;;  %v1182_v52 = vsel %vm1176_vm10, %v1179_v27, %v1181_v29  ;;  %v1049_v37 = vadd.s32 1, %v8004_v9  ;;  %v9347_v50 = vsel %vm9311_vm6, %v9038_v10, %v604_v35 }
 0x14d   : > { %15825 = vst [vmem:[#allocation15_spill] sm:$0xff] %v9341_v41  ;;  %v811_v15 = vxor.u32 2147483648, %v810_v5  ;;  %v698_v28 = vor.u32 %v697_v23, %v696_v18  ;;  %v709_v48 = vsub.s32 4, %v9184_v34  ;;  %v703_v19 = vand.u32 2147483647, %v702_v44 }
 0x14e   : > { %vm7999_vm12 = vcmp.lt.s32.totalorder %v7998_v22, 0  ;;  %v1201_v7 = vadd.s32 1, %v9321_v30  ;;  %vm1050_vm13 = vcmp.gt.s32.totalorder %v1049_v37, 0  ;;  %v1001_v57 = vsub.s32 0, %v9326_v42 }
 0x14f   : > { %v1198_v21 = vmul.u32 %v1191_v24, %v1182_v52  ;;  %vm1200_vm14 = vc.u32 %v9329_v20, %v9320_v60  ;;  %v1051_v62 = vsel %vm1050_vm13, %v1049_v37, 0  ;;  %vm9359_vm15 = vcmp.le.f32.partialorder %v727_v14, 0.7853982 }
 0x150   : > { %v15826_v38 = vmov 0  ;;  %v1202_v23 = vsel %vm1200_vm14, %v1201_v7, %v9321_v30  ;;  %v1053_v44 = vand.u32 31, %v1051_v62  ;;  %v705_v2 = vcvt.s32.f32 %v698_v28 }
 0x151   : > { %v15827_v38 = vsel %vm9359_vm15, 4294967295, %v15826_v38  ;;  %v9367_v24 = vsel %vm7999_vm12, 0, %v7998_v22  ;;  %v1203_v53 = vadd.s32 %v1202_v23, %v1198_v21  ;;  %8580 = vcosq.f32 %v9347_v50 }
 0x152   : > { %15828 = vst [vmem:[#allocation16_spill] sm:$0xff] %v15827_v38  ;;  %v9373_v14 = vsel %vm625_vm11, %v709_v48, %v9184_v34  ;;  %v15499_v12 = vand.u32 2147483647, %v9283_v26  ;;  %v1054_v4 = vsub.s32 32, %v1053_v44  ;;  %v9378_v3 = vsel %vm729_vm5, %v811_v15, %v810_v5 }
 0x153   : > { %15829 = vst [vmem:[#allocation17_spill] sm:$0xff] %v9373_v14  ;;  %v9380_v9 = vmul.f32 %v705_v2, %v703_v19  ;;  %v8001_v27 = vmin.u32 %v1001_v57, %v9326_v42  ;;  %v1204_v29 = vadd.s32 536870912, %v1203_v53  ;;  %v907_v25 = vsub.s32 4294967266, %v9367_v24  ;;  %v9397_v57 = vpop.f32.mrf.mxu1 }
 0x154   : > { %v1057_v31 = vshrl.u32 %v15512_v43, %v1054_v4  ;;  %v1060_v22 = vshrl.u32 %v15505_v45, %v1054_v4  ;;  %v1063_v34 = vshrl.u32 %v15503_v47, %v1054_v4  ;;  %v1056_v30 = vshll.u32 %v15510_v39, %v1053_v44  ;;  %15830 = vst [vmem:[#allocation18_spill] sm:$0xff] %v9397_v57 }
 0x155   : > { %v9387_v40 = vshrl.u32 %v1204_v29, 30  ;;  %v1059_v5 = vshll.u32 %v15512_v43, %v1053_v44  ;;  %v1066_v18 = vshrl.u32 %v15517_v49, %v1054_v4  ;;  %v1046_v8 = vand.u32 8388607, %v15499_v12 }
 0x156   : > { %v1052_v52 = vshrl.u32 %v1051_v62, 5  ;;  %v1062_v37 = vshll.u32 %v15505_v45, %v1053_v44  ;;  %v1065_v15 = vshll.u32 %v15503_v47, %v1053_v44  ;;  %v1003_v28 = vclz %v8001_v27 }
 0x157   : > { %v1206_v48 = vshll.u32 %v9387_v40, 30  ;;  %v1058_v19 = vor.u32 %v1057_v31, %v1056_v30  ;;  %v1061_v7 = vor.u32 %v1060_v22, %v1059_v5  ;;  %v1068_v2 = vshll.u32 %v15517_v49, %v1053_v44 }
 0x158   : > { %v1064_v21 = vor.u32 %v1063_v34, %v1062_v37  ;;  %v1067_v23 = vor.u32 %v1066_v18, %v1065_v15  ;;  %v1069_v29 = vshrl.u32 %v15507_v56, %v1054_v4  ;;  %v707_v0 = vxor.u32 2147483648, %v9380_v9 }
 0x159   : > { %v887_v62 = vadd.s32 %v9210_v46, %v9218_v55  ;;  %v903_v35 = vsub.s32 32, %v9367_v24  ;;  %v908_v27 = vadd.s32 127, %v907_v25  ;;  %v1047_v12 = vor.u32 8388608, %v1046_v8 }
 0x15a   : > { %v1070_v63 = vor.u32 %v1069_v29, %v1068_v2  ;;  %vm1071_vm0 = vcmp.lt.s32.totalorder %v1052_v52, 1  ;;  %v1250_v31 = vand.u32 2139095040, %v9397_v57  ;;  %v8002_v22 = vadd.s32 4294967294, %v1003_v28 }
 0x15b   : > { %v9406_v34 = vsub.s32 %v1203_v53, %v1206_v48  ;;  %vm1074_vm1 = vcmp.lt.s32.totalorder %v1052_v52, 4  ;;  %v1079_v44 = vsel %vm1071_vm0, %v1058_v19, %v1061_v7  ;;  %vm1073_vm2 = vcmp.lt.s32.totalorder %v1052_v52, 3 }
 0x15c   : > { %v1080_v30 = vsel %vm1074_vm1, %v1067_v23, 920167782  ;;  %v1083_v5 = vsel %vm1071_vm0, %v1061_v7, %v1064_v21  ;;  %v1084_v18 = vsel %vm1074_vm1, %v1070_v63, 1326507024  ;;  %v1055_v46 = vshrl.u32 %v15510_v39, %v1054_v4 }
 0x15d   : > { %vm1072_vm3 = vcmp.lt.s32.totalorder %v1052_v52, 2  ;;  %v1076_v55 = vsel %vm1074_vm1, %v1064_v21, 2102212464  ;;  %v1081_v25 = vsel %vm1073_vm2, %v1064_v21, %v1080_v30  ;;  %v1085_v37 = vsel %vm1073_vm2, %v1067_v23, %v1084_v18 }
 0x15e   : > { %v1082_v8 = vsel %vm1072_vm3, %v1079_v44, %v1081_v25  ;;  %v1087_v53 = vshll.u32 %v1047_v12, 8  ;;  %v1251_v15 = vshrl.u32 %v1250_v31, 23  ;;  %v9414_v28 = vpop.eup %8580  ;;  %vm9418_vm4 = vcmp.le.f32.partialorder %v623_v36, 0.7853982  ;;  %v9429_v31 = vpop.f32.mrf.mxu0 }
 0x15f   : > { %15831 = vst [vmem:[#allocation19_spill] sm:$0xff] %v9414_v28  ;;  %v15832_v48 = vmov 0  ;;  %vm8003_vm5 = vcmp.lt.s32.totalorder %v8002_v22, 0  ;;  %v1209_v63 = vsub.s32 0, %v9406_v34  ;;  %v1075_v4 = vsel %vm1071_vm0, %v1055_v46, %v1058_v19 }
 0x160   : > { %v15833_v48 = vsel %vm9418_vm4, 4294967295, %v15832_v48  ;;  %v1086_v21 = vsel %vm1072_vm3, %v1083_v5, %v1085_v37  ;;  %v1077_v2 = vsel %vm1073_vm2, %v1061_v7, %v1076_v55  ;;  %v8012_v29 = vadd.s32 4294967169, %v1251_v15 }
 0x161   : > { %15834 = vst [vmem:[#allocation20_spill] sm:$0xff] %v15833_v48  ;;  %v9426_v23 = vmul.u32.u64.low %v1087_v53, %v1086_v21  ;;  %v9427_v12 = vmul.u32.u64.high %v1087_v53, %v1086_v21, %v9426_v23  ;;  %v905_v44 = vshrl.u32 %v887_v62, %v903_v35  ;;  %v909_v36 = vshll.u32 %v908_v27, 23 }
 0x162   : > { %v9431_v30 = vmul.u32.u64.low %v1087_v53, %v1082_v8  ;;  %v9432_v18 = vmul.u32.u64.high %v1087_v53, %v1082_v8, %v9431_v30  ;;  %8582 = vsinq.f32 %v9347_v50  ;;  %v9436_v25 = vsel %vm8003_vm5, 0, %v8002_v22 }
 0x163   : > { %v15501_v19 = vand.u32 2147483647, %v9397_v57  ;;  %v1257_v5 = vadd.s32 1, %v8012_v29  ;;  %v904_v7 = vshll.u32 %v9270_v54, %v9367_v24  ;;  %v8009_v46 = vmin.u32 %v1209_v63, %v9406_v34 }
 0x164   : > { %v1078_v55 = vsel %vm1072_vm3, %v1075_v4, %v1077_v2  ;;  %v1354_v35 = vand.u32 2139095040, %v9429_v31  ;;  %v9448_v62 = vsel %vm9359_vm15, %v9040_v11, %v9378_v3  ;;  %v708_v50 = vsel %vm625_vm11, %v707_v0, %v9380_v9 }
 0x165   : > { %vm1096_vm7 = vc.u32 %v9427_v12, %v9431_v30  ;;  %vm1258_vm8 = vcmp.gt.s32.totalorder %v1257_v5, 0  ;;  %v9455_v54 = vor.u32 %v905_v44, %v904_v7  ;;  %v9457_v24 = vor.u32 4788187, %v909_v36 }
 0x166   : > { %v1007_v52 = vsub.s32 32, %v9436_v25  ;;  %v1097_v27 = vadd.s32 1, %v9432_v18  ;;  %v1011_v22 = vsub.s32 4294967266, %v9436_v25  ;;  %v1094_v3 = vmul.u32 %v1087_v53, %v1078_v55 }
 0x167   : > { %v1254_v8 = vand.u32 8388607, %v15501_v19  ;;  %v1259_v37 = vsel %vm1258_vm8, %v1257_v5, 0  ;;  %v991_v0 = vadd.s32 %v9266_v51, %v9273_v61  ;;  %v1211_v9 = vclz %v8009_v46 }
 0x168   : > { %v1098_v15 = vsel %vm1096_vm7, %v1097_v27, %v9432_v18  ;;  %v1355_v63 = vshrl.u32 %v1354_v35, 23  ;;  %8584 = vcosq.f32 %v9448_v62  ;;  %v9471_v4 = vsel %vm9418_vm4, %v9046_v16, %v708_v50 }
 0x169   : > { %v1099_v21 = vadd.s32 %v1098_v15, %v1094_v3  ;;  %v1261_v53 = vand.u32 31, %v1259_v37  ;;  %v911_v2 = vand.u32 2147483647, %v9457_v24  ;;  %v913_v23 = vcvt.s32.f32 %v9455_v54 }
 0x16a   : > { %v1008_v51 = vshll.u32 %v9326_v42, %v9436_v25  ;;  %v1009_v61 = vshrl.u32 %v991_v0, %v1007_v52  ;;  %v1012_v29 = vadd.s32 127, %v1011_v22  ;;  %v1255_v36 = vor.u32 8388608, %v1254_v8 }
 0x16b   : > { %v1100_v44 = vadd.s32 536870912, %v1099_v21  ;;  %v1262_v18 = vsub.s32 32, %v1261_v53  ;;  %v8010_v5 = vadd.s32 4294967294, %v1211_v9  ;;  %v1260_v7 = vshrl.u32 %v1259_v37, 5 }
 0x16c   : > { %v1264_v46 = vshll.u32 %v15510_v39, %v1261_v53  ;;  %v8016_v55 = vadd.s32 4294967169, %v1355_v63  ;;  %v1267_v24 = vshll.u32 %v15512_v43, %v1261_v53  ;;  %v1270_v42 = vshll.u32 %v15505_v45, %v1261_v53 }
 0x16d   : > { %v9478_v35 = vshrl.u32 %v1100_v44, 30  ;;  %v1265_v50 = vshrl.u32 %v15512_v43, %v1262_v18  ;;  %v1268_v54 = vshrl.u32 %v15505_v45, %v1262_v18  ;;  %v1271_v25 = vshrl.u32 %v15503_v47, %v1262_v18 }
 0x16e   : > { %v1273_v52 = vshll.u32 %v15503_v47, %v1261_v53  ;;  %v1274_v27 = vshrl.u32 %v15517_v49, %v1262_v18  ;;  %v1013_v22 = vshll.u32 %v1012_v29, 23  ;;  %v1276_v63 = vshll.u32 %v15517_v49, %v1261_v53 }
 0x16f   : > { %v1102_v3 = vshll.u32 %v9478_v35, 30  ;;  %v1266_v8 = vor.u32 %v1265_v50, %v1264_v46  ;;  %v1269_v37 = vor.u32 %v1268_v54, %v1267_v24  ;;  %v9488_v0 = vpop.eup %8582  ;;  %v1272_v9 = vor.u32 %v1271_v25, %v1270_v42 }
 0x170   : > { %15835 = vst [vmem:[#allocation21_spill] sm:$0xff] %v9488_v0  ;;  %v1275_v15 = vor.u32 %v1274_v27, %v1273_v52  ;;  %v1277_v44 = vshrl.u32 %v15507_v56, %v1262_v18  ;;  %vm8011_vm9 = vcmp.lt.s32.totalorder %v8010_v5, 0  ;;  %v1295_v17 = vshll.u32 %v1255_v36, 8 }
 0x171   : > { %v9492_v19 = vsub.s32 %v1099_v21, %v1102_v3  ;;  %v1361_v47 = vadd.s32 1, %v8016_v55  ;;  %v1263_v45 = vshrl.u32 %v15510_v39, %v1262_v18  ;;  %vm1279_vm10 = vcmp.lt.s32.totalorder %v1260_v7, 1 }
 0x172   : > { %v1278_v29 = vor.u32 %v1277_v44, %v1276_v63  ;;  %vm1282_vm11 = vcmp.lt.s32.totalorder %v1260_v7, 4  ;;  %vm1281_vm12 = vcmp.lt.s32.totalorder %v1260_v7, 3  ;;  %v1287_v50 = vsel %vm1279_vm10, %v1266_v8, %v1269_v37 }
 0x173   : > { %v1284_v46 = vsel %vm1282_vm11, %v1272_v9, 2102212464  ;;  %v1288_v24 = vsel %vm1282_vm11, %v1275_v15, 920167782  ;;  %vm833_vm13 = vcmp.lt.s32.totalorder %v9125_v6, 0  ;;  %v1105_v53 = vsub.s32 0, %v9492_v19 }
 0x174   : > { %vm1280_vm14 = vcmp.lt.s32.totalorder %v1260_v7, 2  ;;  %v1289_v54 = vsel %vm1281_vm12, %v1272_v9, %v1288_v24  ;;  %v1291_v42 = vsel %vm1279_vm10, %v1269_v37, %v1272_v9  ;;  %v1014_v21 = vor.u32 4788187, %v1013_v22 }
 0x175   : > { %v1283_v25 = vsel %vm1279_vm10, %v1263_v45, %v1266_v8  ;;  %v1290_v36 = vsel %vm1280_vm14, %v1287_v50, %v1289_v54  ;;  %v1292_v55 = vsel %vm1282_vm11, %v1278_v29, 1326507024  ;;  %v9498_v18 = vpop.eup %8584  ;;  %v1285_v52 = vsel %vm1281_vm12, %v1269_v37, %v1284_v46 }
 0x176   : > { %15836 = vst [vmem:[#allocation22_spill] sm:$0xff] %v9498_v18  ;;  %v1293_v27 = vsel %vm1281_vm12, %v1275_v15, %v1292_v55  ;;  %v9500_v3 = vmul.u32.u64.low %v1295_v17, %v1290_v36  ;;  %v9501_v63 = vmul.u32.u64.high %v1295_v17, %v1290_v36, %v9500_v3  ;;  %v1010_v44 = vor.u32 %v1009_v61, %v1008_v51  ;;  %v9538_v55 = vpop.f32.mrf.mxu1 }
 0x177   : > { %v9505_v56 = vsel %vm8011_vm9, 0, %v8010_v5  ;;  %v1294_v24 = vsel %vm1280_vm14, %v1291_v42, %v1293_v27  ;;  %v15509_v22 = vand.u32 2147483647, %v9429_v31  ;;  %v8005_v45 = vmin.u32 %v1105_v53, %v9492_v19 }
 0x178   : > { %v9510_v8 = vmul.u32.u64.low %v1295_v17, %v1294_v24  ;;  %v9511_v9 = vmul.u32.u64.high %v1295_v17, %v1294_v24, %v9510_v8  ;;  %vm1362_vm0 = vcmp.gt.s32.totalorder %v1361_v47, 0  ;;  %v9513_v37 = vmul.f32 %v913_v23, %v911_v2 }
 0x179   : > { %v917_v15 = vsub.s32 4, %v9249_v33  ;;  %v1286_v29 = vsel %vm1280_vm14, %v1283_v25, %v1285_v52  ;;  %v1363_v51 = vsel %vm1362_vm0, %v1361_v47, 0  ;;  %8586 = vsinq.f32 %v9448_v62 }
 0x17a   : > { %v1015_v61 = vand.u32 2147483647, %v1014_v21  ;;  %v1305_v5 = vadd.s32 1, %v9501_v63  ;;  %v1365_v46 = vand.u32 31, %v1363_v51  ;;  %8588 = vcosq.f32 %v9471_v4 }
 0x17b   : > { %v1017_v50 = vcvt.s32.f32 %v1010_v44  ;;  %v1219_v53 = vsub.s32 4294967266, %v9505_v56  ;;  %v1358_v2 = vand.u32 8388607, %v15509_v22  ;;  %v1107_v23 = vclz %v8005_v45 }
 0x17c   : > { %v1302_v54 = vmul.u32 %v1295_v17, %v1286_v29  ;;  %vm1304_vm1 = vc.u32 %v9511_v9, %v9500_v3  ;;  %v1366_v47 = vsub.s32 32, %v1365_v46  ;;  %8590 = vsinq.f32 %v9471_v4 }
 0x17d   : > { %v9530_v7 = vsel %vm833_vm13, %v917_v15, %v9249_v33  ;;  %v1306_v42 = vsel %vm1304_vm1, %v1305_v5, %v9501_v63  ;;  %v9533_v21 = vmul.f32 %v1017_v50, %v1015_v61  ;;  %v1199_v17 = vadd.s32 %v9320_v60, %v9329_v20 }
 0x17e   : > { %15837 = vst [vmem:[#allocation23_spill] sm:$0xff] %v9530_v7  ;;  %v1307_v25 = vadd.s32 %v1306_v42, %v1302_v54  ;;  %v1369_v36 = vshrl.u32 %v15512_v43, %v1366_v47  ;;  %v1215_v4 = vsub.s32 32, %v9505_v56  ;;  %v1220_v52 = vadd.s32 127, %v1219_v53 }
 0x17f   : > { %v1359_v27 = vor.u32 8388608, %v1358_v2  ;;  %v15838_v44 = vmov 2131351028   ;;  %v8006_v33 = vadd.s32 4294967294, %v1107_v23  ;;  %v1368_v63 = vshll.u32 %v15510_v39, %v1365_v46 }
 0x180   : > { %v1372_v24 = vshrl.u32 %v15838_v44, %v1366_v47  ;;  %v1308_v45 = vadd.s32 536870912, %v1307_v25  ;;  %v15839_v8 = vmov 2102212464   ;;  %v1364_v29 = vshrl.u32 %v1363_v51, 5 }
 0x181   : > { %v1375_v15 = vshrl.u32 %v15839_v8, %v1366_v47  ;;  %v1371_v60 = vshll.u32 %v15512_v43, %v1365_v46  ;;  %v1374_v20 = vshll.u32 %v15838_v44, %v1365_v46  ;;  %v1562_v61 = vand.u32 2139095040, %v9538_v55 }
 0x182   : > { %v9547_v5 = vshrl.u32 %v1308_v45, 30  ;;  %v1370_v50 = vor.u32 %v1369_v36, %v1368_v63  ;;  %v1377_v53 = vshll.u32 %v15839_v8, %v1365_v46  ;;  %v1378_v2 = vshrl.u32 %v15517_v49, %v1366_v47 }
 0x183   : > { %v1373_v23 = vor.u32 %v1372_v24, %v1371_v60  ;;  %v1376_v54 = vor.u32 %v1375_v15, %v1374_v20  ;;  %v1380_v42 = vshll.u32 %v15517_v49, %v1365_v46  ;;  %v15840_v22 = vmov 1326507024  }
 0x184   : > { %v1381_v62 = vshrl.u32 %v15840_v22, %v1366_v47  ;;  %v1217_v51 = vshrl.u32 %v1199_v17, %v1215_v4  ;;  %v1379_v39 = vor.u32 %v1378_v2, %v1377_v53  ;;  %v9553_v43 = vshll.u32 %v1359_v27, 8 }
 0x185   : > { %v15519_v11 = vand.u32 2147483647, %v9538_v55  ;;  %v1221_v18 = vshll.u32 %v1220_v52, 23  ;;  %vm8007_vm2 = vcmp.lt.s32.totalorder %v8006_v33, 0  ;;  %v1310_v36 = vshll.u32 %v9547_v5, 30 }
 0x186   : > { %v1382_v45 = vor.u32 %v1381_v62, %v1380_v42  ;;  %v15841_v63 = vmov 683565275   ;;  %vm1383_vm3 = vcmp.lt.s32.totalorder %v1364_v29, 1  ;;  %vm1386_vm5 = vcmp.lt.s32.totalorder %v1364_v29, 4  ;;  %v9558_v15 = vpop.eup %8586 }
 0x187   : > { %v1367_v10 = vshrl.u32 %v15841_v63, %v1366_v47  ;;  %v1563_v24 = vshrl.u32 %v1562_v61, 23  ;;  %15842 = vst [vmem:[#allocation24_spill] sm:$0xff] %v9558_v15  ;;  %vm1385_vm7 = vcmp.lt.s32.totalorder %v1364_v29, 3  ;;  %v1388_v46 = vsel %vm1386_vm5, %v1376_v54, 2102212464  ;;  %v9563_v27 = vpop.eup %8588 }
 0x188   : > { %v1391_v17 = vsel %vm1383_vm3, %v1370_v50, %v1373_v23  ;;  %v1392_v4 = vsel %vm1386_vm5, %v1379_v39, 920167782  ;;  %15843 = vst [vmem:[#allocation25_spill] sm:$0xff] %v9563_v27  ;;  %v9565_v52 = vsel %vm8007_vm2, 0, %v8006_v33  ;;  %vm1384_vm8 = vcmp.lt.s32.totalorder %v1364_v29, 2 }
 0x189   : > { %v1393_v62 = vsel %vm1385_vm7, %v1376_v54, %v1392_v4  ;;  %v1395_v47 = vsel %vm1383_vm3, %v1373_v23, %v1376_v54  ;;  %v15844_v60 = vand.u32 2147483647, %v9125_v6  ;;  %v15845_v20 = vmov 0  ;;  %v9581_v42 = vpop.eup %8590 }
 0x18a   : > { %vm937_vm10 = vcmp.lt.s32.totalorder %v9199_v13, 0  ;;  %v9576_v61 = vsub.s32 %v1307_v25, %v1310_v36  ;;  %v1387_v53 = vsel %vm1383_vm3, %v1367_v10, %v1370_v50  ;;  %v1394_v33 = vsel %vm1384_vm8, %v1391_v17, %v1393_v62  ;;  %15848 = vst [vmem:[#allocation27_spill] sm:$0xff] %v9581_v42 }
 0x18b   : > { %vm9571_vm9 = vcmp.le.f32.partialorder %v15844_v60, 0.7853982  ;;  %v1396_v2 = vsel %vm1386_vm5, %v1382_v45, 1326507024  ;;  %vm1145_vm11 = vcmp.lt.s32.totalorder %v9238_v32, 0  ;;  %v1389_v54 = vsel %vm1385_vm7, %v1373_v23, %v1388_v46 }
 0x18c   : > { %v15846_v20 = vsel %vm9571_vm9, 4294967295, %v15845_v20  ;;  %v1397_v4 = vsel %vm1385_vm7, %v1379_v39, %v1396_v2  ;;  %v9587_v60 = vmul.u32.u64.low %v9553_v43, %v1394_v33  ;;  %v9588_v49 = vmul.u32.u64.high %v9553_v43, %v1394_v33, %v9587_v60 }
 0x18d   : > { %15847 = vst [vmem:[#allocation26_spill] sm:$0xff] %v15846_v20  ;;  %v1216_v10 = vshll.u32 %v9406_v34, %v9505_v56  ;;  %v1222_v25 = vor.u32 4788187, %v1221_v18  ;;  %v1398_v50 = vsel %vm1384_vm8, %v1395_v47, %v1397_v4  ;;  %v8024_v36 = vadd.s32 4294967169, %v1563_v24 }
 0x18e   : > { %v1021_v45 = vsub.s32 4, %v9307_v1  ;;  %v1115_v17 = vsub.s32 4294967266, %v9565_v52  ;;  %v9597_v23 = vmul.u32.u64.low %v9553_v43, %v1398_v50  ;;  %v9598_v46 = vmul.u32.u64.high %v9553_v43, %v1398_v50, %v9597_v23 }
 0x18f   : > { %v1218_v39 = vor.u32 %v1217_v51, %v1216_v10  ;;  %v1313_v62 = vsub.s32 0, %v9576_v61  ;;  %v1390_v33 = vsel %vm1384_vm8, %v1387_v53, %v1389_v54  ;;  %v1569_v2 = vadd.s32 1, %v8024_v36 }
 0x190   : > { %v15849_v56 = vxor.u32 2147483648, %v9513_v37  ;;  %v1019_v18 = vxor.u32 2147483648, %v9533_v21  ;;  %v1229_v24 = vsub.s32 4, %v9387_v40  ;;  %v1409_v47 = vadd.s32 1, %v9588_v49 }
 0x191   : > { %v1223_v4 = vand.u32 2147483647, %v1222_v25  ;;  %v1111_v51 = vsub.s32 32, %v9565_v52  ;;  %v1566_v29 = vand.u32 8388607, %v15519_v11  ;;  %vm1570_vm12 = vcmp.gt.s32.totalorder %v1569_v2, 0 }
 0x192   : > { %v916_v34 = vsel %vm833_vm13, %v15849_v56, %v9513_v37  ;;  %v1116_v53 = vadd.s32 127, %v1115_v17  ;;  %v1406_v54 = vmul.u32 %v9553_v43, %v1390_v33  ;;  %vm1408_vm14 = vc.u32 %v9598_v46, %v9587_v60 }
 0x193   : > { %v1571_v37 = vsel %vm1570_vm12, %v1569_v2, 0  ;;  %v1225_v10 = vcvt.s32.f32 %v1218_v39  ;;  %v8013_v50 = vmin.u32 %v1313_v62, %v9576_v61  ;;  %v1410_v36 = vsel %vm1408_vm14, %v1409_v47, %v9588_v49  ;;  %v9642_v47 = vpop.f32.mrf.mxu0 }
 0x194   : > { %v1573_v23 = vand.u32 31, %v1571_v37  ;;  %v9621_v25 = vsel %vm9571_vm9, %v9125_v6, %v916_v34  ;;  %v9626_v17 = vsel %vm937_vm10, %v1021_v45, %v9307_v1  ;;  %v1095_v43 = vadd.s32 %v9431_v30, %v9427_v12 }
 0x195   : > { %v1411_v33 = vadd.s32 %v1410_v36, %v1406_v54  ;;  %v9633_v39 = vsel %vm937_vm10, %v1019_v18, %v9533_v21  ;;  %v9635_v49 = vmul.f32 %v1225_v10, %v1223_v4  ;;  %v9640_v62 = vsel %vm1145_vm11, %v1229_v24, %v9387_v40 }
 0x196   : > { %15850 = vst [vmem:[#allocation28_spill] sm:$0xff] %v9640_v62  ;;  %v1574_v2 = vsub.s32 32, %v1573_v23  ;;  %v1113_v56 = vshrl.u32 %v1095_v43, %v1111_v51  ;;  %v1117_v1 = vshll.u32 %v1116_v53, 23  ;;  %v1567_v34 = vor.u32 8388608, %v1566_v29 }
 0x197   : > { %v1412_v45 = vadd.s32 536870912, %v1411_v33  ;;  %v1315_v12 = vclz %v8013_v50  ;;  %v15851_v30 = vmov 2475754826   ;;  %v1576_v10 = vshll.u32 %v15841_v63, %v1573_v23 }
 0x198   : > { %v1577_v54 = vshrl.u32 %v15851_v30, %v1574_v2  ;;  %v1580_v21 = vshrl.u32 %v15838_v44, %v1574_v2  ;;  %v1583_v18 = vshrl.u32 %v15839_v8, %v1574_v2  ;;  %v1579_v40 = vshll.u32 %v15851_v30, %v1573_v23 }
 0x199   : > { %v9647_v4 = vshrl.u32 %v1412_v45, 30  ;;  %v15852_v24 = vmov 920167782   ;;  %v1572_v53 = vshrl.u32 %v1571_v37, 5  ;;  %v1582_v29 = vshll.u32 %v15838_v44, %v1573_v23 }
 0x19a   : > { %v1586_v51 = vshrl.u32 %v15852_v24, %v1574_v2  ;;  %v1585_v36 = vshll.u32 %v15839_v8, %v1573_v23  ;;  %v1458_v50 = vand.u32 2139095040, %v9642_v47  ;;  %v1112_v43 = vshll.u32 %v9492_v19, %v9565_v52 }
 0x19b   : > { %v1414_v11 = vshll.u32 %v9647_v4, 30  ;;  %v1578_v45 = vor.u32 %v1577_v54, %v1576_v10  ;;  %v1581_v6 = vor.u32 %v1580_v21, %v1579_v40  ;;  %v1584_v15 = vor.u32 %v1583_v18, %v1582_v29 }
 0x19c   : > { %v1587_v41 = vor.u32 %v1586_v51, %v1585_v36  ;;  %v1588_v38 = vshll.u32 %v15852_v24, %v1573_v23  ;;  %v1589_v16 = vshrl.u32 %v15840_v22, %v1574_v2  ;;  %v15853_v37 = vand.u32 2147483647, %v9199_v13 }
 0x19d   : > { %v1114_v0 = vor.u32 %v1113_v56, %v1112_v43  ;;  %v1118_v58 = vor.u32 4788187, %v1117_v1  ;;  %v9666_v59 = vsub.s32 %v1411_v33, %v1414_v11  ;;  %v8014_v52 = vadd.s32 4294967294, %v1315_v12 }
 0x19e   : > { %vm9662_vm13 = vcmp.le.f32.partialorder %v15853_v37, 0.7853982  ;;  %v1590_v54 = vor.u32 %v1589_v16, %v1588_v38  ;;  %vm1591_vm0 = vcmp.lt.s32.totalorder %v1572_v53, 1  ;;  %v1459_v21 = vshrl.u32 %v1458_v50, 23 }
 0x19f   : > { %v15856_v23 = vand.u32 2147483647, %v9238_v32  ;;  %v15857_v18 = vmov 0  ;;  %v1575_v10 = vshrl.u32 %v15841_v63, %v1574_v2  ;;  %vm1594_vm2 = vcmp.lt.s32.totalorder %v1572_v53, 4 }
 0x1a0   : > { %v1599_v56 = vsel %vm1591_vm0, %v1578_v45, %v1581_v6  ;;  %v1607_v1 = vshll.u32 %v1567_v34, 8  ;;  %vm1593_vm3 = vcmp.lt.s32.totalorder %v1572_v53, 3  ;;  %v1600_v11 = vsel %vm1594_vm2, %v1587_v41, 920167782 }
 0x1a1   : > { %vm9671_vm1 = vcmp.le.f32.partialorder %v15856_v23, 0.7853982  ;;  %v1603_v33 = vsel %vm1591_vm0, %v1581_v6, %v1584_v15  ;;  %v1604_v12 = vsel %vm1594_vm2, %v1590_v54, 1326507024  ;;  %v1417_v16 = vsub.s32 0, %v9666_v59 }
 0x1a2   : > { %v15858_v18 = vsel %vm9671_vm1, 4294967295, %v15857_v18  ;;  %vm1592_vm5 = vcmp.lt.s32.totalorder %v1572_v53, 2  ;;  %v1596_v38 = vsel %vm1594_vm2, %v1584_v15, 2102212464  ;;  %v1601_v40 = vsel %vm1593_vm3, %v1584_v15, %v1600_v11 }
 0x1a3   : > { %15859 = vst [vmem:[#allocation29_spill] sm:$0xff] %v15858_v18  ;;  %vm8015_vm7 = vcmp.lt.s32.totalorder %v8014_v52, 0  ;;  %v1602_v51 = vsel %vm1592_vm5, %v1599_v56, %v1601_v40  ;;  %v1605_v2 = vsel %vm1593_vm3, %v1587_v41, %v1604_v12  ;;  %v8020_v29 = vadd.s32 4294967169, %v1459_v21 }
 0x1a4   : > { %v1119_v36 = vand.u32 2147483647, %v1118_v58  ;;  %v1121_v50 = vcvt.s32.f32 %v1114_v0  ;;  %v1595_v34 = vsel %vm1591_vm0, %v1575_v10, %v1578_v45  ;;  %v1606_v43 = vsel %vm1592_vm5, %v1603_v33, %v1605_v2 }
 0x1a5   : > { %v1597_v37 = vsel %vm1593_vm3, %v1581_v6, %v1596_v38  ;;  %v9685_v54 = vmul.u32.u64.low %v1607_v1, %v1606_v43  ;;  %v9686_v23 = vmul.u32.u64.high %v1607_v1, %v1606_v43, %v9685_v54  ;;  %v1465_v19 = vadd.s32 1, %v8020_v29 }
 0x1a6   : > { %v9688_v20 = vsel %vm8015_vm7, 0, %v8014_v52  ;;  %v8017_v15 = vmin.u32 %v1417_v16, %v9666_v59  ;;  %v9691_v56 = vmul.u32.u64.low %v1607_v1, %v1602_v51  ;;  %v9692_v11 = vmul.u32.u64.high %v1607_v1, %v1602_v51, %v9691_v56 }
 0x1a7   : > { %8592 = vcosq.f32 %v9621_v25  ;;  %v9700_v58 = vsel %vm9662_vm13, %v9199_v13, %v9633_v39  ;;  %vm1466_vm8 = vcmp.gt.s32.totalorder %v1465_v19, 0  ;;  %v1227_v41 = vxor.u32 2147483648, %v9635_v49 }
 0x1a8   : > { %v9706_v0 = vmul.f32 %v1121_v50, %v1119_v36  ;;  %v1598_v45 = vsel %vm1592_vm5, %v1595_v34, %v1597_v37  ;;  %v1467_v52 = vsel %vm1466_vm8, %v1465_v19, 0  ;;  %8594 = vsinq.f32 %v9621_v25 }
 0x1a9   : > { %v1319_v39 = vsub.s32 32, %v9688_v20  ;;  %vm1616_vm10 = vc.u32 %v9686_v23, %v9691_v56  ;;  %v1323_v10 = vsub.s32 4294967266, %v9688_v20  ;;  %v1419_v33 = vclz %v8017_v15 }
 0x1aa   : > { %v1617_v12 = vadd.s32 1, %v9692_v11  ;;  %v15860_v53 = vand.u32 2147483647, %v9642_v47  ;;  %8596 = vcosq.f32 %v9700_v58  ;;  %v1303_v25 = vadd.s32 %v9500_v3, %v9511_v9 }
 0x1ab   : > { %v1614_v19 = vmul.u32 %v1607_v1, %v1598_v45  ;;  %v1469_v38 = vand.u32 31, %v1467_v52  ;;  %v1228_v40 = vsel %vm1145_vm11, %v1227_v41, %v9635_v49  ;;  %v1320_v2 = vshll.u32 %v9576_v61, %v9688_v20 }
 0x1ac   : > { %v1462_v16 = vand.u32 8388607, %v15860_v53  ;;  %v1618_v29 = vsel %vm1616_vm10, %v1617_v12, %v9692_v11  ;;  %v1321_v36 = vshrl.u32 %v1303_v25, %v1319_v39  ;;  %v9730_v34 = vshrl.u32 %v1467_v52, 5  ;;  %v9740_v52 = vpop.f32.mrf.mxu1 }
 0x1ad   : > { %v1619_v50 = vadd.s32 %v1618_v29, %v1614_v19  ;;  %v1470_v43 = vsub.s32 32, %v1469_v38  ;;  %v1324_v37 = vadd.s32 127, %v1323_v10  ;;  %v8018_v3 = vadd.s32 4294967294, %v1419_v33 }
 0x1ae   : > { %v1463_v9 = vor.u32 8388608, %v1462_v16  ;;  %v1472_v1 = vshll.u32 %v15841_v63, %v1469_v38  ;;  %v1475_v15 = vshll.u32 %v15851_v30, %v1469_v38  ;;  %v1478_v20 = vshll.u32 %v15838_v44, %v1469_v38 }
 0x1af   : > { %v1620_v54 = vadd.s32 536870912, %v1619_v50  ;;  %v1473_v49 = vshrl.u32 %v15851_v30, %v1470_v43  ;;  %v1476_v41 = vshrl.u32 %v15838_v44, %v1470_v43  ;;  %v1479_v61 = vshrl.u32 %v15839_v8, %v1470_v43 }
 0x1b0   : > { %v1481_v11 = vshll.u32 %v15839_v8, %v1469_v38  ;;  %v1482_v45 = vshrl.u32 %v15852_v24, %v1470_v43  ;;  %vm1487_vm11 = vcmp.lt.s32.totalorder %v9730_v34, 1  ;;  %vm1041_vm12 = vcmp.lt.s32.totalorder %v9283_v26, 0 }
 0x1b1   : > { %v9742_v39 = vshrl.u32 %v1620_v54, 30  ;;  %v1474_v10 = vor.u32 %v1473_v49, %v1472_v1  ;;  %v1477_v33 = vor.u32 %v1476_v41, %v1475_v15  ;;  %v1480_v12 = vor.u32 %v1479_v61, %v1478_v20 }
 0x1b2   : > { %v1483_v53 = vor.u32 %v1482_v45, %v1481_v11  ;;  %v1484_v16 = vshll.u32 %v15852_v24, %v1469_v38  ;;  %v1485_v25 = vshrl.u32 %v15840_v22, %v1470_v43  ;;  %v1325_v19 = vshll.u32 %v1324_v37, 23 }
 0x1b3   : > { %vm1490_vm14 = vcmp.lt.s32.totalorder %v9730_v34, 4  ;;  %v1495_v29 = vsel %vm1487_vm11, %v1474_v10, %v1477_v33  ;;  %v1666_v54 = vand.u32 2139095040, %v9740_v52  ;;  %vm1488_vm0 = vcmp.lt.s32.totalorder %v9730_v34, 2 }
 0x1b4   : > { %v9752_v1 = vpop.eup %8592  ;;  %v1486_v49 = vor.u32 %v1485_v25, %v1484_v16  ;;  %vm1489_vm2 = vcmp.lt.s32.totalorder %v9730_v34, 3  ;;  %v1496_v38 = vsel %vm1490_vm14, %v1483_v53, 920167782  ;;  %v15862_v15 = vand.u32 2147483647, %v9283_v26 }
 0x1b5   : > { %15861 = vst [vmem:[#allocation30_spill] sm:$0xff] %v9752_v1  ;;  %v1622_v41 = vshll.u32 %v9742_v39, 30  ;;  %v1471_v20 = vshrl.u32 %v15841_v63, %v1470_v43  ;;  %v1492_v61 = vsel %vm1490_vm14, %v1480_v12, 2102212464  ;;  %v1497_v11 = vsel %vm1489_vm2, %v1480_v12, %v1496_v38  ;;  %v9770_v45 = vpop.eup %8594 }
 0x1b6   : > { %vm9760_vm3 = vcmp.le.f32.partialorder %v15862_v15, 0.7853982  ;;  %15865 = vst [vmem:[#allocation31_spill] sm:$0xff] %v9770_v45  ;;  %v1322_v16 = vor.u32 %v1321_v36, %v1320_v2  ;;  %vm8019_vm5 = vcmp.lt.s32.totalorder %v8018_v3, 0  ;;  %v1498_v25 = vsel %vm1488_vm0, %v1495_v29, %v1497_v11 }
 0x1b7   : > { %v1503_v15 = vshll.u32 %v1463_v9, 8  ;;  %v1326_v21 = vor.u32 4788187, %v1325_v19  ;;  %v1491_v6 = vsel %vm1487_vm11, %v1471_v20, %v1474_v10  ;;  %v1499_v43 = vsel %vm1487_vm11, %v1477_v33, %v1480_v12  ;;  %v9780_v1 = vpop.eup %8596 }
 0x1b8   : > { %v1500_v51 = vsel %vm1490_vm14, %v1486_v49, 1326507024  ;;  %15866 = vst [vmem:[#allocation32_spill] sm:$0xff] %v9780_v1  ;;  %v1493_v2 = vsel %vm1489_vm2, %v1477_v33, %v1492_v61  ;;  %v9790_v19 = vsel %vm8019_vm5, 0, %v8018_v3  ;;  %v9792_v10 = vsub.s32 %v1619_v50, %v1622_v41 }
 0x1b9   : > { %v1501_v36 = vsel %vm1489_vm2, %v1483_v53, %v1500_v51  ;;  %v9786_v29 = vmul.u32.u64.low %v1503_v15, %v1498_v25  ;;  %v9787_v9 = vmul.u32.u64.high %v1503_v15, %v1498_v25, %v9786_v29  ;;  %v1667_v49 = vshrl.u32 %v1666_v54, 23 }
 0x1ba   : > { %v1502_v12 = vsel %vm1488_vm0, %v1499_v43, %v1501_v36  ;;  %v1231_v38 = vsel %vm9671_vm1, %v9238_v32, %v1228_v40  ;;  %vm1353_vm7 = vcmp.lt.s32.totalorder %v9429_v31, 0  ;;  %v15531_v53 = vand.u32 2147483647, %v9740_v52 }
 0x1bb   : > { %v9800_v33 = vmul.u32.u64.low %v1503_v15, %v1502_v12  ;;  %v9801_v51 = vmul.u32.u64.high %v1503_v15, %v1502_v12, %v9800_v33  ;;  %v15867_v3 = vxor.u32 2147483648, %v9706_v0  ;;  %v1327_v41 = vand.u32 2147483647, %v1326_v21  ;;  %v9825_v21 = vpop.f32.mrf.mxu0 }
 0x1bc   : > { %v1494_v54 = vsel %vm1488_vm0, %v1491_v6, %v1493_v2  ;;  %v8028_v20 = vadd.s32 4294967169, %v1667_v49  ;;  %8598 = vsinq.f32 %v9700_v58  ;;  %v1125_v40 = vsub.s32 4, %v9478_v35 }
 0x1bd   : > { %v1124_v50 = vsel %vm1041_vm12, %v15867_v3, %v9706_v0  ;;  %v1427_v61 = vsub.s32 4294967266, %v9790_v19  ;;  %v1513_v11 = vadd.s32 1, %v9787_v9  ;;  %8600 = vcosq.f32 %v1231_v38 }
 0x1be   : > { %v1329_v25 = vcvt.s32.f32 %v1322_v16  ;;  %v1625_v43 = vsub.s32 0, %v9792_v10  ;;  %v1673_v36 = vadd.s32 1, %v8028_v20  ;;  %v9819_v0 = vsel %vm9760_vm3, %v9283_v26, %v1124_v50 }
 0x1bf   : > { %v1510_v6 = vmul.u32 %v1503_v15, %v1494_v54  ;;  %vm1512_vm8 = vc.u32 %v9801_v51, %v9786_v29  ;;  %v1670_v58 = vand.u32 8388607, %v15531_v53  ;;  %v1437_v16 = vsub.s32 4, %v9647_v4 }
 0x1c0   : > { %v9827_v34 = vmul.f32 %v1329_v25, %v1327_v41  ;;  %v1514_v2 = vsel %vm1512_vm8, %v1513_v11, %v9787_v9  ;;  %vm1674_vm10 = vcmp.gt.s32.totalorder %v1673_v36, 0  ;;  %v1423_v12 = vsub.s32 32, %v9790_v19 }
 0x1c1   : > { %v9832_v49 = vadd.s32 127, %v1427_v61  ;;  %v1515_v15 = vadd.s32 %v1514_v2, %v1510_v6  ;;  %v1675_v33 = vsel %vm1674_vm10, %v1673_v36, 0  ;;  %8602 = vsinq.f32 %v1231_v38 }
 0x1c2   : > { %v9837_v3 = vsel %vm1041_vm12, %v1125_v40, %v9478_v35  ;;  %v9840_v50 = vmin.u32 %v1625_v43, %v9792_v10  ;;  %v1770_v41 = vand.u32 2139095040, %v9825_v21  ;;  %v1407_v9 = vadd.s32 %v9587_v60, %v9598_v46 }
 0x1c3   : > { %v1516_v54 = vadd.s32 536870912, %v1515_v15  ;;  %v1671_v20 = vor.u32 8388608, %v1670_v58  ;;  %v1677_v61 = vand.u32 31, %v1675_v33  ;;  %8604 = vcosq.f32 %v9819_v0 }
 0x1c4   : > { %v1331_v38 = vxor.u32 2147483648, %v9827_v34  ;;  %v9851_v35 = vsel %vm1353_vm7, %v1437_v16, %v9647_v4  ;;  %v1425_v40 = vshrl.u32 %v1407_v9, %v1423_v12  ;;  %v1429_v25 = vshll.u32 %v9832_v49, 23 }
 0x1c5   : > { %v9854_v43 = vshrl.u32 %v1516_v54, 30  ;;  %v1678_v60 = vsub.s32 32, %v1677_v61  ;;  %v1627_v46 = vclz %v9840_v50  ;;  %v1676_v36 = vshrl.u32 %v1675_v33, 5 }
 0x1c6   : > { %v1771_v58 = vshrl.u32 %v1770_v41, 23  ;;  %v1680_v53 = vshll.u32 %v15841_v63, %v1677_v61  ;;  %v9861_v4 = vshll.u32 %v1671_v20, 8  ;;  %vm1249_vm11 = vcmp.lt.s32.totalorder %v9397_v57, 0 }
 0x1c7   : > { %v1518_v2 = vshll.u32 %v9854_v43, 30  ;;  %v1681_v11 = vshrl.u32 %v15851_v30, %v1678_v60  ;;  %v1683_v16 = vshll.u32 %v15851_v30, %v1677_v61  ;;  %v1684_v12 = vshrl.u32 %v15838_v44, %v1678_v60 }
 0x1c8   : > { %v1686_v49 = vshll.u32 %v15838_v44, %v1677_v61  ;;  %v1687_v33 = vshrl.u32 %v15839_v8, %v1678_v60  ;;  %v1689_v9 = vshll.u32 %v15839_v8, %v1677_v61  ;;  %v1690_v54 = vshrl.u32 %v15852_v24, %v1678_v60 }
 0x1c9   : > { %v9868_v50 = vsub.s32 %v1515_v15, %v1518_v2  ;;  %v1682_v41 = vor.u32 %v1681_v11, %v1680_v53  ;;  %v9872_v6 = vpop.eup %8598  ;;  %v1685_v20 = vor.u32 %v1684_v12, %v1683_v16  ;;  %vm1695_vm12 = vcmp.lt.s32.totalorder %v1676_v36, 1 }
 0x1ca   : > { %15868 = vst [vmem:[#allocation33_spill] sm:$0xff] %v9872_v6  ;;  %v1688_v32 = vor.u32 %v1687_v33, %v1686_v49  ;;  %v8032_v45 = vadd.s32 4294967169, %v1771_v58  ;;  %v9874_v62 = vpop.eup %8600  ;;  %v1691_v7 = vor.u32 %v1690_v54, %v1689_v9  ;;  %v1692_v27 = vshll.u32 %v15852_v24, %v1677_v61 }
 0x1cb   : > { %15869 = vst [vmem:[#allocation34_spill] sm:$0xff] %v9874_v62  ;;  %v1521_v18 = vsub.s32 0, %v9868_v50  ;;  %v1693_v15 = vshrl.u32 %v15840_v22, %v1678_v60  ;;  %v15870_v53 = vand.u32 2147483647, %v9397_v57  ;;  %v15871_v11 = vmov 0 }
 0x1cc   : > { %v15874_v2 = vand.u32 2147483647, %v9429_v31  ;;  %v1679_v58 = vshrl.u32 %v15841_v63, %v1678_v60  ;;  %vm1697_vm2 = vcmp.lt.s32.totalorder %v1676_v36, 3  ;;  %vm1698_vm5 = vcmp.lt.s32.totalorder %v1676_v36, 4 }
 0x1cd   : > { %vm9881_vm14 = vcmp.le.f32.partialorder %v15870_v53, 0.7853982  ;;  %v1703_v61 = vsel %vm1695_vm12, %v1682_v41, %v1685_v20  ;;  %v8021_v12 = vmin.u32 %v1521_v18, %v9868_v50  ;;  %v1694_v49 = vor.u32 %v1693_v15, %v1692_v27 }
 0x1ce   : > { %v15872_v11 = vsel %vm9881_vm14, 4294967295, %v15871_v11  ;;  %vm9887_vm0 = vcmp.le.f32.partialorder %v15874_v2, 0.7853982  ;;  %v1700_v33 = vsel %vm1698_vm5, %v1688_v32, 2102212464  ;;  %vm1696_vm8 = vcmp.lt.s32.totalorder %v1676_v36, 2  ;;  %v9896_v62 = vpop.eup %8602 }
 0x1cf   : > { %15873 = vst [vmem:[#allocation35_spill] sm:$0xff] %v15872_v11  ;;  %v1704_v9 = vsel %vm1698_vm5, %v1691_v7, 920167782  ;;  %v1707_v53 = vsel %vm1695_vm12, %v1685_v20, %v1688_v32  ;;  %v1777_v2 = vadd.s32 1, %v8032_v45  ;;  %15877 = vst [vmem:[#allocation36_spill] sm:$0xff] %v9896_v62  ;;  %v1523_v42 = vclz %v8021_v12 }
 0x1d0   : > { %v1705_v54 = vsel %vm1697_vm2, %v1688_v32, %v1704_v9  ;;  %v1699_v60 = vsel %vm1695_vm12, %v1679_v58, %v1682_v41  ;;  %v1708_v14 = vsel %vm1698_vm5, %v1694_v49, 1326507024  ;;  %v1701_v13 = vsel %vm1697_vm2, %v1685_v20, %v1700_v33  ;;  %v9907_v9 = vpop.eup %8604 }
 0x1d1   : > { %v1706_v48 = vsel %vm1696_vm8, %v1703_v61, %v1705_v54  ;;  %v1709_v27 = vsel %vm1697_vm2, %v1691_v7, %v1708_v14  ;;  %v1332_v32 = vsel %vm1249_vm11, %v1331_v38, %v9827_v34  ;;  %v1424_v45 = vshll.u32 %v9666_v59, %v9790_v19 }
 0x1d2   : > { %v9903_v18 = vmul.u32.u64.low %v9861_v4, %v1706_v48  ;;  %v9904_v15 = vmul.u32.u64.high %v9861_v4, %v1706_v48, %v9903_v18  ;;  %v8022_v41 = vadd.s32 4294967294, %v1523_v42  ;;  %v1710_v58 = vsel %vm1696_vm8, %v1707_v53, %v1709_v27 }
 0x1d3   : > { %v8026_v20 = vadd.s32 4294967294, %v1627_v46  ;;  %v9916_v14 = vmul.u32.u64.low %v9861_v4, %v1710_v58  ;;  %v9917_v7 = vmul.u32.u64.high %v9861_v4, %v1710_v58, %v9916_v14  ;;  %vm1778_vm10 = vcmp.gt.s32.totalorder %v1777_v2, 0 }
 0x1d4   : > { %v1426_v48 = vor.u32 %v1425_v40, %v1424_v45  ;;  %v1430_v61 = vor.u32 4788187, %v1429_v25  ;;  %v1702_v12 = vsel %vm1696_vm8, %v1699_v60, %v1701_v13  ;;  %v1779_v49 = vsel %vm1778_vm10, %v1777_v2, 0 }
 0x1d5   : > { %vm8023_vm12 = vcmp.lt.s32.totalorder %v8022_v41, 0  ;;  %v1721_v34 = vadd.s32 1, %v9904_v15  ;;  %v15878_v38 = vand.u32 2147483647, %v9825_v21  ;;  %v1781_v42 = vand.u32 31, %v1779_v49 }
 0x1d6   : > { %8606 = vsinq.f32 %v9819_v0  ;;  %v15879_v19 = vsub.s32 4, %v9547_v5  ;;  %v9934_v13 = vsel %vm9881_vm14, %v9397_v57, %v1332_v32  ;;  %vm8027_vm2 = vcmp.lt.s32.totalorder %v8026_v20, 0 }
 0x1d7   : > { %v1774_v59 = vand.u32 8388607, %v15878_v38  ;;  %v1718_v25 = vmul.u32 %v9861_v4, %v1702_v12  ;;  %vm1720_vm5 = vc.u32 %v9917_v7, %v9903_v18  ;;  %v1782_v0 = vsub.s32 32, %v1781_v42 }
 0x1d8   : > { %v9929_v46 = vsel %vm1249_vm11, %v15879_v19, %v9547_v5  ;;  %v1431_v36 = vand.u32 2147483647, %v1430_v61  ;;  %v1433_v33 = vcvt.s32.f32 %v1426_v48  ;;  %v9942_v5 = vsel %vm8023_vm12, 0, %v8022_v41 }
 0x1d9   : > { %15880 = vst [vmem:[#allocation37_spill] sm:$0xff] %v9929_v46  ;;  %v1722_v54 = vsel %vm1720_vm5, %v1721_v34, %v9904_v15  ;;  %v1775_v2 = vor.u32 8388608, %v1774_v59  ;;  %v1785_v60 = vshrl.u32 %v15851_v30, %v1782_v0  ;;  %v1788_v27 = vshrl.u32 %v15838_v44, %v1782_v0 }
 0x1da   : > { %v1723_v53 = vadd.s32 %v1722_v54, %v1718_v25  ;;  %v9947_v32 = vsel %vm8027_vm2, 0, %v8026_v20  ;;  %v1784_v4 = vshll.u32 %v15841_v63, %v1781_v42  ;;  %v1787_v45 = vshll.u32 %v15851_v30, %v1781_v42 }
 0x1db   : > { %v1791_v58 = vshrl.u32 %v15839_v8, %v1782_v0  ;;  %v1531_v14 = vsub.s32 4294967266, %v9942_v5  ;;  %v1780_v48 = vshrl.u32 %v1779_v49, 5  ;;  %v1790_v15 = vshll.u32 %v15838_v44, %v1781_v42 }
 0x1dc   : > { %v1724_v41 = vadd.s32 536870912, %v1723_v53  ;;  %v1786_v61 = vor.u32 %v1785_v60, %v1784_v4  ;;  %v1789_v12 = vor.u32 %v1788_v27, %v1787_v45  ;;  %v1793_v34 = vshll.u32 %v15839_v8, %v1781_v42 }
 0x1dd   : > { %v1794_v38 = vshrl.u32 %v15852_v24, %v1782_v0  ;;  %v1792_v59 = vor.u32 %v1791_v58, %v1790_v15  ;;  %v1796_v19 = vshll.u32 %v15852_v24, %v1781_v42  ;;  %v1797_v25 = vshrl.u32 %v15840_v22, %v1782_v0 }
 0x1de   : > { %v9956_v20 = vshrl.u32 %v1724_v41, 30  ;;  %v1434_v54 = vmul.f32 %v1433_v33, %v1431_v36  ;;  %v1635_v40 = vsub.s32 4294967266, %v9947_v32  ;;  %v1511_v49 = vadd.s32 %v9786_v29, %v9801_v51 }
 0x1df   : > { %v1795_v57 = vor.u32 %v1794_v38, %v1793_v34  ;;  %v1798_v27 = vor.u32 %v1797_v25, %v1796_v19  ;;  %vm1799_vm11 = vcmp.lt.s32.totalorder %v1780_v48, 1  ;;  %v1815_v4 = vshll.u32 %v1775_v2, 8  ;;  %v9970_v34 = vpop.f32.mrf.mxu1 }
 0x1e0   : > { %v1726_v60 = vshll.u32 %v9956_v20, 30  ;;  %v1532_v45 = vadd.s32 127, %v1531_v14  ;;  %v1783_v41 = vshrl.u32 %v15841_v63, %v1782_v0  ;;  %vm1802_vm8 = vcmp.lt.s32.totalorder %v1780_v48, 4 }
 0x1e1   : > { %v1807_v42 = vsel %vm1799_vm11, %v1786_v61, %v1789_v12  ;;  %vm1801_vm10 = vcmp.lt.s32.totalorder %v1780_v48, 3  ;;  %v1804_v36 = vsel %vm1802_vm8, %v1792_v59, 2102212464  ;;  %v1808_v33 = vsel %vm1802_vm8, %v1795_v57, 920167782 }
 0x1e2   : > { %v9966_v58 = vsub.s32 %v1723_v53, %v1726_v60  ;;  %v1527_v15 = vsub.s32 32, %v9942_v5  ;;  %vm1800_vm12 = vcmp.lt.s32.totalorder %v1780_v48, 2  ;;  %v1809_v29 = vsel %vm1801_vm10, %v1792_v59, %v1808_v33 }
 0x1e3   : > { %v1811_v51 = vsel %vm1799_vm11, %v1789_v12, %v1792_v59  ;;  %v9972_v2 = vpop.eup %8606  ;;  %v1803_v14 = vsel %vm1799_vm11, %v1783_v41, %v1786_v61  ;;  %v1810_v53 = vsel %vm1800_vm12, %v1807_v42, %v1809_v29  ;;  %v1812_v38 = vsel %vm1802_vm8, %v1798_v27, 1326507024  ;;  %v9988_v42 = vpop.f32.mrf.mxu0 }
 0x1e4   : > { %v1729_v0 = vsub.s32 0, %v9966_v58  ;;  %v1805_v19 = vsel %vm1801_vm10, %v1789_v12, %v1804_v36  ;;  %v1813_v25 = vsel %vm1801_vm10, %v1795_v57, %v1812_v38  ;;  %v1533_v11 = vshll.u32 %v1532_v45, 23 }
 0x1e5   : > { %v9977_v60 = vmul.u32.u64.low %v1815_v4, %v1810_v53  ;;  %v9978_v62 = vmul.u32.u64.high %v1815_v4, %v1810_v53, %v9977_v60  ;;  %v1814_v59 = vsel %vm1800_vm12, %v1811_v51, %v1813_v25  ;;  %v1978_v46 = vand.u32 2139095040, %v9970_v34 }
 0x1e6   : > { %v8029_v33 = vmin.u32 %v1729_v0, %v9966_v58  ;;  %8608 = vcosq.f32 %v9934_v13  ;;  %v1435_v26 = vxor.u32 2147483648, %v1434_v54  ;;  %v1529_v41 = vshrl.u32 %v1511_v49, %v1527_v15 }
 0x1e7   : > { %v9984_v1 = vmul.u32.u64.low %v1815_v4, %v1814_v59  ;;  %v9985_v61 = vmul.u32.u64.high %v1815_v4, %v1814_v59, %v9984_v1  ;;  %v1806_v57 = vsel %vm1800_vm12, %v1803_v14, %v1805_v19  ;;  %v1979_v12 = vshrl.u32 %v1978_v46, 23 }
 0x1e8   : > { %v1731_v27 = vclz %v8029_v33  ;;  %v1631_v45 = vsub.s32 32, %v9947_v32  ;;  %v1636_v36 = vadd.s32 127, %v1635_v40  ;;  %v1825_v29 = vadd.s32 1, %v9978_v62 }
 0x1e9   : > { %v15547_v51 = vand.u32 2147483647, %v9970_v34  ;;  %v1528_v0 = vshll.u32 %v9868_v50, %v9942_v5  ;;  %v1534_v53 = vor.u32 4788187, %v1533_v11  ;;  %v8040_v1 = vadd.s32 4294967169, %v1979_v12 }
 0x1ea   : > { %v8030_v38 = vadd.s32 4294967294, %v1731_v27  ;;  %v1615_v48 = vadd.s32 %v9691_v56, %v9686_v23  ;;  %v1822_v49 = vmul.u32 %v1815_v4, %v1806_v57  ;;  %vm1824_vm2 = vc.u32 %v9985_v61, %v9977_v60 }
 0x1eb   : > { %v1874_v46 = vand.u32 2139095040, %v9988_v42  ;;  %v1436_v40 = vsel %vm1353_vm7, %v1435_v26, %v1434_v54  ;;  %v1530_v15 = vor.u32 %v1529_v41, %v1528_v0  ;;  %v1826_v14 = vsel %vm1824_vm2, %v1825_v29, %v9978_v62 }
 0x1ec   : > { %v1985_v19 = vadd.s32 1, %v8040_v1  ;;  %v1632_v50 = vshll.u32 %v9792_v10, %v9947_v32  ;;  %v1633_v11 = vshrl.u32 %v1615_v48, %v1631_v45  ;;  %v1637_v5 = vshll.u32 %v1636_v36, 23 }
 0x1ed   : > { %v1827_v25 = vadd.s32 %v1826_v14, %v1822_v49  ;;  %v1535_v33 = vand.u32 2147483647, %v1534_v53  ;;  %vm8031_vm5 = vcmp.lt.s32.totalorder %v8030_v38, 0  ;;  %v1982_v23 = vand.u32 8388607, %v15547_v51 }
 0x1ee   : > { %vm1986_vm11 = vcmp.gt.s32.totalorder %v1985_v19, 0  ;;  %v15546_v26 = vand.u32 2147483647, %v9988_v42  ;;  %v1875_v54 = vshrl.u32 %v1874_v46, 23  ;;  %8610 = vsinq.f32 %v9934_v13 }
 0x1ef   : > { %v1828_v56 = vadd.s32 536870912, %v1827_v25  ;;  %v1987_v4 = vsel %vm1986_vm11, %v1985_v19, 0  ;;  %v10011_v62 = vsel %vm9887_vm0, %v9429_v31, %v1436_v40  ;;  %v1537_v10 = vcvt.s32.f32 %v1530_v15 }
 0x1f0   : > { %v1989_v32 = vand.u32 31, %v1987_v4  ;;  %v10013_v59 = vor.u32 %v1633_v11, %v1632_v50  ;;  %v10015_v41 = vor.u32 4788187, %v1637_v5  ;;  %v10017_v27 = vsel %vm8031_vm5, 0, %v8030_v38 }
 0x1f1   : > { %v10019_v57 = vshrl.u32 %v1828_v56, 30  ;;  %v10021_v12 = vmul.f32 %v1537_v10, %v1535_v33  ;;  %v10025_v13 = vadd.s32 %v9903_v18, %v9917_v7  ;;  %v1983_v45 = vor.u32 8388608, %v1982_v23 }
 0x1f2   : > { %v1990_v36 = vsub.s32 32, %v1989_v32  ;;  %v10028_v29 = vadd.s32 %v9977_v60, %v9985_v61  ;;  %v8036_v53 = vadd.s32 4294967169, %v1875_v54  ;;  %v1878_v38 = vand.u32 8388607, %v15546_v26 }
 0x1f3   : > { %v1830_v0 = vshll.u32 %v10019_v57, 30  ;;  %v10033_v1 = vpop.eup %8608  ;;  %v1739_v48 = vsub.s32 4294967266, %v10017_v27  ;;  %v1992_v49 = vshll.u32 %v15841_v63, %v1989_v32  ;;  %v1995_v7 = vshll.u32 %v15851_v30, %v1989_v32 }
 0x1f4   : > { %15881 = vst [vmem:[#allocation38_spill] sm:$0xff] %v10033_v1  ;;  %v1993_v18 = vshrl.u32 %v15851_v30, %v1990_v36  ;;  %v1996_v60 = vshrl.u32 %v15838_v44, %v1990_v36  ;;  %v1998_v61 = vshll.u32 %v15838_v44, %v1989_v32  ;;  %v1999_v40 = vshrl.u32 %v15839_v8, %v1990_v36 }
 0x1f5   : > { %v10039_v46 = vsub.s32 %v1827_v25, %v1830_v0  ;;  %v1988_v15 = vshrl.u32 %v1987_v4, 5  ;;  %v2001_v19 = vshll.u32 %v15839_v8, %v1989_v32  ;;  %v10045_v50 = vshll.u32 %v1983_v45, 8 }
 0x1f6   : > { %v1994_v14 = vor.u32 %v1993_v18, %v1992_v49  ;;  %v1997_v5 = vor.u32 %v1996_v60, %v1995_v7  ;;  %v2000_v33 = vor.u32 %v1999_v40, %v1998_v61  ;;  %v2002_v23 = vshrl.u32 %v15852_v24, %v1990_v36 }
 0x1f7   : > { %v1833_v11 = vsub.s32 0, %v10039_v46  ;;  %v2004_v25 = vshll.u32 %v15852_v24, %v1989_v32  ;;  %v2005_v56 = vshrl.u32 %v15840_v22, %v1990_v36  ;;  %v1879_v54 = vor.u32 8388608, %v1878_v38 }
 0x1f8   : > { %v1881_v10 = vadd.s32 1, %v8036_v53  ;;  %v1740_v0 = vadd.s32 127, %v1739_v48  ;;  %v1991_v49 = vshrl.u32 %v15841_v63, %v1990_v36  ;;  %v2003_v18 = vor.u32 %v2002_v23, %v2001_v19 }
 0x1f9   : > { %v8033_v4 = vmin.u32 %v1833_v11, %v10039_v46  ;;  %v2006_v45 = vor.u32 %v2005_v56, %v2004_v25  ;;  %vm2007_vm7 = vcmp.lt.s32.totalorder %v1988_v15, 1  ;;  %vm2009_vm8 = vcmp.lt.s32.totalorder %v1988_v15, 3 }
 0x1fa   : > { %vm2010_vm10 = vcmp.lt.s32.totalorder %v1988_v15, 4  ;;  %v2015_v61 = vsel %vm2007_vm7, %v1994_v14, %v1997_v5  ;;  %v1735_v32 = vsub.s32 32, %v10017_v27  ;;  %vm2008_vm12 = vcmp.lt.s32.totalorder %v1988_v15, 2 }
 0x1fb   : > { %v1835_v7 = vclz %v8033_v4  ;;  %v2012_v60 = vsel %vm2010_vm10, %v2000_v33, 2102212464  ;;  %v2016_v40 = vsel %vm2010_vm10, %v2003_v18, 920167782  ;;  %vm1882_vm2 = vcmp.gt.s32.totalorder %v1881_v10, 0  ;;  %v10055_v53 = vpop.eup %8610 }
 0x1fc   : > { %v2017_v38 = vsel %vm2009_vm8, %v2000_v33, %v2016_v40  ;;  %15882 = vst [vmem:[#allocation39_spill] sm:$0xff] %v10055_v53  ;;  %v2011_v11 = vsel %vm2007_vm7, %v1991_v49, %v1994_v14  ;;  %v2019_v19 = vsel %vm2007_vm7, %v1997_v5, %v2000_v33  ;;  %v2013_v23 = vsel %vm2009_vm8, %v1997_v5, %v2012_v60 }
 0x1fd   : > { %v8034_v48 = vadd.s32 4294967294, %v1835_v7  ;;  %v2018_v36 = vsel %vm2008_vm12, %v2015_v61, %v2017_v38  ;;  %v2020_v25 = vsel %vm2010_vm10, %v2006_v45, 1326507024  ;;  %v1741_v40 = vshll.u32 %v1740_v0, 23  ;;  %v10074_v38 = vpop.f32.mrf.mxu1 }
 0x1fe   : > { %v10060_v56 = vmul.u32.u64.low %v10045_v50, %v2018_v36  ;;  %v10061_v4 = vmul.u32.u64.high %v10045_v50, %v2018_v36, %v10060_v56  ;;  %v2021_v51 = vsel %vm2009_vm8, %v2003_v18, %v2020_v25  ;;  %v1883_v33 = vsel %vm1882_vm2, %v1881_v10, 0 }
 0x1ff   : > { %vm8035_vm5 = vcmp.lt.s32.totalorder %v8034_v48, 0  ;;  %v2022_v14 = vsel %vm2008_vm12, %v2019_v19, %v2021_v51  ;;  %v10069_v49 = vshll.u32 %v1879_v54, 8  ;;  %v2014_v60 = vsel %vm2008_vm12, %v2011_v11, %v2013_v23 }
 0x200   : > { %v1838_v7 = vsel %vm8035_vm5, 0, %v8034_v48  ;;  %v10072_v61 = vshrl.u32 %v1883_v33, 5  ;;  %v1737_v0 = vshrl.u32 %v10025_v13, %v1735_v32  ;;  %v1885_v48 = vand.u32 31, %v1883_v33 }
 0x201   : > { %v1839_v5 = vsub.s32 32, %v1838_v7  ;;  %v1843_v45 = vsub.s32 4294967266, %v1838_v7  ;;  %v10078_v36 = vmul.u32.u64.low %v10045_v50, %v2022_v14  ;;  %v10079_v18 = vmul.u32.u64.high %v10045_v50, %v2022_v14, %v10078_v36 }
 0x202   : > { %v10081_v51 = vor.u32 4788187, %v1741_v40  ;;  %v2033_v19 = vadd.s32 1, %v10061_v4  ;;  %v1840_v15 = vshll.u32 %v10039_v46, %v1838_v7  ;;  %v2030_v11 = vmul.u32 %v10045_v50, %v2014_v60 }
 0x203   : > { %v1841_v54 = vshrl.u32 %v10028_v29, %v1839_v5  ;;  %v1844_v10 = vadd.s32 127, %v1843_v45  ;;  %v1886_v23 = vsub.s32 32, %v1885_v48  ;;  %v2082_v25 = vand.u32 2139095040, %v10074_v38 }
 0x204   : > { %v1888_v32 = vshll.u32 %v15841_v63, %v1885_v48  ;;  %v1891_v14 = vshll.u32 %v15851_v30, %v1885_v48  ;;  %vm1903_vm11 = vcmp.lt.s32.totalorder %v10072_v61, 1  ;;  %vm2032_vm7 = vc.u32 %v10079_v18, %v10060_v56 }
 0x205   : > { %v1845_v13 = vshll.u32 %v1844_v10, 23  ;;  %v1842_v40 = vor.u32 %v1841_v54, %v1840_v15  ;;  %v1889_v29 = vshrl.u32 %v15851_v30, %v1886_v23  ;;  %v1894_v46 = vshll.u32 %v15838_v44, %v1885_v48 }
 0x206   : > { %v2034_v50 = vsel %vm2032_vm7, %v2033_v19, %v10061_v4  ;;  %v1892_v33 = vshrl.u32 %v15838_v44, %v1886_v23  ;;  %v1897_v5 = vshll.u32 %v15839_v8, %v1885_v48  ;;  %v1895_v36 = vshrl.u32 %v15839_v8, %v1886_v23 }
 0x207   : > { %v1846_v7 = vor.u32 4788187, %v1845_v13  ;;  %v2035_v45 = vadd.s32 %v2034_v50, %v2030_v11  ;;  %v1890_v60 = vor.u32 %v1889_v29, %v1888_v32  ;;  %v1898_v54 = vshrl.u32 %v15852_v24, %v1886_v23 }
 0x208   : > { %v1887_v10 = vshrl.u32 %v15841_v63, %v1886_v23  ;;  %v1893_v15 = vor.u32 %v1892_v33, %v1891_v14  ;;  %v1900_v26 = vshll.u32 %v15852_v24, %v1885_v48  ;;  %v1901_v1 = vshrl.u32 %v15840_v22, %v1886_v23 }
 0x209   : > { %v1847_v13 = vand.u32 2147483647, %v1846_v7  ;;  %v2036_v53 = vadd.s32 536870912, %v2035_v45  ;;  %v1896_v4 = vor.u32 %v1895_v36, %v1894_v46  ;;  %v1899_v19 = vor.u32 %v1898_v54, %v1897_v5 }
 0x20a   : > { %vm15554_vm8 = vcmp.lt.s32.totalorder %v9642_v47, 0  ;;  %v1849_v6 = vcvt.s32.f32 %v1842_v40  ;;  %v1902_v11 = vor.u32 %v1901_v1, %v1900_v26  ;;  %vm1906_vm10 = vcmp.lt.s32.totalorder %v10072_v61, 4 }
 0x20b   : > { %v1911_v32 = vsel %vm1903_vm11, %v1890_v60, %v1893_v15  ;;  %v10107_v29 = vshrl.u32 %v2036_v53, 30  ;;  %vm1905_vm12 = vcmp.lt.s32.totalorder %v10072_v61, 3  ;;  %v1908_v48 = vsel %vm1906_vm10, %v1896_v4, 2102212464 }
 0x20c   : > { %v1912_v14 = vsel %vm1906_vm10, %v1899_v19, 920167782  ;;  %vm1904_vm2 = vcmp.lt.s32.totalorder %v10072_v61, 2  ;;  %v1915_v46 = vsel %vm1903_vm11, %v1893_v15, %v1896_v4  ;;  %v1916_v7 = vsel %vm1906_vm10, %v1902_v11, 1326507024 }
 0x20d   : > { %v1913_v23 = vsel %vm1905_vm12, %v1896_v4, %v1912_v14  ;;  %v15883_v26 = vand.u32 2147483647, %v9642_v47  ;;  %v1850_v40 = vmul.f32 %v1849_v6, %v1847_v13  ;;  %v2038_v53 = vshll.u32 %v10107_v29, 30 }
 0x20e   : > { %v1907_v50 = vsel %vm1903_vm11, %v1887_v10, %v1890_v60  ;;  %v1914_v33 = vsel %vm1904_vm2, %v1911_v32, %v1913_v23  ;;  %v1909_v5 = vsel %vm1905_vm12, %v1893_v15, %v1908_v48  ;;  %v1917_v36 = vsel %vm1905_vm12, %v1899_v19, %v1916_v7 }
 0x20f   : > { %vm10115_vm5 = vcmp.le.f32.partialorder %v15883_v26, 0.7853982  ;;  %v10125_v54 = vmul.u32.u64.low %v10069_v49, %v1914_v33  ;;  %v10126_v4 = vmul.u32.u64.high %v10069_v49, %v1914_v33, %v10125_v54  ;;  %v1639_v11 = vand.u32 2147483647, %v10015_v41 }
 0x210   : > { %v1539_v14 = vxor.u32 2147483648, %v10021_v12  ;;  %v10131_v6 = vsub.s32 %v2035_v45, %v2038_v53  ;;  %v1918_v13 = vsel %vm1904_vm2, %v1915_v46, %v1917_v36  ;;  %v1641_v60 = vcvt.s32.f32 %v10013_v59 }
 0x211   : > { %v15886_v10 = vshll.u32 %v9966_v58, %v10017_v27  ;;  %v10140_v19 = vmul.u32.u64.low %v10069_v49, %v1918_v13  ;;  %v10141_v32 = vmul.u32.u64.high %v10069_v49, %v1918_v13, %v10140_v19  ;;  %v1851_v48 = vxor.u32 2147483648, %v1850_v40 }
 0x212   : > { %v2041_v41 = vsub.s32 0, %v10131_v6  ;;  %v1910_v45 = vsel %vm1904_vm2, %v1907_v50, %v1909_v5  ;;  %v2083_v23 = vshrl.u32 %v2082_v25, 23  ;;  %8612 = vcosq.f32 %v10011_v62 }
 0x213   : > { %v1738_v15 = vor.u32 %v1737_v0, %v15886_v10  ;;  %v1743_v46 = vand.u32 2147483647, %v10081_v51  ;;  %vm15555_vm11 = vcmp.lt.s32.totalorder %v9825_v21, 0  ;;  %v1929_v58 = vadd.s32 1, %v10126_v4 }
 0x214   : > { %v10150_v59 = vmul.f32 %v1641_v60, %v1639_v11  ;;  %v1540_v27 = vsel %vm15554_vm8, %v1539_v14, %v10021_v12  ;;  %v8041_v0 = vmin.u32 %v2041_v41, %v10131_v6  ;;  %v8044_v7 = vadd.s32 4294967169, %v2083_v23 }
 0x215   : > { %v1745_v61 = vcvt.s32.f32 %v1738_v15  ;;  %v1926_v25 = vmul.u32 %v10069_v49, %v1910_v45  ;;  %vm1928_vm7 = vc.u32 %v10141_v32, %v10125_v54  ;;  %v15551_v51 = vand.u32 2147483647, %v10074_v38 }
 0x216   : > { %v1852_v26 = vsel %vm15555_vm11, %v1851_v48, %v1850_v40  ;;  %v2043_v53 = vclz %v8041_v0  ;;  %v1930_v50 = vsel %vm1928_vm7, %v1929_v58, %v10126_v4  ;;  %v2089_v33 = vadd.s32 1, %v8044_v7 }
 0x217   : > { %v10166_v12 = vsel %vm10115_vm5, %v9642_v47, %v1540_v27  ;;  %v10168_v5 = vmul.f32 %v1745_v61, %v1743_v46  ;;  %v15887_v49 = vand.u32 2147483647, %v9825_v21  ;;  %v1931_v11 = vadd.s32 %v1930_v50, %v1926_v25 }
 0x218   : > { %v8042_v4 = vadd.s32 4294967294, %v2043_v53  ;;  %vm2090_vm12 = vcmp.gt.s32.totalorder %v2089_v33, 0  ;;  %v2086_v10 = vand.u32 8388607, %v15551_v51  ;;  %8614 = vcosq.f32 %v10166_v12 }
 0x219   : > { %vm10172_vm10 = vcmp.le.f32.partialorder %v15887_v49, 0.7853982  ;;  %v1932_v60 = vadd.s32 536870912, %v1931_v11  ;;  %v2091_v15 = vsel %vm2090_vm12, %v2089_v33, 0  ;;  %v2031_v45 = vadd.s32 %v10060_v56, %v10079_v18 }
 0x21a   : > { %v1855_v13 = vsel %vm10172_vm10, %v9825_v21, %v1852_v26  ;;  %vm8043_vm2 = vcmp.lt.s32.totalorder %v8042_v4, 0  ;;  %v2093_v48 = vand.u32 31, %v2091_v15  ;;  %v2087_v61 = vor.u32 8388608, %v2086_v10 }
 0x21b   : > { %v2046_v23 = vsel %vm8043_vm2, 0, %v8042_v4  ;;  %v10188_v46 = vshrl.u32 %v1932_v60, 30  ;;  %8616 = vcosq.f32 %v1855_v13  ;;  %v10191_v25 = vshrl.u32 %v2091_v15, 5 }
 0x21c   : > { %v2047_v58 = vsub.s32 32, %v2046_v23  ;;  %v2051_v27 = vsub.s32 4294967266, %v2046_v23  ;;  %v2094_v0 = vsub.s32 32, %v2093_v48  ;;  %8618 = vsinq.f32 %v1855_v13 }
 0x21d   : > { %v1934_v7 = vshll.u32 %v10188_v46, 30  ;;  %v2048_v26 = vshll.u32 %v10131_v6, %v2046_v23  ;;  %v2096_v18 = vshll.u32 %v15841_v63, %v2093_v48  ;;  %v2099_v49 = vshll.u32 %v15851_v30, %v2093_v48 }
 0x21e   : > { %v2049_v53 = vshrl.u32 %v2031_v45, %v2047_v58  ;;  %v2052_v50 = vadd.s32 127, %v2051_v27  ;;  %v2097_v33 = vshrl.u32 %v15851_v30, %v2094_v0  ;;  %v2100_v4 = vshrl.u32 %v15838_v44, %v2094_v0 }
 0x21f   : > { %v10195_v56 = vsub.s32 %v1931_v11, %v1934_v7  ;;  %v10200_v13 = vpop.eup %8612  ;;  %v2102_v15 = vshll.u32 %v15838_v44, %v2093_v48  ;;  %v2103_v6 = vshrl.u32 %v15839_v8, %v2094_v0  ;;  %v2105_v23 = vshll.u32 %v15839_v8, %v2093_v48 }
 0x220   : > { %v2050_v60 = vor.u32 %v2049_v53, %v2048_v26  ;;  %v2053_v10 = vshll.u32 %v2052_v50, 23  ;;  %v2106_v11 = vshrl.u32 %v15852_v24, %v2094_v0  ;;  %v10207_v58 = vshll.u32 %v2087_v61, 8 }
 0x221   : > { %v1937_v45 = vsub.s32 0, %v10195_v56  ;;  %v2098_v7 = vor.u32 %v2097_v33, %v2096_v18  ;;  %v2101_v51 = vor.u32 %v2100_v4, %v2099_v49  ;;  %v2104_v40 = vor.u32 %v2103_v6, %v2102_v15 }
 0x222   : > { %v2054_v27 = vor.u32 4788187, %v2053_v10  ;;  %v2107_v53 = vor.u32 %v2106_v11, %v2105_v23  ;;  %v2108_v50 = vshll.u32 %v15852_v24, %v2093_v48  ;;  %v2109_v14 = vshrl.u32 %v15840_v22, %v2094_v0 }
 0x223   : > { %v8037_v26 = vmin.u32 %v1937_v45, %v10195_v56  ;;  %v2057_v19 = vcvt.s32.f32 %v2050_v60  ;;  %v2095_v8 = vshrl.u32 %v15841_v63, %v2094_v0  ;;  %vm2114_vm12 = vcmp.lt.s32.totalorder %v10191_v25, 4 }
 0x224   : > { %v2055_v41 = vand.u32 2147483647, %v2054_v27  ;;  %v2110_v44 = vor.u32 %v2109_v14, %v2108_v50  ;;  %vm2111_vm2 = vcmp.lt.s32.totalorder %v10191_v25, 1  ;;  %v2116_v33 = vsel %vm2114_vm12, %v2104_v40, 2102212464 }
 0x225   : > { %v1939_v61 = vclz %v8037_v26  ;;  %v15890_v18 = vand.u32 2147483647, %v9740_v52  ;;  %vm2112_vm7 = vcmp.lt.s32.totalorder %v10191_v25, 2  ;;  %vm2113_vm11 = vcmp.lt.s32.totalorder %v10191_v25, 3  ;;  %v10228_v14 = vpop.eup %8614 }
 0x226   : > { %v2119_v48 = vsel %vm2111_vm2, %v2098_v7, %v2101_v51  ;;  %v2120_v0 = vsel %vm2114_vm12, %v2107_v53, 920167782  ;;  %v2115_v60 = vsel %vm2111_vm2, %v2095_v8, %v2098_v7  ;;  %v2123_v15 = vsel %vm2111_vm2, %v2101_v51, %v2104_v40 }
 0x227   : > { %vm10220_vm8 = vcmp.le.f32.partialorder %v15890_v18, 0.7853982  ;;  %v8038_v4 = vadd.s32 4294967294, %v1939_v61  ;;  %v2121_v10 = vsel %vm2113_vm11, %v2104_v40, %v2120_v0  ;;  %vm1561_vm15 = vcmp.lt.s32.totalorder %v9538_v55, 0 }
 0x228   : > { %v2058_v6 = vmul.f32 %v2057_v19, %v2055_v41  ;;  %v2117_v45 = vsel %vm2113_vm11, %v2101_v51, %v2116_v33  ;;  %v2122_v23 = vsel %vm2112_vm7, %v2119_v48, %v2121_v10  ;;  %v2124_v11 = vsel %vm2114_vm12, %v2110_v44, 1326507024  ;;  %v10235_v27 = vpop.eup %8616  ;;  %v15923_v48 = vld [vmem:[#allocation37_spill] sm:$0xff] }
 0x229   : > { %vm8039_vm1 = vcmp.lt.s32.totalorder %v8038_v4, 0  ;;  %v2125_v26 = vsel %vm2113_vm11, %v2107_v53, %v2124_v11  ;;  %v10238_v50 = vmul.u32.u64.low %v10207_v58, %v2122_v23  ;;  %v10239_v61 = vmul.u32.u64.high %v10207_v58, %v2122_v23, %v10238_v50  ;;  %v10242_v8 = vpop.eup %8618 }
 0x22a   : > { %8620 = vsinq.f32 %v10166_v12  ;;  %v15893_v51 = vsub.s32 4, %v10019_v57  ;;  %vm15894_vm2 = vcmp.lt.s32.totalorder %v9825_v21, 0  ;;  %v1942_v44 = vsel %vm8039_vm1, 0, %v8038_v4 }
 0x22b   : > { %v2126_v19 = vsel %vm2112_vm7, %v2123_v15, %v2125_v26  ;;  %v15895_v41 = vxor.u32 2147483648, %v10168_v5  ;;  %vm15896_vm11 = vcmp.lt.s32.totalorder %v9740_v52, 0  ;;  %v1927_v53 = vadd.s32 %v10125_v54, %v10141_v32 }
 0x22c   : > { %v1854_v40 = vsel %vm15894_vm2, %v15893_v51, %v10019_v57  ;;  %v1943_v12 = vsub.s32 32, %v1942_v44  ;;  %v1947_v33 = vsub.s32 4294967266, %v1942_v44  ;;  %v15897_v18 = vand.u32 2147483647, %v9538_v55 }
 0x22d   : > { %v1748_v7 = vsel %vm15896_vm11, %v15895_v41, %v10168_v5  ;;  %v2059_v57 = vxor.u32 2147483648, %v2058_v6  ;;  %v2118_v0 = vsel %vm2112_vm7, %v2115_v60, %v2117_v45  ;;  %v1944_v5 = vshll.u32 %v10195_v56, %v1942_v44 }
 0x22e   : > { %vm10261_vm12 = vcmp.le.f32.partialorder %v15897_v18, 0.7853982  ;;  %v10268_v4 = vmul.u32.u64.low %v10207_v58, %v2126_v19  ;;  %v10269_v10 = vmul.u32.u64.high %v10207_v58, %v2126_v19, %v10268_v4  ;;  %v1945_v15 = vshrl.u32 %v1927_v53, %v1943_v12 }
 0x22f   : > { %v1948_v54 = vadd.s32 127, %v1947_v33  ;;  %v2137_v32 = vadd.s32 1, %v10239_v61  ;;  %8622 = vsinq.f32 %v10011_v62  ;;  %v1645_v23 = vsub.s32 4, %v9742_v39 }
 0x230   : > { %v15900_v11 = vsub.s32 4, %v9854_v43  ;;  %vm15901_vm1 = vcmp.lt.s32.totalorder %v9642_v47, 0  ;;  %vm1977_vm7 = vcmp.lt.s32.totalorder %v9970_v34, 0  ;;  %v1751_v56 = vsel %vm10220_vm8, %v9740_v52, %v1748_v7 }
 0x231   : > { %v1856_v60 = vsel %vm10172_vm10, 0, %v1854_v40  ;;  %v1946_v45 = vor.u32 %v1945_v15, %v1944_v5  ;;  %v1949_v26 = vshll.u32 %v1948_v54, 23  ;;  %v2060_v62 = vsel %vm1977_vm7, %v2059_v57, %v2058_v6 }
 0x232   : > { %v1542_v25 = vsel %vm15901_vm1, %v15900_v11, %v9854_v43  ;;  %v1957_v51 = vsub.s32 4, %v10188_v46  ;;  %v2134_v44 = vmul.u32 %v10207_v58, %v2118_v0  ;;  %vm2136_vm2 = vc.u32 %v10269_v10, %v10238_v50 }
 0x233   : > { %v15902_v43 = vxor.u32 2147483648, %v10150_v59  ;;  %v15903_v36 = vand.u32 2147483647, %v9970_v34  ;;  %v1950_v6 = vor.u32 4788187, %v1949_v26  ;;  %v2138_v41 = vsel %vm2136_vm2, %v2137_v32, %v10239_v61 }
 0x234   : > { %v2061_v58 = vsub.s32 4, %v10107_v29  ;;  %vm1873_vm11 = vcmp.lt.s32.totalorder %v9988_v42, 0  ;;  %v2139_v7 = vadd.s32 %v2138_v41, %v2134_v44  ;;  %v1860_v53 = vadd.s32 3, %v1856_v60 }
 0x235   : > { %v1644_v19 = vsel %vm1561_vm15, %v15902_v43, %v10150_v59  ;;  %vm10299_vm10 = vcmp.le.f32.partialorder %v15903_v36, 0.7853982  ;;  %8624 = vsinq.f32 %v1751_v56  ;;  %v1951_v12 = vand.u32 2147483647, %v1950_v6 }
 0x236   : > { %v2063_v59 = vsel %vm10299_vm10, %v9970_v34, %v2060_v62  ;;  %v1953_v33 = vcvt.s32.f32 %v1946_v45  ;;  %v10312_v18 = vsel %vm1561_vm15, %v1645_v23, %v9742_v39  ;;  %8626 = vcosq.f32 %v1751_v56 }
 0x237   : > { %v1958_v61 = vsel %vm1873_vm11, %v1957_v51, %v10188_v46  ;;  %v2140_v57 = vadd.s32 536870912, %v2139_v7  ;;  %v1647_v0 = vsel %vm10261_vm12, %v9538_v55, %v1644_v19  ;;  %v15906_v4 = vand.u32 2147483647, %v9988_v42  ;;  %v8621_v23 = vpop.eup %8620 }
 0x238   : > { %v1954_v15 = vmul.f32 %v1953_v33, %v1951_v12  ;;  %v1544_v39 = vsel %vm10115_vm5, 0, %v1542_v25  ;;  %v2062_v54 = vsel %vm1977_vm7, %v2061_v58, %v10107_v29  ;;  %8628 = vcosq.f32 %v2063_v59 }
 0x239   : > { %vm10322_vm1 = vcmp.le.f32.partialorder %v15906_v4, 0.7853982  ;;  %v10331_v46 = vshrl.u32 %v2140_v57, 30  ;;  %v1861_v32 = vand.u32 3, %v1860_v53  ;;  %v1749_v11 = vsub.s32 4, %v9956_v20 }
 0x23a   : > { %v1955_v56 = vxor.u32 2147483648, %v1954_v15  ;;  %v1960_v60 = vsel %vm10322_vm1, 0, %v1958_v61  ;;  %v1864_v45 = vxor.u32 2147483648, %v10242_v8  ;;  %8630 = vcosq.f32 %v1647_v0  ;;  %v15927_v61 = vld [vmem:[#allocation17_spill] sm:$0xff] }
 0x23b   : > { %v2142_v1 = vshll.u32 %v10331_v46, 30  ;;  %v1867_v25 = vxor.u32 2147483648, %v10235_v27  ;;  %v1548_v26 = vadd.s32 3, %v1544_v39  ;;  %v1648_v29 = vsel %vm10261_vm12, 0, %v10312_v18 }
 0x23c   : > { %v2064_v62 = vsel %vm10299_vm10, 0, %v2062_v54  ;;  %8632 = vsinq.f32 %v2063_v59  ;;  %v1956_v51 = vsel %vm1873_vm11, %v1955_v56, %v1954_v15  ;;  %v1964_v19 = vadd.s32 3, %v1960_v60  ;;  %v10351_v36 = vpop.eup %8622 }
 0x23d   : > { %v1959_v44 = vsel %vm10322_vm1, %v9988_v42, %v1956_v51  ;;  %v10349_v43 = vsub.s32 %v2139_v7, %v2142_v1  ;;  %vm1863_vm15 = vcmp.eq.s32.totalorder %v1861_v32, 0  ;;  %vm15909_vm5 = vcmp.lt.s32.totalorder %v9740_v52, 0 }
 0x23e   : > { %v1750_v6 = vsel %vm15909_vm5, %v1749_v11, %v9956_v20  ;;  %8634 = vcosq.f32 %v1959_v44  ;;  %v1865_v40 = vsel %vm1863_vm15, %v10235_v27, %v1864_v45  ;;  %vm1866_vm7 = vcmp.eq.s32.totalorder %v1861_v32, 2 }
 0x23f   : > { %8636 = vsinq.f32 %v1959_v44  ;;  %v2145_v41 = vsub.s32 0, %v10349_v43  ;;  %v1868_v58 = vsel %vm1866_vm7, %v1867_v25, %v10242_v8  ;;  %v1549_v53 = vand.u32 3, %v1548_v26 }
 0x240   : > { %8638 = vsinq.f32 %v1647_v0  ;;  %v2068_v7 = vadd.s32 3, %v2064_v62  ;;  %v1552_v59 = vxor.u32 2147483648, %v8621_v23  ;;  %v1555_v12 = vxor.u32 2147483648, %v10228_v14 }
 0x241   : > { %v15910_v33 = vand.u32 2147483647, %v10074_v38  ;;  %v8045_v20 = vmin.u32 %v2145_v41, %v10349_v43  ;;  %v10367_v27 = vand.u32 3, %v1964_v19  ;;  %vm1862_vm10 = vcmp.lt.s32.totalorder %v1861_v32, 2 }
 0x242   : > { %v1752_v8 = vsel %vm10220_vm8, 0, %v1750_v6  ;;  %vm15558_vm11 = vcmp.lt.s32.totalorder %v10074_v38, 0  ;;  %vm1859_vm1 = vweird.f32 %v9825_v21  ;;  %v1869_v57 = vsel %vm1862_vm10, %v1865_v40, %v1868_v58  ;;  %v10377_v5 = vpop.eup %8624 }
 0x243   : > { %vm10362_vm2 = vcmp.le.f32.partialorder %v15910_v33, 0.7853982  ;;  %v15913_v0 = vsel %vm9887_vm0, 0, %v9851_v35  ;;  %v2147_v15 = vclz %v8045_v20  ;;  %v2165_v39 = vsub.s32 4, %v10331_v46  ;;  %v10380_v54 = vpop.eup %8626 }
 0x244   : > { %v1444_v4 = vadd.s32 3, %v15913_v0  ;;  %vm1551_vm15 = vcmp.eq.s32.totalorder %v1549_v53, 0  ;;  %vm1554_vm5 = vcmp.eq.s32.totalorder %v1549_v53, 2  ;;  %v10382_v49 = vand.u32 3, %v2068_v7 }
 0x245   : > { %v1553_v32 = vsel %vm1551_vm15, %v10228_v14, %v1552_v59  ;;  %v1556_v11 = vsel %vm1554_vm5, %v1555_v12, %v8621_v23  ;;  %v1756_v56 = vadd.s32 3, %v1752_v8  ;;  %v2135_v16 = vadd.s32 %v10238_v50, %v10269_v10  ;;  %v10392_v45 = vpop.eup %8628 }
 0x246   : > { %v8046_v35 = vadd.s32 4294967294, %v2147_v15  ;;  %vm1970_vm0 = vcmp.eq.s32.totalorder %v10367_v27, 2  ;;  %v10390_v60 = vsel %vm1859_vm1, nan, %v1869_v57  ;;  %vm1967_vm8 = vcmp.eq.s32.totalorder %v10367_v27, 0 }
 0x247   : > { %vm1550_vm7 = vcmp.lt.s32.totalorder %v1549_v53, 2  ;;  %v1760_v1 = vxor.u32 2147483648, %v10377_v5  ;;  %v1445_v14 = vand.u32 3, %v1444_v4  ;;  %v1128_v23 = vsel %vm9760_vm3, 0, %v9837_v3  ;;  %v10405_v25 = vpop.eup %8630 }
 0x248   : > { %vm8047_vm10 = vcmp.lt.s32.totalorder %v8046_v35, 0  ;;  %v2166_v50 = vsel %vm15558_vm11, %v2165_v39, %v10331_v46  ;;  %vm1966_vm1 = vcmp.lt.s32.totalorder %v10367_v27, 2  ;;  %v1557_v21 = vsel %vm1550_vm7, %v1553_v32, %v1556_v11 }
 0x249   : > { %v1763_v10 = vxor.u32 2147483648, %v10380_v54  ;;  %v2150_v26 = vsel %vm8047_vm10, 0, %v8046_v35  ;;  %v10408_v62 = vand.u32 3, %v1756_v56  ;;  %v1448_v37 = vxor.u32 2147483648, %v10351_v36  ;;  %v8633_v51 = vpop.eup %8632 }
 0x24a   : > { %v1132_v3 = vadd.s32 3, %v1128_v23  ;;  %v2151_v44 = vsub.s32 32, %v2150_v26  ;;  %v2155_v46 = vsub.s32 4294967266, %v2150_v26  ;;  %v2075_v19 = vxor.u32 2147483648, %v10392_v45 }
 0x24b   : > { %v1451_v6 = vxor.u32 2147483648, %v10200_v13  ;;  %v2168_v40 = vsel %vm10362_vm2, 0, %v2166_v50  ;;  %vm1447_vm7 = vcmp.eq.s32.totalorder %v1445_v14, 0  ;;  %v1136_v58 = vxor.u32 2147483648, %v9972_v2  ;;  %v8635_v53 = vpop.eup %8634 }
 0x24c   : > { %v1133_v41 = vand.u32 3, %v1132_v3  ;;  %v2152_v7 = vshll.u32 %v10349_v43, %v2150_v26  ;;  %v2153_v59 = vshrl.u32 %v2135_v16, %v2151_v44  ;;  %v2156_v12 = vadd.s32 127, %v2155_v46  ;;  %v8637_v20 = vpop.eup %8636 }
 0x24d   : > { %v1139_v33 = vxor.u32 2147483648, %v9907_v9  ;;  %v1971_v8 = vxor.u32 2147483648, %v8635_v53  ;;  %vm2070_vm11 = vcmp.lt.s32.totalorder %v10382_v49, 2  ;;  %v2072_v57 = vxor.u32 2147483648, %v8633_v51  ;;  %v10423_v4 = vpop.eup %8638 }
 0x24e   : > { %v1449_v0 = vsel %vm1447_vm7, %v10200_v13, %v1448_v37  ;;  %vm1450_vm3 = vcmp.eq.s32.totalorder %v1445_v14, 2  ;;  %v2154_v15 = vor.u32 %v2153_v59, %v2152_v7  ;;  %v2157_v39 = vshll.u32 %v2156_v12, 23  ;;  %v15926_v59 = vld [vmem:[#allocation10_spill] sm:$0xff] }
 0x24f   : > { %v1968_v32 = vxor.u32 2147483648, %v8637_v20  ;;  %v1452_v43 = vsel %vm1450_vm3, %v1451_v6, %v10351_v36  ;;  %v1972_v11 = vsel %vm1970_vm0, %v1971_v8, %v8637_v20  ;;  %vm1446_vm10 = vcmp.lt.s32.totalorder %v1445_v14, 2  ;;  %v15920_v6 = vld [vmem:[#allocation32_spill] sm:$0xff] }
 0x250   : > { %vm1135_vm5 = vcmp.eq.s32.totalorder %v1133_v41, 0  ;;  %vm1138_vm15 = vcmp.eq.s32.totalorder %v1133_v41, 2  ;;  %v2158_v56 = vor.u32 4788187, %v2157_v39  ;;  %v2172_v50 = vadd.s32 3, %v2168_v40 }
 0x251   : > { %v1969_v16 = vsel %vm1967_vm8, %v8635_v53, %v1968_v32  ;;  %v1137_v13 = vsel %vm1135_vm5, %v9907_v9, %v1136_v58  ;;  %v1140_v35 = vsel %vm1138_vm15, %v1139_v33, %v9972_v2  ;;  %vm15914_vm3 = vweird.f32 %v9642_v47 }
 0x252   : > { %v1973_v23 = vsel %vm1966_vm1, %v1969_v16, %v1972_v11  ;;  %v1558_v36 = vsel %vm15914_vm3, nan, %v1557_v21  ;;  %v1453_v26 = vsel %vm1446_vm10, %v1449_v0, %v1452_v43  ;;  %v2159_v37 = vand.u32 2147483647, %v2158_v56  ;;  %v15929_v43 = vld [vmem:[#allocation27_spill] sm:$0xff]  ;;  %v15930_v56 = vld [vmem:[#allocation25_spill] sm:$0xff] }
 0x253   : > { %v2161_v14 = vcvt.s32.f32 %v2154_v15  ;;  %vm15915_vm0 = vweird.f32 %v9988_v42  ;;  %vm1134_vm7 = vcmp.lt.s32.totalorder %v1133_v41, 2  ;;  %vm2067_vm8 = vweird.f32 %v9970_v34  ;;  %v15919_v42 = vld [vmem:[#allocation33_spill] sm:$0xff] }
 0x254   : > { %v1974_v3 = vsel %vm15915_vm0, nan, %v1973_v23  ;;  %vm15916_vm15 = vcmp.eq.s32.totalorder %v10382_v49, 0  ;;  %vm15917_vm1 = vcmp.eq.s32.totalorder %v10382_v49, 2  ;;  %v1141_v27 = vsel %vm1134_vm7, %v1137_v13, %v1140_v35 }
 0x255   : > { %2288 = vmatprep.subr.mxu0 %v1974_v3  ;;  %v2073_v9 = vsel %vm15916_vm15, %v10392_v45, %v2072_v57  ;;  %v2076_v2 = vsel %vm15917_vm1, %v2075_v19, %v8633_v51  ;;  %v15918_v47 = vsel %vm9662_vm13, 0, %v9626_v17  ;;  %v2162_v44 = vmul.f32 %v2161_v14, %v2159_v37  ;;  %v15922_v17 = vld [vmem:[#allocation12_spill] sm:$0xff]  ;;  %v15934_v37 = vld [vmem:[#allocation14_spill] sm:$0xff] }
 0x256   : > { %v1028_v21 = vadd.s32 3, %v15918_v47  ;;  %2289 = vmatpush1.msra.mxu0 %v10390_v60  ;;  %vm1759_vm5 = vcmp.eq.s32.totalorder %v10408_v62, 0  ;;  %v1032_v46 = vxor.u32 2147483648, %v15919_v42  ;;  %v1035_v40 = vxor.u32 2147483648, %v15920_v6  ;;  %v15937_v47 = vld [vmem:[#allocation19_spill] sm:$0xff] }
 0x257   : > { %2290 = vmatprep.subr.mxu0 %v1558_v36  ;;  %vm15921_vm10 = vweird.f32 %v9429_v31  ;;  %v1652_v28 = vadd.s32 3, %v1648_v29  ;;  %vm1131_vm13 = vweird.f32 %v15922_v17  ;;  %v2163_v19 = vxor.u32 2147483648, %v2162_v44  ;;  %v15943_v17 = vld [vmem:[#allocation39_spill] sm:$0xff]  ;;  %v15953_v36 = vld [vmem:[#allocation30_spill] sm:$0xff] }
 0x258   : > { %v1454_v45 = vsel %vm15921_vm10, nan, %v1453_v26  ;;  %v1029_v51 = vand.u32 3, %v1028_v21  ;;  %v2077_v60 = vsel %vm2070_vm11, %v2073_v9, %v2076_v2  ;;  %vm1762_vm3 = vcmp.eq.s32.totalorder %v10408_v62, 2  ;;  %v15936_v9 = vld [vmem:[#allocation21_spill] sm:$0xff] }
 0x259   : > { %2291 = vmatpush1.msra.mxu0 %v1454_v45  ;;  %v1142_v41 = vsel %vm1131_vm13, nan, %v1141_v27  ;;  %v1761_v31 = vsel %vm1759_vm5, %v10380_v54, %v1760_v1  ;;  %v1336_v18 = vsel %vm9881_vm14, 0, %v15923_v48  ;;  %vm15925_vm7 = vcmp.lt.s32.totalorder %v10074_v38, 0  ;;  %v15942_v45 = vld [vmem:[#allocation8_spill] sm:$0xff] }
 0x25a   : > { %2292 = vmatprep.subr.mxu0 %v1142_v41  ;;  %vm1031_vm12 = vcmp.eq.s32.totalorder %v1029_v51, 0  ;;  %vm1034_vm0 = vcmp.eq.s32.totalorder %v1029_v51, 2  ;;  %v2164_v29 = vsel %vm15925_vm7, %v2163_v19, %v2162_v44  ;;  %vm1030_vm15 = vcmp.lt.s32.totalorder %v1029_v51, 2  ;;  %v15944_v19 = vld [vmem:[#allocation38_spill] sm:$0xff] }
 0x25b   : > { %v1033_v49 = vsel %vm1031_vm12, %v15920_v6, %v1032_v46  ;;  %v1036_v53 = vsel %vm1034_vm0, %v1035_v40, %v15919_v42  ;;  %v2167_v7 = vsel %vm10362_vm2, %v10074_v38, %v2164_v29  ;;  %v1653_v1 = vand.u32 3, %v1652_v28  ;;  %v15938_v42 = vld [vmem:[#allocation29_spill] sm:$0xff]  ;;  %v15940_v46 = vld [vmem:[#allocation28_spill] sm:$0xff]  ;;  %v15947_v29 = vld [vmem:[#allocation15_spill] sm:$0xff] }
 0x25c   : > { %vm1027_vm11 = vweird.f32 %v15926_v59  ;;  %v1037_v12 = vsel %vm1030_vm15, %v1033_v49, %v1036_v53  ;;  %8640 = vcosq.f32 %v2167_v7  ;;  %v1764_v33 = vsel %vm1762_vm3, %v1763_v10, %v10377_v5 }
 0x25d   : > { %v1656_v20 = vxor.u32 2147483648, %v10423_v4  ;;  %v1038_v8 = vsel %vm1027_vm11, nan, %v1037_v12  ;;  %8642 = vsinq.f32 %v2167_v7  ;;  %v1659_v57 = vxor.u32 2147483648, %v10405_v25  ;;  %v10540_v12 = vld [vmem:[%s15489_s2] sm:$0xff] }
 0x25e   : > { %v1340_v0 = vadd.s32 3, %v1336_v18  ;;  %2293 = vmatpush1.msra.mxu0 %v1038_v8  ;;  %v712_v39 = vsel %vm9418_vm4, 0, %v15927_v61  ;;  %v10486_v32 = vand.u32 3, %v2172_v50  ;;  %v10490_v54 = vsel %vm2067_vm8, nan, %v2077_v60  ;;  %v15931_v50 = vld [vmem:[#allocation23_spill] sm:$0xff]  ;;  %v15945_v18 = vld [vmem:[#allocation16_spill] sm:$0xff] }
 0x25f   : > { %vm1758_vm14 = vcmp.lt.s32.totalorder %v10408_v62, 2  ;;  %v716_v5 = vadd.s32 3, %v712_v39  ;;  %vm1655_vm2 = vcmp.eq.s32.totalorder %v1653_v1, 0  ;;  %v720_v11 = vxor.u32 2147483648, %v15929_v43  ;;  %v15950_v8 = vld [vmem:[#allocation36_spill] sm:$0xff] }
 0x260   : > { %v10493_v10 = vsel %vm1758_vm14, %v1761_v31, %v1764_v33  ;;  %v723_v16 = vxor.u32 2147483648, %v15930_v56  ;;  %vm1654_vm1 = vcmp.lt.s32.totalorder %v1653_v1, 2  ;;  %v1657_v13 = vsel %vm1655_vm2, %v10405_v25, %v1656_v20  ;;  %v2196_v33 = vld [vmem:[%s15490_s3 + $0x28] sm:$0xff] }
 0x261   : > { %vm1658_vm4 = vcmp.eq.s32.totalorder %v1653_v1, 2  ;;  %v717_v35 = vand.u32 3, %v716_v5  ;;  %v10499_v34 = vand.u32 3, %v1340_v0  ;;  %v920_v62 = vsel %vm9571_vm9, 0, %v15931_v50  ;;  %v15949_v1 = vld [vmem:[#allocation6_spill] sm:$0xff] }
 0x262   : > { %v1660_v23 = vsel %vm1658_vm4, %v1659_v57, %v10423_v4  ;;  %v15935_v14 = vsel %vm9311_vm6, 0, %v15934_v37  ;;  %v616_v25 = vxor.u32 2147483648, %v15936_v9  ;;  %vm2178_vm13 = vcmp.eq.s32.totalorder %v10486_v32, 2 }
 0x263   : > { %v612_v3 = vadd.s32 3, %v15935_v14  ;;  %vm718_vm8 = vcmp.lt.s32.totalorder %v717_v35, 2  ;;  %vm719_vm5 = vcmp.eq.s32.totalorder %v717_v35, 0  ;;  %vm722_vm10 = vcmp.eq.s32.totalorder %v717_v35, 2  ;;  %v2198_v35 = vld [vmem:[%s15490_s3 + $0x38] sm:$0xff] }
 0x264   : > { %v721_v4 = vsel %vm719_vm5, %v15930_v56, %v720_v11  ;;  %v724_v2 = vsel %vm722_vm10, %v723_v16, %v15929_v43  ;;  %v619_v21 = vxor.u32 2147483648, %v15937_v47  ;;  %vm2175_vm9 = vcmp.eq.s32.totalorder %v10486_v32, 0  ;;  %v15951_v43 = vld [vmem:[#allocation34_spill] sm:$0xff]  ;;  %v15952_v56 = vld [vmem:[#allocation31_spill] sm:$0xff]  ;;  %v15954_v14 = vld [vmem:[#allocation24_spill] sm:$0xff] }
 0x265   : > { %v613_v27 = vand.u32 3, %v612_v3  ;;  %v10515_v44 = vsel %vm1654_vm1, %v1657_v13, %v1660_v23  ;;  %vm15939_vm6 = vnez %v15938_v42  ;;  %vm715_vm3 = vweird.f32 %v15942_v45 }
 0x266   : > { %v15941_v6 = vsel %vm15939_vm6, 0, %v15940_v46  ;;  %v725_v28 = vsel %vm718_vm8, %v721_v4, %v724_v2  ;;  %vm2174_vm12 = vcmp.lt.s32.totalorder %v10486_v32, 2  ;;  %v1344_v51 = vxor.u32 2147483648, %v15943_v17  ;;  %v10568_v2 = vld [vmem:[%s15489_s2 + $0x8] sm:$0xff] }
 0x267   : > { %v1236_v40 = vadd.s32 3, %v15941_v6  ;;  %v1347_v60 = vxor.u32 2147483648, %v15944_v19  ;;  %v726_v41 = vsel %vm715_vm3, nan, %v725_v28  ;;  %v924_v31 = vadd.s32 3, %v920_v62 }
 0x268   : > { %vm2171_vm0 = vweird.f32 %v10074_v38  ;;  %vm1343_vm7 = vcmp.eq.s32.totalorder %v10499_v34, 0  ;;  %vm1346_vm15 = vcmp.eq.s32.totalorder %v10499_v34, 2  ;;  %2294 = vmatprep.subr.mxu0 %v726_v41  ;;  %vm615_vm11 = vcmp.eq.s32.totalorder %v613_v27, 0  ;;  %v2185_v38 = vld [vmem:[%s15489_s2 + $0x10] sm:$0xff] }
 0x269   : > { %vm618_vm14 = vcmp.eq.s32.totalorder %v613_v27, 2  ;;  %vm1342_vm2 = vcmp.lt.s32.totalorder %v10499_v34, 2  ;;  %vm614_vm1 = vcmp.lt.s32.totalorder %v613_v27, 2  ;;  %v617_v48 = vsel %vm615_vm11, %v15937_v47, %v616_v25  ;;  %v8641_v20 = vpop.eup %8640  ;;  %v2195_v27 = vld [vmem:[%s15490_s3 + $0x20] sm:$0xff]  ;;  %v15957_v41 = vld [vmem:[#allocation18_spill] sm:$0xff] }
 0x26a   : > { %v620_v58 = vsel %vm618_vm14, %v619_v21, %v15936_v9  ;;  %vm15946_vm4 = vnez %v15945_v18  ;;  %vm1755_vm8 = vweird.f32 %v9740_v52  ;;  %v1237_v7 = vand.u32 3, %v1236_v40  ;;  %v8643_v15 = vpop.eup %8642  ;;  %v15955_v9 = vld [vmem:[#allocation22_spill] sm:$0xff]  ;;  %v15958_v52 = vld [vmem:[#allocation11_spill] sm:$0xff] }
 0x26b   : > { %v15948_v49 = vsel %vm15946_vm4, 0, %v15947_v29  ;;  %vm611_vm5 = vweird.f32 %v15949_v1  ;;  %v621_v59 = vsel %vm614_vm1, %v617_v48, %v620_v58  ;;  %vm15620_vm10 = vcmask 261120   ;;  %v2197_v40 = vld [vmem:[%s15490_s3 + $0x30] sm:$0xff]  ;;  %v15959_v58 = vld [vmem:[#allocation9_spill] sm:$0xff]  ;;  %v2186_v18 = vld [vmem:[%s15489_s2 + $0x18] sm:$0xff] }
 0x26c   : > { %v820_v53 = vadd.s32 3, %v15948_v49  ;;  %v1240_v57 = vxor.u32 2147483648, %v15950_v8  ;;  %v925_v0 = vand.u32 3, %v924_v31  ;;  %v622_v61 = vsel %vm611_vm5, nan, %v621_v59  ;;  %v15960_v49 = vld [vmem:[#allocation7_spill] sm:$0xff]  ;;  %v2192_v1 = vld [vmem:[%s15490_s3 + $0x8] sm:$0xff] }
 0x26d   : > { %v2179_v39 = vxor.u32 2147483648, %v8641_v20  ;;  %v1345_v5 = vsel %vm1343_vm7, %v15944_v19, %v1344_v51  ;;  %v1243_v11 = vxor.u32 2147483648, %v15951_v43  ;;  %v928_v16 = vxor.u32 2147483648, %v15952_v56  ;;  %2295 = vmatpush1.msra.mxu0 %v622_v61  ;;  %v2187_v59 = vld [vmem:[%s15489_s2 + $0x20] sm:$0xff] }
 0x26e   : > { %v8905_v13 = vmov 0   ;;  %v2176_v23 = vxor.u32 2147483648, %v8643_v15  ;;  %v1348_v50 = vsel %vm1346_vm15, %v1347_v60, %v15943_v17  ;;  %v931_v62 = vxor.u32 2147483648, %v15953_v36  ;;  %8048 = vmatmul.mubr.msk.f32.vlgmr.msra.gmra.mxu0 %vm15620_vm10, %v10540_v12  ;;  %v7702_v61 = vld [vmem:[#allocation2] sm:$0x1] }
 0x26f   : > { %8577 = vset.pattern.permute.xlu1 %v8905_v13  ;;  %v821_v26 = vand.u32 3, %v820_v53  ;;  %v2180_v37 = vsel %vm2178_vm13, %v2179_v39, %v8643_v15  ;;  %vm1239_vm6 = vcmp.eq.s32.totalorder %v1237_v7, 0  ;;  %v824_v3 = vxor.u32 2147483648, %v15954_v14  ;;  %8576 = vset.pattern.permute.xlu0 %v8905_v13  ;;  %v2190_v15 = vld [vmem:[%s15489_s2 + $0x38] sm:$0xff] }
 0x270   : > { %2226 = vperm.xlu1 %8577, %v2196_v33   ;;  %v827_v25 = vxor.u32 2147483648, %v15955_v9  ;;  %v15956_v4 = vmov 0.0   ;;  %v2177_v47 = vsel %vm2175_vm9, %v8641_v20, %v2176_v23  ;;  %v1241_v21 = vsel %vm1239_vm6, %v15951_v43, %v1240_v57  ;;  %2236 = vperm.xlu0 %8576, %v2198_v35   ;;  %v5824_v33 = vld [vmem:[%s15492_s5 + $0x10] sm:$0xff]  ;;  %v2188_v20 = vld [vmem:[%s15489_s2 + $0x28] sm:$0xff] }
 0x271   : > { %2334 = vmatprep.mubr.f32.mxu0 %v15956_v4  ;;  %vm1242_vm13 = vcmp.eq.s32.totalorder %v1237_v7, 2  ;;  %vm927_vm3 = vcmp.eq.s32.totalorder %v925_v0, 0  ;;  %v2181_v42 = vsel %vm2174_vm12, %v2177_v47, %v2180_v37  ;;  %vm930_vm7 = vcmp.eq.s32.totalorder %v925_v0, 2  ;;  %v5823_v57 = vld [vmem:[%s15492_s5 + $0x8] sm:$0xff] }
 0x272   : > { %v1244_v46 = vsel %vm1242_vm13, %v1243_v11, %v15950_v8  ;;  %v929_v6 = vsel %vm927_vm3, %v15953_v36, %v928_v16  ;;  %v2182_v45 = vsel %vm2171_vm0, nan, %v2181_v42  ;;  %v932_v28 = vsel %vm930_vm7, %v931_v62, %v15952_v56  ;;  %8049 = vmatmul.mubr.msk.f32.gmra.mxu0 %vm15620_vm10, %v10568_v2  ;;  %v5822_v8 = vld [vmem:[%s15492_s5] sm:$0xff] }
 0x273   : > { %vm823_vm9 = vcmp.eq.s32.totalorder %v821_v26, 0  ;;  %vm826_vm15 = vcmp.eq.s32.totalorder %v821_v26, 2  ;;  %2401 = vmatprep.subr.mxu1 %v2182_v45  ;;  %v1349_v32 = vsel %vm1342_vm2, %v1345_v5, %v1348_v50  ;;  %vm1238_vm12 = vcmp.lt.s32.totalorder %v1237_v7, 2  ;;  %2340 = vmatprep.mubr.f32.mxu0 %v15956_v4  ;;  %v2191_v7 = vld [vmem:[%s15490_s3] sm:$0xff] }
 0x274   : > { %2221 = vperm.xlu1 %8577, %v2195_v27   ;;  %v825_v17 = vsel %vm823_vm9, %v15955_v9, %v824_v3  ;;  %v828_v51 = vsel %vm826_vm15, %v827_v25, %v15954_v14  ;;  %2402 = vmatpush1.msra.mxu1 %v10490_v54  ;;  %v1766_v19 = vsel %vm1755_vm8, nan, %v10493_v10  ;;  %vm1651_vm0 = vweird.f32 %v9538_v55  ;;  %v2193_v54 = vld [vmem:[%s15490_s3 + $0x10] sm:$0xff]  ;;  %v2194_v55 = vld [vmem:[%s15490_s3 + $0x18] sm:$0xff] }
 0x275   : > { %v1245_v34 = vsel %vm1238_vm12, %v1241_v21, %v1244_v46  ;;  %vm926_vm11 = vcmp.lt.s32.totalorder %v925_v0, 2  ;;  %2231 = vperm.xlu0 %8576, %v2197_v40   ;;  %2403 = vmatprep.subr.mxu1 %v1766_v19  ;;  %v1662_v60 = vsel %vm1651_vm0, nan, %v10515_v44  ;;  %vm1339_vm14 = vweird.f32 %v15957_v41  ;;  %v2189_v0 = vld [vmem:[%s15489_s2 + $0x30] sm:$0xff] }
 0x276   : > { %v933_v31 = vsel %vm926_vm11, %v929_v6, %v932_v28  ;;  %vm822_vm2 = vcmp.lt.s32.totalorder %v821_v26, 2  ;;  %2404 = vmatpush1.msra.mxu1 %v1662_v60  ;;  %v1350_v48 = vsel %vm1339_vm14, nan, %v1349_v32  ;;  %vm1235_vm1 = vweird.f32 %v15958_v52  ;;  %8050 = vmatmul.mubr.msk.f32.gmra.mxu0 %vm15620_vm10, %v2185_v38 }
 0x277   : > { %v829_v10 = vsel %vm822_vm2, %v825_v17, %v828_v51  ;;  %2405 = vmatprep.subr.mxu1 %v1350_v48  ;;  %v1246_v44 = vsel %vm1235_vm1, nan, %v1245_v34  ;;  %vm923_vm4 = vweird.f32 %v15959_v58  ;;  %2346 = vmatprep.mubr.f32.mxu0 %v15956_v4  ;;  %vm819_vm8 = vweird.f32 %v15960_v49 }
 0x278   : > { %2406 = vmatpush1.msra.mxu1 %v1246_v44  ;;  %v934_v29 = vsel %vm923_vm4, nan, %v933_v31  ;;  %2211 = vperm.xlu1 %8577, %v2193_v54   ;;  %v830_v53 = vsel %vm819_vm8, nan, %v829_v10  ;;  %v15965_v51 = vmov 2131351028   ;;  %v15966_v34 = vmov 2102212464  }
 0x279   : > { %2407 = vmatprep.subr.mxu1 %v934_v29  ;;  %2216 = vperm.xlu0 %8576, %v2194_v55  }
 0x27a   : > { %2408 = vmatpush1.msra.mxu1 %v830_v53  ;;  %8051 = vmatmul.mubr.msk.f32.gmra.mxu0 %vm15620_vm10, %v2186_v18 }
 0x27b   : > { %8056 = vmatmul.mubr.msk.f32.vlgmr.msra.gmra.mxu1 %vm15620_vm10, %v10540_v12  ;;  %2352 = vmatprep.mubr.f32.mxu0 %v15956_v4  ;;  %v5825_v12 = vld [vmem:[%s15492_s5 + $0x18] sm:$0xff] }
 0x27c   : > { %2447 = vmatprep.mubr.f32.mxu1 %v15956_v4  ;;  %2201 = vperm.xlu1 %8577, %v2191_v7  }
 0x27d   : > { %2206 = vperm.xlu0 %8576, %v2192_v1  }
 0x27e   : > { %8052 = vmatmul.mubr.msk.f32.gmra.mxu0 %vm15620_vm10, %v2187_v59 }
 0x27f   : > { %8057 = vmatmul.mubr.msk.f32.gmra.mxu1 %vm15620_vm10, %v10568_v2  ;;  %2358 = vmatprep.mubr.f32.mxu0 %v15956_v4 }
 0x280   : > { %2453 = vmatprep.mubr.f32.mxu1 %v15956_v4  ;;  %5838 = vperm.xlu1 %8577, %v5824_v33  }
 0x281   : > { %5843 = vperm.xlu0 %8576, %v5825_v12  }
 0x282   : > { %8053 = vmatmul.mubr.msk.f32.gmra.mxu0 %vm15620_vm10, %v2188_v20 }
 0x283   : > { %8058 = vmatmul.mubr.msk.f32.gmra.mxu1 %vm15620_vm10, %v2185_v38  ;;  %2364 = vmatprep.mubr.f32.mxu0 %v15956_v4 }
 0x284   : > { %2459 = vmatprep.mubr.f32.mxu1 %v15956_v4  ;;  %5828 = vperm.xlu1 %8577, %v5822_v8  }
 0x285   : > { %5833 = vperm.xlu0 %8576, %v5823_v57  }
 0x286   : > { %8054 = vmatmul.mubr.msk.f32.gmra.mxu0 %vm15620_vm10, %v2189_v0 }
 0x287   : > { %8059 = vmatmul.mubr.msk.f32.gmra.mxu1 %vm15620_vm10, %v2186_v18  ;;  %2370 = vmatprep.mubr.f32.mxu0 %v15956_v4 }
 0x288   : > { %2465 = vmatprep.mubr.f32.mxu1 %v15956_v4 }
 0x289   : > { %7705 = vperm.xlu0 %8576, %v7702_v61  }
 0x28a   : > { %8055 = vmatmul.mubr.msk.f32.gmra.mxu0 %vm15620_vm10, %v2190_v15 }
 0x28b   : > { %8060 = vmatmul.mubr.msk.f32.gmra.mxu1 %vm15620_vm10, %v2187_v59  ;;  %5923 = vmatprep.mubr.f32.mxu0 %v15956_v4 }
 0x28c   : > { %2471 = vmatprep.mubr.f32.mxu1 %v15956_v4 }
 0x28f   : > { %8061 = vmatmul.mubr.msk.f32.gmra.mxu1 %vm15620_vm10, %v2188_v20 }
 0x290   : > { %2477 = vmatprep.mubr.f32.mxu1 %v15956_v4 }
 0x293   : > { %8062 = vmatmul.mubr.msk.f32.gmra.mxu1 %vm15620_vm10, %v2189_v0 }
 0x294   : > { %2483 = vmatprep.mubr.f32.mxu1 %v15956_v4 }
 0x297   : > { %8063 = vmatmul.mubr.msk.f32.gmra.mxu1 %vm15620_vm10, %v2190_v15 }
 0x298   : > { %6012 = vmatprep.mubr.f32.mxu1 %v15956_v4 }
 0x2eb   : > { %v10675_v39 = vpop.permute.xlu1 %2226  ;;  %v10694_v27 = vpop.permute.xlu0 %2236 }
 0x2ec   : > { %15963 = vst [vmem:[#allocation12_spill] sm:$0xff] %v10694_v27 }
 0x2ef   : > { %v10677_v5 = vpop.permute.xlu1 %2221 }
 0x2f0   : > { %v10709_v52 = vpop.permute.xlu0 %2231 }
 0x2f1   : > { %15967 = vst [vmem:[#allocation35_spill] sm:$0xff] %v10709_v52 }
 0x2f3   : > { %v10679_v43 = vpop.permute.xlu1 %2211 }
 0x2f7   : > { %v10681_v11 = vpop.permute.xlu1 %2201 }
 0x32e   : > { %v2330_v56 = vpop.f32.mrf.mxu0 }
 0x32f   : > { %v10684_v16 = vadd.f32 %v2330_v56, %v10681_v11  ;;  %v10716_v56 = vpop.permute.xlu0 %2216 }
 0x330   : > { %v2332_v13 = vpop.f32.mrf.mxu0 }
 0x331   : > { %15961 = vst [vmem:[#allocation33_spill] sm:$0xff] %v10684_v16  ;;  %v15563_v35 = vand.u32 2147483647, %v10684_v16  ;;  %v2493_v23 = vand.u32 2139095040, %v10684_v16  ;;  %v10689_v50 = vadd.f32 %v2332_v13, %v10681_v11 }
 0x333   : > { %15962 = vst [vmem:[#allocation32_spill] sm:$0xff] %v10689_v50  ;;  %v2494_v36 = vshrl.u32 %v2493_v23, 23  ;;  %v2597_v62 = vand.u32 2139095040, %v10689_v50  ;;  %v2497_v37 = vand.u32 8388607, %v15563_v35 }
 0x335   : > { %v8064_v26 = vadd.s32 4294967169, %v2494_v36  ;;  %v2598_v14 = vshrl.u32 %v2597_v62, 23  ;;  %v2498_v9 = vor.u32 8388608, %v2497_v37 }
 0x337   : > { %v2500_v3 = vadd.s32 1, %v8064_v26  ;;  %v8068_v2 = vadd.s32 4294967169, %v2598_v14  ;;  %v2538_v6 = vshll.u32 %v2498_v9, 8 }
 0x339   : > { %vm2501_vm5 = vcmp.gt.s32.totalorder %v2500_v3, 0  ;;  %v2604_v32 = vadd.s32 1, %v8068_v2 }
 0x33a   : > { %v2502_v25 = vsel %vm2501_vm5, %v2500_v3, 0 }
 0x33b   : > { %v2504_v47 = vand.u32 31, %v2502_v25  ;;  %v2443_v21 = vpop.f32.mrf.mxu1  ;;  %v2503_v42 = vshrl.u32 %v2502_v25, 5  ;;  %vm2605_vm3 = vcmp.gt.s32.totalorder %v2604_v32, 0 }
 0x33c   : > { %v10699_v28 = vadd.f32 %v2443_v21, %v10681_v11  ;;  %v2606_v3 = vsel %vm2605_vm3, %v2604_v32, 0 }
 0x33d   : > { %v2505_v46 = vsub.s32 32, %v2504_v47  ;;  %v2507_v40 = vshll.u32 %v15841_v63, %v2504_v47  ;;  %v2510_v45 = vshll.u32 %v15851_v30, %v2504_v47  ;;  %v2513_v19 = vshll.u32 %v15965_v51, %v2504_v47 }
 0x33e   : > { %15964 = vst [vmem:[#allocation37_spill] sm:$0xff] %v10699_v28  ;;  %v2516_v41 = vshll.u32 %v15966_v34, %v2504_v47  ;;  %v2519_v54 = vshll.u32 %v15852_v24, %v2504_v47  ;;  %vm2522_vm6 = vcmp.lt.s32.totalorder %v2503_v42, 1  ;;  %vm2525_vm13 = vcmp.lt.s32.totalorder %v2503_v42, 4 }
 0x33f   : > { %v2508_v17 = vshrl.u32 %v15851_v30, %v2505_v46  ;;  %v2511_v38 = vshrl.u32 %v15965_v51, %v2505_v46  ;;  %v2514_v60 = vshrl.u32 %v15966_v34, %v2505_v46  ;;  %v2517_v31 = vshrl.u32 %v15852_v24, %v2505_v46 }
 0x340   : > { %v2520_v48 = vshrl.u32 %v15840_v22, %v2505_v46  ;;  %v2701_v29 = vand.u32 2139095040, %v10699_v28  ;;  %v2506_v1 = vshrl.u32 %v15841_v63, %v2505_v46  ;;  %vm2524_vm7 = vcmp.lt.s32.totalorder %v2503_v42, 3 }
 0x341   : > { %v2509_v10 = vor.u32 %v2508_v17, %v2507_v40  ;;  %v2512_v55 = vor.u32 %v2511_v38, %v2510_v45  ;;  %v2515_v44 = vor.u32 %v2514_v60, %v2513_v19  ;;  %v2518_v58 = vor.u32 %v2517_v31, %v2516_v41  ;;  %v10733_v40 = vpop.permute.xlu0 %2206  ;;  %v2336_v45 = vpop.f32.mrf.mxu0 }
 0x342   : > { %v2521_v18 = vor.u32 %v2520_v48, %v2519_v54  ;;  %vm2523_vm9 = vcmp.lt.s32.totalorder %v2503_v42, 2  ;;  %v2702_v8 = vshrl.u32 %v2701_v29, 23  ;;  %v15562_v26 = vand.u32 2147483647, %v10699_v28 }
 0x343   : > { %v2527_v49 = vsel %vm2525_vm13, %v2515_v44, 2102212464  ;;  %v2530_v53 = vsel %vm2522_vm6, %v2509_v10, %v2512_v55  ;;  %v2534_v7 = vsel %vm2522_vm6, %v2512_v55, %v2515_v44  ;;  %v2531_v59 = vsel %vm2525_vm13, %v2518_v58, 920167782 }
 0x344   : > { %v2535_v33 = vsel %vm2525_vm13, %v2521_v18, 1326507024  ;;  %v2532_v12 = vsel %vm2524_vm7, %v2515_v44, %v2531_v59  ;;  %v2526_v57 = vsel %vm2522_vm6, %v2506_v1, %v2509_v10  ;;  %v2528_v0 = vsel %vm2524_vm7, %v2512_v55, %v2527_v49 }
 0x345   : > { %v2536_v20 = vsel %vm2524_vm7, %v2518_v58, %v2535_v33  ;;  %v2533_v61 = vsel %vm2523_vm9, %v2530_v53, %v2532_v12  ;;  %v8072_v37 = vadd.s32 4294967169, %v2702_v8  ;;  %v2529_v14 = vsel %vm2523_vm9, %v2526_v57, %v2528_v0 }
 0x346   : > { %v2537_v15 = vsel %vm2523_vm9, %v2534_v7, %v2536_v20  ;;  %v10721_v36 = vmul.u32.u64.low %v2538_v6, %v2533_v61  ;;  %v10722_v62 = vmul.u32.u64.high %v2538_v6, %v2533_v61, %v10721_v36  ;;  %v2545_v2 = vmul.u32 %v2538_v6, %v2529_v14 }
 0x347   : > { %v10718_v13 = vmul.u32.u64.low %v2538_v6, %v2537_v15  ;;  %v10719_v23 = vmul.u32.u64.high %v2538_v6, %v2537_v15, %v10718_v13  ;;  %v2708_v9 = vadd.s32 1, %v8072_v37  ;;  %v2705_v47 = vand.u32 8388607, %v15562_v26 }
 0x348   : > { %v2548_v25 = vadd.s32 1, %v10722_v62  ;;  %v2608_v21 = vand.u32 31, %v2606_v3  ;;  %v15560_v38 = vand.u32 2147483647, %v10689_v50  ;;  %v10739_v6 = vadd.f32 %v2336_v45, %v10733_v40 }
 0x349   : > { %vm2547_vm15 = vc.u32 %v10719_v23, %v10721_v36  ;;  %vm2709_vm12 = vcmp.gt.s32.totalorder %v2708_v9, 0  ;;  %v2706_v19 = vor.u32 8388608, %v2705_v47  ;;  %v10751_v12 = vshrl.u32 %v2606_v3, 5 }
 0x34a   : > { %v2549_v42 = vsel %vm2547_vm15, %v2548_v25, %v10722_v62  ;;  %v2710_v46 = vsel %vm2709_vm12, %v2708_v9, 0  ;;  %v10736_v41 = vsub.s32 32, %v2608_v21  ;;  %15968 = vst [vmem:[#allocation10_spill] sm:$0xff] %v10739_v6 }
 0x34b   : > { %v2550_v17 = vadd.s32 %v2549_v42, %v2545_v2  ;;  %v2712_v32 = vand.u32 31, %v2710_v46  ;;  %v2711_v54 = vshrl.u32 %v2710_v46, 5  ;;  %v2746_v33 = vshll.u32 %v2706_v19, 8 }
 0x34c   : > { %v2612_v15 = vshrl.u32 %v15851_v30, %v10736_v41  ;;  %v2621_v42 = vshrl.u32 %v15852_v24, %v10736_v41  ;;  %v2620_v19 = vshll.u32 %v15966_v34, %v2608_v21  ;;  %vm2629_vm4 = vcmp.lt.s32.totalorder %v10751_v12, 4 }
 0x34d   : > { %v2713_v60 = vsub.s32 32, %v2712_v32  ;;  %v2551_v31 = vadd.s32 536870912, %v2550_v17  ;;  %v2715_v48 = vshll.u32 %v15841_v63, %v2712_v32  ;;  %v2718_v10 = vshll.u32 %v15851_v30, %v2712_v32 }
 0x34e   : > { %v2721_v58 = vshll.u32 %v15965_v51, %v2712_v32  ;;  %v2724_v18 = vshll.u32 %v15966_v34, %v2712_v32  ;;  %v2727_v53 = vshll.u32 %v15852_v24, %v2712_v32  ;;  %vm2730_vm0 = vcmp.lt.s32.totalorder %v2711_v54, 1 }
 0x34f   : > { %v2716_v55 = vshrl.u32 %v15851_v30, %v2713_v60  ;;  %v2719_v44 = vshrl.u32 %v15965_v51, %v2713_v60  ;;  %v2722_v29 = vshrl.u32 %v15966_v34, %v2713_v60  ;;  %v2725_v49 = vshrl.u32 %v15852_v24, %v2713_v60 }
 0x350   : > { %v2728_v7 = vshrl.u32 %v15840_v22, %v2713_v60  ;;  %v10753_v0 = vshrl.u32 %v2551_v31, 30  ;;  %vm2733_vm11 = vcmp.lt.s32.totalorder %v2711_v54, 4  ;;  %vm2732_vm14 = vcmp.lt.s32.totalorder %v2711_v54, 3 }
 0x351   : > { %v2717_v1 = vor.u32 %v2716_v55, %v2715_v48  ;;  %v2720_v59 = vor.u32 %v2719_v44, %v2718_v10  ;;  %v2723_v20 = vor.u32 %v2722_v29, %v2721_v58  ;;  %v2726_v8 = vor.u32 %v2725_v49, %v2724_v18 }
 0x352   : > { %v2729_v57 = vor.u32 %v2728_v7, %v2727_v53  ;;  %15969 = vst [vmem:[#allocation17_spill] sm:$0xff] %v10753_v0  ;;  %vm2731_vm2 = vcmp.lt.s32.totalorder %v2711_v54, 2  ;;  %v2714_v25 = vshrl.u32 %v15841_v63, %v2713_v60  ;;  %v2553_v46 = vshll.u32 %v10753_v0, 30 }
 0x353   : > { %v2738_v61 = vsel %vm2730_vm0, %v2717_v1, %v2720_v59  ;;  %v2739_v13 = vsel %vm2733_vm11, %v2726_v8, 920167782  ;;  %v2742_v62 = vsel %vm2730_vm0, %v2720_v59, %v2723_v20  ;;  %v2735_v14 = vsel %vm2733_vm11, %v2723_v20, 2102212464 }
 0x354   : > { %v2743_v37 = vsel %vm2733_vm11, %v2729_v57, 1326507024  ;;  %v2740_v3 = vsel %vm2732_vm14, %v2723_v20, %v2739_v13  ;;  %v2734_v31 = vsel %vm2730_vm0, %v2714_v25, %v2717_v1  ;;  %v2736_v48 = vsel %vm2732_vm14, %v2720_v59, %v2735_v14 }
 0x355   : > { %v2744_v9 = vsel %vm2732_vm14, %v2726_v8, %v2743_v37  ;;  %v2741_v2 = vsel %vm2731_vm2, %v2738_v61, %v2740_v3  ;;  %v2615_v55 = vshrl.u32 %v15965_v51, %v10736_v41  ;;  %v2618_v44 = vshrl.u32 %v15966_v34, %v10736_v41  ;;  %v2445_v8 = vpop.f32.mrf.mxu1 }
 0x356   : > { %v2745_v47 = vsel %vm2731_vm2, %v2742_v62, %v2744_v9  ;;  %v10773_v10 = vmul.u32.u64.low %v2746_v33, %v2741_v2  ;;  %v10774_v60 = vmul.u32.u64.high %v2746_v33, %v2741_v2, %v10773_v10  ;;  %v2623_v58 = vshll.u32 %v15852_v24, %v2608_v21 }
 0x357   : > { %v10767_v45 = vmul.u32.u64.low %v2746_v33, %v2745_v47  ;;  %v10768_v32 = vmul.u32.u64.high %v2746_v33, %v2745_v47, %v10767_v45  ;;  %v2624_v18 = vshrl.u32 %v15840_v22, %v10736_v41  ;;  %v2611_v29 = vshll.u32 %v15841_v63, %v2608_v21 }
 0x358   : > { %v2614_v49 = vshll.u32 %v15851_v30, %v2608_v21  ;;  %v2617_v53 = vshll.u32 %v15965_v51, %v2608_v21  ;;  %v2622_v7 = vor.u32 %v2621_v42, %v2620_v19  ;;  %v10787_v1 = vsub.s32 %v2550_v17, %v2553_v46 }
 0x359   : > { %v2737_v59 = vsel %vm2731_vm2, %v2734_v31, %v2736_v48  ;;  %vm2755_vm1 = vc.u32 %v10768_v32, %v10773_v10  ;;  %v2625_v20 = vor.u32 %v2624_v18, %v2623_v58  ;;  %v2756_v57 = vadd.s32 1, %v10774_v60 }
 0x35a   : > { %v2601_v61 = vand.u32 8388607, %v15560_v38  ;;  %v2909_v13 = vand.u32 2139095040, %v10739_v6  ;;  %v2613_v62 = vor.u32 %v2612_v15, %v2611_v29  ;;  %v2616_v37 = vor.u32 %v2615_v55, %v2614_v49 }
 0x35b   : > { %v2619_v21 = vor.u32 %v2618_v44, %v2617_v53  ;;  %v2753_v17 = vmul.u32 %v2746_v33, %v2737_v59  ;;  %v2757_v54 = vsel %vm2755_vm1, %v2756_v57, %v10774_v60  ;;  %v2635_v14 = vsel %vm2629_vm4, %v2622_v7, 920167782 }
 0x35c   : > { %v10801_v3 = vadd.f32 %v2445_v8, %v10681_v11  ;;  %v2556_v9 = vsub.s32 0, %v10787_v1  ;;  %v2639_v25 = vsel %vm2629_vm4, %v2625_v20, 1326507024  ;;  %vm2626_vm8 = vcmp.lt.s32.totalorder %v10751_v12, 1 }
 0x35d   : > { %v2758_v2 = vadd.s32 %v2757_v54, %v2753_v17  ;;  %vm2628_vm5 = vcmp.lt.s32.totalorder %v10751_v12, 3  ;;  %v2602_v15 = vor.u32 8388608, %v2601_v61  ;;  %v2634_v33 = vsel %vm2626_vm8, %v2613_v62, %v2616_v37 }
 0x35e   : > { %15970 = vst [vmem:[#allocation20_spill] sm:$0xff] %v10801_v3  ;;  %v2636_v47 = vsel %vm2628_vm5, %v2619_v21, %v2635_v14  ;;  %v2910_v42 = vshrl.u32 %v2909_v13, 23  ;;  %v2638_v11 = vsel %vm2626_vm8, %v2616_v37, %v2619_v21  ;;  %v2640_v46 = vsel %vm2628_vm5, %v2622_v7, %v2639_v25 }
 0x35f   : > { %v2805_v45 = vand.u32 2139095040, %v10801_v3  ;;  %v8065_v19 = vmin.u32 %v2556_v9, %v10787_v1  ;;  %vm2627_vm6 = vcmp.lt.s32.totalorder %v10751_v12, 2  ;;  %v2759_v31 = vadd.s32 536870912, %v2758_v2 }
 0x360   : > { %v2637_v48 = vsel %vm2627_vm6, %v2634_v33, %v2636_v47  ;;  %v2641_v55 = vsel %vm2627_vm6, %v2638_v11, %v2640_v46  ;;  %v2642_v44 = vshll.u32 %v2602_v15, 8  ;;  %v8080_v58 = vadd.s32 4294967169, %v2910_v42  ;;  %v2338_v33 = vpop.f32.mrf.mxu0 }
 0x361   : > { %v2806_v60 = vshrl.u32 %v2805_v45, 23  ;;  %v2558_v29 = vclz %v8065_v19  ;;  %v2631_v49 = vsel %vm2629_vm4, %v2619_v21, 2102212464  ;;  %v10829_v59 = vshrl.u32 %v2759_v31, 30 }
 0x362   : > { %v10825_v53 = vmul.u32.u64.low %v2642_v44, %v2637_v48  ;;  %v10826_v7 = vmul.u32.u64.high %v2642_v44, %v2637_v48, %v10825_v53  ;;  %v10831_v20 = vmul.u32.u64.low %v2642_v44, %v2641_v55  ;;  %v10832_v8 = vmul.u32.u64.high %v2642_v44, %v2641_v55, %v10831_v20 }
 0x363   : > { %v8076_v18 = vadd.s32 4294967169, %v2806_v60  ;;  %15971 = vst [vmem:[#allocation27_spill] sm:$0xff] %v10829_v59  ;;  %v2610_v61 = vshrl.u32 %v15841_v63, %v10736_v41  ;;  %v2916_v13 = vadd.s32 1, %v8080_v58  ;;  %v15561_v17 = vand.u32 2147483647, %v10739_v6 }
 0x364   : > { %v8066_v54 = vadd.s32 4294967294, %v2558_v29  ;;  %v2632_v14 = vsel %vm2628_vm5, %v2616_v37, %v2631_v49  ;;  %v2761_v25 = vshll.u32 %v10829_v59, 30  ;;  %v15559_v47 = vand.u32 2147483647, %v10801_v3 }
 0x365   : > { %v2812_v57 = vadd.s32 1, %v8076_v18  ;;  %v2630_v21 = vsel %vm2626_vm8, %v2610_v61, %v2613_v62  ;;  %vm2917_vm3 = vcmp.gt.s32.totalorder %v2916_v13, 0  ;;  %v2652_v11 = vadd.s32 1, %v10826_v7 }
 0x366   : > { %v2633_v41 = vsel %vm2627_vm6, %v2630_v21, %v2632_v14  ;;  %vm8067_vm7 = vcmp.lt.s32.totalorder %v8066_v54, 0  ;;  %v2913_v62 = vand.u32 8388607, %v15561_v17  ;;  %v10851_v37 = vadd.f32 %v2338_v33, %v10733_v40 }
 0x367   : > { %vm2813_vm13 = vcmp.gt.s32.totalorder %v2812_v57, 0  ;;  %v10853_v46 = vsub.s32 %v2758_v2, %v2761_v25  ;;  %vm2651_vm9 = vc.u32 %v10832_v8, %v10825_v53  ;;  %v2918_v45 = vsel %vm2917_vm3, %v2916_v13, 0 }
 0x368   : > { %v2814_v9 = vsel %vm2813_vm13, %v2812_v57, 0  ;;  %15972 = vst [vmem:[#allocation25_spill] sm:$0xff] %v10851_v37  ;;  %v2649_v19 = vmul.u32 %v2642_v44, %v2633_v41  ;;  %v2809_v31 = vand.u32 8388607, %v15559_v47  ;;  %v2653_v44 = vsel %vm2651_vm9, %v2652_v11, %v10826_v7 }
 0x369   : > { %v2816_v15 = vand.u32 31, %v2814_v9  ;;  %v10871_v29 = vshrl.u32 %v2814_v9, 5  ;;  %v2920_v20 = vand.u32 31, %v2918_v45  ;;  %v2764_v57 = vsub.s32 0, %v10853_v46 }
 0x36a   : > { %v3013_v7 = vand.u32 2139095040, %v10851_v37  ;;  %v10884_v9 = vsel %vm8067_vm7, 0, %v8066_v54  ;;  %v10886_v41 = vadd.s32 %v2653_v44, %v2649_v19  ;;  %v2810_v11 = vor.u32 8388608, %v2809_v31 }
 0x36b   : > { %v10845_v42 = vsub.s32 32, %v2816_v15  ;;  %v2819_v2 = vshll.u32 %v15841_v63, %v2816_v15  ;;  %v2822_v55 = vshll.u32 %v15851_v30, %v2816_v15  ;;  %v2828_v58 = vshll.u32 %v15966_v34, %v2816_v15 }
 0x36c   : > { %v2825_v49 = vshll.u32 %v15965_v51, %v2816_v15  ;;  %v2831_v25 = vshll.u32 %v15852_v24, %v2816_v15  ;;  %v2914_v47 = vor.u32 8388608, %v2913_v62  ;;  %vm2834_vm15 = vcmp.lt.s32.totalorder %v10871_v29, 1 }
 0x36d   : > { %v2820_v12 = vshrl.u32 %v15851_v30, %v10845_v42  ;;  %v2823_v48 = vshrl.u32 %v15965_v51, %v10845_v42  ;;  %v2826_v60 = vshrl.u32 %v15966_v34, %v10845_v42  ;;  %v2829_v18 = vshrl.u32 %v15852_v24, %v10845_v42 }
 0x36e   : > { %v2832_v33 = vshrl.u32 %v15840_v22, %v10845_v42  ;;  %vm2837_vm12 = vcmp.lt.s32.totalorder %v10871_v29, 4  ;;  %v8073_v15 = vmin.u32 %v2764_v57, %v10853_v46  ;;  %vm2836_vm0 = vcmp.lt.s32.totalorder %v10871_v29, 3 }
 0x36f   : > { %v10875_v61 = vor.u32 %v2820_v12, %v2819_v2  ;;  %v10877_v13 = vor.u32 %v2823_v48, %v2822_v55  ;;  %v2830_v21 = vor.u32 %v2829_v18, %v2828_v58  ;;  %v2827_v14 = vor.u32 %v2826_v60, %v2825_v49 }
 0x370   : > { %v2833_v12 = vor.u32 %v2832_v33, %v2831_v25  ;;  %v10890_v48 = vsub.s32 32, %v2920_v20  ;;  %v2566_v62 = vsub.s32 4294967266, %v10884_v9  ;;  %v10903_v60 = vshrl.u32 %v3013_v7, 23 }
 0x371   : > { %v2842_v54 = vsel %vm2834_vm15, %v10875_v61, %v10877_v13  ;;  %v2843_v19 = vsel %vm2837_vm12, %v2830_v21, 920167782  ;;  %v2546_v2 = vadd.s32 %v10721_v36, %v10719_v23  ;;  %vm2835_vm11 = vcmp.lt.s32.totalorder %v10871_v29, 2 }
 0x372   : > { %v2844_v31 = vsel %vm2836_vm0, %v2827_v14, %v2843_v19  ;;  %v2846_v55 = vsel %vm2834_vm15, %v10877_v13, %v2827_v14  ;;  %v10911_v58 = vshll.u32 %v2914_v47, 8  ;;  %v2562_v18 = vsub.s32 32, %v10884_v9 }
 0x373   : > { %v2655_v44 = vadd.s32 536870912, %v10886_v41  ;;  %v2845_v49 = vsel %vm2835_vm11, %v2842_v54, %v2844_v31  ;;  %v2847_v57 = vsel %vm2837_vm12, %v2833_v12, 1326507024  ;;  %v2766_v25 = vclz %v8073_v15 }
 0x374   : > { %v2848_v23 = vsel %vm2836_vm0, %v2830_v21, %v2847_v57  ;;  %v10921_v36 = vshll.u32 %v2810_v11, 8  ;;  %v2924_v47 = vshrl.u32 %v15851_v30, %v10890_v48  ;;  %v2567_v33 = vadd.s32 127, %v2566_v62  ;;  %v2449_v57 = vpop.f32.mrf.mxu1 }
 0x375   : > { %v2849_v7 = vsel %vm2835_vm11, %v2846_v55, %v2848_v23  ;;  %v10927_v19 = vshrl.u32 %v2918_v45, 5  ;;  %v2927_v54 = vshrl.u32 %v15965_v51, %v10890_v48  ;;  %v2923_v21 = vshll.u32 %v15841_v63, %v2920_v20 }
 0x376   : > { %v10932_v12 = vmul.u32.u64.low %v10921_v36, %v2845_v49  ;;  %v10933_v15 = vmul.u32.u64.high %v10921_v36, %v2845_v49, %v10932_v12  ;;  %v2930_v11 = vshrl.u32 %v15966_v34, %v10890_v48  ;;  %v10939_v31 = vshrl.u32 %v2655_v44, 30 }
 0x377   : > { %v10942_v62 = vmul.u32.u64.low %v10921_v36, %v2849_v7  ;;  %v10943_v55 = vmul.u32.u64.high %v10921_v36, %v2849_v7, %v10942_v62  ;;  %v2926_v45 = vshll.u32 %v15851_v30, %v2920_v20  ;;  %v8074_v23 = vadd.s32 4294967294, %v2766_v25 }
 0x378   : > { %15973 = vst [vmem:[#allocation23_spill] sm:$0xff] %v10939_v31  ;;  %v2925_v38 = vor.u32 %v2924_v47, %v2923_v21  ;;  %v2929_v49 = vshll.u32 %v15965_v51, %v2920_v20  ;;  %v2933_v17 = vshrl.u32 %v15852_v24, %v10890_v48  ;;  %v2932_v35 = vshll.u32 %v15966_v34, %v2920_v20 }
 0x379   : > { %v2928_v26 = vor.u32 %v2927_v54, %v2926_v45  ;;  %v2935_v44 = vshll.u32 %v15852_v24, %v2920_v20  ;;  %v2936_v4 = vshrl.u32 %v15840_v22, %v10890_v48  ;;  %v2564_v7 = vshrl.u32 %v2546_v2, %v2562_v18 }
 0x37a   : > { %v2839_v62 = vsel %vm2837_vm12, %v2827_v14, 2102212464  ;;  %v2931_v59 = vor.u32 %v2930_v11, %v2929_v49  ;;  %v10956_v25 = vadd.f32 %v2449_v57, %v10733_v40  ;;  %v2657_v47 = vshll.u32 %v10939_v31, 30 }
 0x37b   : > { %v2818_v54 = vshrl.u32 %v15841_v63, %v10845_v42  ;;  %v2934_v21 = vor.u32 %v2933_v17, %v2932_v35  ;;  %v2937_v45 = vor.u32 %v2936_v4, %v2935_v44  ;;  %v2568_v0 = vshll.u32 %v2567_v33, 23 }
 0x37c   : > { %15974 = vst [vmem:[#allocation26_spill] sm:$0xff] %v10956_v25  ;;  %vm8075_vm14 = vcmp.lt.s32.totalorder %v8074_v23, 0  ;;  %vm2938_vm2 = vcmp.lt.s32.totalorder %v10927_v19, 1  ;;  %vm2939_vm1 = vcmp.lt.s32.totalorder %v10927_v19, 2  ;;  %v2840_v14 = vsel %vm2836_vm0, %v10877_v13, %v2839_v62 }
 0x37d   : > { %v2838_v20 = vsel %vm2834_vm15, %v2818_v54, %v10875_v61  ;;  %vm2941_vm4 = vcmp.lt.s32.totalorder %v10927_v19, 4  ;;  %v2946_v35 = vsel %vm2938_vm2, %v2925_v38, %v2928_v26  ;;  %v2860_v4 = vadd.s32 1, %v10933_v15 }
 0x37e   : > { %vm2940_vm8 = vcmp.lt.s32.totalorder %v10927_v19, 3  ;;  %v2947_v17 = vsel %vm2941_vm4, %v2934_v21, 920167782  ;;  %v2950_v42 = vsel %vm2938_vm2, %v2928_v26, %v2931_v59  ;;  %v10977_v2 = vsub.s32 %v10886_v41, %v2657_v47 }
 0x37f   : > { %vm2859_vm5 = vc.u32 %v10943_v55, %v10932_v12  ;;  %v2948_v61 = vsel %vm2940_vm8, %v2931_v59, %v2947_v17  ;;  %v2951_v13 = vsel %vm2941_vm4, %v2937_v45, 1326507024  ;;  %v2769_v18 = vsel %vm8075_vm14, 0, %v8074_v23 }
 0x380   : > { %v2841_v33 = vsel %vm2835_vm11, %v2838_v20, %v2840_v14  ;;  %v2949_v11 = vsel %vm2939_vm1, %v2946_v35, %v2948_v61  ;;  %v2952_v57 = vsel %vm2940_vm8, %v2934_v21, %v2951_v13  ;;  %v2943_v49 = vsel %vm2941_vm4, %v2931_v59, 2102212464 }
 0x381   : > { %v2953_v41 = vsel %vm2939_vm1, %v2950_v42, %v2952_v57  ;;  %v10992_v44 = vmul.u32.u64.low %v10911_v58, %v2949_v11  ;;  %v10993_v62 = vmul.u32.u64.high %v10911_v58, %v2949_v11, %v10992_v44  ;;  %v2861_v23 = vsel %vm2859_vm5, %v2860_v4, %v10933_v15 }
 0x382   : > { %v2922_v29 = vshrl.u32 %v15841_v63, %v10890_v48  ;;  %v11000_v47 = vmul.u32.u64.low %v10911_v58, %v2953_v41  ;;  %v11001_v54 = vmul.u32.u64.high %v10911_v58, %v2953_v41, %v11000_v47  ;;  %v2563_v59 = vshll.u32 %v10787_v1, %v10884_v9 }
 0x383   : > { %v2569_v21 = vor.u32 4788187, %v2568_v0  ;;  %v2857_v45 = vmul.u32 %v10921_v36, %v2841_v33  ;;  %v3117_v20 = vand.u32 2139095040, %v10956_v25  ;;  %v2774_v14 = vsub.s32 4294967266, %v2769_v18 }
 0x384   : > { %v2660_v35 = vsub.s32 0, %v10977_v2  ;;  %v2942_v15 = vsel %vm2938_vm2, %v2922_v29, %v2925_v38  ;;  %v2944_v48 = vsel %vm2940_vm8, %v2928_v26, %v2943_v49  ;;  %v2565_v4 = vor.u32 %v2564_v7, %v2563_v59 }
 0x385   : > { %v2862_v17 = vadd.s32 %v2861_v23, %v2857_v45  ;;  %v2964_v42 = vadd.s32 1, %v10993_v62  ;;  %v3118_v61 = vshrl.u32 %v3117_v20, 23  ;;  %vm2963_vm6 = vc.u32 %v11001_v54, %v10992_v44 }
 0x386   : > { %v8084_v0 = vadd.s32 4294967169, %v10903_v60  ;;  %v2570_v1 = vand.u32 2147483647, %v2569_v21  ;;  %v2770_v9 = vsub.s32 32, %v2769_v18  ;;  %v2945_v36 = vsel %vm2939_vm1, %v2942_v15, %v2944_v48 }
 0x387   : > { %v8088_v13 = vadd.s32 4294967169, %v3118_v61  ;;  %v2754_v38 = vadd.s32 %v10773_v10, %v10768_v32  ;;  %v2775_v26 = vadd.s32 127, %v2774_v14  ;;  %v8069_v7 = vmin.u32 %v2660_v35, %v10977_v2 }
 0x388   : > { %v2572_v33 = vcvt.s32.f32 %v2565_v4  ;;  %v2863_v11 = vadd.s32 536870912, %v2862_v17  ;;  %v2965_v57 = vsel %vm2963_vm6, %v2964_v42, %v10993_v62  ;;  %v2961_v41 = vmul.u32 %v10911_v58, %v2945_v36 }
 0x389   : > { %v3124_v49 = vadd.s32 1, %v8088_v13  ;;  %v3020_v60 = vadd.s32 1, %v8084_v0  ;;  %v2772_v29 = vshrl.u32 %v2754_v38, %v2770_v9  ;;  %v2776_v19 = vshll.u32 %v2775_v26, 23 }
 0x38a   : > { %v2573_v23 = vmul.f32 %v2572_v33, %v2570_v1  ;;  %v2662_v47 = vclz %v8069_v7  ;;  %v2966_v59 = vadd.s32 %v2965_v57, %v2961_v41  ;;  %v11023_v45 = vshrl.u32 %v2863_v11, 30 }
 0x38b   : > { %vm3125_vm13 = vcmp.gt.s32.totalorder %v3124_v49, 0  ;;  %v15570_v32 = vand.u32 2147483647, %v10956_v25  ;;  %v2771_v20 = vshll.u32 %v10853_v46, %v2769_v18  ;;  %vm3021_vm3 = vcmp.gt.s32.totalorder %v3020_v60, 0 }
 0x38c   : > { %v3126_v21 = vsel %vm3125_vm13, %v3124_v49, 0  ;;  %15975 = vst [vmem:[#allocation13_spill] sm:$0xff] %v11023_v45  ;;  %vm15626_vm7 = vcmp.lt.s32.totalorder %v10684_v16, 0  ;;  %v2574_v62 = vxor.u32 2147483648, %v2573_v23  ;;  %v15569_v14 = vand.u32 2147483647, %v10851_v37 }
 0x38d   : > { %v3128_v10 = vand.u32 31, %v3126_v21  ;;  %v11029_v35 = vor.u32 %v2772_v29, %v2771_v20  ;;  %v11031_v15 = vor.u32 4788187, %v2776_v19  ;;  %v8070_v48 = vadd.s32 4294967294, %v2662_v47 }
 0x38e   : > { %v2967_v4 = vadd.s32 536870912, %v2966_v59  ;;  %v2865_v42 = vshll.u32 %v11023_v45, 30  ;;  %v3121_v61 = vand.u32 8388607, %v15570_v32  ;;  %v3022_v18 = vsel %vm3021_vm3, %v3020_v60, 0  ;;  %v2451_v32 = vpop.f32.mrf.mxu1 }
 0x38f   : > { %v3129_v58 = vsub.s32 32, %v3128_v10  ;;  %v3131_v46 = vshll.u32 %v15841_v63, %v3128_v10  ;;  %v3134_v1 = vshll.u32 %v15851_v30, %v3128_v10  ;;  %v3127_v13 = vshrl.u32 %v3126_v21, 5 }
 0x390   : > { %v3137_v38 = vshll.u32 %v15965_v51, %v3128_v10  ;;  %v3140_v26 = vshll.u32 %v15966_v34, %v3128_v10  ;;  %v11044_v33 = vshrl.u32 %v2967_v4, 30  ;;  %v3024_v49 = vand.u32 31, %v3022_v18 }
 0x391   : > { %v3132_v0 = vshrl.u32 %v15851_v30, %v3129_v58  ;;  %v3135_v9 = vshrl.u32 %v15965_v51, %v3129_v58  ;;  %v3138_v36 = vshrl.u32 %v15966_v34, %v3129_v58  ;;  %v3141_v7 = vshrl.u32 %v15852_v24, %v3129_v58 }
 0x392   : > { %15976 = vst [vmem:[#allocation14_spill] sm:$0xff] %v11044_v33  ;;  %v3143_v29 = vshll.u32 %v15852_v24, %v3128_v10  ;;  %v3144_v19 = vshrl.u32 %v15840_v22, %v3129_v58  ;;  %v11050_v47 = vsel %vm15626_vm7, %v2574_v62, %v2573_v23  ;;  %v2780_v21 = vcvt.s32.f32 %v11029_v35 }
 0x393   : > { %v3133_v11 = vor.u32 %v3132_v0, %v3131_v46  ;;  %v3136_v57 = vor.u32 %v3135_v9, %v3134_v1  ;;  %v3139_v41 = vor.u32 %v3138_v36, %v3137_v38  ;;  %v3142_v60 = vor.u32 %v3141_v7, %v3140_v26 }
 0x394   : > { %v11053_v20 = vsub.s32 %v2862_v17, %v2865_v42  ;;  %v11057_v4 = vand.u32 8388607, %v15569_v14  ;;  %vm8071_vm9 = vcmp.lt.s32.totalorder %v8070_v48, 0  ;;  %v3122_v46 = vor.u32 8388608, %v3121_v61 }
 0x395   : > { %v3145_v0 = vor.u32 %v3144_v19, %v3143_v29  ;;  %vm3146_vm15 = vcmp.lt.s32.totalorder %v3127_v13, 1  ;;  %v2778_v10 = vand.u32 2147483647, %v11031_v15  ;;  %v2969_v1 = vshll.u32 %v11044_v33, 30 }
 0x396   : > { %vm3149_vm12 = vcmp.lt.s32.totalorder %v3127_v13, 4  ;;  %v3154_v23 = vsel %vm3146_vm15, %v3133_v11, %v3136_v57  ;;  %vm3148_vm0 = vcmp.lt.s32.totalorder %v3127_v13, 3  ;;  %v3158_v17 = vsel %vm3146_vm15, %v3136_v57, %v3139_v41 }
 0x397   : > { %v3155_v62 = vsel %vm3149_vm12, %v3142_v60, 920167782  ;;  %v11063_v35 = vsub.s32 32, %v3024_v49  ;;  %v2868_v42 = vsub.s32 0, %v11053_v20  ;;  %vm3147_vm11 = vcmp.lt.s32.totalorder %v3127_v13, 2 }
 0x398   : > { %v3156_v61 = vsel %vm3148_vm0, %v3139_v41, %v3155_v62  ;;  %v3159_v9 = vsel %vm3149_vm12, %v3145_v0, 1326507024  ;;  %v3151_v36 = vsel %vm3149_vm12, %v3139_v41, 2102212464  ;;  %v3162_v26 = vshll.u32 %v3122_v46, 8 }
 0x399   : > { %v3157_v15 = vsel %vm3147_vm11, %v3154_v23, %v3156_v61  ;;  %v3160_v38 = vsel %vm3148_vm0, %v3142_v60, %v3159_v9  ;;  %v11070_v7 = vsel %vm8071_vm9, 0, %v8070_v48  ;;  %v11072_v29 = vsub.s32 %v2966_v59, %v2969_v1 }
 0x39a   : > { %v3130_v19 = vshrl.u32 %v15841_v63, %v3129_v58  ;;  %v3161_v14 = vsel %vm3147_vm11, %v3158_v17, %v3160_v38  ;;  %v3028_v41 = vshrl.u32 %v15851_v30, %v11063_v35  ;;  %v3031_v60 = vshrl.u32 %v15965_v51, %v11063_v35 }
 0x39b   : > { %v11076_v45 = vmul.u32.u64.low %v3162_v26, %v3161_v14  ;;  %v11077_v31 = vmul.u32.u64.high %v3162_v26, %v3161_v14, %v11076_v45  ;;  %v3152_v48 = vsel %vm3148_vm0, %v3136_v57, %v3151_v36  ;;  %v2670_v58 = vsub.s32 4294967266, %v11070_v7 }
 0x39c   : > { %v3150_v46 = vsel %vm3146_vm15, %v3130_v19, %v3133_v11  ;;  %v11085_v59 = vmul.u32.u64.low %v3162_v26, %v3157_v15  ;;  %v11086_v0 = vmul.u32.u64.high %v3162_v26, %v3157_v15, %v11085_v59  ;;  %v8077_v1 = vmin.u32 %v2868_v42, %v11053_v20 }
 0x39d   : > { %v11091_v14 = vshrl.u32 %v3022_v18, 5  ;;  %v11094_v45 = vadd.f32 %v2451_v32, %v10733_v40  ;;  %v2972_v23 = vsub.s32 0, %v11072_v29  ;;  %v3027_v62 = vshll.u32 %v15841_v63, %v3024_v49 }
 0x39e   : > { %v3030_v11 = vshll.u32 %v15851_v30, %v3024_v49  ;;  %v3034_v57 = vshrl.u32 %v15966_v34, %v11063_v35  ;;  %v15978_v17 = vand.u32 2147483647, %v10684_v16  ;;  %v15979_v61 = vmov 0 }
 0x39f   : > { %15977 = vst [vmem:[#allocation21_spill] sm:$0xff] %v11094_v45  ;;  %v3153_v18 = vsel %vm3147_vm11, %v3150_v46, %v3152_v48  ;;  %v3033_v40 = vshll.u32 %v15965_v51, %v3024_v49  ;;  %v3036_v32 = vshll.u32 %v15966_v34, %v3024_v49  ;;  %v3037_v42 = vshrl.u32 %v15852_v24, %v11063_v35 }
 0x3a0   : > { %vm11103_vm14 = vcmp.le.f32.partialorder %v15978_v17, 0.7853982  ;;  %vm3171_vm2 = vc.u32 %v11077_v31, %v11085_v59  ;;  %v3172_v9 = vadd.s32 1, %v11086_v0  ;;  %v11115_v36 = vor.u32 %v3028_v41, %v3027_v62 }
 0x3a1   : > { %v15980_v61 = vsel %vm11103_vm14, 4294967295, %v15979_v61  ;;  %v11117_v15 = vor.u32 %v3031_v60, %v3030_v11  ;;  %v3035_v38 = vor.u32 %v3034_v57, %v3033_v40  ;;  %v3038_v19 = vor.u32 %v3037_v42, %v3036_v32 }
 0x3a2   : > { %15981 = vst [vmem:[#allocation19_spill] sm:$0xff] %v15980_v61  ;;  %v3039_v13 = vshll.u32 %v15852_v24, %v3024_v49  ;;  %v3040_v46 = vshrl.u32 %v15840_v22, %v11063_v35  ;;  %v2781_v48 = vmul.f32 %v2780_v21, %v2778_v10  ;;  %v2870_v17 = vclz %v8077_v1 }
 0x3a3   : > { %v3018_v33 = vor.u32 8388608, %v11057_v4  ;;  %v3221_v3 = vand.u32 2139095040, %v11094_v45  ;;  %v3173_v50 = vsel %vm3171_vm2, %v3172_v9, %v11086_v0  ;;  %vm3042_vm1 = vcmp.lt.s32.totalorder %v11091_v14, 1  ;;  %v2342_v9 = vpop.f32.mrf.mxu0 }
 0x3a4   : > { %v3041_v27 = vor.u32 %v3040_v46, %v3039_v13  ;;  %vm3045_vm4 = vcmp.lt.s32.totalorder %v11091_v14, 4  ;;  %v3169_v41 = vmul.u32 %v3162_v26, %v3153_v18  ;;  %vm3044_vm8 = vcmp.lt.s32.totalorder %v11091_v14, 3 }
 0x3a5   : > { %v3050_v49 = vsel %vm3042_vm1, %v11115_v36, %v11117_v15  ;;  %v3051_v21 = vsel %vm3045_vm4, %v3038_v19, 920167782  ;;  %v8081_v4 = vmin.u32 %v2972_v23, %v11072_v29  ;;  %vm3043_vm5 = vcmp.lt.s32.totalorder %v11091_v14, 2 }
 0x3a6   : > { %v3052_v10 = vsel %vm3044_vm8, %v3035_v38, %v3051_v21  ;;  %v3054_v26 = vsel %vm3042_vm1, %v11117_v15, %v3035_v38  ;;  %v2650_v60 = vadd.s32 %v10825_v53, %v10832_v8  ;;  %v3174_v0 = vadd.s32 %v3173_v50, %v3169_v41 }
 0x3a7   : > { %v3053_v1 = vsel %vm3043_vm5, %v3050_v49, %v3052_v10  ;;  %v3055_v62 = vsel %vm3045_vm4, %v3041_v27, 1326507024  ;;  %v2666_v23 = vsub.s32 32, %v11070_v7  ;;  %v2671_v11 = vadd.s32 127, %v2670_v58 }
 0x3a8   : > { %v3056_v57 = vsel %vm3044_vm8, %v3038_v19, %v3055_v62  ;;  %v11150_v18 = vshll.u32 %v3018_v33, 8  ;;  %v2578_v53 = vsel %vm11103_vm14, %v10684_v16, %v11050_v47  ;;  %v2782_v50 = vxor.u32 2147483648, %v2781_v48 }
 0x3a9   : > { %v3057_v8 = vsel %vm3043_vm5, %v3054_v26, %v3056_v57  ;;  %v3222_v40 = vshrl.u32 %v3221_v3, 23  ;;  %v8078_v32 = vadd.s32 4294967294, %v2870_v17  ;;  %v2974_v27 = vclz %v8081_v4 }
 0x3aa   : > { %v11159_v42 = vmul.u32.u64.low %v11150_v18, %v3053_v1  ;;  %v11160_v58 = vmul.u32.u64.high %v11150_v18, %v3053_v1, %v11159_v42  ;;  %v3175_v33 = vadd.s32 536870912, %v3174_v0  ;;  %vm15621_vm6 = vcmp.lt.s32.totalorder %v10699_v28, 0 }
 0x3ab   : > { %v11164_v19 = vmul.u32.u64.low %v11150_v18, %v3057_v8  ;;  %v11165_v13 = vmul.u32.u64.high %v11150_v18, %v3057_v8, %v11164_v19  ;;  %v8092_v46 = vadd.s32 4294967169, %v3222_v40  ;;  %v2668_v47 = vshrl.u32 %v2650_v60, %v2666_v23 }
 0x3ac   : > { %v2672_v41 = vshll.u32 %v2671_v11, 23  ;;  %v15982_v3 = vand.u32 2147483647, %v10699_v28  ;;  %v15983_v17 = vmov 0  ;;  %v2783_v49 = vsel %vm15621_vm6, %v2782_v50, %v2781_v48 }
 0x3ad   : > { %v3228_v21 = vadd.s32 1, %v8092_v46  ;;  %v11177_v4 = vadd.f32 %v2342_v9, %v10679_v43  ;;  %8644 = vcosq.f32 %v2578_v53  ;;  %v2667_v10 = vshll.u32 %v10977_v2, %v11070_v7 }
 0x3ae   : > { %vm11170_vm13 = vcmp.le.f32.partialorder %v15982_v3, 0.7853982  ;;  %v3026_v26 = vshrl.u32 %v15841_v63, %v11063_v35  ;;  %v3047_v60 = vsel %vm3045_vm4, %v3035_v38, 2102212464  ;;  %vm8079_vm3 = vcmp.lt.s32.totalorder %v8078_v32, 0 }
 0x3af   : > { %v15984_v17 = vsel %vm11170_vm13, 4294967295, %v15983_v17  ;;  %15986 = vst [vmem:[#allocation28_spill] sm:$0xff] %v11177_v4  ;;  %v8082_v1 = vadd.s32 4294967294, %v2974_v27  ;;  %v11185_v62 = vshrl.u32 %v3175_v33, 30  ;;  %vm3229_vm9 = vcmp.gt.s32.totalorder %v3228_v21, 0 }
 0x3b0   : > { %15985 = vst [vmem:[#allocation29_spill] sm:$0xff] %v15984_v17  ;;  %v11190_v48 = vsel %vm11170_vm13, %v10699_v28, %v2783_v49  ;;  %v11192_v23 = vor.u32 %v2668_v47, %v2667_v10  ;;  %v11194_v11 = vor.u32 4788187, %v2672_v41  ;;  %v3230_v2 = vsel %vm3229_vm9, %v3228_v21, 0 }
 0x3b1   : > { %15987 = vst [vmem:[#allocation8_spill] sm:$0xff] %v11185_v62  ;;  %15988 = vst [vmem:[#allocation39_spill] sm:$0xff] %v11190_v48  ;;  %v3046_v35 = vsel %vm3042_vm1, %v3026_v26, %v11115_v36  ;;  %v3048_v7 = vsel %vm3044_vm8, %v11117_v15, %v3047_v60  ;;  %v3232_v38 = vand.u32 31, %v3230_v2  ;;  %v3325_v57 = vand.u32 2139095040, %v11177_v4 }
 0x3b2   : > { %8646 = vsinq.f32 %v2578_v53  ;;  %v11203_v50 = vsel %vm8079_vm3, 0, %v8078_v32  ;;  %v3068_v8 = vadd.s32 1, %v11160_v58  ;;  %vm8083_vm15 = vcmp.lt.s32.totalorder %v8082_v1, 0 }
 0x3b3   : > { %v3177_v40 = vshll.u32 %v11185_v62, 30  ;;  %vm3067_vm12 = vc.u32 %v11165_v13, %v11159_v42  ;;  %v11209_v27 = vsub.s32 32, %v3232_v38  ;;  %8648 = vcosq.f32 %v11190_v48 }
 0x3b4   : > { %v2858_v15 = vadd.s32 %v10932_v12, %v10943_v55  ;;  %v3049_v53 = vsel %vm3043_vm5, %v3046_v35, %v3048_v7  ;;  %v2878_v9 = vsub.s32 4294967266, %v11203_v50  ;;  %v15582_v33 = vand.u32 2147483647, %v11094_v45 }
 0x3b5   : > { %v3326_v19 = vshrl.u32 %v3325_v57, 23  ;;  %v11220_v46 = vsel %vm8083_vm15, 0, %v8082_v1  ;;  %v3069_v47 = vsel %vm3067_vm12, %v3068_v8, %v11160_v58  ;;  %v3245_v41 = vshrl.u32 %v15852_v24, %v11209_v27 }
 0x3b6   : > { %v3248_v12 = vshrl.u32 %v15840_v22, %v11209_v27  ;;  %v11227_v55 = vsub.s32 %v3174_v0, %v3177_v40  ;;  %v3065_v14 = vmul.u32 %v11150_v18, %v3049_v53  ;;  %v11230_v3 = vshrl.u32 %v3230_v2, 5 }
 0x3b7   : > { %v3244_v49 = vshll.u32 %v15966_v34, %v3232_v38  ;;  %v3236_v21 = vshrl.u32 %v15851_v30, %v11209_v27  ;;  %v3239_v58 = vshrl.u32 %v15965_v51, %v11209_v27  ;;  %v3242_v10 = vshrl.u32 %v15966_v34, %v11209_v27 }
 0x3b8   : > { %v3247_v26 = vshll.u32 %v15852_v24, %v3232_v38  ;;  %v2982_v0 = vsub.s32 4294967266, %v11220_v46  ;;  %v11241_v60 = vadd.s32 %v3069_v47, %v3065_v14  ;;  %v8096_v1 = vadd.s32 4294967169, %v3326_v19 }
 0x3b9   : > { %v3246_v18 = vor.u32 %v3245_v41, %v3244_v49  ;;  %v3235_v2 = vshll.u32 %v15841_v63, %v3232_v38  ;;  %v3238_v35 = vshll.u32 %v15851_v30, %v3232_v38  ;;  %v3241_v7 = vshll.u32 %v15965_v51, %v3232_v38 }
 0x3ba   : > { %v3249_v57 = vor.u32 %v3248_v12, %v3247_v26  ;;  %v11246_v8 = vpop.eup %8644  ;;  %v2874_v40 = vsub.s32 32, %v11203_v50  ;;  %v2962_v53 = vadd.s32 %v10992_v44, %v11001_v54  ;;  %v3180_v36 = vsub.s32 0, %v11227_v55 }
 0x3bb   : > { %15989 = vst [vmem:[#allocation38_spill] sm:$0xff] %v11246_v8  ;;  %v3225_v47 = vand.u32 8388607, %v15582_v33  ;;  %v3237_v19 = vor.u32 %v3236_v21, %v3235_v2  ;;  %v3240_v41 = vor.u32 %v3239_v58, %v3238_v35  ;;  %v3243_v14 = vor.u32 %v3242_v10, %v3241_v7 }
 0x3bc   : > { %vm3253_vm0 = vcmp.lt.s32.totalorder %v11230_v3, 4  ;;  %v2978_v38 = vsub.s32 32, %v11220_v46  ;;  %v3071_v12 = vadd.s32 536870912, %v11241_v60  ;;  %v3332_v26 = vadd.s32 1, %v8096_v1 }
 0x3bd   : > { %v3259_v49 = vsel %vm3253_vm0, %v3246_v18, 920167782  ;;  %v11261_v54 = vadd.s32 127, %v2878_v9  ;;  %v2983_v32 = vadd.s32 127, %v2982_v0  ;;  %v3263_v21 = vsel %vm3253_vm0, %v3249_v57, 1326507024 }
 0x3be   : > { %v3226_v10 = vor.u32 8388608, %v3225_v47  ;;  %vm3250_vm11 = vcmp.lt.s32.totalorder %v11230_v3, 1  ;;  %vm3252_vm2 = vcmp.lt.s32.totalorder %v11230_v3, 3  ;;  %vm3333_vm1 = vcmp.gt.s32.totalorder %v3332_v26, 0 }
 0x3bf   : > { %v11265_v58 = vpop.eup %8646  ;;  %v8089_v2 = vmin.u32 %v3180_v36, %v11227_v55  ;;  %v3258_v1 = vsel %vm3250_vm11, %v3237_v19, %v3240_v41  ;;  %v3260_v9 = vsel %vm3252_vm2, %v3243_v14, %v3259_v49  ;;  %v2980_v7 = vshrl.u32 %v2962_v53, %v2978_v38  ;;  %v2455_v36 = vpop.f32.mrf.mxu1 }
 0x3c0   : > { %15990 = vst [vmem:[#allocation16_spill] sm:$0xff] %v11265_v58  ;;  %v11275_v35 = vpop.eup %8648  ;;  %v11277_v57 = vshrl.u32 %v3071_v12, 30  ;;  %v3262_v47 = vsel %vm3250_vm11, %v3240_v41, %v3243_v14  ;;  %v3264_v33 = vsel %vm3252_vm2, %v3246_v18, %v3263_v21  ;;  %v11283_v44 = vshrl.u32 %v2858_v15, %v2874_v40 }
 0x3c1   : > { %15991 = vst [vmem:[#allocation15_spill] sm:$0xff] %v11275_v35  ;;  %v2984_v8 = vshll.u32 %v2983_v32, 23  ;;  %vm3251_vm4 = vcmp.lt.s32.totalorder %v11230_v3, 2  ;;  %v3334_v49 = vsel %vm3333_vm1, %v3332_v26, 0  ;;  %v2979_v0 = vshll.u32 %v11072_v29, %v11220_v46 }
 0x3c2   : > { %15992 = vst [vmem:[#allocation6_spill] sm:$0xff] %v11277_v57  ;;  %v3261_v53 = vsel %vm3251_vm4, %v3258_v1, %v3260_v9  ;;  %v11290_v38 = vshll.u32 %v3226_v10, 8  ;;  %v3336_v12 = vand.u32 31, %v3334_v49  ;;  %v3182_v35 = vclz %v8089_v2 }
 0x3c3   : > { %v3265_v18 = vsel %vm3251_vm4, %v3262_v47, %v3264_v33  ;;  %v15993_v15 = vand.u32 2147483647, %v11177_v4  ;;  %v11297_v32 = vadd.f32 %v2455_v36, %v10679_v43  ;;  %v11300_v21 = vor.u32 %v2980_v7, %v2979_v0 }
 0x3c4   : > { %v3073_v29 = vshll.u32 %v11277_v57, 30  ;;  %v3337_v46 = vsub.s32 32, %v3336_v12  ;;  %v11303_v10 = vor.u32 4788187, %v2984_v8  ;;  %v3234_v2 = vshrl.u32 %v15841_v63, %v11209_v27  ;;  %v2344_v57 = vpop.f32.mrf.mxu0 }
 0x3c5   : > { %v3329_v40 = vand.u32 8388607, %v15993_v15  ;;  %15994 = vst [vmem:[#allocation36_spill] sm:$0xff] %v11297_v32  ;;  %v11308_v33 = vmul.u32.u64.low %v11290_v38, %v3261_v53  ;;  %v11309_v1 = vmul.u32.u64.high %v11290_v38, %v3261_v53, %v11308_v33  ;;  %v3255_v9 = vsel %vm3253_vm0, %v3243_v14, 2102212464 }
 0x3c6   : > { %v11315_v47 = vmul.u32.u64.low %v11290_v38, %v3265_v18  ;;  %v11316_v0 = vmul.u32.u64.high %v11290_v38, %v3265_v18, %v11315_v47  ;;  %v3340_v7 = vshrl.u32 %v15851_v30, %v3337_v46  ;;  %v8090_v36 = vadd.s32 4294967294, %v3182_v35 }
 0x3c7   : > { %v3330_v8 = vor.u32 8388608, %v3329_v40  ;;  %v3339_v15 = vshll.u32 %v15841_v63, %v3336_v12  ;;  %v11322_v26 = vsub.s32 %v11241_v60, %v3073_v29  ;;  %v3254_v53 = vsel %vm3250_vm11, %v3234_v2, %v3237_v19 }
 0x3c8   : > { %v3342_v14 = vshll.u32 %v15851_v30, %v3336_v12  ;;  %v3343_v58 = vshrl.u32 %v15965_v51, %v3337_v46  ;;  %v3256_v18 = vsel %vm3252_vm2, %v3240_v41, %v3255_v9  ;;  %v3335_v47 = vshrl.u32 %v3334_v49, 5 }
 0x3c9   : > { %v3341_v35 = vor.u32 %v3340_v7, %v3339_v15  ;;  %v3345_v40 = vshll.u32 %v15965_v51, %v3336_v12  ;;  %v3346_v27 = vshrl.u32 %v15966_v34, %v3337_v46  ;;  %v3348_v60 = vshll.u32 %v15966_v34, %v3336_v12 }
 0x3ca   : > { %v3344_v17 = vor.u32 %v3343_v58, %v3342_v14  ;;  %v3349_v29 = vshrl.u32 %v15852_v24, %v3337_v46  ;;  %vm8091_vm8 = vcmp.lt.s32.totalorder %v8090_v36, 0  ;;  %v3351_v19 = vshll.u32 %v15852_v24, %v3336_v12 }
 0x3cb   : > { %v3352_v2 = vshrl.u32 %v15840_v22, %v3337_v46  ;;  %v3370_v28 = vshll.u32 %v3330_v8, 8  ;;  %v3076_v61 = vsub.s32 0, %v11322_v26  ;;  %v3347_v41 = vor.u32 %v3346_v27, %v3345_v40 }
 0x3cc   : > { %v3350_v49 = vor.u32 %v3349_v29, %v3348_v60  ;;  %v3533_v9 = vand.u32 2139095040, %v11297_v32  ;;  %v3257_v58 = vsel %vm3251_vm4, %v3254_v53, %v3256_v18  ;;  %v3276_v7 = vadd.s32 1, %v11309_v1 }
 0x3cd   : > { %v3353_v15 = vor.u32 %v3352_v2, %v3351_v19  ;;  %vm3354_vm5 = vcmp.lt.s32.totalorder %v3335_v47, 1  ;;  %vm3275_vm3 = vc.u32 %v11316_v0, %v11308_v33  ;;  %v3338_v12 = vshrl.u32 %v15841_v63, %v3337_v46 }
 0x3ce   : > { %vm3357_vm9 = vcmp.lt.s32.totalorder %v3335_v47, 4  ;;  %v3362_v8 = vsel %vm3354_vm5, %v3341_v35, %v3344_v17  ;;  %vm3355_vm15 = vcmp.lt.s32.totalorder %v3335_v47, 2  ;;  %vm3356_vm12 = vcmp.lt.s32.totalorder %v3335_v47, 3 }
 0x3cf   : > { %v3359_v27 = vsel %vm3357_vm9, %v3347_v41, 2102212464  ;;  %v3363_v14 = vsel %vm3357_vm9, %v3350_v49, 920167782  ;;  %v3366_v60 = vsel %vm3354_vm5, %v3344_v17, %v3347_v41  ;;  %v3367_v29 = vsel %vm3357_vm9, %v3353_v15, 1326507024 }
 0x3d0   : > { %v3364_v40 = vsel %vm3356_vm12, %v3347_v41, %v3363_v14  ;;  %v3534_v3 = vshrl.u32 %v3533_v9, 23  ;;  %v3273_v53 = vmul.u32 %v11290_v38, %v3257_v58  ;;  %v3277_v18 = vsel %vm3275_vm3, %v3276_v7, %v11309_v1 }
 0x3d1   : > { %v3358_v19 = vsel %vm3354_vm5, %v3338_v12, %v3341_v35  ;;  %v3365_v2 = vsel %vm3355_vm15, %v3362_v8, %v3364_v40  ;;  %v3360_v16 = vsel %vm3356_vm12, %v3344_v17, %v3359_v27  ;;  %v3368_v62 = vsel %vm3356_vm12, %v3350_v49, %v3367_v29 }
 0x3d2   : > { %v11347_v46 = vmul.u32.u64.low %v3370_v28, %v3365_v2  ;;  %v11348_v48 = vmul.u32.u64.high %v3370_v28, %v3365_v2, %v11347_v46  ;;  %v3185_v52 = vsel %vm8091_vm8, 0, %v8090_v36  ;;  %v8085_v41 = vmin.u32 %v3076_v61, %v11322_v26 }
 0x3d3   : > { %v3369_v9 = vsel %vm3355_vm15, %v3366_v60, %v3368_v62  ;;  %v8104_v15 = vadd.s32 4294967169, %v3534_v3  ;;  %v15995_v38 = vshll.u32 %v11053_v20, %v11203_v50  ;;  %v11360_v17 = vadd.s32 %v3277_v18, %v3273_v53 }
 0x3d4   : > { %v11362_v35 = vmul.u32.u64.low %v3370_v28, %v3369_v9  ;;  %v11363_v49 = vmul.u32.u64.high %v3370_v28, %v3369_v9, %v11362_v35  ;;  %v15996_v58 = vshll.u32 %v11261_v54, 23  ;;  %v3361_v61 = vsel %vm3355_vm15, %v3358_v19, %v3360_v16 }
 0x3d5   : > { %v11358_v1 = vor.u32 %v11283_v44, %v15995_v38  ;;  %v3540_v36 = vadd.s32 1, %v8104_v15  ;;  %v11371_v62 = vadd.f32 %v2344_v57, %v10679_v43  ;;  %v2986_v20 = vand.u32 2147483647, %v11303_v10 }
 0x3d6   : > { %v11367_v7 = vor.u32 4788187, %v15996_v58  ;;  %v2988_v50 = vcvt.s32.f32 %v11300_v21  ;;  %v3186_v44 = vsub.s32 32, %v3185_v52  ;;  %v3380_v12 = vadd.s32 1, %v11348_v48 }
 0x3d7   : > { %15997 = vst [vmem:[#allocation34_spill] sm:$0xff] %v11371_v62  ;;  %v3190_v8 = vsub.s32 4294967266, %v3185_v52  ;;  %v3078_v27 = vclz %v8085_v41  ;;  %v15998_v14 = vand.u32 2147483647, %v11297_v32  ;;  %vm3541_vm0 = vcmp.gt.s32.totalorder %v3540_v36, 0 }
 0x3d8   : > { %v3279_v47 = vadd.s32 536870912, %v11360_v17  ;;  %v3377_v16 = vmul.u32 %v3370_v28, %v3361_v61  ;;  %vm3379_vm11 = vc.u32 %v11363_v49, %v11347_v46  ;;  %v3542_v57 = vsel %vm3541_vm0, %v3540_v36, 0 }
 0x3d9   : > { %v3537_v54 = vand.u32 8388607, %v15998_v14  ;;  %v3170_v10 = vadd.s32 %v11085_v59, %v11077_v31  ;;  %v3381_v21 = vsel %vm3379_vm11, %v3380_v12, %v11348_v48  ;;  %v3544_v40 = vand.u32 31, %v3542_v57 }
 0x3da   : > { %v3429_v60 = vand.u32 2139095040, %v11371_v62  ;;  %v2882_v29 = vand.u32 2147483647, %v11367_v7  ;;  %v2884_v3 = vcvt.s32.f32 %v11358_v1  ;;  %v11387_v53 = vmul.f32 %v2988_v50, %v2986_v20 }
 0x3db   : > { %v3382_v18 = vadd.s32 %v3381_v21, %v3377_v16  ;;  %v3187_v28 = vshll.u32 %v11227_v55, %v3185_v52  ;;  %v3188_v19 = vshrl.u32 %v3170_v10, %v3186_v44  ;;  %v3191_v2 = vadd.s32 127, %v3190_v8 }
 0x3dc   : > { %v3545_v41 = vsub.s32 32, %v3544_v40  ;;  %v8086_v9 = vadd.s32 4294967294, %v3078_v27  ;;  %v11390_v15 = vshrl.u32 %v3279_v47, 30  ;;  %v3538_v59 = vor.u32 8388608, %v3537_v54 }
 0x3dd   : > { %v3383_v31 = vadd.s32 536870912, %v3382_v18  ;;  %v3547_v48 = vshll.u32 %v15841_v63, %v3544_v40  ;;  %v3550_v35 = vshll.u32 %v15851_v30, %v3544_v40  ;;  %v3430_v58 = vshrl.u32 %v3429_v60, 23 }
 0x3de   : > { %15999 = vst [vmem:[#allocation31_spill] sm:$0xff] %v11390_v15  ;;  %v3548_v38 = vshrl.u32 %v15851_v30, %v3545_v41  ;;  %v3551_v36 = vshrl.u32 %v15965_v51, %v3545_v41  ;;  %v3553_v52 = vshll.u32 %v15965_v51, %v3544_v40  ;;  %v3554_v55 = vshrl.u32 %v15966_v34, %v3545_v41 }
 0x3df   : > { %v11395_v61 = vshrl.u32 %v3383_v31, 30  ;;  %v11400_v20 = vor.u32 %v3188_v19, %v3187_v28  ;;  %v3543_v50 = vshrl.u32 %v3542_v57, 5  ;;  %v3556_v44 = vshll.u32 %v15966_v34, %v3544_v40 }
 0x3e0   : > { %v3557_v12 = vshrl.u32 %v15852_v24, %v3545_v41  ;;  %v3192_v8 = vshll.u32 %v3191_v2, 23  ;;  %v3549_v27 = vor.u32 %v3548_v38, %v3547_v48  ;;  %v3552_v14 = vor.u32 %v3551_v36, %v3550_v35 }
 0x3e1   : > { %16000 = vst [vmem:[#allocation30_spill] sm:$0xff] %v11395_v61  ;;  %v3555_v54 = vor.u32 %v3554_v55, %v3553_v52  ;;  %v3385_v47 = vshll.u32 %v11395_v61, 30  ;;  %v3559_v10 = vshll.u32 %v15852_v24, %v3544_v40  ;;  %v3560_v21 = vshrl.u32 %v15840_v22, %v3545_v41 }
 0x3e2   : > { %v3558_v16 = vor.u32 %v3557_v12, %v3556_v44  ;;  %vm8087_vm2 = vcmp.lt.s32.totalorder %v8086_v9, 0  ;;  %v3281_v60 = vshll.u32 %v11390_v15, 30  ;;  %v3578_v28 = vshll.u32 %v3538_v59, 8 }
 0x3e3   : > { %v8100_v57 = vadd.s32 4294967169, %v3430_v58  ;;  %v3546_v19 = vshrl.u32 %v15841_v63, %v3545_v41  ;;  %v3561_v31 = vor.u32 %v3560_v21, %v3559_v10  ;;  %vm3562_vm1 = vcmp.lt.s32.totalorder %v3543_v50, 1  ;;  %v2457_v21 = vpop.f32.mrf.mxu1 }
 0x3e4   : > { %vm3565_vm4 = vcmp.lt.s32.totalorder %v3543_v50, 4  ;;  %vm3564_vm8 = vcmp.lt.s32.totalorder %v3543_v50, 3  ;;  %v3570_v48 = vsel %vm3562_vm1, %v3549_v27, %v3552_v14  ;;  %v11409_v35 = vsub.s32 %v3382_v18, %v3385_v47 }
 0x3e5   : > { %v3567_v2 = vsel %vm3565_vm4, %v3555_v54, 2102212464  ;;  %v3571_v38 = vsel %vm3565_vm4, %v3558_v16, 920167782  ;;  %vm3563_vm5 = vcmp.lt.s32.totalorder %v3543_v50, 2  ;;  %v3574_v36 = vsel %vm3562_vm1, %v3552_v14, %v3555_v54 }
 0x3e6   : > { %v3572_v40 = vsel %vm3564_vm8, %v3555_v54, %v3571_v38  ;;  %v3566_v52 = vsel %vm3562_vm1, %v3546_v19, %v3549_v27  ;;  %v3575_v44 = vsel %vm3565_vm4, %v3561_v31, 1326507024  ;;  %v15598_v59 = vand.u32 2147483647, %v11371_v62 }
 0x3e7   : > { %v3573_v55 = vsel %vm3563_vm5, %v3570_v48, %v3572_v40  ;;  %vm15628_vm3 = vcmp.lt.s32.totalorder %v10739_v6, 0  ;;  %v3568_v41 = vsel %vm3564_vm8, %v3552_v14, %v3567_v2  ;;  %v3576_v58 = vsel %vm3564_vm8, %v3558_v16, %v3575_v44 }
 0x3e8   : > { %v11414_v12 = vmul.u32.u64.low %v3578_v28, %v3573_v55  ;;  %v11415_v10 = vmul.u32.u64.high %v3578_v28, %v3573_v55, %v11414_v12  ;;  %v3193_v18 = vor.u32 4788187, %v3192_v8  ;;  %v11419_v47 = vsel %vm8087_vm2, 0, %v8086_v9 }
 0x3e9   : > { %v11422_v27 = vsub.s32 %v11360_v17, %v3281_v60  ;;  %v3577_v54 = vsel %vm3563_vm5, %v3574_v36, %v3576_v58  ;;  %v3388_v19 = vsub.s32 0, %v11409_v35  ;;  %v3436_v14 = vadd.s32 1, %v8100_v57 }
 0x3ea   : > { %v11426_v31 = vmul.u32.u64.low %v3578_v28, %v3577_v54  ;;  %v11427_v48 = vmul.u32.u64.high %v3578_v28, %v3577_v54, %v11426_v31  ;;  %v16001_v16 = vand.u32 2147483647, %v11194_v11  ;;  %v16002_v2 = vcvt.s32.f32 %v11192_v23 }
 0x3eb   : > { %v3569_v9 = vsel %vm3563_vm5, %v3566_v52, %v3568_v41  ;;  %v3433_v17 = vand.u32 8388607, %v15598_v59  ;;  %v11439_v8 = vadd.f32 %v2457_v21, %v10679_v43  ;;  %v11445_v60 = vmul.f32 %v2884_v3, %v2882_v29 }
 0x3ec   : > { %v11433_v38 = vmul.f32 %v16002_v2, %v16001_v16  ;;  %v2990_v11 = vxor.u32 2147483648, %v11387_v53  ;;  %v3588_v23 = vadd.s32 1, %v11415_v10  ;;  %vm3437_vm9 = vcmp.gt.s32.totalorder %v3436_v14, 0 }
 0x3ed   : > { %16004 = vst [vmem:[#allocation22_spill] sm:$0xff] %v11439_v8  ;;  %16005 = vst [vmem:[#allocation18_spill] sm:$0xff] %v11445_v60  ;;  %v3194_v57 = vand.u32 2147483647, %v3193_v18  ;;  %v3196_v50 = vcvt.s32.f32 %v11400_v20  ;;  %v3086_v40 = vsub.s32 4294967266, %v11419_v47  ;;  %v3438_v36 = vsel %vm3437_vm9, %v3436_v14, 0 }
 0x3ee   : > { %16003 = vst [vmem:[#allocation24_spill] sm:$0xff] %v11433_v38  ;;  %v3284_v43 = vsub.s32 0, %v11422_v27  ;;  %v8097_v52 = vmin.u32 %v3388_v19, %v11409_v35  ;;  %v3585_v7 = vmul.u32 %v3578_v28, %v3569_v9  ;;  %vm3587_vm15 = vc.u32 %v11427_v48, %v11414_v12 }
 0x3ef   : > { %v3589_v1 = vsel %vm3587_vm15, %v3588_v23, %v11415_v10  ;;  %v3434_v29 = vor.u32 8388608, %v3433_v17  ;;  %v11456_v3 = vshrl.u32 %v3438_v36, 5  ;;  %v3637_v55 = vand.u32 2139095040, %v11439_v8 }
 0x3f0   : > { %v3590_v41 = vadd.s32 %v3589_v1, %v3585_v7  ;;  %v3440_v58 = vand.u32 31, %v3438_v36  ;;  %v2991_v28 = vsel %vm15628_vm3, %v2990_v11, %v11387_v53  ;;  %v11464_v21 = vmul.f32 %v3196_v50, %v3194_v57 }
 0x3f1   : > { %v3082_v18 = vsub.s32 32, %v11419_v47  ;;  %v11467_v10 = vadd.s32 127, %v3086_v40  ;;  %v11470_v54 = vmin.u32 %v3284_v43, %v11422_v27  ;;  %v3390_v19 = vclz %v8097_v52 }
 0x3f2   : > { %v3591_v31 = vadd.s32 536870912, %v3590_v41  ;;  %v3441_v14 = vsub.s32 32, %v3440_v58  ;;  %v3443_v16 = vshll.u32 %v15841_v63, %v3440_v58  ;;  %vm3458_vm12 = vcmp.lt.s32.totalorder %v11456_v3, 1 }
 0x3f3   : > { %v11474_v2 = vshll.u32 %v3434_v29, 8  ;;  %v3638_v9 = vshrl.u32 %v3637_v55, 23  ;;  %v3446_v11 = vshll.u32 %v15851_v30, %v3440_v58  ;;  %v16007_v57 = vand.u32 2147483647, %v10739_v6 }
 0x3f4   : > { %v11476_v53 = vshrl.u32 %v3591_v31, 30  ;;  %v3444_v17 = vshrl.u32 %v15851_v30, %v3441_v14  ;;  %v3447_v23 = vshrl.u32 %v15965_v51, %v3441_v14  ;;  %v16008_v50 = vmov 0 }
 0x3f5   : > { %vm11483_vm0 = vcmp.le.f32.partialorder %v16007_v57, 0.7853982  ;;  %v3449_v40 = vshll.u32 %v15965_v51, %v3440_v58  ;;  %v3450_v36 = vshrl.u32 %v15966_v34, %v3441_v14  ;;  %v3452_v43 = vshll.u32 %v15966_v34, %v3440_v58 }
 0x3f6   : > { %16006 = vst [vmem:[#allocation11_spill] sm:$0xff] %v11476_v53  ;;  %v16009_v50 = vsel %vm11483_vm0, 4294967295, %v16008_v50  ;;  %v3453_v52 = vshrl.u32 %v15852_v24, %v3441_v14  ;;  %v3593_v7 = vshll.u32 %v11476_v53, 30  ;;  %v3445_v1 = vor.u32 %v3444_v17, %v3443_v16 }
 0x3f7   : > { %16010 = vst [vmem:[#allocation9_spill] sm:$0xff] %v16009_v50  ;;  %v3448_v29 = vor.u32 %v3447_v23, %v3446_v11  ;;  %vm3460_vm11 = vcmp.lt.s32.totalorder %v11456_v3, 3  ;;  %v3451_v55 = vor.u32 %v3450_v36, %v3449_v40  ;;  %v3455_v57 = vshll.u32 %v15852_v24, %v3440_v58 }
 0x3f8   : > { %v3454_v31 = vor.u32 %v3453_v52, %v3452_v43  ;;  %v3456_v44 = vshrl.u32 %v15840_v22, %v3441_v14  ;;  %v11495_v20 = vsub.s32 %v3590_v41, %v3593_v7  ;;  %v3442_v59 = vshrl.u32 %v15841_v63, %v3441_v14 }
 0x3f9   : > { %vm3461_vm2 = vcmp.lt.s32.totalorder %v11456_v3, 4  ;;  %v3466_v60 = vsel %vm3458_vm12, %v3445_v1, %v3448_v29  ;;  %v8108_v11 = vadd.s32 4294967169, %v3638_v9  ;;  %vm3459_vm1 = vcmp.lt.s32.totalorder %v11456_v3, 2 }
 0x3fa   : > { %v3457_v38 = vor.u32 %v3456_v44, %v3455_v57  ;;  %v3463_v16 = vsel %vm3461_vm2, %v3451_v55, 2102212464  ;;  %v3467_v17 = vsel %vm3461_vm2, %v3454_v31, 920167782  ;;  %v3596_v23 = vsub.s32 0, %v11495_v20 }
 0x3fb   : > { %v3468_v58 = vsel %vm3460_vm11, %v3451_v55, %v3467_v17  ;;  %v3470_v41 = vsel %vm3458_vm12, %v3448_v29, %v3451_v55  ;;  %vm15627_vm4 = vcmp.lt.s32.totalorder %v10956_v25, 0  ;;  %v8098_v14 = vadd.s32 4294967294, %v3390_v19 }
 0x3fc   : > { %v3462_v40 = vsel %vm3458_vm12, %v3442_v59, %v3445_v1  ;;  %v3469_v44 = vsel %vm3459_vm1, %v3466_v60, %v3468_v58  ;;  %v3471_v9 = vsel %vm3461_vm2, %v3457_v38, 1326507024  ;;  %v3464_v36 = vsel %vm3460_vm11, %v3448_v29, %v3463_v16 }
 0x3fd   : > { %v3472_v43 = vsel %vm3460_vm11, %v3454_v31, %v3471_v9  ;;  %v11517_v52 = vmul.u32.u64.low %v11474_v2, %v3469_v44  ;;  %v11518_v7 = vmul.u32.u64.high %v11474_v2, %v3469_v44, %v11517_v52  ;;  %v3066_v19 = vadd.s32 %v11159_v42, %v11165_v13 }
 0x3fe   : > { %v3286_v59 = vclz %v11470_v54  ;;  %v3473_v60 = vsel %vm3459_vm1, %v3470_v41, %v3472_v43  ;;  %v3644_v38 = vadd.s32 1, %v8108_v11  ;;  %v11529_v1 = vsel %vm11483_vm0, %v10739_v6, %v2991_v28 }
 0x3ff   : > { %v8105_v29 = vmin.u32 %v3596_v23, %v11495_v20  ;;  %v11533_v55 = vmul.u32.u64.low %v11474_v2, %v3473_v60  ;;  %v11534_v31 = vmul.u32.u64.high %v11474_v2, %v3473_v60, %v11533_v55  ;;  %v3198_v57 = vxor.u32 2147483648, %v11464_v21 }
 0x400   : > { %v3084_v42 = vshrl.u32 %v3066_v19, %v3082_v18  ;;  %v3465_v13 = vsel %vm3459_vm1, %v3462_v40, %v3464_v36  ;;  %vm3645_vm8 = vcmp.gt.s32.totalorder %v3644_v38, 0  ;;  %v3088_v54 = vshll.u32 %v11467_v10, 23  ;;  %v2348_v10 = vpop.f32.mrf.mxu0 }
 0x401   : > { %vm8099_vm5 = vcmp.lt.s32.totalorder %v8098_v14, 0  ;;  %v3484_v16 = vadd.s32 1, %v11518_v7  ;;  %v3646_v28 = vsel %vm3645_vm8, %v3644_v38, 0  ;;  %8650 = vcosq.f32 %v11529_v1 }
 0x402   : > { %v3083_v17 = vshll.u32 %v11322_v26, %v11419_v47  ;;  %v8094_v11 = vadd.s32 4294967294, %v3286_v59  ;;  %v3648_v23 = vand.u32 31, %v3646_v28  ;;  %v3598_v58 = vclz %v8105_v29 }
 0x403   : > { %v3481_v18 = vmul.u32 %v11474_v2, %v3465_v13  ;;  %vm3483_vm9 = vc.u32 %v11534_v31, %v11517_v52  ;;  %v15603_v3 = vand.u32 2147483647, %v11439_v8  ;;  %v11550_v41 = vadd.s32 %v11308_v33, %v11316_v0 }
 0x404   : > { %v11552_v40 = vsel %vm8099_vm5, 0, %v8098_v14  ;;  %v3485_v44 = vsel %vm3483_vm9, %v3484_v16, %v11518_v7  ;;  %v11555_v26 = vsub.s32 32, %v3648_v23  ;;  %v11560_v47 = vsel %vm15627_vm4, %v3198_v57, %v11464_v21 }
 0x405   : > { %v11562_v2 = vor.u32 %v3084_v42, %v3083_v17  ;;  %v11564_v9 = vor.u32 4788187, %v3088_v54  ;;  %v11566_v36 = vadd.s32 %v3485_v44, %v3481_v18  ;;  %v3378_v33 = vadd.s32 %v11347_v46, %v11363_v49 }
 0x406   : > { %v3652_v0 = vshrl.u32 %v15851_v30, %v11555_v26  ;;  %v3655_v14 = vshrl.u32 %v15965_v51, %v11555_v26  ;;  %v11575_v43 = vadd.f32 %v2348_v10, %v10716_v56  ;;  %vm8095_vm15 = vcmp.lt.s32.totalorder %v8094_v11, 0 }
 0x407   : > { %v3398_v21 = vsub.s32 4294967266, %v11552_v40  ;;  %v8106_v7 = vadd.s32 4294967294, %v3598_v58  ;;  %v3641_v19 = vand.u32 8388607, %v15603_v3  ;;  %v11580_v59 = vshrl.u32 %v3646_v28, 5 }
 0x408   : > { %16011 = vst [vmem:[#allocation7_spill] sm:$0xff] %v11575_v43  ;;  %v3651_v46 = vshll.u32 %v15841_v63, %v3648_v23  ;;  %v3654_v49 = vshll.u32 %v15851_v30, %v3648_v23  ;;  %v3658_v60 = vshrl.u32 %v15966_v34, %v11555_v26  ;;  %v3487_v38 = vadd.s32 536870912, %v11566_v36 }
 0x409   : > { %v3657_v29 = vshll.u32 %v15965_v51, %v3648_v23  ;;  %v3660_v55 = vshll.u32 %v15966_v34, %v3648_v23  ;;  %v3661_v57 = vshrl.u32 %v15852_v24, %v11555_v26  ;;  %v3663_v54 = vshll.u32 %v15852_v24, %v3648_v23 }
 0x40a   : > { %v3653_v42 = vor.u32 %v3652_v0, %v3651_v46  ;;  %v3656_v13 = vor.u32 %v3655_v14, %v3654_v49  ;;  %v3664_v16 = vshrl.u32 %v15840_v22, %v11555_v26  ;;  %v3399_v28 = vadd.s32 127, %v3398_v21 }
 0x40b   : > { %vm8107_vm12 = vcmp.lt.s32.totalorder %v8106_v7, 0  ;;  %v3659_v17 = vor.u32 %v3658_v60, %v3657_v29  ;;  %v3662_v58 = vor.u32 %v3661_v57, %v3660_v55  ;;  %v11595_v18 = vsel %vm8095_vm15, 0, %v8094_v11 }
 0x40c   : > { %v3642_v10 = vor.u32 8388608, %v3641_v19  ;;  %v3665_v44 = vor.u32 %v3664_v16, %v3663_v54  ;;  %v3741_v3 = vand.u32 2139095040, %v11575_v43  ;;  %v3394_v50 = vsub.s32 32, %v11552_v40 }
 0x40d   : > { %v11599_v0 = vshrl.u32 %v3487_v38, 30  ;;  %vm3666_vm11 = vcmp.lt.s32.totalorder %v11580_v59, 1  ;;  %vm3669_vm2 = vcmp.lt.s32.totalorder %v11580_v59, 4  ;;  %v11603_v23 = vsel %vm8107_vm12, 0, %v8106_v7 }
 0x40e   : > { %vm3668_vm1 = vcmp.lt.s32.totalorder %v11580_v59, 3  ;;  %v3674_v11 = vsel %vm3666_vm11, %v3653_v42, %v3656_v13  ;;  %v3675_v14 = vsel %vm3669_vm2, %v3662_v58, 920167782  ;;  %v11610_v21 = vpop.eup %8650  ;;  %v3400_v19 = vshll.u32 %v3399_v28, 23 }
 0x40f   : > { %16012 = vst [vmem:[#allocation40_spill] sm:$0xff] %v11599_v0  ;;  %16013 = vst [vmem:[#allocation41_spill] sm:$0xff] %v11610_v21  ;;  %vm3667_vm8 = vcmp.lt.s32.totalorder %v11580_v59, 2  ;;  %v3676_v46 = vsel %vm3668_vm1, %v3659_v17, %v3675_v14  ;;  %v3678_v7 = vsel %vm3666_vm11, %v3656_v13, %v3659_v17  ;;  %v3679_v60 = vsel %vm3669_vm2, %v3665_v44, 1326507024 }
 0x410   : > { %v3677_v49 = vsel %vm3667_vm8, %v3674_v11, %v3676_v46  ;;  %v11621_v38 = vshll.u32 %v3642_v10, 8  ;;  %v3742_v29 = vshrl.u32 %v3741_v3, 23  ;;  %v3290_v55 = vsub.s32 32, %v11595_v18 }
 0x411   : > { %v3606_v57 = vsub.s32 4294967266, %v11603_v23  ;;  %v3489_v54 = vshll.u32 %v11599_v0, 30  ;;  %v3680_v16 = vsel %vm3668_vm1, %v3662_v58, %v3679_v60  ;;  %v3294_v3 = vsub.s32 4294967266, %v11595_v18 }
 0x412   : > { %v3681_v28 = vsel %vm3667_vm8, %v3678_v7, %v3680_v16  ;;  %v11631_v11 = vmul.u32.u64.low %v11621_v38, %v3677_v49  ;;  %v11632_v14 = vmul.u32.u64.high %v11621_v38, %v3677_v49, %v11631_v11  ;;  %v8112_v10 = vadd.s32 4294967169, %v3742_v29 }
 0x413   : > { %v3396_v44 = vshrl.u32 %v3378_v33, %v3394_v50  ;;  %v11637_v46 = vmul.u32.u64.low %v11621_v38, %v3681_v28  ;;  %v11638_v21 = vmul.u32.u64.high %v11621_v38, %v3681_v28, %v11637_v46  ;;  %v11642_v60 = vor.u32 4788187, %v3400_v19 }
 0x414   : > { %v3748_v7 = vadd.s32 1, %v8112_v10  ;;  %v11645_v16 = vshrl.u32 %v11550_v41, %v3290_v55  ;;  %v3395_v49 = vshll.u32 %v11409_v35, %v11552_v40  ;;  %v3671_v50 = vsel %vm3669_vm2, %v3659_v17, 2102212464  ;;  %v2461_v10 = vpop.f32.mrf.mxu1 }
 0x415   : > { %v15608_v33 = vand.u32 2147483647, %v11575_v43  ;;  %v3607_v29 = vadd.s32 127, %v3606_v57  ;;  %v11653_v28 = vsub.s32 %v11566_v36, %v3489_v54  ;;  %v3650_v19 = vshrl.u32 %v15841_v63, %v11555_v26 }
 0x416   : > { %vm3749_vm5 = vcmp.gt.s32.totalorder %v3748_v7, 0  ;;  %v11657_v46 = vadd.s32 127, %v3294_v3  ;;  %v11659_v41 = vor.u32 %v3396_v44, %v3395_v49  ;;  %v3586_v35 = vadd.s32 %v11414_v12, %v11427_v48 }
 0x417   : > { %v3750_v40 = vsel %vm3749_vm5, %v3748_v7, 0  ;;  %v3670_v55 = vsel %vm3666_vm11, %v3650_v19, %v3653_v42  ;;  %v3672_v36 = vsel %vm3668_vm1, %v3656_v13, %v3671_v50  ;;  %v3602_v26 = vsub.s32 32, %v11603_v23 }
 0x418   : > { %v3752_v57 = vand.u32 31, %v3750_v40  ;;  %v3603_v54 = vshll.u32 %v11495_v20, %v11603_v23  ;;  %v3745_v3 = vand.u32 8388607, %v15608_v33  ;;  %v11674_v12 = vadd.f32 %v2461_v10, %v10716_v56 }
 0x419   : > { %v3608_v48 = vshll.u32 %v3607_v29, 23  ;;  %v3492_v44 = vsub.s32 0, %v11653_v28  ;;  %v3692_v42 = vadd.s32 1, %v11632_v14  ;;  %v3673_v13 = vsel %vm3667_vm8, %v3670_v55, %v3672_v36 }
 0x41a   : > { %16014 = vst [vmem:[#allocation42_spill] sm:$0xff] %v11674_v12  ;;  %v3753_v7 = vsub.s32 32, %v3752_v57  ;;  %vm3691_vm9 = vc.u32 %v11638_v21, %v11631_v11  ;;  %v3755_v20 = vshll.u32 %v15841_v63, %v3752_v57  ;;  %v3758_v23 = vshll.u32 %v15851_v30, %v3752_v57 }
 0x41b   : > { %v3761_v29 = vshll.u32 %v15965_v51, %v3752_v57  ;;  %v3604_v10 = vshrl.u32 %v3586_v35, %v3602_v26  ;;  %v3751_v33 = vshrl.u32 %v3750_v40, 5  ;;  %v3764_v59 = vshll.u32 %v15966_v34, %v3752_v57 }
 0x41c   : > { %v3756_v49 = vshrl.u32 %v15851_v30, %v3753_v7  ;;  %v3759_v50 = vshrl.u32 %v15965_v51, %v3753_v7  ;;  %v3762_v19 = vshrl.u32 %v15966_v34, %v3753_v7  ;;  %v3765_v55 = vshrl.u32 %v15852_v24, %v3753_v7 }
 0x41d   : > { %v3693_v36 = vsel %vm3691_vm9, %v3692_v42, %v11632_v14  ;;  %v3609_v15 = vor.u32 4788187, %v3608_v48  ;;  %v8101_v53 = vmin.u32 %v3492_v44, %v11653_v28  ;;  %v3689_v61 = vmul.u32 %v11621_v38, %v3673_v13 }
 0x41e   : > { %v3757_v58 = vor.u32 %v3756_v49, %v3755_v20  ;;  %v3760_v6 = vor.u32 %v3759_v50, %v3758_v23  ;;  %v3763_v17 = vor.u32 %v3762_v19, %v3761_v29  ;;  %v3766_v0 = vor.u32 %v3765_v55, %v3764_v59 }
 0x41f   : > { %v16015_v8 = vand.u32 2147483647, %v10956_v25  ;;  %v16016_v35 = vmov 0  ;;  %v3746_v40 = vor.u32 8388608, %v3745_v3  ;;  %v3767_v26 = vshll.u32 %v15852_v24, %v3752_v57 }
 0x420   : > { %v3768_v14 = vshrl.u32 %v15840_v22, %v3753_v7  ;;  %v3949_v42 = vand.u32 2139095040, %v11674_v12  ;;  %v11702_v20 = vadd.s32 %v3693_v36, %v3689_v61  ;;  %vm3770_vm12 = vcmp.lt.s32.totalorder %v3751_v33, 1 }
 0x421   : > { %vm11695_vm15 = vcmp.le.f32.partialorder %v16015_v8, 0.7853982  ;;  %vm3772_vm11 = vcmp.lt.s32.totalorder %v3751_v33, 3  ;;  %vm3773_vm2 = vcmp.lt.s32.totalorder %v3751_v33, 4  ;;  %v3778_v44 = vsel %vm3770_vm12, %v3757_v58, %v3760_v6 }
 0x422   : > { %v16017_v35 = vsel %vm11695_vm15, 4294967295, %v16016_v35  ;;  %v3769_v38 = vor.u32 %v3768_v14, %v3767_v26  ;;  %v3775_v48 = vsel %vm3773_vm2, %v3763_v17, 2102212464  ;;  %v3779_v8 = vsel %vm3773_vm2, %v3766_v0, 920167782 }
 0x423   : > { %16018 = vst [vmem:[#allocation43_spill] sm:$0xff] %v16017_v35  ;;  %v3494_v13 = vclz %v8101_v53  ;;  %v3754_v23 = vshrl.u32 %v15841_v63, %v3753_v7  ;;  %vm3771_vm1 = vcmp.lt.s32.totalorder %v3751_v33, 2  ;;  %v3780_v57 = vsel %vm3772_vm11, %v3763_v17, %v3779_v8 }
 0x424   : > { %v3781_v3 = vsel %vm3771_vm1, %v3778_v44, %v3780_v57  ;;  %v3782_v49 = vsel %vm3770_vm12, %v3760_v6, %v3763_v17  ;;  %v3783_v61 = vsel %vm3773_vm2, %v3769_v38, 1326507024  ;;  %v3786_v50 = vshll.u32 %v3746_v40, 8 }
 0x425   : > { %v3695_v29 = vadd.s32 536870912, %v11702_v20  ;;  %v3774_v19 = vsel %vm3770_vm12, %v3754_v23, %v3757_v58  ;;  %v3776_v59 = vsel %vm3772_vm11, %v3760_v6, %v3775_v48  ;;  %v3784_v55 = vsel %vm3772_vm11, %v3766_v0, %v3783_v61 }
 0x426   : > { %v3785_v53 = vsel %vm3771_vm1, %v3782_v49, %v3784_v55  ;;  %v11714_v7 = vmul.u32.u64.low %v3786_v50, %v3781_v3  ;;  %v11715_v36 = vmul.u32.u64.high %v3786_v50, %v3781_v3, %v11714_v7  ;;  %v3950_v26 = vshrl.u32 %v3949_v42, 23 }
 0x427   : > { %v3404_v14 = vcvt.s32.f32 %v11659_v41  ;;  %v3605_v17 = vor.u32 %v3604_v10, %v3603_v54  ;;  %v11719_v38 = vmul.u32.u64.low %v3786_v50, %v3785_v53  ;;  %v11720_v40 = vmul.u32.u64.high %v3786_v50, %v3785_v53, %v11719_v38 }
 0x428   : > { %v3296_v44 = vshll.u32 %v11657_v46, 23  ;;  %v8102_v58 = vadd.s32 4294967294, %v3494_v13  ;;  %v3777_v6 = vsel %vm3771_vm1, %v3774_v19, %v3776_v59  ;;  %v8120_v48 = vadd.s32 4294967169, %v3950_v26 }
 0x429   : > { %v11728_v0 = vsel %vm11695_vm15, %v10956_v25, %v11560_v47  ;;  %v3291_v42 = vshll.u32 %v11422_v27, %v11595_v18  ;;  %v16019_v41 = vand.u32 2147483647, %v11642_v60  ;;  %v3610_v10 = vand.u32 2147483647, %v3609_v15 }
 0x42a   : > { %v16020_v8 = vand.u32 2147483647, %v11564_v9  ;;  %v16021_v46 = vcvt.s32.f32 %v11562_v2  ;;  %v11740_v13 = vshrl.u32 %v3695_v29, 30  ;;  %v3796_v23 = vadd.s32 1, %v11715_v36  ;;  %v2350_v9 = vpop.f32.mrf.mxu0 }
 0x42b   : > { %v3405_v54 = vmul.f32 %v3404_v14, %v16019_v41  ;;  %v3956_v57 = vadd.s32 1, %v8120_v48  ;;  %v11744_v47 = vor.u32 %v11645_v16, %v3291_v42  ;;  %v3612_v3 = vcvt.s32.f32 %v3605_v17 }
 0x42c   : > { %v11738_v33 = vmul.f32 %v16021_v46, %v16020_v8  ;;  %16022 = vst [vmem:[#allocation44_spill] sm:$0xff] %v11740_v13  ;;  %v3793_v27 = vmul.u32 %v3786_v50, %v3777_v6  ;;  %vm3795_vm8 = vc.u32 %v11720_v40, %v11714_v7  ;;  %v11748_v15 = vor.u32 4788187, %v3296_v44 }
 0x42d   : > { %vm8103_vm5 = vcmp.lt.s32.totalorder %v8102_v58, 0  ;;  %v3797_v2 = vsel %vm3795_vm8, %v3796_v23, %v11715_v36  ;;  %vm3957_vm9 = vcmp.gt.s32.totalorder %v3956_v57, 0  ;;  %8652 = vsinq.f32 %v11529_v1 }
 0x42e   : > { %v3406_v18 = vxor.u32 2147483648, %v3405_v54  ;;  %v11752_v60 = vmul.f32 %v3612_v3, %v3610_v10  ;;  %v3798_v49 = vadd.s32 %v3797_v2, %v3793_v27  ;;  %vm15669_vm12 = vcmp.lt.s32.totalorder %v11177_v4, 0 }
 0x42f   : > { %v3697_v16 = vshll.u32 %v11740_v13, 30  ;;  %v15619_v61 = vand.u32 2147483647, %v11674_v12  ;;  %v3958_v50 = vsel %vm3957_vm9, %v3956_v57, 0  ;;  %8654 = vcosq.f32 %v11728_v0 }
 0x430   : > { %v11758_v29 = vsel %vm8103_vm5, 0, %v8102_v58  ;;  %v3799_v19 = vadd.s32 536870912, %v3798_v49  ;;  %v11761_v59 = vadd.f32 %v2350_v9, %v10716_v56  ;;  %v3960_v36 = vand.u32 31, %v3958_v50 }
 0x431   : > { %v11768_v26 = vsel %vm15669_vm12, %v3406_v18, %v3405_v54  ;;  %v11773_v17 = vadd.s32 %v11517_v52, %v11534_v31  ;;  %v11779_v58 = vsub.s32 %v11702_v20, %v3697_v16  ;;  %v3953_v6 = vand.u32 8388607, %v15619_v61 }
 0x432   : > { %16023 = vst [vmem:[#allocation45_spill] sm:$0xff] %v11761_v59  ;;  %v11775_v38 = vshrl.u32 %v3799_v19, 30  ;;  %v3961_v48 = vsub.s32 32, %v3960_v36  ;;  %v3959_v42 = vshrl.u32 %v3958_v50, 5  ;;  %v3963_v41 = vshll.u32 %v15841_v63, %v3960_v36 }
 0x433   : > { %v3966_v54 = vshll.u32 %v15851_v30, %v3960_v36  ;;  %v3845_v10 = vand.u32 2139095040, %v11761_v59  ;;  %v3969_v8 = vshll.u32 %v15965_v51, %v3960_v36  ;;  %v3972_v23 = vshll.u32 %v15966_v34, %v3960_v36 }
 0x434   : > { %16024 = vst [vmem:[#allocation46_spill] sm:$0xff] %v11775_v38  ;;  %v3964_v52 = vshrl.u32 %v15851_v30, %v3961_v48  ;;  %v3967_v31 = vshrl.u32 %v15965_v51, %v3961_v48  ;;  %v3970_v20 = vshrl.u32 %v15966_v34, %v3961_v48  ;;  %v3801_v46 = vshll.u32 %v11775_v38, 30 }
 0x435   : > { %v3973_v57 = vshrl.u32 %v15852_v24, %v3961_v48  ;;  %v3975_v3 = vshll.u32 %v15852_v24, %v3960_v36  ;;  %vm15667_vm11 = vcmp.lt.s32.totalorder %v10851_v37, 0  ;;  %v3976_v18 = vshrl.u32 %v15840_v22, %v3961_v48 }
 0x436   : > { %v3965_v27 = vor.u32 %v3964_v52, %v3963_v41  ;;  %v3968_v2 = vor.u32 %v3967_v31, %v3966_v54  ;;  %v3971_v9 = vor.u32 %v3970_v20, %v3969_v8  ;;  %v16025_v16 = vand.u32 2147483647, %v11177_v4 }
 0x437   : > { %v16026_v50 = vmov 0  ;;  %vm15668_vm1 = vcmp.lt.s32.totalorder %v11297_v32, 0  ;;  %v3502_v19 = vsub.s32 4294967266, %v11758_v29  ;;  %v3700_v61 = vsub.s32 0, %v11779_v58 }
 0x438   : > { %vm11798_vm2 = vcmp.le.f32.partialorder %v16025_v16, 0.7853982  ;;  %v3954_v36 = vor.u32 8388608, %v3953_v6  ;;  %v3974_v44 = vor.u32 %v3973_v57, %v3972_v23  ;;  %v3977_v14 = vor.u32 %v3976_v18, %v3975_v3 }
 0x439   : > { %v16027_v50 = vsel %vm11798_vm2, 4294967295, %v16026_v50  ;;  %vm3978_vm8 = vcmp.lt.s32.totalorder %v3959_v42, 1  ;;  %vm3981_vm5 = vcmp.lt.s32.totalorder %v3959_v42, 4  ;;  %v3846_v41 = vshrl.u32 %v3845_v10, 23 }
 0x43a   : > { %16028 = vst [vmem:[#allocation47_spill] sm:$0xff] %v16027_v50  ;;  %v11805_v54 = vsub.s32 %v3798_v49, %v3801_v46  ;;  %v3962_v52 = vshrl.u32 %v15841_v63, %v3961_v48  ;;  %v3983_v31 = vsel %vm3981_vm5, %v3971_v9, 2102212464  ;;  %v3986_v8 = vsel %vm3978_vm8, %v3965_v27, %v3968_v2  ;;  %v11808_v20 = vpop.eup %8652 }
 0x43b   : > { %16029 = vst [vmem:[#allocation48_spill] sm:$0xff] %v11808_v20  ;;  %vm3980_vm9 = vcmp.lt.s32.totalorder %v3959_v42, 3  ;;  %v3987_v16 = vsel %vm3981_vm5, %v3974_v44, 920167782  ;;  %v3990_v53 = vsel %vm3978_vm8, %v3968_v2, %v3971_v9  ;;  %v3991_v55 = vsel %vm3981_vm5, %v3977_v14, 1326507024 }
 0x43c   : > { %vm3979_vm10 = vcmp.lt.s32.totalorder %v3959_v42, 2  ;;  %v3982_v1 = vsel %vm3978_vm8, %v3962_v52, %v3965_v27  ;;  %v3988_v6 = vsel %vm3980_vm9, %v3971_v9, %v3987_v16  ;;  %v3994_v23 = vshll.u32 %v3954_v36, 8  ;;  %v11810_v57 = vpop.eup %8654 }
 0x43d   : > { %16030 = vst [vmem:[#allocation49_spill] sm:$0xff] %v11810_v57  ;;  %v16031_v10 = vand.u32 2147483647, %v11297_v32  ;;  %v16032_v49 = vmov 0  ;;  %v3984_v48 = vsel %vm3980_vm9, %v3968_v2, %v3983_v31  ;;  %v3989_v46 = vsel %vm3979_vm10, %v3986_v8, %v3988_v6 }
 0x43e   : > { %v3992_v3 = vsel %vm3980_vm9, %v3974_v44, %v3991_v55  ;;  %v8116_v18 = vadd.s32 4294967169, %v3846_v41  ;;  %v11820_v14 = vmul.u32.u64.low %v3994_v23, %v3989_v46  ;;  %v11821_v20 = vmul.u32.u64.high %v3994_v23, %v3989_v46, %v11820_v14 }
 0x43f   : > { %vm11814_vm6 = vcmp.le.f32.partialorder %v16031_v10, 0.7853982  ;;  %v3993_v35 = vsel %vm3979_vm10, %v3990_v53, %v3992_v3  ;;  %v15624_v27 = vand.u32 2147483647, %v11761_v59  ;;  %v3804_v9 = vsub.s32 0, %v11805_v54 }
 0x440   : > { %v16033_v49 = vsel %vm11814_vm6, 4294967295, %v16032_v49  ;;  %v11826_v36 = vmul.u32.u64.low %v3994_v23, %v3993_v35  ;;  %v11827_v52 = vmul.u32.u64.high %v3994_v23, %v3993_v35, %v11826_v36  ;;  %v3852_v16 = vadd.s32 1, %v8116_v18 }
 0x441   : > { %16034 = vst [vmem:[#allocation50_spill] sm:$0xff] %v16033_v49  ;;  %8656 = vsinq.f32 %v11728_v0  ;;  %v16035_v55 = vxor.u32 2147483648, %v11738_v33  ;;  %v16037_v44 = vand.u32 2147483647, %v11748_v15  ;;  %v16038_v2 = vcvt.s32.f32 %v11744_v47  ;;  %v2463_v47 = vpop.f32.mrf.mxu1 }
 0x442   : > { %v3985_v31 = vsel %vm3979_vm10, %v3982_v1, %v3984_v48  ;;  %v3410_v35 = vsel %vm11798_vm2, %v11177_v4, %v11768_v26  ;;  %v16039_v0 = vxor.u32 2147483648, %v11752_v60  ;;  %v16040_v8 = vsub.s32 32, %v11758_v29 }
 0x443   : > { %v11835_v53 = vsel %vm15667_vm11, %v16035_v55, %v11738_v33  ;;  %v11841_v41 = vmul.f32 %v16038_v2, %v16037_v44  ;;  %vm3853_vm8 = vcmp.gt.s32.totalorder %v3852_v16, 0  ;;  %v11856_v6 = vadd.s32 127, %v3502_v19 }
 0x444   : > { %16036 = vst [vmem:[#allocation51_spill] sm:$0xff] %v11835_v53  ;;  %v3615_v33 = vsel %vm15668_vm1, %v16039_v0, %v11752_v60  ;;  %v3500_v15 = vshrl.u32 %v11773_v17, %v16040_v8  ;;  %v8109_v1 = vmin.u32 %v3700_v61, %v11779_v58  ;;  %v4004_v42 = vadd.s32 1, %v11821_v20 }
 0x445   : > { %v3849_v26 = vand.u32 8388607, %v15624_v27  ;;  %v8113_v10 = vmin.u32 %v3804_v9, %v11805_v54  ;;  %v4001_v48 = vmul.u32 %v3994_v23, %v3985_v31  ;;  %vm4003_vm10 = vc.u32 %v11827_v52, %v11820_v14 }
 0x446   : > { %v3854_v60 = vsel %vm3853_vm8, %v3852_v16, 0  ;;  %8658 = vcosq.f32 %v3410_v35  ;;  %v3499_v17 = vshll.u32 %v11653_v28, %v11758_v29  ;;  %v4005_v19 = vsel %vm4003_vm10, %v4004_v42, %v11821_v20 }
 0x447   : > { %v11869_v61 = vadd.f32 %v2463_v47, %v10716_v56  ;;  %8660 = vsinq.f32 %v3410_v35  ;;  %v4006_v3 = vadd.s32 %v4005_v19, %v4001_v48  ;;  %v3856_v18 = vand.u32 31, %v3854_v60 }
 0x448   : > { %v11875_v23 = vsel %vm11814_vm6, %v11297_v32, %v3615_v33  ;;  %v11877_v9 = vor.u32 %v3500_v15, %v3499_v17  ;;  %v3504_v36 = vshll.u32 %v11856_v6, 23  ;;  %v3702_v28 = vclz %v8109_v1 }
 0x449   : > { %16041 = vst [vmem:[#allocation52_spill] sm:$0xff] %v11869_v61  ;;  %16042 = vst [vmem:[#allocation53_spill] sm:$0xff] %v11875_v23  ;;  %v3806_v29 = vclz %v8113_v10  ;;  %v4007_v20 = vadd.s32 536870912, %v4006_v3  ;;  %v3850_v16 = vor.u32 8388608, %v3849_v26  ;;  %v3857_v56 = vsub.s32 32, %v3856_v18 }
 0x44a   : > { %v11880_v55 = vshrl.u32 %v3854_v60, 5  ;;  %v3859_v44 = vshll.u32 %v15841_v63, %v3856_v18  ;;  %v3862_v2 = vshll.u32 %v15851_v30, %v3856_v18  ;;  %v4053_v31 = vand.u32 2139095040, %v11869_v61 }
 0x44b   : > { %v11885_v35 = vshrl.u32 %v4007_v20, 30  ;;  %v3860_v0 = vshrl.u32 %v15851_v30, %v3857_v56  ;;  %v3863_v33 = vshrl.u32 %v15965_v51, %v3857_v56  ;;  %v3865_v8 = vshll.u32 %v15965_v51, %v3856_v18 }
 0x44c   : > { %v3866_v15 = vshrl.u32 %v15966_v34, %v3857_v56  ;;  %v3868_v47 = vshll.u32 %v15966_v34, %v3856_v18  ;;  %v3869_v6 = vshrl.u32 %v15852_v24, %v3857_v56  ;;  %v3871_v1 = vshll.u32 %v15852_v24, %v3856_v18 }
 0x44d   : > { %16043 = vst [vmem:[#allocation54_spill] sm:$0xff] %v11885_v35  ;;  %v4009_v42 = vshll.u32 %v11885_v35, 30  ;;  %v3861_v26 = vor.u32 %v3860_v0, %v3859_v44  ;;  %v3864_v10 = vor.u32 %v3863_v33, %v3862_v2  ;;  %v3872_v48 = vshrl.u32 %v15840_v22, %v3857_v56 }
 0x44e   : > { %vm15652_vm5 = vcmp.lt.s32.totalorder %v11094_v45, 0  ;;  %v8114_v60 = vadd.s32 4294967294, %v3806_v29  ;;  %v3867_v17 = vor.u32 %v3866_v15, %v3865_v8  ;;  %v3870_v19 = vor.u32 %v3869_v6, %v3868_v47  ;;  %v11897_v27 = vpop.eup %8656 }
 0x44f   : > { %v4054_v20 = vshrl.u32 %v4053_v31, 23  ;;  %16044 = vst [vmem:[#allocation55_spill] sm:$0xff] %v11897_v27  ;;  %v8110_v46 = vadd.s32 4294967294, %v3702_v28  ;;  %v3873_v57 = vor.u32 %v3872_v48, %v3871_v1  ;;  %vm3874_vm9 = vcmp.lt.s32.totalorder %v11880_v55, 1 }
 0x450   : > { %vm3877_vm8 = vcmp.lt.s32.totalorder %v11880_v55, 4  ;;  %vm3876_vm10 = vcmp.lt.s32.totalorder %v11880_v55, 3  ;;  %v3882_v18 = vsel %vm3874_vm9, %v3861_v26, %v3864_v10  ;;  %v11904_v2 = vshll.u32 %v3850_v16, 8 }
 0x451   : > { %v3883_v44 = vsel %vm3877_vm8, %v3870_v19, 920167782  ;;  %v11906_v29 = vsub.s32 %v4006_v3, %v4009_v42  ;;  %vm3875_vm7 = vcmp.lt.s32.totalorder %v11880_v55, 2  ;;  %v3886_v31 = vsel %vm3874_vm9, %v3864_v10, %v3867_v17 }
 0x452   : > { %v3884_v28 = vsel %vm3876_vm10, %v3867_v17, %v3883_v44  ;;  %vm8115_vm4 = vcmp.lt.s32.totalorder %v8114_v60, 0  ;;  %v3887_v33 = vsel %vm3877_vm8, %v3873_v57, 1326507024  ;;  %v8124_v8 = vadd.s32 4294967169, %v4054_v20  ;;  %v2354_v20 = vpop.f32.mrf.mxu0 }
 0x453   : > { %v3885_v0 = vsel %vm3875_vm7, %v3882_v18, %v3884_v28  ;;  %v11915_v15 = vpop.eup %8658  ;;  %vm8111_vm3 = vcmp.lt.s32.totalorder %v8110_v46, 0  ;;  %v3879_v16 = vsel %vm3877_vm8, %v3867_v17, 2102212464  ;;  %v3888_v3 = vsel %vm3876_vm10, %v3870_v19, %v3887_v33 }
 0x454   : > { %16045 = vst [vmem:[#allocation56_spill] sm:$0xff] %v11915_v15  ;;  %v15629_v47 = vand.u32 2147483647, %v11869_v61  ;;  %v11920_v6 = vpop.eup %8660  ;;  %v3858_v1 = vshrl.u32 %v15841_v63, %v3857_v56  ;;  %v3889_v42 = vsel %vm3875_vm7, %v3886_v31, %v3888_v3  ;;  %v11930_v18 = vsel %vm8115_vm4, 0, %v8114_v60 }
 0x455   : > { %16046 = vst [vmem:[#allocation57_spill] sm:$0xff] %v11920_v6  ;;  %v11926_v48 = vmul.u32.u64.low %v11904_v2, %v3885_v0  ;;  %v11927_v57 = vmul.u32.u64.high %v11904_v2, %v3885_v0, %v11926_v48  ;;  %v4012_v17 = vsub.s32 0, %v11906_v29  ;;  %v11937_v28 = vor.u32 4788187, %v3504_v36 }
 0x456   : > { %v11934_v19 = vmul.u32.u64.low %v11904_v2, %v3889_v42  ;;  %v11935_v44 = vmul.u32.u64.high %v11904_v2, %v3889_v42, %v11934_v19  ;;  %v3878_v56 = vsel %vm3874_vm9, %v3858_v1, %v3861_v26  ;;  %v3880_v31 = vsel %vm3876_vm10, %v3864_v10, %v3879_v16 }
 0x457   : > { %v4060_v0 = vadd.s32 1, %v8124_v8  ;;  %v16047_v33 = vxor.u32 2147483648, %v11841_v41  ;;  %8662 = vcosq.f32 %v11875_v23  ;;  %v11953_v36 = vadd.s32 %v11631_v11, %v11638_v21 }
 0x458   : > { %v11956_v3 = vadd.f32 %v2354_v20, %v10677_v5  ;;  %v11959_v26 = vsel %vm8111_vm3, 0, %v8110_v46  ;;  %v3814_v10 = vsub.s32 4294967266, %v11930_v18  ;;  %v4057_v8 = vand.u32 8388607, %v15629_v47 }
 0x459   : > { %v11948_v60 = vsel %vm15652_vm5, %v16047_v33, %v11841_v41  ;;  %vm4061_vm4 = vcmp.gt.s32.totalorder %v4060_v0, 0  ;;  %v8121_v41 = vmin.u32 %v4012_v17, %v11906_v29  ;;  %v3881_v16 = vsel %vm3875_vm7, %v3878_v56, %v3880_v31 }
 0x45a   : > { %16048 = vst [vmem:[#allocation58_spill] sm:$0xff] %v11948_v60  ;;  %16049 = vst [vmem:[#allocation59_spill] sm:$0xff] %v11956_v3  ;;  %v3900_v21 = vadd.s32 1, %v11927_v57  ;;  %v4062_v11 = vsel %vm4061_vm4, %v4060_v0, 0  ;;  %vm3899_vm3 = vc.u32 %v11935_v44, %v11926_v48  ;;  %v3710_v20 = vsub.s32 4294967266, %v11959_v26 }
 0x45b   : > { %v4064_v46 = vand.u32 31, %v4062_v11  ;;  %v3794_v19 = vadd.s32 %v11714_v7, %v11720_v40  ;;  %v3810_v17 = vsub.s32 32, %v11930_v18  ;;  %v4157_v55 = vand.u32 2139095040, %v11956_v3 }
 0x45c   : > { %v3815_v56 = vadd.s32 127, %v3814_v10  ;;  %v3897_v31 = vmul.u32 %v11904_v2, %v3881_v16  ;;  %v4058_v0 = vor.u32 8388608, %v4057_v8  ;;  %v4014_v47 = vclz %v8121_v41 }
 0x45d   : > { %v4065_v33 = vsub.s32 32, %v4064_v46  ;;  %v3901_v42 = vsel %vm3899_vm3, %v3900_v21, %v11927_v57  ;;  %v4067_v1 = vshll.u32 %v15841_v63, %v4064_v46  ;;  %v4070_v27 = vshll.u32 %v15851_v30, %v4064_v46 }
 0x45e   : > { %v4073_v40 = vshll.u32 %v15965_v51, %v4064_v46  ;;  %v4063_v10 = vshrl.u32 %v4062_v11, 5  ;;  %v4076_v2 = vshll.u32 %v15966_v34, %v4064_v46  ;;  %v4158_v41 = vshrl.u32 %v4157_v55, 23 }
 0x45f   : > { %v4068_v25 = vshrl.u32 %v15851_v30, %v4065_v33  ;;  %v4071_v7 = vshrl.u32 %v15965_v51, %v4065_v33  ;;  %v4074_v60 = vshrl.u32 %v15966_v34, %v4065_v33  ;;  %v4077_v8 = vshrl.u32 %v15852_v24, %v4065_v33 }
 0x460   : > { %v3811_v57 = vshll.u32 %v11805_v54, %v11930_v18  ;;  %v3812_v53 = vshrl.u32 %v3794_v19, %v3810_v17  ;;  %v3816_v49 = vshll.u32 %v3815_v56, 23  ;;  %v11989_v37 = vadd.s32 %v3901_v42, %v3897_v31 }
 0x461   : > { %v4069_v16 = vor.u32 %v4068_v25, %v4067_v1  ;;  %v4072_v21 = vor.u32 %v4071_v7, %v4070_v27  ;;  %v4075_v45 = vor.u32 %v4074_v60, %v4073_v40  ;;  %v4078_v15 = vor.u32 %v4077_v8, %v4076_v2  ;;  %v2467_v2 = vpop.f32.mrf.mxu1 }
 0x462   : > { %v8122_v32 = vadd.s32 4294967294, %v4014_v47  ;;  %v4079_v6 = vshll.u32 %v15852_v24, %v4064_v46  ;;  %v4080_v11 = vshrl.u32 %v15840_v22, %v4065_v33  ;;  %v4098_v50 = vshll.u32 %v4058_v0, 8 }
 0x463   : > { %vm4082_vm7 = vcmp.lt.s32.totalorder %v4063_v10, 1  ;;  %vm4084_vm9 = vcmp.lt.s32.totalorder %v4063_v10, 3  ;;  %vm4085_vm8 = vcmp.lt.s32.totalorder %v4063_v10, 4  ;;  %v8128_v55 = vadd.s32 4294967169, %v4158_v41 }
 0x464   : > { %v11993_v4 = vpop.eup %8662  ;;  %v4081_v25 = vor.u32 %v4080_v11, %v4079_v6  ;;  %v4087_v54 = vsel %vm4085_vm8, %v4075_v45, 2102212464  ;;  %v4090_v27 = vsel %vm4082_vm7, %v4069_v16, %v4072_v21  ;;  %v4091_v18 = vsel %vm4085_vm8, %v4078_v15, 920167782 }
 0x465   : > { %16050 = vst [vmem:[#allocation60_spill] sm:$0xff] %v11993_v4  ;;  %v3903_v60 = vadd.s32 536870912, %v11989_v37  ;;  %v4066_v47 = vshrl.u32 %v15841_v63, %v4065_v33  ;;  %vm4083_vm10 = vcmp.lt.s32.totalorder %v4063_v10, 2  ;;  %v4092_v1 = vsel %vm4084_vm9, %v4075_v45, %v4091_v18 }
 0x466   : > { %vm8123_vm4 = vcmp.lt.s32.totalorder %v8122_v32, 0  ;;  %v4093_v42 = vsel %vm4083_vm10, %v4090_v27, %v4092_v1  ;;  %v4094_v46 = vsel %vm4082_vm7, %v4072_v21, %v4075_v45  ;;  %v4095_v19 = vsel %vm4085_vm8, %v4081_v25, 1326507024 }
 0x467   : > { %v3817_v17 = vor.u32 4788187, %v3816_v49  ;;  %v4086_v6 = vsel %vm4082_vm7, %v4066_v47, %v4069_v16  ;;  %v4088_v56 = vsel %vm4084_vm9, %v4072_v21, %v4087_v54  ;;  %v4096_v31 = vsel %vm4084_vm9, %v4078_v15, %v4095_v19 }
 0x468   : > { %v3813_v0 = vor.u32 %v3812_v53, %v3811_v57  ;;  %v4097_v7 = vsel %vm4083_vm10, %v4094_v46, %v4096_v31  ;;  %v12005_v33 = vmul.u32.u64.low %v4098_v50, %v4093_v42  ;;  %v12006_v40 = vmul.u32.u64.high %v4098_v50, %v4093_v42, %v12005_v33 }
 0x469   : > { %v12009_v8 = vsel %vm8123_vm4, 0, %v8122_v32  ;;  %v12011_v41 = vshrl.u32 %v3903_v60, 30  ;;  %v12013_v45 = vmul.u32.u64.low %v4098_v50, %v4097_v7  ;;  %v12014_v49 = vmul.u32.u64.high %v4098_v50, %v4097_v7, %v12013_v45 }
 0x46a   : > { %v3706_v16 = vsub.s32 32, %v11959_v26  ;;  %v12017_v21 = vadd.s32 127, %v3710_v20  ;;  %v4089_v53 = vsel %vm4083_vm10, %v4086_v6, %v4088_v56  ;;  %v4164_v15 = vadd.s32 1, %v8128_v55 }
 0x46b   : > { %16051 = vst [vmem:[#allocation61_spill] sm:$0xff] %v12011_v41  ;;  %v3818_v11 = vand.u32 2147483647, %v3817_v17  ;;  %v15645_v25 = vand.u32 2147483647, %v11956_v3  ;;  %v12024_v32 = vadd.f32 %v2467_v2, %v10677_v5  ;;  %v3820_v54 = vcvt.s32.f32 %v3813_v0 }
 0x46c   : > { %v4022_v27 = vsub.s32 4294967266, %v12009_v8  ;;  %v4108_v18 = vadd.s32 1, %v12006_v40  ;;  %vm4165_vm3 = vcmp.gt.s32.totalorder %v4164_v15, 0  ;;  %v3905_v20 = vshll.u32 %v12011_v41, 30 }
 0x46d   : > { %16052 = vst [vmem:[#allocation62_spill] sm:$0xff] %v12024_v32  ;;  %v4105_v10 = vmul.u32 %v4098_v50, %v4089_v53  ;;  %vm4107_vm7 = vc.u32 %v12014_v49, %v12005_v33  ;;  %v4166_v55 = vsel %vm4165_vm3, %v4164_v15, 0  ;;  %v12032_v60 = vshrl.u32 %v11953_v36, %v3706_v16 }
 0x46e   : > { %v4109_v1 = vsel %vm4107_vm7, %v4108_v18, %v12006_v40  ;;  %v4168_v42 = vand.u32 31, %v4166_v55  ;;  %v12036_v46 = vmul.f32 %v3820_v54, %v3818_v11  ;;  %v4002_v19 = vadd.s32 %v11820_v14, %v11827_v52 }
 0x46f   : > { %v4110_v17 = vadd.s32 %v4109_v1, %v4105_v10  ;;  %v4161_v50 = vand.u32 8388607, %v15645_v25  ;;  %v4018_v6 = vsub.s32 32, %v12009_v8  ;;  %v12043_v56 = vadd.s32 127, %v4022_v27 }
 0x470   : > { %v4169_v36 = vsub.s32 32, %v4168_v42  ;;  %v4365_v31 = vand.u32 2139095040, %v12024_v32  ;;  %v12047_v0 = vsub.s32 %v11989_v37, %v3905_v20  ;;  %v4171_v40 = vshll.u32 %v15841_v63, %v4168_v42 }
 0x471   : > { %v4111_v7 = vadd.s32 536870912, %v4110_v17  ;;  %v4174_v2 = vshll.u32 %v15851_v30, %v4168_v42  ;;  %v4177_v45 = vshll.u32 %v15965_v51, %v4168_v42  ;;  %v4167_v15 = vshrl.u32 %v4166_v55, 5 }
 0x472   : > { %v4172_v14 = vshrl.u32 %v15851_v30, %v4169_v36  ;;  %v4175_v52 = vshrl.u32 %v15965_v51, %v4169_v36  ;;  %v4178_v16 = vshrl.u32 %v15966_v34, %v4169_v36  ;;  %v4180_v11 = vshll.u32 %v15966_v34, %v4168_v42 }
 0x473   : > { %v12055_v53 = vshrl.u32 %v4111_v7, 30  ;;  %v4181_v37 = vshrl.u32 %v15852_v24, %v4169_v36  ;;  %v3822_v54 = vxor.u32 2147483648, %v12036_v46  ;;  %v4020_v10 = vshrl.u32 %v4002_v19, %v4018_v6 }
 0x474   : > { %v4173_v27 = vor.u32 %v4172_v14, %v4171_v40  ;;  %v4176_v18 = vor.u32 %v4175_v52, %v4174_v2  ;;  %v4179_v20 = vor.u32 %v4178_v16, %v4177_v45  ;;  %v4024_v1 = vshll.u32 %v12043_v56, 23 }
 0x475   : > { %16053 = vst [vmem:[#allocation63_spill] sm:$0xff] %v12055_v53  ;;  %v3908_v25 = vsub.s32 0, %v12047_v0  ;;  %v4182_v47 = vor.u32 %v4181_v37, %v4180_v11  ;;  %vm15679_vm9 = vcmp.lt.s32.totalorder %v11575_v43, 0  ;;  %v4162_v7 = vor.u32 8388608, %v4161_v50 }
 0x476   : > { %v4183_v55 = vshll.u32 %v15852_v24, %v4168_v42  ;;  %v4184_v57 = vshrl.u32 %v15840_v22, %v4169_v36  ;;  %v4366_v4 = vshrl.u32 %v4365_v31, 23  ;;  %v4113_v13 = vshll.u32 %v12055_v53, 30 }
 0x477   : > { %vm4186_vm8 = vcmp.lt.s32.totalorder %v4167_v15, 1  ;;  %vm4188_vm10 = vcmp.lt.s32.totalorder %v4167_v15, 3  ;;  %vm4189_vm4 = vcmp.lt.s32.totalorder %v4167_v15, 4  ;;  %v8117_v2 = vmin.u32 %v3908_v25, %v12047_v0 }
 0x478   : > { %v4185_v40 = vor.u32 %v4184_v57, %v4183_v55  ;;  %v4191_v19 = vsel %vm4189_vm4, %v4179_v20, 2102212464  ;;  %v4194_v6 = vsel %vm4186_vm8, %v4173_v27, %v4176_v18  ;;  %v4195_v56 = vsel %vm4189_vm4, %v4182_v47, 920167782 }
 0x479   : > { %v4170_v14 = vshrl.u32 %v15841_v63, %v4169_v36  ;;  %vm4187_vm3 = vcmp.lt.s32.totalorder %v4167_v15, 2  ;;  %v4196_v42 = vsel %vm4188_vm10, %v4179_v20, %v4195_v56  ;;  %v16054_v50 = vand.u32 2147483647, %v11575_v43 }
 0x47a   : > { %v16055_v31 = vmov 0  ;;  %v4197_v52 = vsel %vm4187_vm3, %v4194_v6, %v4196_v42  ;;  %v4198_v57 = vsel %vm4186_vm8, %v4176_v18, %v4179_v20  ;;  %v4199_v45 = vsel %vm4189_vm4, %v4185_v40, 1326507024 }
 0x47b   : > { %vm12072_vm7 = vcmp.le.f32.partialorder %v16054_v50, 0.7853982  ;;  %v4202_v16 = vshll.u32 %v4162_v7, 8  ;;  %v12078_v11 = vsub.s32 %v4110_v17, %v4113_v13  ;;  %v4190_v25 = vsel %vm4186_vm8, %v4170_v14, %v4173_v27 }
 0x47c   : > { %v16056_v31 = vsel %vm12072_vm7, 4294967295, %v16055_v31  ;;  %v4192_v36 = vsel %vm4188_vm10, %v4176_v18, %v4191_v19  ;;  %v4200_v37 = vsel %vm4188_vm10, %v4182_v47, %v4199_v45  ;;  %v8136_v35 = vadd.s32 4294967169, %v4366_v4  ;;  %v2356_v19 = vpop.f32.mrf.mxu0 }
 0x47d   : > { %16057 = vst [vmem:[#allocation64_spill] sm:$0xff] %v16056_v31  ;;  %v4201_v55 = vsel %vm4187_vm3, %v4198_v57, %v4200_v37  ;;  %v12084_v56 = vmul.u32.u64.low %v4202_v16, %v4197_v52  ;;  %v12085_v50 = vmul.u32.u64.high %v4202_v16, %v4197_v52, %v12084_v56  ;;  %v16058_v6 = vand.u32 2147483647, %v11937_v28 }
 0x47e   : > { %v16059_v20 = vcvt.s32.f32 %v11877_v9  ;;  %v4019_v13 = vshll.u32 %v11906_v29, %v12009_v8  ;;  %v12096_v17 = vmul.u32.u64.low %v4202_v16, %v4201_v55  ;;  %v12097_v27 = vmul.u32.u64.high %v4202_v16, %v4201_v55, %v12096_v17  ;;  %v2360_v53 = vpop.f32.mrf.mxu0 }
 0x47f   : > { %v16061_v47 = vshll.u32 %v11779_v58, %v11959_v26  ;;  %v16062_v4 = vshll.u32 %v12017_v21, 23  ;;  %v4193_v9 = vsel %vm4187_vm3, %v4190_v25, %v4192_v36  ;;  %v4372_v28 = vadd.s32 1, %v8136_v35 }
 0x480   : > { %v12092_v7 = vmul.f32 %v16059_v20, %v16058_v6  ;;  %v3823_v29 = vsel %vm15679_vm9, %v3822_v54, %v12036_v46  ;;  %v12113_v8 = vor.u32 %v4020_v10, %v4019_v13  ;;  %v12115_v14 = vor.u32 4788187, %v4024_v1 }
 0x481   : > { %v12103_v18 = vor.u32 %v12032_v60, %v16061_v47  ;;  %v12107_v40 = vor.u32 4788187, %v16062_v4  ;;  %v15651_v58 = vand.u32 2147483647, %v12024_v32  ;;  %v3910_v26 = vclz %v8117_v2 }
 0x482   : > { %16060 = vst [vmem:[#allocation65_spill] sm:$0xff] %v12092_v7  ;;  %v4116_v60 = vsub.s32 0, %v12078_v11  ;;  %v4212_v21 = vadd.s32 1, %v12085_v50  ;;  %vm4373_vm8 = vcmp.gt.s32.totalorder %v4372_v28, 0  ;;  %v4209_v15 = vmul.u32 %v4202_v16, %v4193_v9 }
 0x483   : > { %vm4211_vm10 = vc.u32 %v12097_v27, %v12084_v56  ;;  %v4374_v35 = vsel %vm4373_vm8, %v4372_v28, 0  ;;  %v12123_v42 = vadd.f32 %v2356_v19, %v10677_v5  ;;  %v12131_v2 = vsel %vm12072_vm7, %v11575_v43, %v3823_v29 }
 0x484   : > { %v4213_v10 = vsel %vm4211_vm10, %v4212_v21, %v12085_v50  ;;  %v4376_v1 = vand.u32 31, %v4374_v35  ;;  %v12135_v16 = vadd.s32 4294967294, %v3910_v26  ;;  %v8125_v25 = vmin.u32 %v4116_v60, %v12078_v11 }
 0x485   : > { %16063 = vst [vmem:[#allocation66_spill] sm:$0xff] %v12123_v42  ;;  %v4214_v45 = vadd.s32 %v4213_v10, %v4209_v15  ;;  %v4369_v36 = vand.u32 8388607, %v15651_v58  ;;  %v4261_v20 = vand.u32 2139095040, %v12123_v42  ;;  %v4375_v28 = vshrl.u32 %v4374_v35, 5 }
 0x486   : > { %v4377_v37 = vsub.s32 32, %v4376_v1  ;;  %v4379_v50 = vshll.u32 %v15841_v63, %v4376_v1  ;;  %v4382_v6 = vshll.u32 %v15851_v30, %v4376_v1  ;;  %v4385_v47 = vshll.u32 %v15965_v51, %v4376_v1 }
 0x487   : > { %v4215_v55 = vadd.s32 536870912, %v4214_v45  ;;  %v4388_v19 = vshll.u32 %v15966_v34, %v4376_v1  ;;  %vm8119_vm4 = vcmp.lt.s32.totalorder %v12135_v16, 0  ;;  %v4118_v10 = vclz %v8125_v25 }
 0x488   : > { %v4380_v13 = vshrl.u32 %v15851_v30, %v4377_v37  ;;  %v4383_v17 = vshrl.u32 %v15965_v51, %v4377_v37  ;;  %v4386_v4 = vshrl.u32 %v15966_v34, %v4377_v37  ;;  %v4389_v29 = vshrl.u32 %v15852_v24, %v4377_v37 }
 0x489   : > { %v12147_v9 = vshrl.u32 %v4215_v55, 30  ;;  %v4370_v52 = vor.u32 8388608, %v4369_v36  ;;  %v4391_v55 = vshll.u32 %v15852_v24, %v4376_v1  ;;  %v4392_v35 = vshrl.u32 %v15840_v22, %v4377_v37 }
 0x48a   : > { %v4381_v26 = vor.u32 %v4380_v13, %v4379_v50  ;;  %v4384_v60 = vor.u32 %v4383_v17, %v4382_v6  ;;  %v4387_v21 = vor.u32 %v4386_v4, %v4385_v47  ;;  %v4390_v57 = vor.u32 %v4389_v29, %v4388_v19 }
 0x48b   : > { %16064 = vst [vmem:[#allocation67_spill] sm:$0xff] %v12147_v9  ;;  %v4217_v58 = vshll.u32 %v12147_v9, 30  ;;  %v4262_v54 = vshrl.u32 %v4261_v20, 23  ;;  %vm4394_vm3 = vcmp.lt.s32.totalorder %v4375_v28, 1  ;;  %vm4396_vm8 = vcmp.lt.s32.totalorder %v4375_v28, 3 }
 0x48c   : > { %vm4397_vm10 = vcmp.lt.s32.totalorder %v4375_v28, 4  ;;  %v4393_v50 = vor.u32 %v4392_v35, %v4391_v55  ;;  %v4402_v13 = vsel %vm4394_vm3, %v4381_v26, %v4384_v60  ;;  %v4378_v47 = vshrl.u32 %v15841_v63, %v4377_v37 }
 0x48d   : > { %v12156_v46 = vsub.s32 %v4214_v45, %v4217_v58  ;;  %v4399_v6 = vsel %vm4397_vm10, %v4387_v21, 2102212464  ;;  %v4403_v17 = vsel %vm4397_vm10, %v4390_v57, 920167782  ;;  %vm4395_vm5 = vcmp.lt.s32.totalorder %v4375_v28, 2 }
 0x48e   : > { %v4404_v1 = vsel %vm4396_vm8, %v4387_v21, %v4403_v17  ;;  %v4406_v58 = vsel %vm4394_vm3, %v4384_v60, %v4387_v21  ;;  %v4407_v45 = vsel %vm4397_vm10, %v4393_v50, 1326507024  ;;  %v4410_v20 = vshll.u32 %v4370_v52, 8 }
 0x48f   : > { %v4220_v25 = vsub.s32 0, %v12156_v46  ;;  %v4405_v36 = vsel %vm4395_vm5, %v4402_v13, %v4404_v1  ;;  %v4398_v19 = vsel %vm4394_vm3, %v4378_v47, %v4381_v26  ;;  %v4400_v29 = vsel %vm4396_vm8, %v4384_v60, %v4399_v6 }
 0x490   : > { %v4408_v55 = vsel %vm4396_vm8, %v4390_v57, %v4407_v45  ;;  %v12169_v37 = vmul.u32.u64.low %v4410_v20, %v4405_v36  ;;  %v12170_v15 = vmul.u32.u64.high %v4410_v20, %v4405_v36, %v12169_v37  ;;  %v8132_v17 = vadd.s32 4294967169, %v4262_v54 }
 0x491   : > { %v8129_v4 = vmin.u32 %v4220_v25, %v12156_v46  ;;  %v4409_v35 = vsel %vm4395_vm5, %v4406_v58, %v4408_v55  ;;  %v8126_v13 = vadd.s32 4294967294, %v4118_v10  ;;  %8664 = vcosq.f32 %v12131_v2 }
 0x492   : > { %v12173_v21 = vmul.u32.u64.low %v4410_v20, %v4409_v35  ;;  %v12174_v50 = vmul.u32.u64.high %v4410_v20, %v4409_v35, %v12173_v21  ;;  %v4401_v26 = vsel %vm4395_vm5, %v4398_v19, %v4400_v29  ;;  %v4268_v60 = vadd.s32 1, %v8132_v17 }
 0x493   : > { %v4222_v1 = vclz %v8129_v4  ;;  %v16065_v57 = vand.u32 2147483647, %v12107_v40  ;;  %v16066_v6 = vcvt.s32.f32 %v12103_v18  ;;  %8666 = vsinq.f32 %v12131_v2 }
 0x494   : > { %v16068_v54 = vand.u32 2147483647, %v12115_v14  ;;  %v16069_v10 = vcvt.s32.f32 %v12113_v8  ;;  %v12195_v28 = vsel %vm8119_vm4, 0, %v12135_v16  ;;  %v4420_v40 = vadd.s32 1, %v12170_v15  ;;  %v2469_v14 = vpop.f32.mrf.mxu1 }
 0x495   : > { %v12183_v25 = vmul.f32 %v16066_v6, %v16065_v57  ;;  %v8130_v36 = vadd.s32 4294967294, %v4222_v1  ;;  %v16070_v18 = vand.u32 2147483647, %v12123_v42  ;;  %vm4269_vm5 = vcmp.gt.s32.totalorder %v4268_v60, 0 }
 0x496   : > { %v12190_v47 = vmul.f32 %v16069_v10, %v16068_v54  ;;  %vm8127_vm3 = vcmp.lt.s32.totalorder %v8126_v13, 0  ;;  %v4417_v2 = vmul.u32 %v4410_v20, %v4401_v26  ;;  %vm4419_vm8 = vc.u32 %v12174_v50, %v12169_v37 }
 0x497   : > { %16067 = vst [vmem:[#allocation68_spill] sm:$0xff] %v12183_v25  ;;  %v4265_v58 = vand.u32 8388607, %v16070_v18  ;;  %v4270_v8 = vsel %vm4269_vm5, %v4268_v60, 0  ;;  %v12204_v45 = vadd.s32 %v11926_v48, %v11935_v44  ;;  %vm8131_vm10 = vcmp.lt.s32.totalorder %v8130_v36, 0 }
 0x498   : > { %v4421_v16 = vsel %vm4419_vm8, %v4420_v40, %v12170_v15  ;;  %v4272_v4 = vand.u32 31, %v4270_v8  ;;  %v4030_v19 = vxor.u32 2147483648, %v12190_v47  ;;  %v3918_v55 = vsub.s32 4294967266, %v12195_v28 }
 0x499   : > { %v4422_v20 = vadd.s32 %v4421_v16, %v4417_v2  ;;  %v12210_v35 = vsel %vm8127_vm3, 0, %v8126_v13  ;;  %v4266_v17 = vor.u32 8388608, %v4265_v58  ;;  %v12213_v21 = vadd.f32 %v2469_v14, %v10677_v5 }
 0x49a   : > { %v4273_v1 = vsub.s32 32, %v4272_v4  ;;  %v12215_v48 = vsel %vm8131_vm10, 0, %v8130_v36  ;;  %v4275_v15 = vshll.u32 %v15841_v63, %v4272_v4  ;;  %v4278_v26 = vshll.u32 %v15851_v30, %v4272_v4 }
 0x49b   : > { %16071 = vst [vmem:[#allocation69_spill] sm:$0xff] %v12213_v21  ;;  %v4423_v44 = vadd.s32 536870912, %v4422_v20  ;;  %v4281_v6 = vshll.u32 %v15965_v51, %v4272_v4  ;;  %v4271_v10 = vshrl.u32 %v4270_v8, 5  ;;  %v4284_v5 = vshll.u32 %v15966_v34, %v4272_v4 }
 0x49c   : > { %v4276_v60 = vshrl.u32 %v15851_v30, %v4273_v1  ;;  %v4279_v57 = vshrl.u32 %v15965_v51, %v4273_v1  ;;  %v4282_v13 = vshrl.u32 %v15966_v34, %v4273_v1  ;;  %v4285_v36 = vshrl.u32 %v15852_v24, %v4273_v1 }
 0x49d   : > { %v12223_v54 = vshrl.u32 %v4423_v44, 30  ;;  %vm15678_vm4 = vcmp.lt.s32.totalorder %v11674_v12, 0  ;;  %v12228_v40 = vadd.s32 127, %v3918_v55  ;;  %v4126_v14 = vsub.s32 4294967266, %v12210_v35 }
 0x49e   : > { %v4277_v18 = vor.u32 %v4276_v60, %v4275_v15  ;;  %v4280_v58 = vor.u32 %v4279_v57, %v4278_v26  ;;  %v4283_v2 = vor.u32 %v4282_v13, %v4281_v6  ;;  %v4286_v52 = vor.u32 %v4285_v36, %v4284_v5  ;;  %v12236_v43 = vpop.eup %8664 }
 0x49f   : > { %16072 = vst [vmem:[#allocation70_spill] sm:$0xff] %v12223_v54  ;;  %v4425_v16 = vshll.u32 %v12223_v54, 30  ;;  %v4469_v44 = vand.u32 2139095040, %v12213_v21  ;;  %v4226_v8 = vsub.s32 32, %v12215_v48  ;;  %v4287_v29 = vshll.u32 %v15852_v24, %v4272_v4  ;;  %16073 = vst [vmem:[#allocation71_spill] sm:$0xff] %v12236_v43 }
 0x4a0   : > { %v4288_v31 = vshrl.u32 %v15840_v22, %v4273_v1  ;;  %v4306_v7 = vshll.u32 %v4266_v17, 8  ;;  %vm4290_vm5 = vcmp.lt.s32.totalorder %v4271_v10, 1  ;;  %vm4292_vm3 = vcmp.lt.s32.totalorder %v4271_v10, 3  ;;  %v12240_v15 = vpop.eup %8666 }
 0x4a1   : > { %v12238_v55 = vsub.s32 %v4422_v20, %v4425_v16  ;;  %vm4293_vm8 = vcmp.lt.s32.totalorder %v4271_v10, 4  ;;  %16074 = vst [vmem:[#allocation72_spill] sm:$0xff] %v12240_v15  ;;  %v4298_v57 = vsel %vm4290_vm5, %v4277_v18, %v4280_v58  ;;  %v4274_v4 = vshrl.u32 %v15841_v63, %v4273_v1 }
 0x4a2   : > { %v4289_v26 = vor.u32 %v4288_v31, %v4287_v29  ;;  %v4295_v60 = vsel %vm4293_vm8, %v4283_v2, 2102212464  ;;  %v4299_v6 = vsel %vm4293_vm8, %v4286_v52, 920167782  ;;  %vm4291_vm10 = vcmp.lt.s32.totalorder %v4271_v10, 2 }
 0x4a3   : > { %v4428_v13 = vsub.s32 0, %v12238_v55  ;;  %v4300_v17 = vsel %vm4292_vm3, %v4283_v2, %v4299_v6  ;;  %v4230_v20 = vsub.s32 4294967266, %v12215_v48  ;;  %v4302_v36 = vsel %vm4290_vm5, %v4280_v58, %v4283_v2 }
 0x4a4   : > { %v4301_v5 = vsel %vm4291_vm10, %v4298_v57, %v4300_v17  ;;  %v4303_v16 = vsel %vm4293_vm8, %v4289_v26, 1326507024  ;;  %v4294_v29 = vsel %vm4290_vm5, %v4274_v4, %v4277_v18  ;;  %v4296_v43 = vsel %vm4292_vm3, %v4280_v58, %v4295_v60 }
 0x4a5   : > { %v8137_v31 = vmin.u32 %v4428_v13, %v12238_v55  ;;  %v4304_v15 = vsel %vm4292_vm3, %v4286_v52, %v4303_v16  ;;  %v12254_v23 = vmul.u32.u64.low %v4306_v7, %v4301_v5  ;;  %v12255_v38 = vmul.u32.u64.high %v4306_v7, %v4301_v5, %v12254_v23 }
 0x4a6   : > { %v4305_v1 = vsel %vm4291_vm10, %v4302_v36, %v4304_v15  ;;  %v4470_v6 = vshrl.u32 %v4469_v44, 23  ;;  %v12261_v2 = vsel %vm15678_vm4, %v4030_v19, %v12190_v47  ;;  %v4127_v58 = vadd.s32 127, %v4126_v14 }
 0x4a7   : > { %v4430_v26 = vclz %v8137_v31  ;;  %v12263_v57 = vmul.u32.u64.low %v4306_v7, %v4305_v1  ;;  %v12264_v18 = vmul.u32.u64.high %v4306_v7, %v4305_v1, %v12263_v57  ;;  %v4210_v52 = vadd.s32 %v12084_v56, %v12097_v27 }
 0x4a8   : > { %v4297_v15 = vsel %vm4291_vm10, %v4294_v29, %v4296_v43  ;;  %v8140_v60 = vadd.s32 4294967169, %v4470_v6  ;;  %v3915_v44 = vshll.u32 %v12047_v0, %v12195_v28  ;;  %v16075_v13 = vsub.s32 32, %v12195_v28 }
 0x4a9   : > { %v3920_v47 = vshll.u32 %v12228_v40, 23  ;;  %v12276_v19 = vadd.f32 %v2360_v53, %v10675_v39  ;;  %v4228_v17 = vshrl.u32 %v4210_v52, %v4226_v8  ;;  %v4231_v14 = vadd.s32 127, %v4230_v20 }
 0x4aa   : > { %v3916_v4 = vshrl.u32 %v12204_v45, %v16075_v13  ;;  %v4316_v5 = vadd.s32 1, %v12255_v38  ;;  %v4476_v56 = vadd.s32 1, %v8140_v60  ;;  %v4122_v43 = vsub.s32 32, %v12210_v35 }
 0x4ab   : > { %16076 = vst [vmem:[#allocation73_spill] sm:$0xff] %v12276_v19  ;;  %v8138_v27 = vadd.s32 4294967294, %v4430_v26  ;;  %v4313_v10 = vmul.u32 %v4306_v7, %v4297_v15  ;;  %vm4315_vm5 = vc.u32 %v12264_v18, %v12254_v23  ;;  %v4128_v0 = vshll.u32 %v4127_v58, 23 }
 0x4ac   : > { %v4227_v28 = vshll.u32 %v12156_v46, %v12215_v48  ;;  %v4317_v45 = vsel %vm4315_vm5, %v4316_v5, %v12255_v38  ;;  %vm4477_vm3 = vcmp.gt.s32.totalorder %v4476_v56, 0  ;;  %v4106_v53 = vadd.s32 %v12005_v33, %v12014_v49 }
 0x4ad   : > { %v4318_v40 = vadd.s32 %v4317_v45, %v4313_v10  ;;  %v15665_v8 = vand.u32 2147483647, %v12213_v21  ;;  %v4573_v20 = vand.u32 2139095040, %v12276_v19  ;;  %v12289_v36 = vor.u32 %v3916_v4, %v3915_v44 }
 0x4ae   : > { %v12291_v7 = vor.u32 %v4228_v17, %v4227_v28  ;;  %v4232_v16 = vshll.u32 %v4231_v14, 23  ;;  %v4478_v31 = vsel %vm4477_vm3, %v4476_v56, 0  ;;  %v12293_v29 = vor.u32 4788187, %v3920_v47 }
 0x4af   : > { %vm8139_vm8 = vcmp.lt.s32.totalorder %v8138_v27, 0  ;;  %v4319_v46 = vadd.s32 536870912, %v4318_v40  ;;  %v12297_v48 = vshrl.u32 %v4106_v53, %v4122_v43  ;;  %v12299_v33 = vor.u32 4788187, %v4128_v0 }
 0x4b0   : > { %v4480_v49 = vand.u32 31, %v4478_v31  ;;  %v15666_v1 = vand.u32 2147483647, %v12276_v19  ;;  %v4418_v6 = vadd.s32 %v12169_v37, %v12174_v50  ;;  %v4473_v57 = vand.u32 8388607, %v15665_v8 }
 0x4b1   : > { %v12304_v26 = vshrl.u32 %v4319_v46, 30  ;;  %v4574_v58 = vshrl.u32 %v4573_v20, 23  ;;  %v4233_v52 = vor.u32 4788187, %v4232_v16  ;;  %v4236_v15 = vcvt.s32.f32 %v12291_v7 }
 0x4b2   : > { %v12309_v60 = vsel %vm8139_vm8, 0, %v8138_v27  ;;  %v4481_v44 = vsub.s32 32, %v4480_v49  ;;  %v4479_v4 = vshrl.u32 %v4478_v31, 5  ;;  %v4483_v47 = vshll.u32 %v15841_v63, %v4480_v49 }
 0x4b3   : > { %16077 = vst [vmem:[#allocation74_spill] sm:$0xff] %v12304_v26  ;;  %v4321_v13 = vshll.u32 %v12304_v26, 30  ;;  %v4486_v17 = vshll.u32 %v15851_v30, %v4480_v49  ;;  %v4489_v14 = vshll.u32 %v15965_v51, %v4480_v49  ;;  %v4492_v56 = vshll.u32 %v15966_v34, %v4480_v49 }
 0x4b4   : > { %v4484_v37 = vshrl.u32 %v15851_v30, %v4481_v44  ;;  %v4487_v50 = vshrl.u32 %v15965_v51, %v4481_v44  ;;  %v4490_v5 = vshrl.u32 %v15966_v34, %v4481_v44  ;;  %v4493_v43 = vshrl.u32 %v15852_v24, %v4481_v44 }
 0x4b5   : > { %v4495_v27 = vshll.u32 %v15852_v24, %v4480_v49  ;;  %v8144_v10 = vadd.s32 4294967169, %v4574_v58  ;;  %v4496_v53 = vshrl.u32 %v15840_v22, %v4481_v44  ;;  %v4234_v20 = vand.u32 2147483647, %v4233_v52 }
 0x4b6   : > { %v4485_v0 = vor.u32 %v4484_v37, %v4483_v47  ;;  %v4488_v28 = vor.u32 %v4487_v50, %v4486_v17  ;;  %v4491_v45 = vor.u32 %v4490_v5, %v4489_v14  ;;  %v12322_v7 = vsub.s32 %v4318_v40, %v4321_v13 }
 0x4b7   : > { %v4474_v16 = vor.u32 8388608, %v4473_v57  ;;  %v4494_v31 = vor.u32 %v4493_v43, %v4492_v56  ;;  %v4434_v46 = vsub.s32 32, %v12309_v60  ;;  %v4438_v8 = vsub.s32 4294967266, %v12309_v60 }
 0x4b8   : > { %v4497_v38 = vor.u32 %v4496_v53, %v4495_v27  ;;  %vm4498_vm10 = vcmp.lt.s32.totalorder %v4479_v4, 1  ;;  %vm4500_vm5 = vcmp.lt.s32.totalorder %v4479_v4, 3  ;;  %vm4501_vm3 = vcmp.lt.s32.totalorder %v4479_v4, 4 }
 0x4b9   : > { %v4506_v49 = vsel %vm4498_vm10, %v4485_v0, %v4488_v28  ;;  %v4580_v58 = vadd.s32 1, %v8144_v10  ;;  %v4503_v47 = vsel %vm4501_vm3, %v4491_v45, 2102212464  ;;  %v4507_v17 = vsel %vm4501_vm3, %v4494_v31, 920167782 }
 0x4ba   : > { %v4510_v37 = vsel %vm4498_vm10, %v4488_v28, %v4491_v45  ;;  %v4511_v52 = vsel %vm4501_vm3, %v4497_v38, 1326507024  ;;  %v4324_v40 = vsub.s32 0, %v12322_v7  ;;  %v4482_v57 = vshrl.u32 %v15841_v63, %v4481_v44 }
 0x4bb   : > { %vm4499_vm8 = vcmp.lt.s32.totalorder %v4479_v4, 2  ;;  %v4508_v13 = vsel %vm4500_vm5, %v4491_v45, %v4507_v17  ;;  %v4512_v14 = vsel %vm4500_vm5, %v4494_v31, %v4511_v52  ;;  %v4514_v5 = vshll.u32 %v4474_v16, 8  ;;  %v2473_v52 = vpop.f32.mrf.mxu1 }
 0x4bc   : > { %v4509_v50 = vsel %vm4499_vm8, %v4506_v49, %v4508_v13  ;;  %v4577_v56 = vand.u32 8388607, %v15666_v1  ;;  %v4502_v43 = vsel %vm4498_vm10, %v4482_v57, %v4485_v0  ;;  %v4504_v27 = vsel %vm4500_vm5, %v4488_v28, %v4503_v47 }
 0x4bd   : > { %v4513_v38 = vsel %vm4499_vm8, %v4510_v37, %v4512_v14  ;;  %vm4581_vm3 = vcmp.gt.s32.totalorder %v4580_v58, 0  ;;  %v4439_v10 = vadd.s32 127, %v4438_v8  ;;  %v4436_v17 = vshrl.u32 %v4418_v6, %v4434_v46 }
 0x4be   : > { %v12338_v44 = vmul.u32.u64.low %v4514_v5, %v4513_v38  ;;  %v12339_v53 = vmul.u32.u64.high %v4514_v5, %v4513_v38, %v12338_v44  ;;  %v4582_v45 = vsel %vm4581_vm3, %v4580_v58, 0  ;;  %v8133_v49 = vmin.u32 %v4324_v40, %v12322_v7 }
 0x4bf   : > { %v12342_v31 = vmul.u32.u64.low %v4514_v5, %v4509_v50  ;;  %v12343_v16 = vmul.u32.u64.high %v4514_v5, %v4509_v50, %v12342_v31  ;;  %v3922_v0 = vand.u32 2147483647, %v12293_v29  ;;  %v16078_v28 = vshll.u32 %v12078_v11, %v12210_v35 }
 0x4c0   : > { %v4505_v8 = vsel %vm4499_vm8, %v4502_v43, %v4504_v27  ;;  %v4584_v37 = vand.u32 31, %v4582_v45  ;;  %v4130_v6 = vand.u32 2147483647, %v12299_v33  ;;  %v12355_v46 = vmul.f32 %v4236_v15, %v4234_v20 }
 0x4c1   : > { %v12351_v47 = vor.u32 %v12297_v48, %v16078_v28  ;;  %v4435_v58 = vshll.u32 %v12238_v55, %v12309_v60  ;;  %v4578_v40 = vor.u32 8388608, %v4577_v56  ;;  %v4440_v57 = vshll.u32 %v4439_v10, 23 }
 0x4c2   : > { %vm4523_vm10 = vc.u32 %v12339_v53, %v12342_v31  ;;  %v4585_v13 = vsub.s32 32, %v4584_v37  ;;  %v12362_v11 = vadd.f32 %v2473_v52, %v10675_v39  ;;  %v4326_v48 = vclz %v8133_v49 }
 0x4c3   : > { %v4437_v35 = vor.u32 %v4436_v17, %v4435_v58  ;;  %v4521_v4 = vmul.u32 %v4514_v5, %v4505_v8  ;;  %v4524_v50 = vadd.s32 1, %v12343_v16  ;;  %v4583_v14 = vshrl.u32 %v4582_v45, 5 }
 0x4c4   : > { %16079 = vst [vmem:[#allocation75_spill] sm:$0xff] %v12362_v11  ;;  %v4587_v15 = vshll.u32 %v15841_v63, %v4584_v37  ;;  %v4588_v20 = vshrl.u32 %v15851_v30, %v4585_v13  ;;  %v4591_v55 = vshrl.u32 %v15965_v51, %v4585_v13  ;;  %v4590_v56 = vshll.u32 %v15851_v30, %v4584_v37 }
 0x4c5   : > { %v4525_v60 = vsel %vm4523_vm10, %v4524_v50, %v12343_v16  ;;  %v4593_v43 = vshll.u32 %v15965_v51, %v4584_v37  ;;  %v4594_v27 = vshrl.u32 %v15966_v34, %v4585_v13  ;;  %v4441_v38 = vor.u32 4788187, %v4440_v57 }
 0x4c6   : > { %v4526_v10 = vadd.s32 %v4525_v60, %v4521_v4  ;;  %v4589_v5 = vor.u32 %v4588_v20, %v4587_v15  ;;  %v12372_v44 = vshll.u32 %v4578_v40, 8  ;;  %v4592_v45 = vor.u32 %v4591_v55, %v4590_v56 }
 0x4c7   : > { %v4595_v17 = vor.u32 %v4594_v27, %v4593_v43  ;;  %v4596_v49 = vshll.u32 %v15966_v34, %v4584_v37  ;;  %v4597_v52 = vshrl.u32 %v15852_v24, %v4585_v13  ;;  %v8134_v28 = vadd.s32 4294967294, %v4326_v48 }
 0x4c8   : > { %v4527_v8 = vadd.s32 536870912, %v4526_v10  ;;  %v4599_v16 = vshll.u32 %v15852_v24, %v4584_v37  ;;  %v4600_v58 = vshrl.u32 %v15840_v22, %v4585_v13  ;;  %v4444_v50 = vcvt.s32.f32 %v4437_v35 }
 0x4c9   : > { %v4598_v1 = vor.u32 %v4597_v52, %v4596_v49  ;;  %vm4602_vm5 = vcmp.lt.s32.totalorder %v4583_v14, 1  ;;  %v4781_v57 = vand.u32 2139095040, %v12362_v11  ;;  %v4586_v40 = vshrl.u32 %v15841_v63, %v4585_v13 }
 0x4ca   : > { %v4601_v4 = vor.u32 %v4600_v58, %v4599_v16  ;;  %vm4604_vm8 = vcmp.lt.s32.totalorder %v4583_v14, 3  ;;  %vm4605_vm3 = vcmp.lt.s32.totalorder %v4583_v14, 4  ;;  %vm15711_vm10 = vcmp.lt.s32.totalorder %v11956_v3, 0 }
 0x4cb   : > { %v12381_v15 = vshrl.u32 %v4527_v8, 30  ;;  %v4607_v48 = vsel %vm4605_vm3, %v4595_v17, 2102212464  ;;  %v4610_v20 = vsel %vm4602_vm5, %v4589_v5, %v4592_v45  ;;  %v4611_v37 = vsel %vm4605_vm3, %v4598_v1, 920167782 }
 0x4cc   : > { %vm8135_vm11 = vcmp.lt.s32.totalorder %v8134_v28, 0  ;;  %vm4603_vm1 = vcmp.lt.s32.totalorder %v4583_v14, 2  ;;  %v4612_v35 = vsel %vm4604_vm8, %v4595_v17, %v4611_v37  ;;  %v4614_v55 = vsel %vm4602_vm5, %v4592_v45, %v4595_v17 }
 0x4cd   : > { %16080 = vst [vmem:[#allocation76_spill] sm:$0xff] %v12381_v15  ;;  %v4442_v60 = vand.u32 2147483647, %v4441_v38  ;;  %v4606_v13 = vsel %vm4602_vm5, %v4586_v40, %v4589_v5  ;;  %v4613_v56 = vsel %vm4603_vm1, %v4610_v20, %v4612_v35  ;;  %v4615_v43 = vsel %vm4605_vm3, %v4601_v4, 1326507024 }
 0x4ce   : > { %v4608_v27 = vsel %vm4604_vm8, %v4592_v45, %v4607_v48  ;;  %v4616_v49 = vsel %vm4604_vm8, %v4598_v1, %v4615_v43  ;;  %v12391_v52 = vmul.u32.u64.low %v12372_v44, %v4613_v56  ;;  %v12392_v8 = vmul.u32.u64.high %v12372_v44, %v4613_v56, %v12391_v52 }
 0x4cf   : > { %v16081_v16 = vand.u32 2147483647, %v11674_v12  ;;  %v16082_v58 = vmov 0  ;;  %v4329_v38 = vsel %vm8135_vm11, 0, %v8134_v28  ;;  %v4529_v5 = vshll.u32 %v12381_v15, 30  ;;  %v2362_v28 = vpop.f32.mrf.mxu0 }
 0x4d0   : > { %v4617_v17 = vsel %vm4603_vm1, %v4614_v55, %v4616_v49  ;;  %v4782_v40 = vshrl.u32 %v4781_v57, 23  ;;  %v3924_v45 = vcvt.s32.f32 %v12289_v36  ;;  %v16085_v1 = vand.u32 2147483647, %v11956_v3 }
 0x4d1   : > { %vm12397_vm12 = vcmp.le.f32.partialorder %v16081_v16, 0.7853982  ;;  %v16086_v4 = vmov 0  ;;  %v4238_v48 = vxor.u32 2147483648, %v12355_v46  ;;  %v4132_v35 = vcvt.s32.f32 %v12351_v47 }
 0x4d2   : > { %v16083_v58 = vsel %vm12397_vm12, 4294967295, %v16082_v58  ;;  %vm12406_vm5 = vcmp.le.f32.partialorder %v16085_v1, 0.7853982  ;;  %v12412_v20 = vmul.u32.u64.low %v12372_v44, %v4617_v17  ;;  %v12413_v37 = vmul.u32.u64.high %v12372_v44, %v4617_v17, %v12412_v20 }
 0x4d3   : > { %16084 = vst [vmem:[#allocation77_spill] sm:$0xff] %v16083_v58  ;;  %v16087_v4 = vsel %vm12406_vm5, 4294967295, %v16086_v4  ;;  %v4445_v56 = vmul.f32 %v4444_v50, %v4442_v60  ;;  %v4609_v57 = vsel %vm4603_vm1, %v4606_v13, %v4608_v27  ;;  %v8152_v55 = vadd.s32 4294967169, %v4782_v40 }
 0x4d4   : > { %16088 = vst [vmem:[#allocation78_spill] sm:$0xff] %v16087_v4  ;;  %v12419_v36 = vmul.f32 %v3924_v45, %v3922_v0  ;;  %v4330_v43 = vsub.s32 32, %v4329_v38  ;;  %v4334_v49 = vsub.s32 4294967266, %v4329_v38  ;;  %v4628_v16 = vadd.s32 1, %v12392_v8 }
 0x4d5   : > { %v12424_v1 = vmul.f32 %v4132_v35, %v4130_v6  ;;  %v12426_v17 = vsub.s32 %v4526_v10, %v4529_v5  ;;  %v4788_v20 = vadd.s32 1, %v8152_v55  ;;  %v12429_v47 = vadd.f32 %v2362_v28, %v10675_v39 }
 0x4d6   : > { %16089 = vst [vmem:[#allocation79_spill] sm:$0xff] %v12419_v36  ;;  %v4239_v29 = vsel %vm15711_vm10, %v4238_v48, %v12355_v46  ;;  %v4314_v0 = vadd.s32 %v12254_v23, %v12264_v18  ;;  %v4625_v14 = vmul.u32 %v12372_v44, %v4609_v57  ;;  %vm4627_vm11 = vc.u32 %v12413_v37, %v12391_v52 }
 0x4d7   : > { %16090 = vst [vmem:[#allocation80_spill] sm:$0xff] %v12424_v1  ;;  %v4446_v33 = vxor.u32 2147483648, %v4445_v56  ;;  %v4629_v6 = vsel %vm4627_vm11, %v4628_v16, %v12392_v8  ;;  %v15670_v10 = vand.u32 2147483647, %v12362_v11  ;;  %vm4789_vm1 = vcmp.gt.s32.totalorder %v4788_v20, 0 }
 0x4d8   : > { %v4332_v50 = vshrl.u32 %v4314_v0, %v4330_v43  ;;  %v4335_v60 = vadd.s32 127, %v4334_v49  ;;  %v4630_v13 = vadd.s32 %v4629_v6, %v4625_v14  ;;  %v4790_v27 = vsel %vm4789_vm1, %v4788_v20, 0 }
 0x4d9   : > { %vm15685_vm8 = vcmp.lt.s32.totalorder %v12024_v32, 0  ;;  %v4532_v46 = vsub.s32 0, %v12426_v17  ;;  %v4792_v23 = vand.u32 31, %v4790_v27  ;;  %v4677_v18 = vand.u32 2139095040, %v12429_v47 }
 0x4da   : > { %v12448_v44 = vsel %vm12397_vm12, %v11674_v12, %v12261_v2  ;;  %v4331_v5 = vshll.u32 %v12322_v7, %v4329_v38  ;;  %v4631_v40 = vadd.s32 536870912, %v4630_v13  ;;  %v4242_v48 = vsel %vm12406_vm5, %v11956_v3, %v4239_v29 }
 0x4db   : > { %16091 = vst [vmem:[#allocation81_spill] sm:$0xff] %v12448_v44  ;;  %v12458_v28 = vsel %vm15685_vm8, %v4446_v33, %v4445_v56  ;;  %v4793_v35 = vsub.s32 32, %v4792_v23  ;;  %v4336_v2 = vshll.u32 %v4335_v60, 23  ;;  %v4785_v7 = vand.u32 8388607, %v15670_v10  ;;  %v2475_v60 = vpop.f32.mrf.mxu1 }
 0x4dc   : > { %v12460_v57 = vor.u32 %v4332_v50, %v4331_v5  ;;  %v12462_v55 = vshrl.u32 %v4631_v40, 30  ;;  %v8141_v38 = vmin.u32 %v4532_v46, %v12426_v17  ;;  %v4678_v16 = vshrl.u32 %v4677_v18, 23 }
 0x4dd   : > { %v4796_v43 = vshrl.u32 %v15851_v30, %v4793_v35  ;;  %v4799_v49 = vshrl.u32 %v15965_v51, %v4793_v35  ;;  %v4795_v56 = vshll.u32 %v15841_v63, %v4792_v23  ;;  %v4798_v29 = vshll.u32 %v15851_v30, %v4792_v23 }
 0x4de   : > { %16092 = vst [vmem:[#allocation82_spill] sm:$0xff] %v12462_v55  ;;  %v4633_v20 = vshll.u32 %v12462_v55, 30  ;;  %v4802_v0 = vshrl.u32 %v15966_v34, %v4793_v35  ;;  %v4791_v14 = vshrl.u32 %v4790_v27, 5  ;;  %v4801_v33 = vshll.u32 %v15965_v51, %v4792_v23 }
 0x4df   : > { %v4804_v6 = vshll.u32 %v15966_v34, %v4792_v23  ;;  %v4805_v50 = vshrl.u32 %v15852_v24, %v4793_v35  ;;  %v4797_v5 = vor.u32 %v4796_v43, %v4795_v56  ;;  %v4800_v18 = vor.u32 %v4799_v49, %v4798_v29 }
 0x4e0   : > { %v12476_v46 = vsub.s32 %v4630_v13, %v4633_v20  ;;  %v15680_v40 = vand.u32 2147483647, %v12429_v47  ;;  %v4803_v45 = vor.u32 %v4802_v0, %v4801_v33  ;;  %v4807_v10 = vshll.u32 %v15852_v24, %v4792_v23 }
 0x4e1   : > { %v4806_v8 = vor.u32 %v4805_v50, %v4804_v6  ;;  %v4808_v58 = vshrl.u32 %v15840_v22, %v4793_v35  ;;  %v12481_v27 = vor.u32 4788187, %v4336_v2  ;;  %v4786_v62 = vor.u32 8388608, %v4785_v7 }
 0x4e2   : > { %v4636_v12 = vsub.s32 0, %v12476_v46  ;;  %v12485_v41 = vadd.f32 %v2475_v60, %v10675_v39  ;;  %v16093_v13 = vand.u32 2147483647, %v12024_v32  ;;  %v16094_v43 = vmov 0 }
 0x4e3   : > { %v4534_v49 = vclz %v8141_v38  ;;  %v4809_v20 = vor.u32 %v4808_v58, %v4807_v10  ;;  %vm4810_vm11 = vcmp.lt.s32.totalorder %v4791_v14, 1  ;;  %v8148_v23 = vadd.s32 4294967169, %v4678_v16 }
 0x4e4   : > { %vm12489_vm3 = vcmp.le.f32.partialorder %v16093_v13, 0.7853982  ;;  %vm4812_vm1 = vcmp.lt.s32.totalorder %v4791_v14, 3  ;;  %vm4813_vm4 = vcmp.lt.s32.totalorder %v4791_v14, 4  ;;  %v4818_v2 = vsel %vm4810_vm11, %v4797_v5, %v4800_v18 }
 0x4e5   : > { %v16095_v43 = vsel %vm12489_vm3, 4294967295, %v16094_v43  ;;  %v4681_v7 = vand.u32 8388607, %v15680_v40  ;;  %v4815_v56 = vsel %vm4813_vm4, %v4803_v45, 2102212464  ;;  %v4822_v29 = vsel %vm4810_vm11, %v4800_v18, %v4803_v45 }
 0x4e6   : > { %16096 = vst [vmem:[#allocation83_spill] sm:$0xff] %v16095_v43  ;;  %v4819_v39 = vsel %vm4813_vm4, %v4806_v8, 920167782  ;;  %v4823_v0 = vsel %vm4813_vm4, %v4809_v20, 1326507024  ;;  %v8145_v33 = vmin.u32 %v4636_v12, %v12476_v46  ;;  %v4794_v6 = vshrl.u32 %v15841_v63, %v4793_v35  ;;  %v2366_v43 = vpop.f32.mrf.mxu0 }
 0x4e7   : > { %vm4811_vm9 = vcmp.lt.s32.totalorder %v4791_v14, 2  ;;  %v4820_v58 = vsel %vm4812_vm1, %v4803_v45, %v4819_v39  ;;  %v4824_v38 = vsel %vm4812_vm1, %v4806_v8, %v4823_v0  ;;  %v4826_v16 = vshll.u32 %v4786_v62, 8 }
 0x4e8   : > { %v4821_v10 = vsel %vm4811_vm9, %v4818_v2, %v4820_v58  ;;  %v4684_v50 = vadd.s32 1, %v8148_v23  ;;  %v8142_v60 = vadd.s32 4294967294, %v4534_v49  ;;  %v4814_v13 = vsel %vm4810_vm11, %v4794_v6, %v4797_v5 }
 0x4e9   : > { %v4816_v40 = vsel %vm4812_vm1, %v4800_v18, %v4815_v56  ;;  %v4825_v20 = vsel %vm4811_vm9, %v4822_v29, %v4824_v38  ;;  %v12508_v35 = vmul.u32.u64.low %v4826_v16, %v4821_v10  ;;  %v12509_v4 = vmul.u32.u64.high %v4826_v16, %v4821_v10, %v12508_v35 }
 0x4ea   : > { %v12505_v54 = vmul.u32.u64.low %v4826_v16, %v4825_v20  ;;  %v12506_v12 = vmul.u32.u64.high %v4826_v16, %v4825_v20, %v12505_v54  ;;  %8668 = vcosq.f32 %v4242_v48  ;;  %v4638_v45 = vclz %v8145_v33 }
 0x4eb   : > { %v4682_v2 = vor.u32 8388608, %v4681_v7  ;;  %vm4685_vm4 = vcmp.gt.s32.totalorder %v4684_v50, 0  ;;  %8670 = vsinq.f32 %v4242_v48  ;;  %v4817_v62 = vsel %vm4811_vm9, %v4814_v13, %v4816_v40 }
 0x4ec   : > { %v4686_v8 = vsel %vm4685_vm4, %v4684_v50, 0  ;;  %v4885_v5 = vand.u32 2139095040, %v12485_v41  ;;  %v12518_v18 = vsel %vm12489_vm3, %v12024_v32, %v12458_v28  ;;  %v12523_v49 = vadd.s32 %v12342_v31, %v12339_v53 }
 0x4ed   : > { %vm8143_vm11 = vcmp.lt.s32.totalorder %v8142_v60, 0  ;;  %vm4835_vm9 = vc.u32 %v12506_v12, %v12508_v35  ;;  %v4836_v14 = vadd.s32 1, %v12509_v4  ;;  %v4688_v40 = vand.u32 31, %v4686_v8 }
 0x4ee   : > { %v8146_v23 = vadd.s32 4294967294, %v4638_v45  ;;  %v4833_v7 = vmul.u32 %v4826_v16, %v4817_v62  ;;  %v12529_v56 = vshll.u32 %v4682_v2, 8  ;;  %v15684_v28 = vand.u32 2147483647, %v12485_v41 }
 0x4ef   : > { %v12532_v39 = vsel %vm8143_vm11, 0, %v8142_v60  ;;  %v4837_v53 = vsel %vm4835_vm9, %v4836_v14, %v12509_v4  ;;  %v4689_v31 = vsub.s32 32, %v4688_v40  ;;  %v4886_v29 = vshrl.u32 %v4885_v5, 23 }
 0x4f0   : > { %v4838_v0 = vadd.s32 %v4837_v53, %v4833_v7  ;;  %v4687_v33 = vshrl.u32 %v4686_v8, 5  ;;  %v4691_v6 = vshll.u32 %v15841_v63, %v4688_v40  ;;  %v4694_v58 = vshll.u32 %v15851_v30, %v4688_v40 }
 0x4f1   : > { %v4692_v10 = vshrl.u32 %v15851_v30, %v4689_v31  ;;  %v4695_v38 = vshrl.u32 %v15965_v51, %v4689_v31  ;;  %v4697_v16 = vshll.u32 %v15965_v51, %v4688_v40  ;;  %v4698_v50 = vshrl.u32 %v15966_v34, %v4689_v31 }
 0x4f2   : > { %vm8147_vm1 = vcmp.lt.s32.totalorder %v8146_v23, 0  ;;  %v4839_v60 = vadd.s32 536870912, %v4838_v0  ;;  %v4700_v4 = vshll.u32 %v15966_v34, %v4688_v40  ;;  %v12544_v13 = vand.u32 8388607, %v15684_v28 }
 0x4f3   : > { %v4693_v20 = vor.u32 %v4692_v10, %v4691_v6  ;;  %v4696_v45 = vor.u32 %v4695_v38, %v4694_v58  ;;  %v4699_v2 = vor.u32 %v4698_v50, %v4697_v16  ;;  %v4701_v62 = vshrl.u32 %v15852_v24, %v4689_v31 }
 0x4f4   : > { %v4538_v8 = vsub.s32 32, %v12532_v39  ;;  %v12548_v5 = vshrl.u32 %v4839_v60, 30  ;;  %v4703_v14 = vshll.u32 %v15852_v24, %v4688_v40  ;;  %v4704_v7 = vshrl.u32 %v15840_v22, %v4689_v31 }
 0x4f5   : > { %v12552_v53 = vsel %vm8147_vm1, 0, %v8146_v23  ;;  %v4702_v54 = vor.u32 %v4701_v62, %v4700_v4  ;;  %vm4706_vm4 = vcmp.lt.s32.totalorder %v4687_v33, 1  ;;  %v8156_v48 = vadd.s32 4294967169, %v4886_v29 }
 0x4f6   : > { %16097 = vst [vmem:[#allocation84_spill] sm:$0xff] %v12548_v5  ;;  %v4841_v28 = vshll.u32 %v12548_v5, 30  ;;  %v4705_v6 = vor.u32 %v4704_v7, %v4703_v14  ;;  %vm4707_vm11 = vcmp.lt.s32.totalorder %v4687_v33, 2  ;;  %vm4709_vm9 = vcmp.lt.s32.totalorder %v4687_v33, 4 }
 0x4f7   : > { %v12555_v58 = vpop.eup %8668  ;;  %vm4708_vm8 = vcmp.lt.s32.totalorder %v4687_v33, 3  ;;  %v4711_v10 = vsel %vm4709_vm9, %v4699_v2, 2102212464  ;;  %v4714_v38 = vsel %vm4706_vm4, %v4693_v20, %v4696_v45  ;;  %v4715_v16 = vsel %vm4709_vm9, %v4702_v54, 920167782 }
 0x4f8   : > { %16098 = vst [vmem:[#allocation85_spill] sm:$0xff] %v12555_v58  ;;  %v12558_v40 = vpop.eup %8670  ;;  %v12560_v50 = vsub.s32 %v4838_v0, %v4841_v28  ;;  %v4690_v23 = vshrl.u32 %v15841_v63, %v4689_v31  ;;  %v4716_v29 = vsel %vm4708_vm8, %v4699_v2, %v4715_v16  ;;  %v4718_v60 = vsel %vm4706_vm4, %v4696_v45, %v4699_v2 }
 0x4f9   : > { %16099 = vst [vmem:[#allocation86_spill] sm:$0xff] %v12558_v40  ;;  %v4646_v4 = vsub.s32 4294967266, %v12552_v53  ;;  %v4717_v62 = vsel %vm4707_vm11, %v4714_v38, %v4716_v29  ;;  %v4719_v14 = vsel %vm4709_vm9, %v4705_v6, 1326507024  ;;  %v4892_v7 = vadd.s32 1, %v8156_v48 }
 0x4fa   : > { %v4844_v32 = vsub.s32 0, %v12560_v50  ;;  %v4710_v58 = vsel %vm4706_vm4, %v4690_v23, %v4693_v20  ;;  %v4712_v28 = vsel %vm4708_vm8, %v4696_v45, %v4711_v10  ;;  %v4720_v0 = vsel %vm4708_vm8, %v4702_v54, %v4719_v14  ;;  %v16100_v20 = vld [vmem:[#allocation35_spill] sm:$0xff] }
 0x4fb   : > { %v4542_v31 = vsub.s32 4294967266, %v12532_v39  ;;  %v4721_v16 = vsel %vm4707_vm11, %v4718_v60, %v4720_v0  ;;  %v12574_v2 = vmul.u32.u64.low %v12529_v56, %v4717_v62  ;;  %v12575_v40 = vmul.u32.u64.high %v12529_v56, %v4717_v62, %v12574_v2 }
 0x4fc   : > { %v8153_v48 = vmin.u32 %v4844_v32, %v12560_v50  ;;  %v12580_v6 = vmul.u32.u64.low %v12529_v56, %v4721_v16  ;;  %v12581_v38 = vmul.u32.u64.high %v12529_v56, %v4721_v16, %v12580_v6  ;;  %v12584_v23 = vadd.f32 %v2366_v43, %v16100_v20 }
 0x4fd   : > { %v4626_v45 = vadd.s32 %v12391_v52, %v12413_v37  ;;  %v4713_v10 = vsel %vm4707_vm11, %v4710_v58, %v4712_v28  ;;  %vm4893_vm8 = vcmp.gt.s32.totalorder %v4892_v7, 0  ;;  %v12592_v29 = vshrl.u32 %v12523_v49, %v4538_v8 }
 0x4fe   : > { %v4647_v32 = vadd.s32 127, %v4646_v4  ;;  %v4846_v60 = vclz %v8153_v48  ;;  %v4894_v62 = vsel %vm4893_vm8, %v4892_v7, 0  ;;  %v12594_v14 = vadd.s32 127, %v4542_v31 }
 0x4ff   : > { %v4732_v43 = vadd.s32 1, %v12575_v40  ;;  %v4890_v0 = vor.u32 8388608, %v12544_v13  ;;  %v4896_v16 = vand.u32 31, %v4894_v62  ;;  %v4642_v6 = vsub.s32 32, %v12552_v53 }
 0x500   : > { %v8154_v54 = vadd.s32 4294967294, %v4846_v60  ;;  %v4729_v52 = vmul.u32 %v12529_v56, %v4713_v10  ;;  %vm4731_vm1 = vc.u32 %v12581_v38, %v12574_v2  ;;  %v4643_v37 = vshll.u32 %v12476_v46, %v12552_v53 }
 0x501   : > { %v4834_v49 = vadd.s32 %v12508_v35, %v12506_v12  ;;  %v4733_v33 = vsel %vm4731_vm1, %v4732_v43, %v12575_v40  ;;  %v4897_v8 = vsub.s32 32, %v4896_v16  ;;  %v4648_v58 = vshll.u32 %v4647_v32, 23 }
 0x502   : > { %vm8155_vm4 = vcmp.lt.s32.totalorder %v8154_v54, 0  ;;  %v4734_v13 = vadd.s32 %v4733_v33, %v4729_v52  ;;  %v4989_v4 = vand.u32 2139095040, %v12584_v23  ;;  %v4895_v56 = vshrl.u32 %v4894_v62, 5 }
 0x503   : > { %v12608_v7 = vsel %vm8155_vm4, 0, %v8154_v54  ;;  %v4900_v28 = vshrl.u32 %v15851_v30, %v4897_v8  ;;  %v4903_v31 = vshrl.u32 %v15965_v51, %v4897_v8  ;;  %v4899_v46 = vshll.u32 %v15841_v63, %v4896_v16 }
 0x504   : > { %v4735_v48 = vadd.s32 536870912, %v4734_v13  ;;  %v4902_v12 = vshll.u32 %v15851_v30, %v4896_v16  ;;  %v4905_v35 = vshll.u32 %v15965_v51, %v4896_v16  ;;  %v4854_v53 = vsub.s32 4294967266, %v12608_v7 }
 0x505   : > { %v4906_v40 = vshrl.u32 %v15966_v34, %v4897_v8  ;;  %v4908_v10 = vshll.u32 %v15966_v34, %v4896_v16  ;;  %v4909_v54 = vshrl.u32 %v15852_v24, %v4897_v8  ;;  %v4850_v32 = vsub.s32 32, %v12608_v7 }
 0x506   : > { %v12620_v60 = vshrl.u32 %v4735_v48, 30  ;;  %v4901_v62 = vor.u32 %v4900_v28, %v4899_v46  ;;  %v4904_v43 = vor.u32 %v4903_v31, %v4902_v12  ;;  %v4911_v3 = vshll.u32 %v15852_v24, %v4896_v16 }
 0x507   : > { %v4907_v52 = vor.u32 %v4906_v40, %v4905_v35  ;;  %v4910_v33 = vor.u32 %v4909_v54, %v4908_v10  ;;  %v4912_v1 = vshrl.u32 %v15840_v22, %v4897_v8  ;;  %v4644_v36 = vshrl.u32 %v4626_v45, %v4642_v6 }
 0x508   : > { %v4649_v44 = vor.u32 4788187, %v4648_v58  ;;  %v4737_v25 = vshll.u32 %v12620_v60, 30  ;;  %v4930_v9 = vshll.u32 %v4890_v0, 8  ;;  %v4855_v15 = vadd.s32 127, %v4854_v53 }
 0x509   : > { %v4898_v61 = vshrl.u32 %v15841_v63, %v4897_v8  ;;  %v4913_v59 = vor.u32 %v4912_v1, %v4911_v3  ;;  %v4990_v26 = vshrl.u32 %v4989_v4, 23  ;;  %v4852_v48 = vshrl.u32 %v4834_v49, %v4850_v32 }
 0x50a   : > { %v12626_v5 = vsub.s32 %v4734_v13, %v4737_v25  ;;  %vm4914_vm11 = vcmp.lt.s32.totalorder %v4895_v56, 1  ;;  %vm4917_vm9 = vcmp.lt.s32.totalorder %v4895_v56, 4  ;;  %vm4916_vm8 = vcmp.lt.s32.totalorder %v4895_v56, 3 }
 0x50b   : > { %v4919_v28 = vsel %vm4917_vm9, %v4907_v52, 2102212464  ;;  %v4922_v16 = vsel %vm4914_vm11, %v4901_v62, %v4904_v43  ;;  %v4923_v31 = vsel %vm4917_vm9, %v4910_v33, 920167782  ;;  %vm4915_vm1 = vcmp.lt.s32.totalorder %v4895_v56, 2 }
 0x50c   : > { %v4740_v45 = vsub.s32 0, %v12626_v5  ;;  %v4924_v6 = vsel %vm4916_vm8, %v4907_v52, %v4923_v31  ;;  %v4926_v58 = vsel %vm4914_vm11, %v4904_v43, %v4907_v52  ;;  %v4856_v0 = vshll.u32 %v4855_v15, 23 }
 0x50d   : > { %v4925_v46 = vsel %vm4915_vm1, %v4922_v16, %v4924_v6  ;;  %v4927_v8 = vsel %vm4917_vm9, %v4913_v59, 1326507024  ;;  %v8160_v3 = vadd.s32 4294967169, %v4990_v26  ;;  %v4918_v25 = vsel %vm4914_vm11, %v4898_v61, %v4901_v62 }
 0x50e   : > { %v8149_v1 = vmin.u32 %v4740_v45, %v12626_v5  ;;  %v4920_v49 = vsel %vm4916_vm8, %v4904_v43, %v4919_v28  ;;  %v4928_v13 = vsel %vm4916_vm8, %v4910_v33, %v4927_v8  ;;  %v4645_v40 = vor.u32 %v4644_v36, %v4643_v37 }
 0x50f   : > { %v4929_v4 = vsel %vm4915_vm1, %v4926_v58, %v4928_v13  ;;  %v12632_v12 = vmul.u32.u64.low %v4930_v9, %v4925_v46  ;;  %v12633_v35 = vmul.u32.u64.high %v4930_v9, %v4925_v46, %v12632_v12  ;;  %v4996_v53 = vadd.s32 1, %v8160_v3 }
 0x510   : > { %v4742_v10 = vclz %v8149_v1  ;;  %v12636_v54 = vmul.u32.u64.low %v4930_v9, %v4929_v4  ;;  %v12637_v15 = vmul.u32.u64.high %v4930_v9, %v4929_v4, %v12636_v54  ;;  %v4544_v59 = vshll.u32 %v12594_v14, 23 }
 0x511   : > { %v4851_v26 = vshll.u32 %v12560_v50, %v12608_v7  ;;  %v4921_v61 = vsel %vm4915_vm1, %v4918_v25, %v4920_v49  ;;  %vm4997_vm4 = vcmp.gt.s32.totalorder %v4996_v53, 0  ;;  %v4650_v32 = vand.u32 2147483647, %v4649_v44  ;;  %v2479_v50 = vpop.f32.mrf.mxu1 }
 0x512   : > { %v8150_v62 = vadd.s32 4294967294, %v4742_v10  ;;  %v15718_v43 = vand.u32 2147483647, %v12584_v23  ;;  %v4998_v52 = vsel %vm4997_vm4, %v4996_v53, 0  ;;  %v4857_v28 = vor.u32 4788187, %v4856_v0 }
 0x513   : > { %v4853_v33 = vor.u32 %v4852_v48, %v4851_v26  ;;  %v4940_v36 = vadd.s32 1, %v12633_v35  ;;  %v5000_v37 = vand.u32 31, %v4998_v52  ;;  %v4652_v16 = vcvt.s32.f32 %v4645_v40 }
 0x514   : > { %vm8151_vm11 = vcmp.lt.s32.totalorder %v8150_v62, 0  ;;  %v4937_v31 = vmul.u32 %v4930_v9, %v4921_v61  ;;  %vm4939_vm9 = vc.u32 %v12637_v15, %v12632_v12  ;;  %v16101_v14 = vshll.u32 %v12426_v17, %v12532_v39 }
 0x515   : > { %v12653_v7 = vor.u32 4788187, %v4544_v59  ;;  %v4941_v56 = vsel %vm4939_vm9, %v4940_v36, %v12633_v35  ;;  %v5001_v48 = vsub.s32 32, %v5000_v37  ;;  %v12656_v45 = vmul.f32 %v4652_v16, %v4650_v32 }
 0x516   : > { %v12651_v44 = vor.u32 %v12592_v29, %v16101_v14  ;;  %v12658_v6 = vsel %vm8151_vm11, 0, %v8150_v62  ;;  %v4942_v9 = vadd.s32 %v4941_v56, %v4937_v31  ;;  %v4993_v58 = vand.u32 8388607, %v15718_v43 }
 0x517   : > { %v4858_v0 = vand.u32 2147483647, %v4857_v28  ;;  %v4860_v46 = vcvt.s32.f32 %v4853_v33  ;;  %v5004_v17 = vshrl.u32 %v15851_v30, %v5001_v48  ;;  %v12664_v39 = vadd.f32 %v2479_v50, %v16100_v20 }
 0x518   : > { %v4943_v29 = vadd.s32 536870912, %v4942_v9  ;;  %v5003_v8 = vshll.u32 %v15841_v63, %v5000_v37  ;;  %v5006_v3 = vshll.u32 %v15851_v30, %v5000_v37  ;;  %v5007_v1 = vshrl.u32 %v15965_v51, %v5001_v48 }
 0x519   : > { %v4750_v25 = vsub.s32 4294967266, %v12658_v6  ;;  %v4999_v49 = vshrl.u32 %v4998_v52, 5  ;;  %v5009_v13 = vshll.u32 %v15965_v51, %v5000_v37  ;;  %v5010_v4 = vshrl.u32 %v15966_v34, %v5001_v48 }
 0x51a   : > { %v12672_v35 = vshrl.u32 %v4943_v29, 30  ;;  %v5005_v53 = vor.u32 %v5004_v17, %v5003_v8  ;;  %v5008_v40 = vor.u32 %v5007_v1, %v5006_v3  ;;  %v5012_v10 = vshll.u32 %v15966_v34, %v5000_v37 }
 0x51b   : > { %v5011_v54 = vor.u32 %v5010_v4, %v5009_v13  ;;  %v5013_v59 = vshrl.u32 %v15852_v24, %v5001_v48  ;;  %v5015_v26 = vshll.u32 %v15852_v24, %v5000_v37  ;;  %v5016_v61 = vshrl.u32 %v15840_v22, %v5001_v48 }
 0x51c   : > { %v12678_v32 = vmul.f32 %v4860_v46, %v4858_v0  ;;  %v4730_v62 = vadd.s32 %v12574_v2, %v12581_v38  ;;  %v4945_v52 = vshll.u32 %v12672_v35, 30  ;;  %v4994_v33 = vor.u32 8388608, %v4993_v58 }
 0x51d   : > { %v4751_v28 = vadd.s32 127, %v4750_v25  ;;  %v5014_v36 = vor.u32 %v5013_v59, %v5012_v10  ;;  %v5017_v16 = vor.u32 %v5016_v61, %v5015_v26  ;;  %v5197_v31 = vand.u32 2139095040, %v12664_v39 }
 0x51e   : > { %v4746_v50 = vsub.s32 32, %v12658_v6  ;;  %v12685_v14 = vsub.s32 %v4942_v9, %v4945_v52  ;;  %vm5018_vm8 = vcmp.lt.s32.totalorder %v4999_v49, 1  ;;  %vm5021_vm1 = vcmp.lt.s32.totalorder %v4999_v49, 4 }
 0x51f   : > { %vm5020_vm4 = vcmp.lt.s32.totalorder %v4999_v49, 3  ;;  %v5023_v37 = vsel %vm5021_vm1, %v5011_v54, 2102212464  ;;  %v5026_v56 = vsel %vm5018_vm8, %v5005_v53, %v5008_v40  ;;  %v5027_v0 = vsel %vm5021_vm1, %v5014_v36, 920167782 }
 0x520   : > { %v5002_v2 = vshrl.u32 %v15841_v63, %v5001_v48  ;;  %vm5019_vm11 = vcmp.lt.s32.totalorder %v4999_v49, 2  ;;  %v5028_v38 = vsel %vm5020_vm4, %v5011_v54, %v5027_v0  ;;  %v5030_v58 = vsel %vm5018_vm8, %v5008_v40, %v5011_v54 }
 0x521   : > { %vm15714_vm9 = vcmp.lt.s32.totalorder %v12276_v19, 0  ;;  %v4752_v46 = vshll.u32 %v4751_v28, 23  ;;  %v5029_v9 = vsel %vm5019_vm11, %v5026_v56, %v5028_v38  ;;  %v5031_v17 = vsel %vm5021_vm1, %v5017_v16, 1326507024 }
 0x522   : > { %v5034_v29 = vshll.u32 %v4994_v33, 8  ;;  %vm15713_vm10 = vcmp.lt.s32.totalorder %v12362_v11, 0  ;;  %v4948_v8 = vsub.s32 0, %v12685_v14  ;;  %v5022_v3 = vsel %vm5018_vm8, %v5002_v2, %v5005_v53  ;;  %v2368_v2 = vpop.f32.mrf.mxu0 }
 0x523   : > { %v5024_v48 = vsel %vm5020_vm4, %v5008_v40, %v5023_v37  ;;  %v5032_v1 = vsel %vm5020_vm4, %v5014_v36, %v5031_v17  ;;  %v5198_v10 = vshrl.u32 %v5197_v31, 23  ;;  %vm15712_vm1 = vcmp.lt.s32.totalorder %v12123_v42, 0 }
 0x524   : > { %v5033_v25 = vsel %vm5019_vm11, %v5030_v58, %v5032_v1  ;;  %v12699_v13 = vmul.u32.u64.low %v5034_v29, %v5029_v9  ;;  %v12700_v4 = vmul.u32.u64.high %v5034_v29, %v5029_v9, %v12699_v13  ;;  %v16102_v54 = vand.u32 2147483647, %v12481_v27 }
 0x525   : > { %v16103_v59 = vcvt.s32.f32 %v12460_v57  ;;  %v16104_v53 = vand.u32 2147483647, %v12276_v19  ;;  %v16105_v40 = vmov 0  ;;  %v4748_v61 = vshrl.u32 %v4730_v62, %v4746_v50 }
 0x526   : > { %v12714_v52 = vmul.u32.u64.low %v5034_v29, %v5033_v25  ;;  %v12715_v33 = vmul.u32.u64.high %v5034_v29, %v5033_v25, %v12714_v52  ;;  %v4546_v28 = vand.u32 2147483647, %v12653_v7  ;;  %v4548_v36 = vcvt.s32.f32 %v12651_v44 }
 0x527   : > { %v4341_v26 = vmul.f32 %v16103_v59, %v16102_v54  ;;  %vm12710_vm8 = vcmp.le.f32.partialorder %v16104_v53, 0.7853982  ;;  %v5025_v16 = vsel %vm5019_vm11, %v5022_v3, %v5024_v48  ;;  %v8168_v27 = vadd.s32 4294967169, %v5198_v10 }
 0x528   : > { %v16106_v40 = vsel %vm12710_vm8, 4294967295, %v16105_v40  ;;  %v4654_v57 = vxor.u32 2147483648, %v12656_v45  ;;  %v4747_v31 = vshll.u32 %v12626_v5, %v12658_v6  ;;  %v4753_v37 = vor.u32 4788187, %v4752_v46 }
 0x529   : > { %16107 = vst [vmem:[#allocation35_spill] sm:$0xff] %v16106_v40  ;;  %v8157_v56 = vmin.u32 %v4948_v8, %v12685_v14  ;;  %v4862_v62 = vxor.u32 2147483648, %v12678_v32  ;;  %v5044_v50 = vadd.s32 1, %v12700_v4  ;;  %v15717_v0 = vand.u32 2147483647, %v12664_v39 }
 0x52a   : > { %v5204_v7 = vadd.s32 1, %v8168_v27  ;;  %8672 = vcosq.f32 %v12518_v18  ;;  %v4749_v44 = vor.u32 %v4748_v61, %v4747_v31  ;;  %v5041_v49 = vmul.u32 %v5034_v29, %v5025_v16 }
 0x52b   : > { %vm5043_vm4 = vc.u32 %v12715_v33, %v12699_v13  ;;  %v4342_v38 = vxor.u32 2147483648, %v4341_v26  ;;  %v12730_v5 = vmul.f32 %v4548_v36, %v4546_v28  ;;  %v4655_v58 = vsel %vm15714_vm9, %v4654_v57, %v12656_v45 }
 0x52c   : > { %v5045_v6 = vsel %vm5043_vm4, %v5044_v50, %v12700_v4  ;;  %vm5205_vm11 = vcmp.gt.s32.totalorder %v5204_v7, 0  ;;  %v4754_v46 = vand.u32 2147483647, %v4753_v37  ;;  %v4950_v9 = vclz %v8157_v56 }
 0x52d   : > { %v5046_v17 = vadd.s32 %v5045_v6, %v5041_v49  ;;  %v4863_v29 = vsel %vm15713_vm10, %v4862_v62, %v12678_v32  ;;  %v5201_v8 = vand.u32 8388607, %v15717_v0  ;;  %v5206_v3 = vsel %vm5205_vm11, %v5204_v7, 0 }
 0x52e   : > { %v12742_v48 = vadd.f32 %v2368_v2, %v16100_v20  ;;  %8674 = vsinq.f32 %v12518_v18  ;;  %v16108_v1 = vand.u32 2147483647, %v12362_v11  ;;  %v16109_v45 = vmov 0 }
 0x52f   : > { %v4756_v25 = vcvt.s32.f32 %v4749_v44  ;;  %v5047_v4 = vadd.s32 536870912, %v5046_v17  ;;  %v12753_v32 = vsel %vm15712_vm1, %v4342_v38, %v4341_v26  ;;  %v4550_v10 = vxor.u32 2147483648, %v12730_v5 }
 0x530   : > { %vm12747_vm4 = vcmp.le.f32.partialorder %v16108_v1, 0.7853982  ;;  %16112 = vst [vmem:[#allocation88_spill] sm:$0xff] %v12753_v32  ;;  %v4658_v54 = vsel %vm12710_vm8, %v12276_v19, %v4655_v58  ;;  %v5208_v59 = vand.u32 31, %v5206_v3  ;;  %v12766_v61 = vadd.s32 4294967294, %v4950_v9 }
 0x531   : > { %v16110_v45 = vsel %vm12747_vm4, 4294967295, %v16109_v45  ;;  %v12762_v18 = vsel %vm12747_vm4, %v12362_v11, %v4863_v29  ;;  %v12764_v53 = vmul.f32 %v4756_v25, %v4754_v46  ;;  %v12768_v52 = vshrl.u32 %v5047_v4, 30 }
 0x532   : > { %16111 = vst [vmem:[#allocation87_spill] sm:$0xff] %v16110_v45  ;;  %v5202_v26 = vor.u32 8388608, %v5201_v8  ;;  %v5209_v28 = vsub.s32 32, %v5208_v59  ;;  %v15716_v36 = vand.u32 2147483647, %v12742_v48  ;;  %v5093_v16 = vand.u32 2139095040, %v12742_v48 }
 0x533   : > { %v5049_v27 = vshll.u32 %v12768_v52, 30  ;;  %v5207_v57 = vshrl.u32 %v5206_v3, 5  ;;  %v5211_v31 = vshll.u32 %v15841_v63, %v5208_v59  ;;  %v5214_v37 = vshll.u32 %v15851_v30, %v5208_v59 }
 0x534   : > { %v5212_v56 = vshrl.u32 %v15851_v30, %v5209_v28  ;;  %v5215_v62 = vshrl.u32 %v15965_v51, %v5209_v28  ;;  %v5217_v50 = vshll.u32 %v15965_v51, %v5208_v59  ;;  %v5218_v7 = vshrl.u32 %v15966_v34, %v5209_v28 }
 0x535   : > { %v12779_v44 = vsub.s32 %v5046_v17, %v5049_v27  ;;  %v5220_v49 = vshll.u32 %v15966_v34, %v5208_v59  ;;  %v5221_v2 = vshrl.u32 %v15852_v24, %v5209_v28  ;;  %v5223_v38 = vshll.u32 %v15852_v24, %v5208_v59 }
 0x536   : > { %v5213_v6 = vor.u32 %v5212_v56, %v5211_v31  ;;  %v5216_v58 = vor.u32 %v5215_v62, %v5214_v37  ;;  %v5219_v46 = vor.u32 %v5218_v7, %v5217_v50  ;;  %v5224_v9 = vshrl.u32 %v15840_v22, %v5209_v28 }
 0x537   : > { %v5052_v29 = vsub.s32 0, %v12779_v44  ;;  %v5222_v8 = vor.u32 %v5221_v2, %v5220_v49  ;;  %v5242_v3 = vshll.u32 %v5202_v26, 8  ;;  %v5097_v17 = vand.u32 8388607, %v15716_v36  ;;  %v12789_v1 = vpop.eup %8672 }
 0x538   : > { %16113 = vst [vmem:[#allocation89_spill] sm:$0xff] %v12789_v1  ;;  %v5225_v25 = vor.u32 %v5224_v9, %v5223_v38  ;;  %vm5226_vm1 = vcmp.lt.s32.totalorder %v5207_v57, 1  ;;  %vm5229_vm10 = vcmp.lt.s32.totalorder %v5207_v57, 4  ;;  %v5094_v4 = vshrl.u32 %v5093_v16, 23 }
 0x539   : > { %v8161_v59 = vmin.u32 %v5052_v29, %v12779_v44  ;;  %v5210_v27 = vshrl.u32 %v15841_v63, %v5209_v28  ;;  %v5231_v31 = vsel %vm5229_vm10, %v5219_v46, 2102212464  ;;  %v5234_v37 = vsel %vm5226_vm1, %v5213_v6, %v5216_v58 }
 0x53a   : > { %vm5228_vm11 = vcmp.lt.s32.totalorder %v5207_v57, 3  ;;  %v5235_v56 = vsel %vm5229_vm10, %v5222_v8, 920167782  ;;  %v5238_v26 = vsel %vm5226_vm1, %v5216_v58, %v5219_v46  ;;  %v5239_v62 = vsel %vm5229_vm10, %v5225_v25, 1326507024 }
 0x53b   : > { %v5054_v50 = vclz %v8161_v59  ;;  %vm5227_vm13 = vcmp.lt.s32.totalorder %v5207_v57, 2  ;;  %v5230_v7 = vsel %vm5226_vm1, %v5210_v27, %v5213_v6  ;;  %v5236_v49 = vsel %vm5228_vm11, %v5219_v46, %v5235_v56  ;;  %v12794_v2 = vpop.eup %8674  ;;  %v2481_v46 = vpop.f32.mrf.mxu1  ;;  %v16118_v56 = vld [vmem:[#allocation12_spill] sm:$0xff] }
 0x53c   : > { %16114 = vst [vmem:[#allocation90_spill] sm:$0xff] %v12794_v2  ;;  %v5232_v38 = vsel %vm5228_vm11, %v5216_v58, %v5231_v31  ;;  %v5237_v16 = vsel %vm5227_vm13, %v5234_v37, %v5236_v49  ;;  %v5240_v9 = vsel %vm5228_vm11, %v5222_v8, %v5239_v62  ;;  %v8164_v29 = vadd.s32 4294967169, %v5094_v4  ;;  %v2372_v31 = vpop.f32.mrf.mxu0 }
 0x53d   : > { %v8162_v28 = vadd.s32 4294967294, %v5054_v50  ;;  %v5241_v36 = vsel %vm5227_vm13, %v5238_v26, %v5240_v9  ;;  %v12798_v0 = vmul.u32.u64.low %v5242_v3, %v5237_v16  ;;  %v12799_v43 = vmul.u32.u64.high %v5242_v3, %v5237_v16, %v12798_v0 }
 0x53e   : > { %8676 = vcosq.f32 %v4658_v54  ;;  %v12802_v25 = vmul.u32.u64.low %v5242_v3, %v5241_v36  ;;  %v12803_v59 = vmul.u32.u64.high %v5242_v3, %v5241_v36, %v12802_v25  ;;  %v5100_v6 = vadd.s32 1, %v8164_v29 }
 0x53f   : > { %8678 = vsinq.f32 %v4658_v54  ;;  %v4758_v58 = vxor.u32 2147483648, %v12764_v53  ;;  %vm8159_vm10 = vcmp.lt.s32.totalorder %v12766_v61, 0  ;;  %v5233_v8 = vsel %vm5227_vm13, %v5230_v7, %v5232_v38 }
 0x540   : > { %vm16115_vm1 = vcmp.lt.s32.totalorder %v12213_v21, 0  ;;  %8680 = vcosq.f32 %v12762_v18  ;;  %vm8163_vm11 = vcmp.lt.s32.totalorder %v8162_v28, 0  ;;  %vm5101_vm9 = vcmp.gt.s32.totalorder %v5100_v6, 0 }
 0x541   : > { %v12813_v4 = vsel %vm16115_vm1, %v4550_v10, %v12730_v5  ;;  %v12818_v54 = vadd.s32 %v12632_v12, %v12637_v15  ;;  %v5252_v36 = vadd.s32 1, %v12799_v43  ;;  %v5098_v27 = vor.u32 8388608, %v5097_v17 }
 0x542   : > { %16116 = vst [vmem:[#allocation91_spill] sm:$0xff] %v12813_v4  ;;  %v12822_v57 = vadd.f32 %v2481_v46, %v16100_v20  ;;  %v12825_v37 = vsel %vm8159_vm10, 0, %v12766_v61  ;;  %v5249_v5 = vmul.u32 %v5242_v3, %v5233_v8  ;;  %vm5251_vm13 = vc.u32 %v12803_v59, %v12798_v0 }
 0x543   : > { %v5102_v10 = vsel %vm5101_vm9, %v5100_v6, 0  ;;  %8682 = vsinq.f32 %v12762_v18  ;;  %vm16117_vm1 = vcmp.lt.s32.totalorder %v12429_v47, 0  ;;  %v12835_v15 = vsel %vm8163_vm11, 0, %v8162_v28 }
 0x544   : > { %v12833_v12 = vsel %vm16117_vm1, %v4758_v58, %v12764_v53  ;;  %v5253_v20 = vsel %vm5251_vm13, %v5252_v36, %v12799_v43  ;;  %v5042_v61 = vadd.s32 %v12699_v13, %v12715_v33  ;;  %v5104_v3 = vand.u32 31, %v5102_v10 }
 0x545   : > { %v5254_v17 = vadd.s32 %v5253_v20, %v5249_v5  ;;  %v12841_v26 = vadd.f32 %v2372_v31, %v16118_v56  ;;  %v4958_v18 = vsub.s32 4294967266, %v12825_v37  ;;  %v12845_v50 = vshll.u32 %v5098_v27, 8 }
 0x546   : > { %v5058_v7 = vsub.s32 32, %v12835_v15  ;;  %v5105_v43 = vsub.s32 32, %v5104_v3  ;;  %v5301_v38 = vand.u32 2139095040, %v12822_v57  ;;  %v5062_v13 = vsub.s32 4294967266, %v12835_v15 }
 0x547   : > { %v5255_v49 = vadd.s32 536870912, %v5254_v17  ;;  %v5103_v33 = vshrl.u32 %v5102_v10, 5  ;;  %v5107_v16 = vshll.u32 %v15841_v63, %v5104_v3  ;;  %v5110_v9 = vshll.u32 %v15851_v30, %v5104_v3 }
 0x548   : > { %v5108_v28 = vshrl.u32 %v15851_v30, %v5105_v43  ;;  %v5111_v25 = vshrl.u32 %v15965_v51, %v5105_v43  ;;  %v5113_v6 = vshll.u32 %v15965_v51, %v5104_v3  ;;  %v5114_v46 = vshrl.u32 %v15966_v34, %v5105_v43 }
 0x549   : > { %v12853_v29 = vshrl.u32 %v5255_v49, 30  ;;  %v5116_v58 = vshll.u32 %v15966_v34, %v5104_v3  ;;  %v5117_v8 = vshrl.u32 %v15852_v24, %v5105_v43  ;;  %v5119_v36 = vshll.u32 %v15852_v24, %v5104_v3 }
 0x54a   : > { %v5109_v31 = vor.u32 %v5108_v28, %v5107_v16  ;;  %v5112_v5 = vor.u32 %v5111_v25, %v5110_v9  ;;  %v5120_v10 = vshrl.u32 %v15840_v22, %v5105_v43  ;;  %v5115_v49 = vor.u32 %v5114_v46, %v5113_v6 }
 0x54b   : > { %v5257_v27 = vshll.u32 %v12853_v29, 30  ;;  %v12864_v20 = vpop.eup %8676  ;;  %v5118_v53 = vor.u32 %v5117_v8, %v5116_v58  ;;  %vm5122_vm9 = vcmp.lt.s32.totalorder %v5103_v33, 1  ;;  %v5302_v62 = vshrl.u32 %v5301_v38, 23 }
 0x54c   : > { %16119 = vst [vmem:[#allocation12_spill] sm:$0xff] %v12864_v20  ;;  %v12866_v1 = vpop.eup %8678  ;;  %v5121_v4 = vor.u32 %v5120_v10, %v5119_v36  ;;  %vm5123_vm10 = vcmp.lt.s32.totalorder %v5103_v33, 2  ;;  %vm5125_vm11 = vcmp.lt.s32.totalorder %v5103_v33, 4  ;;  %vm5124_vm13 = vcmp.lt.s32.totalorder %v5103_v33, 3 }
 0x54d   : > { %16120 = vst [vmem:[#allocation92_spill] sm:$0xff] %v12866_v1  ;;  %v12868_v2 = vsub.s32 %v5254_v17, %v5257_v27  ;;  %v12870_v3 = vpop.eup %8680  ;;  %v5127_v16 = vsel %vm5125_vm11, %v5115_v49, 2102212464  ;;  %v5130_v9 = vsel %vm5122_vm9, %v5109_v31, %v5112_v5  ;;  %v5131_v28 = vsel %vm5125_vm11, %v5118_v53, 920167782  ;;  %v2485_v27 = vpop.f32.mrf.mxu1 }
 0x54e   : > { %16121 = vst [vmem:[#allocation93_spill] sm:$0xff] %v12870_v3  ;;  %v5106_v6 = vshrl.u32 %v15841_v63, %v5105_v43  ;;  %v5132_v38 = vsel %vm5124_vm13, %v5115_v49, %v5131_v28  ;;  %v5134_v46 = vsel %vm5122_vm9, %v5112_v5, %v5115_v49  ;;  %v5060_v17 = vshrl.u32 %v5042_v61, %v5058_v7 }
 0x54f   : > { %v5260_v25 = vsub.s32 0, %v12868_v2  ;;  %v5133_v58 = vsel %vm5123_vm10, %v5130_v9, %v5132_v38  ;;  %v5135_v8 = vsel %vm5125_vm11, %v5121_v4, 1326507024  ;;  %v8172_v36 = vadd.s32 4294967169, %v5302_v62 }
 0x550   : > { %v12878_v10 = vpop.eup %8682  ;;  %v5126_v3 = vsel %vm5122_vm9, %v5106_v6, %v5109_v31  ;;  %v5128_v32 = vsel %vm5124_vm13, %v5112_v5, %v5127_v16  ;;  %v5136_v43 = vsel %vm5124_vm13, %v5118_v53, %v5135_v8  ;;  %v5063_v45 = vadd.s32 127, %v5062_v13 }
 0x551   : > { %16122 = vst [vmem:[#allocation94_spill] sm:$0xff] %v12878_v10  ;;  %v8169_v21 = vmin.u32 %v5260_v25, %v12868_v2  ;;  %v5137_v28 = vsel %vm5123_vm10, %v5134_v46, %v5136_v43  ;;  %v12886_v61 = vmul.u32.u64.low %v12845_v50, %v5133_v58  ;;  %v12887_v7 = vmul.u32.u64.high %v12845_v50, %v5133_v58, %v12886_v61 }
 0x552   : > { %v12891_v62 = vmul.u32.u64.low %v12845_v50, %v5137_v28  ;;  %v12892_v49 = vmul.u32.u64.high %v12845_v50, %v5137_v28, %v12891_v62  ;;  %v12895_v9 = vadd.f32 %v2485_v27, %v16118_v56  ;;  %v12897_v31 = vadd.s32 127, %v4958_v18 }
 0x553   : > { %v5262_v4 = vclz %v8169_v21  ;;  %v5059_v53 = vshll.u32 %v12779_v44, %v12835_v15  ;;  %v5129_v13 = vsel %vm5123_vm10, %v5126_v3, %v5128_v32  ;;  %v5308_v5 = vadd.s32 1, %v8172_v36 }
 0x554   : > { %v16123_v16 = vsub.s32 32, %v12825_v37  ;;  %v16124_v6 = vand.u32 2147483647, %v12822_v57  ;;  %v5405_v46 = vand.u32 2139095040, %v12841_v26  ;;  %v5064_v18 = vshll.u32 %v5063_v45, 23 }
 0x555   : > { %v8170_v21 = vadd.s32 4294967294, %v5262_v4  ;;  %v12910_v58 = vor.u32 %v5060_v17, %v5059_v53  ;;  %v5148_v8 = vadd.s32 1, %v12887_v7  ;;  %vm5309_vm1 = vcmp.gt.s32.totalorder %v5308_v5, 0 }
 0x556   : > { %v12905_v25 = vshrl.u32 %v12818_v54, %v16123_v16  ;;  %v5305_v38 = vand.u32 8388607, %v16124_v6  ;;  %v5145_v32 = vmul.u32 %v12845_v50, %v5129_v13  ;;  %vm5147_vm10 = vc.u32 %v12892_v49, %v12886_v61 }
 0x557   : > { %vm8171_vm9 = vcmp.lt.s32.totalorder %v8170_v21, 0  ;;  %v5310_v44 = vsel %vm5309_vm1, %v5308_v5, 0  ;;  %v5149_v33 = vsel %vm5147_vm10, %v5148_v8, %v12887_v7  ;;  %v5250_v45 = vadd.s32 %v12798_v0, %v12803_v59 }
 0x558   : > { %v12917_v15 = vsel %vm8171_vm9, 0, %v8170_v21  ;;  %v5312_v3 = vand.u32 31, %v5310_v44  ;;  %v5150_v17 = vadd.s32 %v5149_v33, %v5145_v32  ;;  %v5306_v36 = vor.u32 8388608, %v5305_v38 }
 0x559   : > { %v5065_v43 = vor.u32 4788187, %v5064_v18  ;;  %v5068_v50 = vcvt.s32.f32 %v12910_v58  ;;  %v5406_v4 = vshrl.u32 %v5405_v46, 23  ;;  %v5270_v62 = vsub.s32 4294967266, %v12917_v15 }
 0x55a   : > { %v5313_v28 = vsub.s32 32, %v5312_v3  ;;  %v5151_v53 = vadd.s32 536870912, %v5150_v17  ;;  %v5315_v13 = vshll.u32 %v15841_v63, %v5312_v3  ;;  %v5318_v7 = vshll.u32 %v15851_v30, %v5312_v3 }
 0x55b   : > { %v5321_v59 = vshll.u32 %v15965_v51, %v5312_v3  ;;  %v5311_v6 = vshrl.u32 %v5310_v44, 5  ;;  %v5324_v38 = vshll.u32 %v15966_v34, %v5312_v3  ;;  %v5066_v58 = vand.u32 2147483647, %v5065_v43 }
 0x55c   : > { %v5316_v5 = vshrl.u32 %v15851_v30, %v5313_v28  ;;  %v5319_v0 = vshrl.u32 %v15965_v51, %v5313_v28  ;;  %v5322_v16 = vshrl.u32 %v15966_v34, %v5313_v28  ;;  %v12931_v21 = vshrl.u32 %v5151_v53, 30 }
 0x55d   : > { %v5325_v46 = vshrl.u32 %v15852_v24, %v5313_v28  ;;  %v5346_v54 = vshll.u32 %v5306_v36, 8  ;;  %v8176_v10 = vadd.s32 4294967169, %v5406_v4  ;;  %v5266_v11 = vsub.s32 32, %v12917_v15 }
 0x55e   : > { %v5317_v18 = vor.u32 %v5316_v5, %v5315_v13  ;;  %v5320_v8 = vor.u32 %v5319_v0, %v5318_v7  ;;  %v5323_v32 = vor.u32 %v5322_v16, %v5321_v59  ;;  %v5153_v33 = vshll.u32 %v12931_v21, 30 }
 0x55f   : > { %v5326_v27 = vor.u32 %v5325_v46, %v5324_v38  ;;  %v5271_v42 = vadd.s32 127, %v5270_v62  ;;  %v5327_v53 = vshll.u32 %v15852_v24, %v5312_v3  ;;  %v5328_v44 = vshrl.u32 %v15840_v22, %v5313_v28 }
 0x560   : > { %v12939_v20 = vsub.s32 %v5150_v17, %v5153_v33  ;;  %vm5330_vm11 = vcmp.lt.s32.totalorder %v5311_v6, 1  ;;  %vm5332_vm13 = vcmp.lt.s32.totalorder %v5311_v6, 3  ;;  %vm5333_vm1 = vcmp.lt.s32.totalorder %v5311_v6, 4 }
 0x561   : > { %v5329_v43 = vor.u32 %v5328_v44, %v5327_v53  ;;  %v5335_v13 = vsel %vm5333_vm1, %v5323_v32, 2102212464  ;;  %v5338_v7 = vsel %vm5330_vm11, %v5317_v18, %v5320_v8  ;;  %v5339_v5 = vsel %vm5333_vm1, %v5326_v27, 920167782 }
 0x562   : > { %v5156_v36 = vsub.s32 0, %v12939_v20  ;;  %v5314_v4 = vshrl.u32 %v15841_v63, %v5313_v28  ;;  %vm5331_vm9 = vcmp.lt.s32.totalorder %v5311_v6, 2  ;;  %v5340_v62 = vsel %vm5332_vm13, %v5323_v32, %v5339_v5 }
 0x563   : > { %v5268_v3 = vshrl.u32 %v5250_v45, %v5266_v11  ;;  %v5341_v0 = vsel %vm5331_vm9, %v5338_v7, %v5340_v62  ;;  %v5342_v17 = vsel %vm5330_vm11, %v5320_v8, %v5323_v32  ;;  %v5343_v59 = vsel %vm5333_vm1, %v5329_v43, 1326507024 }
 0x564   : > { %v8165_v16 = vmin.u32 %v5156_v36, %v12939_v20  ;;  %v5334_v38 = vsel %vm5330_vm11, %v5314_v4, %v5317_v18  ;;  %v5336_v46 = vsel %vm5332_vm13, %v5320_v8, %v5335_v13  ;;  %v5344_v33 = vsel %vm5332_vm13, %v5326_v27, %v5343_v59 }
 0x565   : > { %v5272_v53 = vshll.u32 %v5271_v42, 23  ;;  %v5345_v28 = vsel %vm5331_vm9, %v5342_v17, %v5344_v33  ;;  %v12952_v44 = vmul.u32.u64.low %v5346_v54, %v5341_v0  ;;  %v12953_v1 = vmul.u32.u64.high %v5346_v54, %v5341_v0, %v12952_v44 }
 0x566   : > { %v4955_v11 = vshll.u32 %v12685_v14, %v12825_v37  ;;  %v5158_v45 = vclz %v8165_v16  ;;  %v12958_v32 = vmul.u32.u64.low %v5346_v54, %v5345_v28  ;;  %v12959_v43 = vmul.u32.u64.high %v5346_v54, %v5345_v28, %v12958_v32 }
 0x567   : > { %v12961_v7 = vmul.f32 %v5068_v50, %v5066_v58  ;;  %v5267_v18 = vshll.u32 %v12868_v2, %v12917_v15  ;;  %v5337_v42 = vsel %vm5331_vm9, %v5334_v38, %v5336_v46  ;;  %v5412_v27 = vadd.s32 1, %v8176_v10 }
 0x568   : > { %v12967_v8 = vor.u32 %v12905_v25, %v4955_v11  ;;  %v16125_v13 = vshll.u32 %v12897_v31, 23  ;;  %v8166_v14 = vadd.s32 4294967294, %v5158_v45  ;;  %v16126_v37 = vand.u32 2147483647, %v12841_v26 }
 0x569   : > { %v5269_v4 = vor.u32 %v5268_v3, %v5267_v18  ;;  %v5273_v50 = vor.u32 4788187, %v5272_v53  ;;  %v5356_v58 = vadd.s32 1, %v12953_v1  ;;  %vm5413_vm10 = vcmp.gt.s32.totalorder %v5412_v27, 0 }
 0x56a   : > { %v12971_v5 = vor.u32 4788187, %v16125_v13  ;;  %v5409_v36 = vand.u32 8388607, %v16126_v37  ;;  %vm8167_vm11 = vcmp.lt.s32.totalorder %v8166_v14, 0  ;;  %v5353_v2 = vmul.u32 %v5346_v54, %v5337_v42 }
 0x56b   : > { %vm5355_vm13 = vc.u32 %v12959_v43, %v12952_v44  ;;  %v5414_v10 = vsel %vm5413_vm10, %v5412_v27, 0  ;;  %v5070_v25 = vxor.u32 2147483648, %v12961_v7  ;;  %v12979_v31 = vsel %vm8167_vm11, 0, %v8166_v14 }
 0x56c   : > { %v5357_v15 = vsel %vm5355_vm13, %v5356_v58, %v12953_v1  ;;  %v5416_v6 = vand.u32 31, %v5414_v10  ;;  %v5146_v62 = vadd.s32 %v12886_v61, %v12892_v49  ;;  %v5613_v17 = vand.u32 2139095040, %v12895_v9 }
 0x56d   : > { %v5358_v3 = vadd.s32 %v5357_v15, %v5353_v2  ;;  %v5274_v54 = vand.u32 2147483647, %v5273_v50  ;;  %v5276_v59 = vcvt.s32.f32 %v5269_v4  ;;  %v5410_v16 = vor.u32 8388608, %v5409_v36 }
 0x56e   : > { %v5417_v38 = vsub.s32 32, %v5416_v6  ;;  %v5162_v46 = vsub.s32 32, %v12979_v31  ;;  %v5419_v53 = vshll.u32 %v15841_v63, %v5416_v6  ;;  %v5422_v1 = vshll.u32 %v15851_v30, %v5416_v6 }
 0x56f   : > { %v5359_v33 = vadd.s32 536870912, %v5358_v3  ;;  %v5425_v49 = vshll.u32 %v15965_v51, %v5416_v6  ;;  %v5415_v32 = vshrl.u32 %v5414_v10, 5  ;;  %v5428_v18 = vshll.u32 %v15966_v34, %v5416_v6 }
 0x570   : > { %v5420_v28 = vshrl.u32 %v15851_v30, %v5417_v38  ;;  %v5423_v61 = vshrl.u32 %v15965_v51, %v5417_v38  ;;  %v5426_v11 = vshrl.u32 %v15966_v34, %v5417_v38  ;;  %v5429_v42 = vshrl.u32 %v15852_v24, %v5417_v38 }
 0x571   : > { %v12993_v45 = vshrl.u32 %v5359_v33, 30  ;;  %v12997_v27 = vmul.f32 %v5276_v59, %v5274_v54  ;;  %v5450_v50 = vshll.u32 %v5410_v16, 8  ;;  %v5614_v58 = vshrl.u32 %v5613_v17, 23 }
 0x572   : > { %v5421_v13 = vor.u32 %v5420_v28, %v5419_v53  ;;  %v5424_v14 = vor.u32 %v5423_v61, %v5422_v1  ;;  %v5427_v37 = vor.u32 %v5426_v11, %v5425_v49  ;;  %v5430_v4 = vor.u32 %v5429_v42, %v5428_v18 }
 0x573   : > { %v5361_v36 = vshll.u32 %v12993_v45, 30  ;;  %v5164_v2 = vshrl.u32 %v5146_v62, %v5162_v46  ;;  %v5166_v15 = vsub.s32 4294967266, %v12979_v31  ;;  %v5431_v10 = vshll.u32 %v15852_v24, %v5416_v6 }
 0x574   : > { %v5432_v33 = vshrl.u32 %v15840_v22, %v5417_v38  ;;  %vm5434_vm9 = vcmp.lt.s32.totalorder %v5415_v32, 1  ;;  %vm5436_vm10 = vcmp.lt.s32.totalorder %v5415_v32, 3  ;;  %vm5437_vm11 = vcmp.lt.s32.totalorder %v5415_v32, 4 }
 0x575   : > { %v13004_v0 = vsub.s32 %v5358_v3, %v5361_v36  ;;  %v5439_v59 = vsel %vm5437_vm11, %v5427_v37, 2102212464  ;;  %v5442_v53 = vsel %vm5434_vm9, %v5421_v13, %v5424_v14  ;;  %v5443_v16 = vsel %vm5437_vm11, %v5430_v4, 920167782 }
 0x576   : > { %v5433_v54 = vor.u32 %v5432_v33, %v5431_v10  ;;  %v5418_v62 = vshrl.u32 %v15841_v63, %v5417_v38  ;;  %vm5435_vm13 = vcmp.lt.s32.totalorder %v5415_v32, 2  ;;  %v5444_v46 = vsel %vm5436_vm10, %v5427_v37, %v5443_v16 }
 0x577   : > { %v5364_v17 = vsub.s32 0, %v13004_v0  ;;  %v16127_v6 = vand.u32 2147483647, %v12584_v23  ;;  %vm15738_vm14 = vcmp.lt.s32.totalorder %v12664_v39, 0  ;;  %v5167_v1 = vadd.s32 127, %v5166_v15 }
 0x578   : > { %v5445_v28 = vsel %vm5435_vm13, %v5442_v53, %v5444_v46  ;;  %v5446_v61 = vsel %vm5434_vm9, %v5424_v14, %v5427_v37  ;;  %v5447_v49 = vsel %vm5437_vm11, %v5433_v54, 1326507024  ;;  %v5438_v38 = vsel %vm5434_vm9, %v5418_v62, %v5421_v13 }
 0x579   : > { %vm13012_vm1 = vcmp.le.f32.partialorder %v16127_v6, 0.7853982  ;;  %v8173_v11 = vmin.u32 %v5364_v17, %v13004_v0  ;;  %v5440_v18 = vsel %vm5436_vm10, %v5424_v14, %v5439_v59  ;;  %v5448_v42 = vsel %vm5436_vm10, %v5430_v4, %v5447_v49 }
 0x57a   : > { %v5449_v36 = vsel %vm5435_vm13, %v5446_v61, %v5448_v42  ;;  %v13024_v10 = vmul.u32.u64.low %v5450_v50, %v5445_v28  ;;  %v13025_v33 = vmul.u32.u64.high %v5450_v50, %v5445_v28, %v13024_v10  ;;  %v8184_v15 = vadd.s32 4294967169, %v5614_v58 }
 0x57b   : > { %v4964_v53 = vcvt.s32.f32 %v12967_v8  ;;  %v5366_v16 = vclz %v8173_v11  ;;  %v13029_v37 = vmul.u32.u64.low %v5450_v50, %v5449_v36  ;;  %v13030_v54 = vmul.u32.u64.high %v5450_v50, %v5449_v36, %v13029_v37 }
 0x57c   : > { %v4962_v17 = vand.u32 2147483647, %v12971_v5  ;;  %v5163_v13 = vshll.u32 %v12939_v20, %v12979_v31  ;;  %v5441_v14 = vsel %vm5435_vm13, %v5438_v38, %v5440_v18  ;;  %v5620_v4 = vadd.s32 1, %v8184_v15 }
 0x57d   : > { %vm16130_vm9 = vcmp.lt.s32.totalorder %v12584_v23, 0  ;;  %v5278_v8 = vxor.u32 2147483648, %v12997_v27  ;;  %v8174_v59 = vadd.s32 4294967294, %v5366_v16  ;;  %v16131_v62 = vand.u32 2147483647, %v12895_v9  ;;  %v2374_v16 = vpop.f32.mrf.mxu0 }
 0x57e   : > { %v5071_v58 = vsel %vm16130_vm9, %v5070_v25, %v12961_v7  ;;  %v13044_v6 = vor.u32 %v5164_v2, %v5163_v13  ;;  %v5168_v5 = vshll.u32 %v5167_v1, 23  ;;  %v5460_v20 = vadd.s32 1, %v13025_v33 }
 0x57f   : > { %v5617_v46 = vand.u32 8388607, %v16131_v62  ;;  %vm5621_vm10 = vcmp.gt.s32.totalorder %v5620_v4, 0  ;;  %vm8175_vm11 = vcmp.lt.s32.totalorder %v8174_v59, 0  ;;  %v5457_v31 = vmul.u32 %v5450_v50, %v5441_v14 }
 0x580   : > { %vm5459_vm13 = vc.u32 %v13030_v54, %v13024_v10  ;;  %v5622_v32 = vsel %vm5621_vm10, %v5620_v4, 0  ;;  %v13049_v28 = vmul.f32 %v4964_v53, %v4962_v17  ;;  %v13051_v7 = vsel %vm8175_vm11, 0, %v8174_v59 }
 0x581   : > { %v5461_v25 = vsel %vm5459_vm13, %v5460_v20, %v13025_v33  ;;  %v5624_v61 = vand.u32 31, %v5622_v32  ;;  %v13057_v2 = vsel %vm13012_vm1, %v12584_v23, %v5071_v58  ;;  %v13062_v50 = vsel %vm15738_vm14, %v5278_v8, %v12997_v27 }
 0x582   : > { %v5354_v1 = vadd.s32 %v12952_v44, %v12959_v43  ;;  %v5462_v49 = vadd.s32 %v5461_v25, %v5457_v31  ;;  %v13066_v11 = vor.u32 4788187, %v5168_v5  ;;  %v5618_v18 = vor.u32 8388608, %v5617_v46 }
 0x583   : > { %v5625_v42 = vsub.s32 32, %v5624_v61  ;;  %v5374_v36 = vsub.s32 4294967266, %v13051_v7  ;;  %v5627_v15 = vshll.u32 %v15841_v63, %v5624_v61  ;;  %v5630_v53 = vshll.u32 %v15851_v30, %v5624_v61 }
 0x584   : > { %v5463_v33 = vadd.s32 536870912, %v5462_v49  ;;  %v5633_v44 = vshll.u32 %v15965_v51, %v5624_v61  ;;  %v5623_v13 = vshrl.u32 %v5622_v32, 5  ;;  %v5636_v14 = vshll.u32 %v15966_v34, %v5624_v61 }
 0x585   : > { %v5628_v27 = vshrl.u32 %v15851_v30, %v5625_v42  ;;  %v5631_v37 = vshrl.u32 %v15965_v51, %v5625_v42  ;;  %v5634_v43 = vshrl.u32 %v15966_v34, %v5625_v42  ;;  %v5637_v4 = vshrl.u32 %v15852_v24, %v5625_v42 }
 0x586   : > { %v13076_v17 = vshrl.u32 %v5463_v33, 30  ;;  %v13081_v62 = vadd.f32 %v2374_v16, %v16118_v56  ;;  %v5370_v46 = vsub.s32 32, %v13051_v7  ;;  %v5658_v31 = vshll.u32 %v5618_v18, 8 }
 0x587   : > { %v5629_v58 = vor.u32 %v5628_v27, %v5627_v15  ;;  %v5632_v8 = vor.u32 %v5631_v37, %v5630_v53  ;;  %v5635_v59 = vor.u32 %v5634_v43, %v5633_v44  ;;  %v5638_v20 = vor.u32 %v5637_v4, %v5636_v14  ;;  %v2487_v37 = vpop.f32.mrf.mxu1 }
 0x588   : > { %v5465_v5 = vshll.u32 %v13076_v17, 30  ;;  %v5375_v25 = vadd.s32 127, %v5374_v36  ;;  %v5626_v33 = vshrl.u32 %v15841_v63, %v5625_v42  ;;  %v5639_v32 = vshll.u32 %v15852_v24, %v5624_v61 }
 0x589   : > { %v5640_v38 = vshrl.u32 %v15840_v22, %v5625_v42  ;;  %vm5642_vm9 = vcmp.lt.s32.totalorder %v5623_v13, 1  ;;  %vm5644_vm10 = vcmp.lt.s32.totalorder %v5623_v13, 3  ;;  %vm5645_vm11 = vcmp.lt.s32.totalorder %v5623_v13, 4 }
 0x58a   : > { %v13088_v40 = vsub.s32 %v5462_v49, %v5465_v5  ;;  %v5647_v53 = vsel %vm5645_vm11, %v5635_v59, 2102212464  ;;  %v5650_v16 = vsel %vm5642_vm9, %v5629_v58, %v5632_v8  ;;  %v5651_v27 = vsel %vm5645_vm11, %v5638_v20, 920167782 }
 0x58b   : > { %v5641_v15 = vor.u32 %v5640_v38, %v5639_v32  ;;  %vm5643_vm13 = vcmp.lt.s32.totalorder %v5623_v13, 2  ;;  %v5646_v18 = vsel %vm5642_vm9, %v5626_v33, %v5629_v58  ;;  %v5652_v36 = vsel %vm5644_vm10, %v5635_v59, %v5651_v27 }
 0x58c   : > { %v5468_v44 = vsub.s32 0, %v13088_v40  ;;  %v5648_v61 = vsel %vm5644_vm10, %v5632_v8, %v5647_v53  ;;  %v5653_v43 = vsel %vm5643_vm13, %v5650_v16, %v5652_v36  ;;  %v5654_v42 = vsel %vm5642_vm9, %v5632_v8, %v5635_v59 }
 0x58d   : > { %v5655_v49 = vsel %vm5645_vm11, %v5641_v15, 1326507024  ;;  %v5376_v14 = vshll.u32 %v5375_v25, 23  ;;  %v13096_v5 = vadd.f32 %v2487_v37, %v16118_v56  ;;  %v5170_v32 = vand.u32 2147483647, %v13066_v11 }
 0x58e   : > { %v8177_v4 = vmin.u32 %v5468_v44, %v13088_v40  ;;  %v5656_v38 = vsel %vm5644_vm10, %v5638_v20, %v5655_v49  ;;  %v13099_v55 = vmul.u32.u64.low %v5658_v31, %v5653_v43  ;;  %v13100_v58 = vmul.u32.u64.high %v5658_v31, %v5653_v43, %v13099_v55 }
 0x58f   : > { %v5657_v19 = vsel %vm5643_vm13, %v5654_v42, %v5656_v38  ;;  %v5649_v27 = vsel %vm5643_vm13, %v5646_v18, %v5648_v61  ;;  %v5372_v8 = vshrl.u32 %v5354_v1, %v5370_v46  ;;  %v5458_v59 = vadd.s32 %v13024_v10, %v13030_v54 }
 0x590   : > { %v5470_v33 = vclz %v8177_v4  ;;  %v13102_v53 = vmul.u32.u64.low %v5658_v31, %v5657_v19  ;;  %v13103_v16 = vmul.u32.u64.high %v5658_v31, %v5657_v19, %v13102_v53  ;;  %v15744_v13 = vand.u32 2147483647, %v13081_v62 }
 0x591   : > { %v5509_v56 = vand.u32 2139095040, %v13081_v62  ;;  %v5371_v11 = vshll.u32 %v13004_v0, %v13051_v7  ;;  %v5377_v20 = vor.u32 4788187, %v5376_v14  ;;  %v5717_v15 = vand.u32 2139095040, %v13096_v5 }
 0x592   : > { %v8178_v25 = vadd.s32 4294967294, %v5470_v33  ;;  %v5665_v37 = vmul.u32 %v5658_v31, %v5649_v27  ;;  %v5668_v44 = vadd.s32 1, %v13100_v58  ;;  %v5513_v1 = vand.u32 8388607, %v15744_v13 }
 0x593   : > { %v5510_v19 = vshrl.u32 %v5509_v56, 23  ;;  %vm5667_vm10 = vc.u32 %v13103_v16, %v13099_v55  ;;  %v15739_v10 = vand.u32 2147483647, %v13096_v5  ;;  %v5718_v54 = vshrl.u32 %v5717_v15, 23 }
 0x594   : > { %vm8179_vm9 = vcmp.lt.s32.totalorder %v8178_v25, 0  ;;  %v5373_v46 = vor.u32 %v5372_v8, %v5371_v11  ;;  %v5669_v0 = vsel %vm5667_vm10, %v5668_v44, %v13100_v58  ;;  %v5378_v36 = vand.u32 2147483647, %v5377_v20 }
 0x595   : > { %v5473_v18 = vsel %vm8179_vm9, 0, %v8178_v25  ;;  %v8180_v7 = vadd.s32 4294967169, %v5510_v19  ;;  %v5670_v43 = vadd.s32 %v5669_v0, %v5665_v37  ;;  %v5514_v49 = vor.u32 8388608, %v5513_v1 }
 0x596   : > { %v5474_v61 = vsub.s32 32, %v5473_v18  ;;  %v5478_v31 = vsub.s32 4294967266, %v5473_v18  ;;  %v5475_v42 = vshll.u32 %v13088_v40, %v5473_v18  ;;  %v8188_v4 = vadd.s32 4294967169, %v5718_v54 }
 0x597   : > { %v5516_v14 = vadd.s32 1, %v8180_v7  ;;  %v5671_v27 = vadd.s32 536870912, %v5670_v43  ;;  %v5721_v53 = vand.u32 8388607, %v15739_v10  ;;  %v16132_v8 = vcvt.s32.f32 %v13044_v6 }
 0x598   : > { %v5476_v38 = vshrl.u32 %v5458_v59, %v5474_v61  ;;  %v5479_v33 = vadd.s32 127, %v5478_v31  ;;  %v5380_v58 = vcvt.s32.f32 %v5373_v46  ;;  %v5724_v11 = vadd.s32 1, %v8188_v4 }
 0x599   : > { %v13123_v56 = vmul.f32 %v16132_v8, %v5170_v32  ;;  %vm5517_vm11 = vcmp.gt.s32.totalorder %v5516_v14, 0  ;;  %v13125_v15 = vshrl.u32 %v5671_v27, 30  ;;  %vm15742_vm13 = vcmp.lt.s32.totalorder %v12841_v26, 0 }
 0x59a   : > { %v5477_v20 = vor.u32 %v5476_v38, %v5475_v42  ;;  %v5480_v25 = vshll.u32 %v5479_v33, 23  ;;  %v5518_v40 = vsel %vm5517_vm11, %v5516_v14, 0  ;;  %v13127_v37 = vmul.f32 %v5380_v58, %v5378_v36 }
 0x59b   : > { %v13131_v59 = vadd.s32 %v13099_v55, %v13103_v16  ;;  %v5520_v44 = vand.u32 31, %v5518_v40  ;;  %v13133_v19 = vshll.u32 %v5514_v49, 8  ;;  %v5673_v32 = vshll.u32 %v13125_v15, 30 }
 0x59c   : > { %v5481_v6 = vor.u32 4788187, %v5480_v25  ;;  %v5519_v1 = vshrl.u32 %v5518_v40, 5  ;;  %v5722_v54 = vor.u32 8388608, %v5721_v53  ;;  %v16133_v46 = vand.u32 2147483647, %v12841_v26 }
 0x59d   : > { %v5484_v0 = vcvt.s32.f32 %v5477_v20  ;;  %v5521_v7 = vsub.s32 32, %v5520_v44  ;;  %v5523_v36 = vshll.u32 %v15841_v63, %v5520_v44  ;;  %vm5725_vm10 = vcmp.gt.s32.totalorder %v5724_v11, 0 }
 0x59e   : > { %vm13138_vm9 = vcmp.le.f32.partialorder %v16133_v46, 0.7853982  ;;  %v5482_v55 = vand.u32 2147483647, %v5481_v6  ;;  %v13143_v16 = vsub.s32 %v5670_v43, %v5673_v32  ;;  %v5526_v61 = vshll.u32 %v15851_v30, %v5520_v44 }
 0x59f   : > { %v5529_v31 = vshll.u32 %v15965_v51, %v5520_v44  ;;  %v5524_v42 = vshrl.u32 %v15851_v30, %v5521_v7  ;;  %v5527_v49 = vshrl.u32 %v15965_v51, %v5521_v7  ;;  %v5530_v14 = vshrl.u32 %v15966_v34, %v5521_v7 }
 0x5a0   : > { %v5532_v4 = vshll.u32 %v15966_v34, %v5520_v44  ;;  %v5485_v38 = vmul.f32 %v5484_v0, %v5482_v55  ;;  %v5676_v33 = vsub.s32 0, %v13143_v16  ;;  %v5533_v27 = vshrl.u32 %v15852_v24, %v5521_v7 }
 0x5a1   : > { %v5536_v43 = vshrl.u32 %v15840_v22, %v5521_v7  ;;  %v5525_v53 = vor.u32 %v5524_v42, %v5523_v36  ;;  %v5528_v8 = vor.u32 %v5527_v49, %v5526_v61  ;;  %v5531_v58 = vor.u32 %v5530_v14, %v5529_v31 }
 0x5a2   : > { %v5535_v20 = vshll.u32 %v15852_v24, %v5520_v44  ;;  %v5486_v25 = vxor.u32 2147483648, %v5485_v38  ;;  %v8185_v40 = vmin.u32 %v5676_v33, %v13143_v16  ;;  %v5534_v6 = vor.u32 %v5533_v27, %v5532_v4 }
 0x5a3   : > { %v13156_v32 = vshll.u32 %v5722_v54, 8  ;;  %vm5538_vm11 = vcmp.lt.s32.totalorder %v5519_v1, 1  ;;  %vm5541_vm14 = vcmp.lt.s32.totalorder %v5519_v1, 4  ;;  %v5726_v0 = vsel %vm5725_vm10, %v5724_v11, 0 }
 0x5a4   : > { %v5537_v46 = vor.u32 %v5536_v43, %v5535_v20  ;;  %v5487_v55 = vsel %vm15742_vm13, %v5486_v25, %v5485_v38  ;;  %v5678_v10 = vclz %v8185_v40  ;;  %v5543_v36 = vsel %vm5541_vm14, %v5531_v58, 2102212464 }
 0x5a5   : > { %v5546_v61 = vsel %vm5538_vm11, %v5525_v53, %v5528_v8  ;;  %v5522_v44 = vshrl.u32 %v15841_v63, %v5521_v7  ;;  %vm5539_vm15 = vcmp.lt.s32.totalorder %v5519_v1, 2  ;;  %vm5540_vm0 = vcmp.lt.s32.totalorder %v5519_v1, 3 }
 0x5a6   : > { %v5547_v31 = vsel %vm5541_vm14, %v5534_v6, 920167782  ;;  %v5490_v54 = vsel %vm13138_vm9, %v12841_v26, %v5487_v55  ;;  %v8186_v42 = vadd.s32 4294967294, %v5678_v10  ;;  %v5550_v11 = vsel %vm5538_vm11, %v5528_v8, %v5531_v58 }
 0x5a7   : > { %v5548_v49 = vsel %vm5540_vm0, %v5531_v58, %v5547_v31  ;;  %v5542_v14 = vsel %vm5538_vm11, %v5522_v44, %v5525_v53  ;;  %v5544_v4 = vsel %vm5540_vm0, %v5528_v8, %v5543_v36  ;;  %v5551_v33 = vsel %vm5541_vm14, %v5537_v46, 1326507024 }
 0x5a8   : > { %v5549_v38 = vsel %vm5539_vm15, %v5546_v61, %v5548_v49  ;;  %vm8187_vm10 = vcmp.lt.s32.totalorder %v8186_v42, 0  ;;  %v5552_v27 = vsel %vm5540_vm0, %v5534_v6, %v5551_v33  ;;  %8684 = vcosq.f32 %v5490_v54 }
 0x5a9   : > { %v13170_v7 = vmul.u32.u64.low %v13133_v19, %v5549_v38  ;;  %v13171_v43 = vmul.u32.u64.high %v13133_v19, %v5549_v38, %v13170_v7  ;;  %v5681_v20 = vsel %vm8187_vm10, 0, %v8186_v42  ;;  %v5553_v25 = vsel %vm5539_vm15, %v5550_v11, %v5552_v27 }
 0x5aa   : > { %v5728_v10 = vand.u32 31, %v5726_v0  ;;  %8686 = vsinq.f32 %v5490_v54  ;;  %v5682_v58 = vsub.s32 32, %v5681_v20  ;;  %v5686_v53 = vsub.s32 4294967266, %v5681_v20 }
 0x5ab   : > { %v5545_v8 = vsel %vm5539_vm15, %v5542_v14, %v5544_v4  ;;  %v13177_v40 = vmul.u32.u64.low %v13133_v19, %v5553_v25  ;;  %v13178_v46 = vmul.u32.u64.high %v13133_v19, %v5553_v25, %v13177_v40  ;;  %v13180_v6 = vshrl.u32 %v5726_v0, 5 }
 0x5ac   : > { %v5729_v55 = vsub.s32 32, %v5728_v10  ;;  %v5683_v36 = vshll.u32 %v13143_v16, %v5681_v20  ;;  %v5684_v61 = vshrl.u32 %v13131_v59, %v5682_v58  ;;  %v5687_v44 = vadd.s32 127, %v5686_v53 }
 0x5ad   : > { %v5564_v31 = vadd.s32 1, %v13171_v43  ;;  %v5731_v54 = vshll.u32 %v15841_v63, %v5728_v10  ;;  %v5734_v1 = vshll.u32 %v15851_v30, %v5728_v10  ;;  %v5737_v0 = vshll.u32 %v15965_v51, %v5728_v10 }
 0x5ae   : > { %v5732_v42 = vshrl.u32 %v15851_v30, %v5729_v55  ;;  %v5735_v49 = vshrl.u32 %v15965_v51, %v5729_v55  ;;  %v5685_v11 = vor.u32 %v5684_v61, %v5683_v36  ;;  %v5688_v14 = vshll.u32 %v5687_v44, 23 }
 0x5af   : > { %v5738_v4 = vshrl.u32 %v15966_v34, %v5729_v55  ;;  %v5561_v59 = vmul.u32 %v13133_v19, %v5545_v8  ;;  %vm5563_vm0 = vc.u32 %v13178_v46, %v13170_v7  ;;  %v5740_v38 = vshll.u32 %v15966_v34, %v5728_v10 }
 0x5b0   : > { %v5733_v16 = vor.u32 %v5732_v42, %v5731_v54  ;;  %v16136_v33 = vand.u32 2147483647, %v12895_v9  ;;  %v5689_v20 = vor.u32 4788187, %v5688_v14  ;;  %v5565_v25 = vsel %vm5563_vm0, %v5564_v31, %v13171_v43 }
 0x5b1   : > { %v5736_v58 = vor.u32 %v5735_v49, %v5734_v1  ;;  %v5739_v53 = vor.u32 %v5738_v4, %v5737_v0  ;;  %v5566_v40 = vadd.s32 %v5565_v25, %v5561_v59  ;;  %v5741_v19 = vshrl.u32 %v15852_v24, %v5729_v55 }
 0x5b2   : > { %vm13198_vm15 = vcmp.le.f32.partialorder %v16136_v33, 0.7853982  ;;  %v5743_v8 = vshll.u32 %v15852_v24, %v5728_v10  ;;  %v5744_v36 = vshrl.u32 %v15840_v22, %v5729_v55  ;;  %v16139_v61 = vand.u32 2147483647, %v12664_v39 }
 0x5b3   : > { %v5690_v54 = vand.u32 2147483647, %v5689_v20  ;;  %v5692_v42 = vcvt.s32.f32 %v5685_v11  ;;  %v5730_v14 = vshrl.u32 %v15841_v63, %v5729_v55  ;;  %vm5746_vm10 = vcmp.lt.s32.totalorder %v13180_v6, 1 }
 0x5b4   : > { %vm13208_vm11 = vcmp.le.f32.partialorder %v16139_v61, 0.7853982  ;;  %v5567_v43 = vadd.s32 536870912, %v5566_v40  ;;  %v5742_v31 = vor.u32 %v5741_v19, %v5740_v38  ;;  %v5745_v1 = vor.u32 %v5744_v36, %v5743_v8 }
 0x5b5   : > { %vm5749_vm0 = vcmp.lt.s32.totalorder %v13180_v6, 4  ;;  %v5693_v10 = vmul.f32 %v5692_v42, %v5690_v54  ;;  %vm5747_vm13 = vcmp.lt.s32.totalorder %v13180_v6, 2  ;;  %v5754_v0 = vsel %vm5746_vm10, %v5733_v16, %v5736_v58  ;;  %v13217_v11 = vpop.eup %8684 }
 0x5b6   : > { %v5751_v49 = vsel %vm5749_vm0, %v5739_v53, 2102212464  ;;  %v5568_v4 = vshrl.u32 %v5567_v43, 30  ;;  %vm5748_vm14 = vcmp.lt.s32.totalorder %v13180_v6, 3  ;;  %v5755_v59 = vsel %vm5749_vm0, %v5742_v31, 920167782 }
 0x5b7   : > { %v5758_v33 = vsel %vm5746_vm10, %v5736_v58, %v5739_v53  ;;  %v5694_v55 = vxor.u32 2147483648, %v5693_v10  ;;  %v5750_v20 = vsel %vm5746_vm10, %v5730_v14, %v5733_v16  ;;  %v5756_v25 = vsel %vm5748_vm14, %v5739_v53, %v5755_v59  ;;  %v13219_v38 = vpop.eup %8686 }
 0x5b8   : > { %v5759_v61 = vsel %vm5749_vm0, %v5745_v1, 1326507024  ;;  %v5569_v19 = vshll.u32 %v5568_v4, 30  ;;  %v5752_v8 = vsel %vm5748_vm14, %v5736_v58, %v5751_v49  ;;  %v5757_v36 = vsel %vm5747_vm13, %v5754_v0, %v5756_v25 }
 0x5b9   : > { %v5760_v54 = vsel %vm5748_vm14, %v5742_v31, %v5759_v61  ;;  %vm16142_vm6 = vcmp.lt.s32.totalorder %v12895_v9, 0  ;;  %v13228_v13 = vmul.u32.u64.low %v13156_v32, %v5757_v36  ;;  %v13229_v22 = vmul.u32.u64.high %v13156_v32, %v5757_v36, %v13228_v13 }
 0x5ba   : > { %v5695_v42 = vsel %vm16142_vm6, %v5694_v55, %v5693_v10  ;;  %v5761_v43 = vsel %vm5747_vm13, %v5758_v33, %v5760_v54  ;;  %v13235_v58 = vsub.s32 %v5566_v40, %v5569_v19  ;;  %v4966_v31 = vxor.u32 2147483648, %v13049_v28 }
 0x5bb   : > { %v5698_v16 = vsel %vm13198_vm15, %v12895_v9, %v5695_v42  ;;  %v13238_v53 = vmul.u32.u64.low %v13156_v32, %v5761_v43  ;;  %v13239_v14 = vmul.u32.u64.high %v13156_v32, %v5761_v43, %v13238_v53  ;;  %8688 = vcosq.f32 %v13057_v2 }
 0x5bc   : > { %v5753_v1 = vsel %vm5747_vm13, %v5750_v20, %v5752_v8  ;;  %v5488_v10 = vsub.s32 4, %v13076_v17  ;;  %v5282_v49 = vsel %vm13208_vm11, %v12664_v39, %v13062_v50  ;;  %v5174_v40 = vxor.u32 2147483648, %v13123_v56 }
 0x5bd   : > { %8690 = vcosq.f32 %v5698_v16  ;;  %v5572_v0 = vsub.s32 0, %v13235_v58  ;;  %v5772_v59 = vadd.s32 1, %v13229_v22  ;;  %v5592_v33 = vsub.s32 4, %v5568_v4 }
 0x5be   : > { %vm16143_vm6 = vcmp.lt.s32.totalorder %v12841_v26, 0  ;;  %v5696_v55 = vsub.s32 4, %v13125_v15  ;;  %v5382_v20 = vxor.u32 2147483648, %v13127_v37  ;;  %v5769_v50 = vmul.u32 %v13156_v32, %v5753_v1 }
 0x5bf   : > { %v5489_v6 = vsel %vm16143_vm6, %v5488_v10, %v13076_v17  ;;  %v8181_v25 = vmin.u32 %v5572_v0, %v13235_v58  ;;  %vm5771_vm13 = vc.u32 %v13239_v14, %v13228_v13  ;;  %8692 = vsinq.f32 %v5698_v16 }
 0x5c0   : > { %v5773_v61 = vsel %vm5771_vm13, %v5772_v59, %v13229_v22  ;;  %v5491_v19 = vsel %vm13138_vm9, 0, %v5489_v6  ;;  %vm16144_vm14 = vcmp.lt.s32.totalorder %v12895_v9, 0  ;;  %8694 = vsinq.f32 %v13057_v2 }
 0x5c1   : > { %v5697_v17 = vsel %vm16144_vm14, %v5696_v55, %v13125_v15  ;;  %vm15746_vm0 = vcmp.lt.s32.totalorder %v13081_v62, 0  ;;  %v5574_v8 = vclz %v8181_v25  ;;  %v5774_v36 = vadd.s32 %v5773_v61, %v5769_v50 }
 0x5c2   : > { %8696 = vcosq.f32 %v5282_v49  ;;  %vm5092_vm6 = vcmp.lt.s32.totalorder %v12742_v48, 0  ;;  %vm15747_vm10 = vcmp.lt.s32.totalorder %v12822_v57, 0  ;;  %v5593_v22 = vsel %vm15746_vm0, %v5592_v33, %v5568_v4 }
 0x5c3   : > { %v8182_v18 = vadd.s32 4294967294, %v5574_v8  ;;  %v5775_v32 = vadd.s32 536870912, %v5774_v36  ;;  %v5495_v54 = vadd.s32 3, %v5491_v19  ;;  %v5699_v15 = vsel %vm13198_vm15, 0, %v5697_v17 }
 0x5c4   : > { %vm16145_vm9 = vcmp.lt.s32.totalorder %v12485_v41, 0  ;;  %8698 = vsinq.f32 %v5282_v49  ;;  %v5175_v42 = vsel %vm5092_vm6, %v5174_v40, %v13123_v56  ;;  %v13286_v4 = vsel %vm15747_vm10, %v5382_v20, %v13127_v37 }
 0x5c5   : > { %v13278_v2 = vsel %vm16145_vm9, %v4966_v31, %v13049_v28  ;;  %vm8183_vm13 = vcmp.lt.s32.totalorder %v8182_v18, 0  ;;  %v5776_v27 = vshrl.u32 %v5775_v32, 30  ;;  %v16146_v43 = vand.u32 2147483647, %v13081_v62 }
 0x5c6   : > { %v5562_v28 = vadd.s32 %v13170_v7, %v13178_v46  ;;  %v5577_v53 = vsel %vm8183_vm13, 0, %v8182_v18  ;;  %v5703_v31 = vadd.s32 3, %v5699_v15  ;;  %v5496_v49 = vand.u32 3, %v5495_v54 }
 0x5c7   : > { %vm13291_vm15 = vcmp.le.f32.partialorder %v16146_v43, 0.7853982  ;;  %v5578_v37 = vsub.s32 32, %v5577_v53  ;;  %v5582_v1 = vsub.s32 4294967266, %v5577_v53  ;;  %v5777_v10 = vshll.u32 %v5776_v27, 30 }
 0x5c8   : > { %v5595_v56 = vsel %vm13291_vm15, 0, %v5593_v22  ;;  %v13300_v40 = vadd.s32 %v13228_v13, %v13239_v14  ;;  %v16149_v0 = vand.u32 2147483647, %v13096_v5  ;;  %v5499_v7 = vxor.u32 2147483648, %v13219_v38  ;;  %v13311_v6 = vpop.eup %8688 }
 0x5c9   : > { %v5502_v46 = vxor.u32 2147483648, %v13217_v11  ;;  %v5176_v33 = vsub.s32 4, %v12931_v21  ;;  %v5579_v55 = vshll.u32 %v13235_v58, %v5577_v53  ;;  %v5580_v20 = vshrl.u32 %v5562_v28, %v5578_v37 }
 0x5ca   : > { %vm13304_vm9 = vcmp.le.f32.partialorder %v16149_v0, 0.7853982  ;;  %v5583_v25 = vadd.s32 127, %v5582_v1  ;;  %v13314_v13 = vsub.s32 %v5774_v36, %v5777_v10  ;;  %v8691_v14 = vpop.eup %8690  ;;  %v13316_v50 = vadd.s32 3, %v5595_v56 }
 0x5cb   : > { %v5800_v61 = vsub.s32 4, %v5776_v27  ;;  %v13318_v19 = vand.u32 3, %v5703_v31  ;;  %v16152_v17 = vand.u32 2147483647, %v12742_v48  ;;  %v5581_v22 = vor.u32 %v5580_v20, %v5579_v55 }
 0x5cc   : > { %v5584_v18 = vshll.u32 %v5583_v25, 23  ;;  %v5780_v58 = vsub.s32 0, %v13314_v13  ;;  %vm5498_vm10 = vcmp.eq.s32.totalorder %v5496_v49, 0  ;;  %vm5501_vm14 = vcmp.eq.s32.totalorder %v5496_v49, 2  ;;  %v8693_v54 = vpop.eup %8692 }
 0x5cd   : > { %vm13322_vm13 = vcmp.le.f32.partialorder %v16152_v17, 0.7853982  ;;  %v5177_v36 = vsel %vm5092_vm6, %v5176_v33, %v12931_v21  ;;  %v5500_v28 = vsel %vm5498_vm10, %v13217_v11, %v5499_v7  ;;  %v5503_v53 = vsel %vm5501_vm14, %v5502_v46, %v13219_v38  ;;  %v13336_v56 = vpop.eup %8694 }
 0x5ce   : > { %v5178_v32 = vsel %vm13322_vm13, %v12742_v48, %v5175_v42  ;;  %v5585_v15 = vor.u32 4788187, %v5584_v18  ;;  %v8189_v43 = vmin.u32 %v5780_v58, %v13314_v13  ;;  %v5588_v31 = vcvt.s32.f32 %v5581_v22 }
 0x5cf   : > { %vm16155_vm0 = vcmp.lt.s32.totalorder %v13096_v5, 0  ;;  %v5710_v1 = vxor.u32 2147483648, %v8691_v14  ;;  %8700 = vcosq.f32 %v5178_v32  ;;  %v13340_v21 = vpop.eup %8696  ;;  %v5179_v0 = vsel %vm13322_vm13, 0, %v5177_v36 }
 0x5d0   : > { %v5801_v37 = vsel %vm16155_vm0, %v5800_v61, %v5776_v27  ;;  %v5586_v10 = vand.u32 2147483647, %v5585_v15  ;;  %v5782_v42 = vclz %v8189_v43  ;;  %8702 = vsinq.f32 %v5178_v32 }
 0x5d1   : > { %vm16156_vm10 = vcmp.lt.s32.totalorder %v5496_v49, 2  ;;  %vm5706_vm14 = vcmp.eq.s32.totalorder %v13318_v19, 0  ;;  %v5707_v38 = vxor.u32 2147483648, %v8693_v54  ;;  %vm5709_vm2 = vcmp.eq.s32.totalorder %v13318_v19, 2  ;;  %v13348_v27 = vpop.eup %8698 }
 0x5d2   : > { %v5504_v11 = vsel %vm16156_vm10, %v5500_v28, %v5503_v53  ;;  %v5589_v7 = vmul.f32 %v5588_v31, %v5586_v10  ;;  %v8190_v46 = vadd.s32 4294967294, %v5782_v42  ;;  %v5803_v33 = vsel %vm13304_vm9, 0, %v5801_v37 }
 0x5d3   : > { %v16157_v55 = vand.u32 2147483647, %v12822_v57  ;;  %v5183_v49 = vadd.s32 3, %v5179_v0  ;;  %v5384_v25 = vsub.s32 4, %v12993_v45  ;;  %v5072_v17 = vsub.s32 4, %v12768_v52 }
 0x5d4   : > { %v5590_v8 = vxor.u32 2147483648, %v5589_v7  ;;  %vm8191_vm10 = vcmp.lt.s32.totalorder %v8190_v46, 0  ;;  %v5711_v22 = vsel %vm5709_vm2, %v5710_v1, %v8693_v54  ;;  %v5708_v58 = vsel %vm5706_vm14, %v8691_v14, %v5707_v38 }
 0x5d5   : > { %vm13355_vm13 = vcmp.le.f32.partialorder %v16157_v55, 0.7853982  ;;  %v5785_v18 = vsel %vm8191_vm10, 0, %v8190_v46  ;;  %vm16160_vm0 = vcmp.lt.s32.totalorder %v12822_v57, 0  ;;  %vm16161_vm6 = vcmp.lt.s32.totalorder %v13081_v62, 0 }
 0x5d6   : > { %v5386_v61 = vsel %vm13355_vm13, %v12822_v57, %v13286_v4  ;;  %v5385_v36 = vsel %vm16160_vm0, %v5384_v25, %v12993_v45  ;;  %v5591_v32 = vsel %vm16161_vm6, %v5590_v8, %v5589_v7  ;;  %v5786_v15 = vsub.s32 32, %v5785_v18 }
 0x5d7   : > { %8704 = vcosq.f32 %v5386_v61  ;;  %v5790_v4 = vsub.s32 4294967266, %v5785_v18  ;;  %vm16162_vm12 = vcmp.lt.s32.totalorder %v12584_v23, 0  ;;  %v5787_v54 = vshll.u32 %v13314_v13, %v5785_v18 }
 0x5d8   : > { %8706 = vsinq.f32 %v5386_v61  ;;  %v5073_v43 = vsel %vm16162_vm12, %v5072_v17, %v12768_v52  ;;  %v5594_v14 = vsel %vm13291_vm15, %v13081_v62, %v5591_v32  ;;  %v5807_v28 = vadd.s32 3, %v5803_v33 }
 0x5d9   : > { %v5184_v53 = vand.u32 3, %v5183_v49  ;;  %v5788_v45 = vshrl.u32 %v13300_v40, %v5786_v15  ;;  %v5791_v31 = vadd.s32 127, %v5790_v4  ;;  %8708 = vcosq.f32 %v5594_v14 }
 0x5da   : > { %v5387_v37 = vsel %vm13355_vm13, 0, %v5385_v36  ;;  %8710 = vsinq.f32 %v5594_v14  ;;  %vm16163_vm2 = vcmp.lt.s32.totalorder %v13318_v19, 2  ;;  %v5075_v13 = vsel %vm13012_vm1, 0, %v5073_v43 }
 0x5db   : > { %v5712_v1 = vsel %vm16163_vm2, %v5708_v58, %v5711_v22  ;;  %v5391_v52 = vadd.s32 3, %v5387_v37  ;;  %v5789_v10 = vor.u32 %v5788_v45, %v5787_v54  ;;  %v5792_v16 = vshll.u32 %v5791_v31, 23 }
 0x5dc   : > { %v13387_v42 = vand.u32 3, %v13316_v50  ;;  %v5079_v0 = vadd.s32 3, %v5075_v13  ;;  %vm16164_vm12 = vweird.f32 %v12841_v26  ;;  %vm5702_vm15 = vweird.f32 %v12895_v9  ;;  %v8701_v7 = vpop.eup %8700 }
 0x5dd   : > { %v13391_v40 = vsel %vm16164_vm12, nan, %v5504_v11  ;;  %v13394_v38 = vand.u32 3, %v5391_v52  ;;  %v5280_v19 = vsub.s32 4, %v12853_v29  ;;  %v5793_v46 = vor.u32 4788187, %v5792_v16  ;;  %v8703_v50 = vpop.eup %8702 }
 0x5de   : > { %v13397_v3 = vand.u32 3, %v5807_v28  ;;  %v13399_v33 = vsel %vm5702_vm15, nan, %v5712_v1  ;;  %vm5186_vm6 = vcmp.eq.s32.totalorder %v5184_v53, 0  ;;  %v5190_v55 = vxor.u32 2147483648, %v8701_v7 }
 0x5df   : > { %v5080_v20 = vand.u32 3, %v5079_v0  ;;  %v5083_v26 = vxor.u32 2147483648, %v13336_v56  ;;  %v5794_v11 = vand.u32 2147483647, %v5793_v46  ;;  %v5796_v49 = vcvt.s32.f32 %v5789_v10 }
 0x5e0   : > { %v5187_v9 = vxor.u32 2147483648, %v8703_v50  ;;  %v5086_v25 = vxor.u32 2147483648, %v13311_v6  ;;  %vm5189_vm0 = vcmp.eq.s32.totalorder %v5184_v53, 2  ;;  %vm16165_vm10 = vcmp.lt.s32.totalorder %v12664_v39, 0 }
 0x5e1   : > { %v5281_v61 = vsel %vm16165_vm10, %v5280_v19, %v12853_v29  ;;  %v5291_v17 = vxor.u32 2147483648, %v13348_v27  ;;  %v5797_v8 = vmul.f32 %v5796_v49, %v5794_v11  ;;  %vm5602_vm2 = vcmp.eq.s32.totalorder %v13387_v42, 0 }
 0x5e2   : > { %v5188_v22 = vsel %vm5186_vm6, %v8701_v7, %v5187_v9  ;;  %v5191_v18 = vsel %vm5189_vm0, %v5190_v55, %v8703_v50  ;;  %v5283_v58 = vsel %vm13208_vm11, 0, %v5281_v61  ;;  %vm5601_vm12 = vcmp.lt.s32.totalorder %v13387_v42, 2 }
 0x5e3   : > { %vm5397_vm14 = vcmp.eq.s32.totalorder %v13394_v38, 2  ;;  %vm5082_vm13 = vcmp.eq.s32.totalorder %v5080_v20, 0  ;;  %vm5085_vm1 = vcmp.eq.s32.totalorder %v5080_v20, 2  ;;  %v5287_v29 = vadd.s32 3, %v5283_v58 }
 0x5e4   : > { %v8705_v36 = vpop.eup %8704  ;;  %v5798_v15 = vxor.u32 2147483648, %v5797_v8  ;;  %v5084_v43 = vsel %vm5082_vm13, %v13311_v6, %v5083_v26  ;;  %v5087_v44 = vsel %vm5085_vm1, %v5086_v25, %v13336_v56  ;;  %vm16166_vm11 = vcmp.lt.s32.totalorder %v5184_v53, 2 }
 0x5e5   : > { %v8707_v32 = vpop.eup %8706  ;;  %v5398_v4 = vxor.u32 2147483648, %v8705_v36  ;;  %v5192_v54 = vsel %vm16166_vm11, %v5188_v22, %v5191_v18  ;;  %vm5081_vm6 = vcmp.lt.s32.totalorder %v5080_v20, 2  ;;  %v5288_v28 = vand.u32 3, %v5287_v29  ;;  %v16185_v29 = vld [vmem:[#allocation92_spill] sm:$0xff] }
 0x5e6   : > { %v5395_v14 = vxor.u32 2147483648, %v8707_v32  ;;  %vm16167_vm0 = vcmp.lt.s32.totalorder %v13096_v5, 0  ;;  %vm5182_vm15 = vweird.f32 %v12742_v48  ;;  %v5294_v31 = vxor.u32 2147483648, %v13340_v21  ;;  %v8709_v56 = vpop.eup %8708 }
 0x5e7   : > { %v5799_v45 = vsel %vm16167_vm0, %v5798_v15, %v5797_v8  ;;  %v16168_v37 = vand.u32 2147483647, %v12429_v47  ;;  %v4760_v6 = vsub.s32 4, %v12620_v60  ;;  %vm5390_vm1 = vweird.f32 %v12822_v57  ;;  %v8711_v16 = vpop.eup %8710  ;;  %v16183_v57 = vld [vmem:[#allocation84_spill] sm:$0xff] }
 0x5e8   : > { %v5802_v53 = vsel %vm13304_vm9, %v13096_v5, %v5799_v45  ;;  %v5399_v52 = vsel %vm5397_vm14, %v5398_v4, %v8707_v32  ;;  %v5088_v13 = vsel %vm5081_vm6, %v5084_v43, %v5087_v44  ;;  %v5606_v0 = vxor.u32 2147483648, %v8709_v56  ;;  %v16186_v15 = vld [vmem:[#allocation12_spill] sm:$0xff]  ;;  %v16187_v43 = vld [vmem:[#allocation66_spill] sm:$0xff]  ;;  %v16191_v45 = vld [vmem:[#allocation75_spill] sm:$0xff] }
 0x5e9   : > { %vm13425_vm10 = vcmp.le.f32.partialorder %v16168_v37, 0.7853982  ;;  %8712 = vcosq.f32 %v5802_v53  ;;  %vm16171_vm13 = vcmp.eq.s32.totalorder %v13394_v38, 0  ;;  %vm5290_vm11 = vcmp.eq.s32.totalorder %v5288_v28, 0  ;;  %v16193_v37 = vld [vmem:[#allocation74_spill] sm:$0xff] }
 0x5ea   : > { %v4762_v10 = vsel %vm13425_vm10, %v12429_v47, %v12833_v12  ;;  %v5396_v19 = vsel %vm16171_vm13, %v8705_v36, %v5395_v14  ;;  %v5603_v59 = vxor.u32 2147483648, %v8711_v16  ;;  %8714 = vsinq.f32 %v5802_v53  ;;  %v16195_v53 = vld [vmem:[#allocation88_spill] sm:$0xff] }
 0x5eb   : > { %v5292_v7 = vsel %vm5290_vm11, %v13340_v21, %v5291_v17  ;;  %vm5293_vm9 = vcmp.eq.s32.totalorder %v5288_v28, 2  ;;  %vm16172_vm14 = vcmp.eq.s32.totalorder %v13387_v42, 2  ;;  %vm16173_vm6 = vcmp.lt.s32.totalorder %v12429_v47, 0 }
 0x5ec   : > { %v5607_v46 = vsel %vm16172_vm14, %v5606_v0, %v8711_v16  ;;  %v5295_v50 = vsel %vm5293_vm9, %v5294_v31, %v13348_v27  ;;  %v4761_v12 = vsel %vm16173_vm6, %v4760_v6, %v12620_v60  ;;  %8716 = vcosq.f32 %v4762_v10  ;;  %v16196_v16 = vld [vmem:[#allocation94_spill] sm:$0xff] }
 0x5ed   : > { %v5604_v55 = vsel %vm5602_vm2, %v8709_v56, %v5603_v59  ;;  %vm5289_vm0 = vcmp.lt.s32.totalorder %v5288_v28, 2  ;;  %v4763_v20 = vsel %vm13425_vm10, 0, %v4761_v12  ;;  %8718 = vsinq.f32 %v4762_v10 }
 0x5ee   : > { %v5608_v21 = vsel %vm5601_vm12, %v5604_v55, %v5607_v46  ;;  %vm16174_vm13 = vcmp.lt.s32.totalorder %v13394_v38, 2  ;;  %v4767_v27 = vadd.s32 3, %v4763_v20  ;;  %v16175_v11 = vand.u32 2147483647, %v12485_v41  ;;  %v16179_v38 = vld [vmem:[#allocation82_spill] sm:$0xff]  ;;  %v16199_v55 = vld [vmem:[#allocation69_spill] sm:$0xff] }
 0x5ef   : > { %v5400_v26 = vsel %vm16174_vm13, %v5396_v19, %v5399_v52  ;;  %vm16178_vm2 = vweird.f32 %v13081_v62  ;;  %v5296_v9 = vsel %vm5289_vm0, %v5292_v7, %v5295_v50  ;;  %v4968_v25 = vsub.s32 4, %v12672_v35  ;;  %v16197_v19 = vld [vmem:[#allocation93_spill] sm:$0xff] }
 0x5f0   : > { %vm13459_vm11 = vcmp.le.f32.partialorder %v16175_v11, 0.7853982  ;;  %v5609_v49 = vsel %vm16178_vm2, nan, %v5608_v21  ;;  %vm5078_vm12 = vweird.f32 %v12584_v23  ;;  %vm5286_vm10 = vweird.f32 %v12664_v39 }
 0x5f1   : > { %v4970_v42 = vsel %vm13459_vm11, %v12485_v41, %v13278_v2  ;;  %5875 = vmatprep.subr.mxu0 %v5609_v49  ;;  %v4656_v61 = vsub.s32 4, %v16179_v38  ;;  %vm5813_vm9 = vcmp.eq.s32.totalorder %v13397_v3, 2  ;;  %v5193_v62 = vsel %vm5182_vm15, nan, %v5192_v54  ;;  %v16210_v54 = vld [vmem:[#allocation76_spill] sm:$0xff] }
 0x5f2   : > { %8720 = vcosq.f32 %v4970_v42  ;;  %5876 = vmatpush1.msra.mxu0 %v13391_v40  ;;  %v5089_v17 = vsel %vm5078_vm12, nan, %v5088_v13  ;;  %vm16180_vm14 = vcmp.lt.s32.totalorder %v12485_v41, 0  ;;  %vm5810_vm6 = vcmp.eq.s32.totalorder %v13397_v3, 0 }
 0x5f3   : > { %v4969_v2 = vsel %vm16180_vm14, %v4968_v25, %v12672_v35  ;;  %8722 = vsinq.f32 %v4970_v42  ;;  %5877 = vmatprep.subr.mxu0 %v5193_v62  ;;  %v13483_v23 = vsel %vm5390_vm1, nan, %v5400_v26  ;;  %v13485_v39 = vsel %vm5286_vm10, nan, %v5296_v9  ;;  %v16181_v35 = vld [vmem:[#allocation73_spill] sm:$0xff] }
 0x5f4   : > { %v13487_v8 = vand.u32 3, %v4767_v27  ;;  %v4971_v48 = vsel %vm13459_vm11, 0, %v4969_v2  ;;  %vm5809_vm15 = vcmp.lt.s32.totalorder %v13397_v3, 2  ;;  %5878 = vmatpush1.msra.mxu0 %v5089_v17  ;;  %vm16182_vm0 = vcmp.lt.s32.totalorder %v16181_v35, 0  ;;  %v16203_v17 = vld [vmem:[#allocation45_spill] sm:$0xff]  ;;  %v16204_v2 = vld [vmem:[#allocation52_spill] sm:$0xff] }
 0x5f5   : > { %v4975_v40 = vadd.s32 3, %v4971_v48  ;;  %v4657_v22 = vsel %vm16182_vm0, %v4656_v61, %v16179_v38  ;;  %v4864_v18 = vsub.s32 4, %v16183_v57  ;;  %v4667_v32 = vxor.u32 2147483648, %v16185_v29 }
 0x5f6   : > { %v4659_v36 = vsel %vm12710_vm8, 0, %v4657_v22  ;;  %v4670_v4 = vxor.u32 2147483648, %v16186_v15  ;;  %v16188_v44 = vand.u32 2147483647, %v16187_v43  ;;  %vm16192_vm2 = vcmp.lt.s32.totalorder %v16191_v45, 0  ;;  %v8713_v13 = vpop.eup %8712 }
 0x5f7   : > { %v13508_v14 = vand.u32 3, %v4975_v40  ;;  %v4663_v28 = vadd.s32 3, %v4659_v36  ;;  %v4865_v31 = vsel %vm16192_vm2, %v4864_v18, %v16183_v57  ;;  %v4344_v1 = vsub.s32 4, %v16193_v37  ;;  %v8715_v7 = vpop.eup %8714 }
 0x5f8   : > { %vm13504_vm11 = vcmp.le.f32.partialorder %v16188_v44, 0.7853982  ;;  %v4867_v56 = vsel %vm12747_vm4, 0, %v4865_v31  ;;  %vm4773_vm14 = vcmp.eq.s32.totalorder %v13487_v8, 2  ;;  %v4875_v0 = vxor.u32 2147483648, %v16196_v16  ;;  %v16212_v31 = vld [vmem:[#allocation91_spill] sm:$0xff] }
 0x5f9   : > { %v4346_v52 = vsel %vm13504_vm11, %v16187_v43, %v16195_v53  ;;  %v4664_v10 = vand.u32 3, %v4663_v28  ;;  %v4878_v59 = vxor.u32 2147483648, %v16197_v19  ;;  %v5814_v46 = vxor.u32 2147483648, %v8713_v13  ;;  %v8717_v26 = vpop.eup %8716 }
 0x5fa   : > { %v4871_v50 = vadd.s32 3, %v4867_v56  ;;  %vm16198_vm4 = vcmp.lt.s32.totalorder %v16187_v43, 0  ;;  %8724 = vcosq.f32 %v4346_v52  ;;  %v16200_v20 = vand.u32 2147483647, %v16199_v55  ;;  %v8719_v11 = vpop.eup %8718  ;;  %v16214_v56 = vld [vmem:[#allocation67_spill] sm:$0xff] }
 0x5fb   : > { %v4345_v12 = vsel %vm16198_vm4, %v4344_v1, %v16193_v37  ;;  %v5811_v27 = vxor.u32 2147483648, %v8715_v7  ;;  %vm4665_vm8 = vcmp.lt.s32.totalorder %v4664_v10, 2  ;;  %vm4666_vm12 = vcmp.eq.s32.totalorder %v4664_v10, 0 }
 0x5fc   : > { %vm13532_vm2 = vcmp.le.f32.partialorder %v16200_v20, 0.7853982  ;;  %vm4669_vm10 = vcmp.eq.s32.totalorder %v4664_v10, 2  ;;  %v5815_v60 = vsel %vm5813_vm9, %v5814_v46, %v8715_v7  ;;  %v4774_v49 = vxor.u32 2147483648, %v8717_v26  ;;  %v16216_v10 = vld [vmem:[#allocation81_spill] sm:$0xff]  ;;  %v16219_v46 = vld [vmem:[#allocation80_spill] sm:$0xff] }
 0x5fd   : > { %vm4974_vm0 = vweird.f32 %v12485_v41  ;;  %v4668_v9 = vsel %vm4666_vm12, %v16186_v15, %v4667_v32  ;;  %v4671_v25 = vsel %vm4669_vm10, %v4670_v4, %v16185_v29  ;;  %v5812_v42 = vsel %vm5810_vm6, %v8713_v13, %v5811_v27  ;;  %v16217_v41 = vld [vmem:[#allocation79_spill] sm:$0xff] }
 0x5fe   : > { %v4771_v38 = vxor.u32 2147483648, %v8719_v11  ;;  %v4672_v61 = vsel %vm4665_vm8, %v4668_v9, %v4671_v25  ;;  %vm4870_vm4 = vweird.f32 %v16191_v45  ;;  %v4872_v62 = vand.u32 3, %v4871_v50  ;;  %v16221_v45 = vld [vmem:[#allocation59_spill] sm:$0xff]  ;;  %v16225_v9 = vld [vmem:[#allocation86_spill] sm:$0xff] }
 0x5ff   : > { %vm3844_vm1 = vcmp.lt.s32.totalorder %v16203_v17, 0  ;;  %vm4052_vm13 = vcmp.lt.s32.totalorder %v16204_v2, 0  ;;  %v5816_v48 = vsel %vm5809_vm15, %v5812_v42, %v5815_v60  ;;  %v4775_v40 = vsel %vm4773_vm14, %v4774_v49, %v8719_v11  ;;  %v8721_v57 = vpop.eup %8720  ;;  %v16224_v11 = vld [vmem:[#allocation70_spill] sm:$0xff] }
 0x600   : > { %vm4981_vm9 = vcmp.eq.s32.totalorder %v13508_v14, 2  ;;  %vm16205_vm12 = vweird.f32 %v16181_v35  ;;  %vm16206_vm6 = vweird.f32 %v13096_v5  ;;  %vm16207_vm8 = vcmp.eq.s32.totalorder %v13487_v8, 0  ;;  %v8723_v36 = vpop.eup %8722 }
 0x601   : > { %v4673_v22 = vsel %vm16205_vm12, nan, %v4672_v61  ;;  %v5817_v18 = vsel %vm16206_vm6, nan, %v5816_v48  ;;  %v4772_v58 = vsel %vm16207_vm8, %v8717_v26, %v4771_v38  ;;  %vm4874_vm10 = vcmp.eq.s32.totalorder %v4872_v62, 0  ;;  %v16226_v38 = vld [vmem:[#allocation85_spill] sm:$0xff] }
 0x602   : > { %v4347_v3 = vsel %vm13504_vm11, 0, %v4345_v12  ;;  %5964 = vmatprep.subr.mxu1 %v5817_v18  ;;  %vm16208_vm15 = vcmp.lt.s32.totalorder %v13487_v8, 2  ;;  %v4982_v32 = vxor.u32 2147483648, %v8721_v57  ;;  %v4876_v35 = vsel %vm4874_vm10, %v16197_v19, %v4875_v0  ;;  %v16247_v18 = vld [vmem:[#allocation65_spill] sm:$0xff] }
 0x603   : > { %v4776_v29 = vsel %vm16208_vm15, %v4772_v58, %v4775_v40  ;;  %vm4877_vm14 = vcmp.eq.s32.totalorder %v4872_v62, 2  ;;  %5965 = vmatpush1.msra.mxu1 %v13399_v33  ;;  %vm16209_vm12 = vweird.f32 %v12429_v47  ;;  %v4979_v15 = vxor.u32 2147483648, %v8723_v36  ;;  %v16229_v40 = vld [vmem:[#allocation90_spill] sm:$0xff] }
 0x604   : > { %v4777_v5 = vsel %vm16209_vm12, nan, %v4776_v29  ;;  %v4879_v4 = vsel %vm4877_vm14, %v4878_v59, %v16196_v16  ;;  %8726 = vsinq.f32 %v4346_v52  ;;  %5966 = vmatprep.subr.mxu1 %v13483_v23  ;;  %v4983_v8 = vsel %vm4981_vm9, %v4982_v32, %v8723_v36  ;;  %v16215_v52 = vld [vmem:[#allocation68_spill] sm:$0xff]  ;;  %v16234_v29 = vld [vmem:[#allocation61_spill] sm:$0xff] }
 0x605   : > { %5879 = vmatprep.subr.mxu0 %v4777_v5  ;;  %vm4873_vm11 = vcmp.lt.s32.totalorder %v4872_v62, 2  ;;  %v4351_v44 = vadd.s32 3, %v4347_v3  ;;  %v4552_v28 = vsub.s32 4, %v16210_v54  ;;  %5967 = vmatpush1.msra.mxu1 %v13485_v39  ;;  %vm4977_vm6 = vcmp.lt.s32.totalorder %v13508_v14, 2  ;;  %v16227_v62 = vld [vmem:[#allocation62_spill] sm:$0xff]  ;;  %v16235_v5 = vld [vmem:[#allocation89_spill] sm:$0xff] }
 0x606   : > { %vm16211_vm8 = vcmp.eq.s32.totalorder %v13508_v14, 0  ;;  %5880 = vmatpush1.msra.mxu0 %v4673_v22  ;;  %v4880_v33 = vsel %vm4873_vm11, %v4876_v35, %v4879_v4  ;;  %v4554_v23 = vsel %vm13532_vm2, %v16199_v55, %v16212_v31  ;;  %vm16213_vm9 = vcmp.lt.s32.totalorder %v16199_v55, 0  ;;  %v16236_v31 = vld [vmem:[#allocation34_spill] sm:$0xff] }
 0x607   : > { %v4980_v47 = vsel %vm16211_vm8, %v8721_v57, %v4979_v15  ;;  %v13578_v1 = vand.u32 3, %v4351_v44  ;;  %v4553_v6 = vsel %vm16213_vm9, %v4552_v28, %v16210_v54  ;;  %8728 = vcosq.f32 %v4554_v23  ;;  %v8725_v19 = vpop.eup %8724 }
 0x608   : > { %v4984_v37 = vsel %vm4977_vm6, %v4980_v47, %v4983_v8  ;;  %v4555_v14 = vsel %vm13532_vm2, 0, %v4553_v6  ;;  %8730 = vsinq.f32 %v4554_v23  ;;  %v4240_v53 = vsub.s32 4, %v16214_v56 }
 0x609   : > { %v4985_v39 = vsel %vm4974_vm0, nan, %v4984_v37  ;;  %v3718_v13 = vxor.u32 2147483648, %v16215_v52  ;;  %8732 = vcosq.f32 %v16216_v10  ;;  %v4881_v16 = vsel %vm4870_vm4, nan, %v4880_v33 }
 0x60a   : > { %5968 = vmatprep.subr.mxu1 %v4985_v39  ;;  %v4559_v0 = vadd.s32 3, %v4555_v14  ;;  %8734 = vsinq.f32 %v16216_v10  ;;  %v16218_v59 = vxor.u32 2147483648, %v16217_v41  ;;  %v16220_v50 = vxor.u32 2147483648, %v16219_v46  ;;  %v16237_v39 = vld [vmem:[#allocation22_spill] sm:$0xff] }
 0x60b   : > { %5969 = vmatpush1.msra.mxu1 %v4881_v16  ;;  %vm16222_vm0 = vcmp.lt.s32.totalorder %v16221_v45, 0  ;;  %vm4354_vm2 = vcmp.eq.s32.totalorder %v13578_v1, 0  ;;  %v4448_v60 = vsub.s32 4, %v16224_v11  ;;  %vm4353_vm4 = vcmp.lt.s32.totalorder %v13578_v1, 2 }
 0x60c   : > { %v3927_v7 = vsel %vm3844_vm1, %v16218_v59, %v16217_v41  ;;  %v13603_v12 = vsel %vm4052_vm13, %v16220_v50, %v16219_v46  ;;  %v4241_v20 = vsel %vm16222_vm0, %v4240_v53, %v16214_v56  ;;  %v13609_v21 = vand.u32 3, %v4559_v0 }
 0x60d   : > { %v4243_v27 = vsel %vm12406_vm5, 0, %v4241_v20  ;;  %vm4357_vm10 = vcmp.eq.s32.totalorder %v13578_v1, 2  ;;  %vm4246_vm15 = vweird.f32 %v16221_v45  ;;  %v4251_v25 = vxor.u32 2147483648, %v16225_v9 }
 0x60e   : > { %v4247_v49 = vadd.s32 3, %v4243_v27  ;;  %vm4350_vm14 = vweird.f32 %v16187_v43  ;;  %v4358_v42 = vxor.u32 2147483648, %v8725_v19  ;;  %v4254_v61 = vxor.u32 2147483648, %v16226_v38  ;;  %v16241_v27 = vld [vmem:[#allocation63_spill] sm:$0xff] }
 0x60f   : > { %vm16228_vm12 = vcmp.lt.s32.totalorder %v16227_v62, 0  ;;  %v4459_v22 = vxor.u32 2147483648, %v16229_v40  ;;  %v16231_v3 = vand.u32 2147483647, %v16203_v17  ;;  %v3928_v32 = vsub.s32 4, %v16234_v29 }
 0x610   : > { %v4449_v48 = vsel %vm16228_vm12, %v4448_v60, %v16224_v11  ;;  %v4248_v57 = vand.u32 3, %v4247_v49  ;;  %vm4562_vm11 = vcmp.eq.s32.totalorder %v13609_v21, 0  ;;  %v4462_v15 = vxor.u32 2147483648, %v16235_v5 }
 0x611   : > { %v4451_v58 = vsel %vm12489_vm3, 0, %v4449_v48  ;;  %vm13628_vm5 = vcmp.le.f32.partialorder %v16231_v3, 0.7853982  ;;  %v3929_v8 = vsel %vm3844_vm1, %v3928_v32, %v16234_v29  ;;  %v8727_v44 = vpop.eup %8726  ;;  %vm3428_vm0 = vcmp.lt.s32.totalorder %v16236_v31, 0 }
 0x612   : > { %v4455_v35 = vadd.s32 3, %v4451_v58  ;;  %v3930_v4 = vsel %vm13628_vm5, %v16203_v17, %v3927_v7  ;;  %vm4249_vm3 = vcmp.lt.s32.totalorder %v4248_v57, 2  ;;  %vm4250_vm8 = vcmp.eq.s32.totalorder %v4248_v57, 0 }
 0x613   : > { %vm4253_vm9 = vcmp.eq.s32.totalorder %v4248_v57, 2  ;;  %v4252_v54 = vsel %vm4250_vm8, %v16226_v38, %v4251_v25  ;;  %v3931_v33 = vsel %vm13628_vm5, 0, %v3929_v8  ;;  %v4355_v23 = vxor.u32 2147483648, %v8727_v44  ;;  %v16252_v8 = vld [vmem:[#allocation71_spill] sm:$0xff] }
 0x614   : > { %v4255_v28 = vsel %vm4253_vm9, %v4254_v61, %v16225_v9  ;;  %v4456_v47 = vand.u32 3, %v4455_v35  ;;  %v4359_v37 = vsel %vm4357_vm10, %v4358_v42, %v8727_v44  ;;  %8736 = vcosq.f32 %v3930_v4  ;;  %v8729_v53 = vpop.eup %8728  ;;  %v16242_v42 = vld [vmem:[#allocation46_spill] sm:$0xff]  ;;  %v16243_v61 = vld [vmem:[#allocation53_spill] sm:$0xff] }
 0x615   : > { %v4256_v6 = vsel %vm4249_vm3, %v4252_v54, %v4255_v28  ;;  %vm3636_vm12 = vcmp.lt.s32.totalorder %v16237_v39, 0  ;;  %vm4565_vm1 = vcmp.eq.s32.totalorder %v13609_v21, 2  ;;  %v16238_v14 = vand.u32 2147483647, %v16204_v2  ;;  %v8731_v41 = vpop.eup %8730  ;;  %v16250_v35 = vld [vmem:[#allocation54_spill] sm:$0xff]  ;;  %v16255_v28 = vld [vmem:[#allocation40_spill] sm:$0xff] }
 0x616   : > { %vm4458_vm6 = vcmp.eq.s32.totalorder %v4456_v47, 0  ;;  %vm4461_vm8 = vcmp.eq.s32.totalorder %v4456_v47, 2  ;;  %v4356_v10 = vsel %vm4354_vm2, %v8725_v19, %v4355_v23  ;;  %8738 = vsinq.f32 %v3930_v4  ;;  %v13665_v20 = vpop.eup %8732 }
 0x617   : > { %vm13653_vm9 = vcmp.le.f32.partialorder %v16238_v14, 0.7853982  ;;  %v4460_v16 = vsel %vm4458_vm6, %v16235_v5, %v4459_v22  ;;  %v4463_v0 = vsel %vm4461_vm8, %v4462_v15, %v16229_v40  ;;  %v4360_v59 = vsel %vm4353_vm4, %v4356_v10, %v4359_v37  ;;  %v13670_v60 = vpop.eup %8734  ;;  %v16245_v22 = vld [vmem:[#allocation7_spill] sm:$0xff]  ;;  %v16251_v15 = vld [vmem:[#allocation72_spill] sm:$0xff]  ;;  %v16256_v37 = vld [vmem:[#allocation77_spill] sm:$0xff] }
 0x618   : > { %v4566_v7 = vxor.u32 2147483648, %v8729_v53  ;;  %v4257_v46 = vsel %vm4246_vm15, nan, %v4256_v6  ;;  %v3935_v50 = vadd.s32 3, %v3931_v33  ;;  %v4361_v26 = vsel %vm4350_vm14, nan, %v4360_v59 }
 0x619   : > { %v4563_v19 = vxor.u32 2147483648, %v8731_v41  ;;  %vm4457_vm2 = vcmp.lt.s32.totalorder %v4456_v47, 2  ;;  %v4136_v11 = vsub.s32 4, %v16241_v27  ;;  %5881 = vmatprep.subr.mxu0 %v4361_v26  ;;  %v4138_v45 = vsel %vm13653_vm9, %v16204_v2, %v13603_v12 }
 0x61a   : > { %v4567_v1 = vsel %vm4565_vm1, %v4566_v7, %v8731_v41  ;;  %v4464_v49 = vsel %vm4457_vm2, %v4460_v16, %v4463_v0  ;;  %v13674_v9 = vand.u32 3, %v3935_v50  ;;  %5882 = vmatpush1.msra.mxu0 %v4257_v46  ;;  %8740 = vcosq.f32 %v4138_v45 }
 0x61b   : > { %v4564_v43 = vsel %vm4562_vm11, %v8729_v53, %v4563_v19  ;;  %v4137_v25 = vsel %vm4052_vm13, %v4136_v11, %v16241_v27  ;;  %v3824_v38 = vsub.s32 4, %v16242_v42  ;;  %8742 = vsinq.f32 %v16243_v61 }
 0x61c   : > { %vm4558_vm4 = vweird.f32 %v16199_v55  ;;  %vm16244_vm10 = vcmp.lt.s32.totalorder %v13609_v21, 2  ;;  %vm4454_vm15 = vweird.f32 %v16227_v62  ;;  %v4139_v40 = vsel %vm13653_vm9, 0, %v4137_v25 }
 0x61d   : > { %v4568_v48 = vsel %vm16244_vm10, %v4564_v43, %v4567_v1  ;;  %8744 = vsinq.f32 %v4138_v45  ;;  %vm16246_vm13 = vcmp.lt.s32.totalorder %v16245_v22, 0  ;;  %v16248_v58 = vxor.u32 2147483648, %v16247_v18 }
 0x61e   : > { %v4569_v12 = vsel %vm4558_vm4, nan, %v4568_v48  ;;  %v3825_v57 = vsel %vm16246_vm13, %v3824_v38, %v16242_v42  ;;  %v4465_v21 = vsel %vm4454_vm15, nan, %v4464_v49  ;;  %v4143_v3 = vadd.s32 3, %v4139_v40 }
 0x61f   : > { %v3511_v55 = vsel %vm3428_vm0, %v16248_v58, %v16247_v18  ;;  %5970 = vmatprep.subr.mxu1 %v4569_v12  ;;  %v3827_v62 = vsel %vm12072_vm7, 0, %v3825_v57  ;;  %v3719_v29 = vsel %vm3636_vm12, %v3718_v13, %v16215_v52  ;;  %vm3937_vm14 = vcmp.lt.s32.totalorder %v13674_v9, 2  ;;  %v16253_v52 = vld [vmem:[#allocation42_spill] sm:$0xff]  ;;  %v16264_v58 = vld [vmem:[#allocation44_spill] sm:$0xff] }
 0x620   : > { %5971 = vmatpush1.msra.mxu1 %v4465_v21  ;;  %v3831_v32 = vadd.s32 3, %v3827_v62  ;;  %v4032_v5 = vsub.s32 4, %v16250_v35  ;;  %vm3934_vm5 = vweird.f32 %v16203_v17  ;;  %vm3938_vm11 = vcmp.eq.s32.totalorder %v13674_v9, 0 }
 0x621   : > { %vm3941_vm6 = vcmp.eq.s32.totalorder %v13674_v9, 2  ;;  %v3835_v4 = vxor.u32 2147483648, %v16251_v15  ;;  %v3838_v44 = vxor.u32 2147483648, %v16252_v8  ;;  %vm3830_vm7 = vweird.f32 %v16245_v22  ;;  %v8737_v33 = vpop.eup %8736 }
 0x622   : > { %v3832_v54 = vand.u32 3, %v3831_v32  ;;  %vm16254_vm3 = vcmp.lt.s32.totalorder %v16253_v52, 0  ;;  %v3512_v47 = vsub.s32 4, %v16255_v28  ;;  %v4144_v23 = vand.u32 3, %v4143_v3 }
 0x623   : > { %v4033_v13 = vsel %vm16254_vm3, %v4032_v5, %v16250_v35  ;;  %vm16257_vm1 = vnez %v16256_v37  ;;  %v4043_v14 = vxor.u32 2147483648, %v13670_v60  ;;  %v16258_v56 = vand.u32 2147483647, %v16236_v31  ;;  %v8739_v0 = vpop.eup %8738  ;;  %v16265_v35 = vld [vmem:[#allocation30_spill] sm:$0xff] }
 0x624   : > { %v4035_v6 = vsel %vm16257_vm1, 0, %v4033_v13  ;;  %v3942_v10 = vxor.u32 2147483648, %v8737_v33  ;;  %vm3834_vm9 = vcmp.eq.s32.totalorder %v3832_v54, 0  ;;  %vm3837_vm2 = vcmp.eq.s32.totalorder %v3832_v54, 2  ;;  %v16269_v13 = vld [vmem:[#allocation47_spill] sm:$0xff] }
 0x625   : > { %vm13725_vm8 = vcmp.le.f32.partialorder %v16258_v56, 0.7853982  ;;  %v3836_v41 = vsel %vm3834_vm9, %v16252_v8, %v3835_v4  ;;  %v3839_v59 = vsel %vm3837_vm2, %v3838_v44, %v16251_v15  ;;  %v4039_v7 = vadd.s32 3, %v4035_v6  ;;  %v16266_v4 = vld [vmem:[#allocation11_spill] sm:$0xff]  ;;  %v16267_v44 = vld [vmem:[#allocation28_spill] sm:$0xff] }
 0x626   : > { %v3514_v16 = vsel %vm13725_vm8, %v16236_v31, %v3511_v55  ;;  %v3513_v46 = vsel %vm3428_vm0, %v3512_v47, %v16255_v28  ;;  %v3939_v50 = vxor.u32 2147483648, %v8739_v0  ;;  %v3943_v26 = vsel %vm3941_vm6, %v3942_v10, %v8739_v0  ;;  %v16271_v47 = vld [vmem:[#allocation57_spill] sm:$0xff] }
 0x627   : > { %v4046_v19 = vxor.u32 2147483648, %v13665_v20  ;;  %v3515_v27 = vsel %vm13725_vm8, 0, %v3513_v46  ;;  %vm4149_vm4 = vcmp.eq.s32.totalorder %v4144_v23, 2  ;;  %vm3833_vm10 = vcmp.lt.s32.totalorder %v3832_v54, 2  ;;  %v8741_v43 = vpop.eup %8740  ;;  %v16275_v10 = vld [vmem:[#allocation25_spill] sm:$0xff]  ;;  %v16281_v46 = vld [vmem:[#allocation60_spill] sm:$0xff] }
 0x628   : > { %v4040_v11 = vand.u32 3, %v4039_v7  ;;  %8746 = vcosq.f32 %v3514_v16  ;;  %v3940_v1 = vsel %vm3938_vm11, %v8737_v33, %v3939_v50  ;;  %v3840_v49 = vsel %vm3833_vm10, %v3836_v41, %v3839_v59  ;;  %v13752_v61 = vpop.eup %8742  ;;  %v16279_v59 = vld [vmem:[#allocation50_spill] sm:$0xff] }
 0x629   : > { %8748 = vsinq.f32 %v3514_v16  ;;  %v3519_v45 = vadd.s32 3, %v3515_v27  ;;  %v3944_v25 = vsel %vm3937_vm14, %v3940_v1, %v3943_v26  ;;  %v16261_v42 = vand.u32 2147483647, %v16237_v39  ;;  %v16282_v26 = vld [vmem:[#allocation6_spill] sm:$0xff]  ;;  %v16283_v27 = vld [vmem:[#allocation51_spill] sm:$0xff] }
 0x62a   : > { %vm4042_vm0 = vcmp.eq.s32.totalorder %v4040_v11, 0  ;;  %vm4045_vm15 = vcmp.eq.s32.totalorder %v4040_v11, 2  ;;  %v3945_v48 = vsel %vm3934_vm5, nan, %v3944_v25  ;;  %v4150_v12 = vxor.u32 2147483648, %v8741_v43  ;;  %v8745_v9 = vpop.eup %8744 }
 0x62b   : > { %vm13748_vm13 = vcmp.le.f32.partialorder %v16261_v42, 0.7853982  ;;  %v4044_v40 = vsel %vm4042_vm0, %v13665_v20, %v4043_v14  ;;  %v4047_v57 = vsel %vm4045_vm15, %v4046_v19, %v13670_v60  ;;  %5883 = vmatprep.subr.mxu0 %v3945_v48  ;;  %v3841_v18 = vsel %vm3830_vm7, nan, %v3840_v49  ;;  %v16274_v14 = vld [vmem:[#allocation56_spill] sm:$0xff] }
 0x62c   : > { %vm4041_vm14 = vcmp.lt.s32.totalorder %v4040_v11, 2  ;;  %v3720_v55 = vsub.s32 4, %v16264_v58  ;;  %v3722_v21 = vsel %vm13748_vm13, %v16237_v39, %v3719_v29  ;;  %v4147_v3 = vxor.u32 2147483648, %v8745_v9  ;;  %5884 = vmatpush1.msra.mxu0 %v3841_v18  ;;  %v16285_v48 = vld [vmem:[#allocation32_spill] sm:$0xff] }
 0x62d   : > { %v4151_v17 = vsel %vm4149_vm4, %v4150_v12, %v8745_v9  ;;  %v3520_v36 = vand.u32 3, %v3519_v45  ;;  %8750 = vcosq.f32 %v3722_v21  ;;  %vm4142_vm5 = vweird.f32 %v16204_v2  ;;  %v16286_v12 = vld [vmem:[#allocation20_spill] sm:$0xff] }
 0x62e   : > { %vm4146_vm11 = vcmp.eq.s32.totalorder %v4144_v23, 0  ;;  %v4048_v20 = vsel %vm4041_vm14, %v4044_v40, %v4047_v57  ;;  %v3721_v60 = vsel %vm3636_vm12, %v3720_v55, %v16264_v58  ;;  %vm4145_vm6 = vcmp.lt.s32.totalorder %v4144_v23, 2  ;;  %v16272_v23 = vld [vmem:[#allocation36_spill] sm:$0xff] }
 0x62f   : > { %v4148_v22 = vsel %vm4146_vm11, %v8741_v43, %v4147_v3  ;;  %v3723_v62 = vsel %vm13748_vm13, 0, %v3721_v60  ;;  %8752 = vsinq.f32 %v3722_v21  ;;  %vm4038_vm7 = vweird.f32 %v16253_v52 }
 0x630   : > { %v4152_v29 = vsel %vm4145_vm6, %v4148_v22, %v4151_v17  ;;  %v3727_v32 = vadd.s32 3, %v3723_v62  ;;  %v3408_v5 = vsub.s32 4, %v16265_v35  ;;  %v4049_v2 = vsel %vm4038_vm7, nan, %v4048_v20  ;;  %v16287_v17 = vld [vmem:[#allocation31_spill] sm:$0xff] }
 0x631   : > { %v4153_v15 = vsel %vm4142_vm5, nan, %v4152_v29  ;;  %vm3521_vm3 = vcmp.lt.s32.totalorder %v3520_v36, 2  ;;  %v3616_v8 = vsub.s32 4, %v16266_v4  ;;  %vm3518_vm12 = vweird.f32 %v16236_v31  ;;  %v16288_v29 = vld [vmem:[#allocation21_spill] sm:$0xff] }
 0x632   : > { %5972 = vmatprep.subr.mxu1 %v4153_v15  ;;  %vm3522_vm1 = vcmp.eq.s32.totalorder %v3520_v36, 0  ;;  %vm3525_vm8 = vcmp.eq.s32.totalorder %v3520_v36, 2  ;;  %vm16268_vm9 = vcmp.lt.s32.totalorder %v16267_v44, 0  ;;  %vm3414_vm2 = vweird.f32 %v16267_v44  ;;  %v16293_v44 = vld [vmem:[#allocation58_spill] sm:$0xff] }
 0x633   : > { %v3409_v54 = vsel %vm16268_vm9, %v3408_v5, %v16265_v35  ;;  %5973 = vmatpush1.msra.mxu1 %v4049_v2  ;;  %v13779_v52 = vand.u32 3, %v3727_v32  ;;  %vm16270_vm4 = vnez %v16269_v13  ;;  %v3419_v33 = vxor.u32 2147483648, %v16271_v47 }
 0x634   : > { %v3411_v28 = vsel %vm16270_vm4, 0, %v3409_v54  ;;  %vm16273_vm10 = vcmp.lt.s32.totalorder %v16272_v23, 0  ;;  %v3422_v56 = vxor.u32 2147483648, %v16274_v14  ;;  %v3627_v53 = vxor.u32 2147483648, %v13752_v61 }
 0x635   : > { %v3617_v37 = vsel %vm16273_vm10, %v3616_v8, %v16266_v4  ;;  %v3415_v6 = vadd.s32 3, %v3411_v28  ;;  %v16276_v16 = vand.u32 2147483647, %v16275_v10  ;;  %v8747_v41 = vpop.eup %8746  ;;  %vm16280_vm15 = vnez %v16279_v59  ;;  %v16298_v59 = vld [vmem:[#allocation18_spill] sm:$0xff] }
 0x636   : > { %v3619_v7 = vsel %vm16280_vm15, 0, %v3617_v37  ;;  %v3630_v50 = vxor.u32 2147483648, %v16281_v46  ;;  %v3096_v19 = vsub.s32 4, %v16282_v26  ;;  %v8749_v1 = vpop.eup %8748  ;;  %v3526_v49 = vxor.u32 2147483648, %v8747_v41  ;;  %v16294_v37 = vld [vmem:[#allocation39_spill] sm:$0xff] }
 0x637   : > { %vm13791_vm0 = vcmp.le.f32.partialorder %v16276_v16, 0.7853982  ;;  %v3416_v45 = vand.u32 3, %v3415_v6  ;;  %v3623_v43 = vadd.s32 3, %v3619_v7  ;;  %v3523_v25 = vxor.u32 2147483648, %v8749_v1  ;;  %v16296_v16 = vld [vmem:[#allocation24_spill] sm:$0xff] }
 0x638   : > { %v3098_v11 = vsel %vm13791_vm0, %v16275_v10, %v16283_v27  ;;  %vm3729_vm13 = vcmp.lt.s32.totalorder %v13779_v52, 2  ;;  %vm3733_vm14 = vcmp.eq.s32.totalorder %v13779_v52, 2  ;;  %vm16284_vm5 = vcmp.lt.s32.totalorder %v16275_v10, 0 }
 0x639   : > { %8754 = vcosq.f32 %v3098_v11  ;;  %v3097_v42 = vsel %vm16284_vm5, %v3096_v19, %v16282_v26  ;;  %v3527_v38 = vsel %vm3525_vm8, %v3526_v49, %v8749_v1  ;;  %vm3417_vm11 = vcmp.lt.s32.totalorder %v3416_v45, 2  ;;  %v16301_v26 = vld [vmem:[#allocation10_spill] sm:$0xff]  ;;  %v16303_v1 = vld [vmem:[#allocation9_spill] sm:$0xff] }
 0x63a   : > { %8756 = vsinq.f32 %v3098_v11  ;;  %vm3418_vm6 = vcmp.eq.s32.totalorder %v3416_v45, 0  ;;  %vm3421_vm7 = vcmp.eq.s32.totalorder %v3416_v45, 2  ;;  %vm2596_vm9 = vcmp.lt.s32.totalorder %v16285_v48, 0  ;;  %v8751_v58 = vpop.eup %8750  ;;  %v16305_v45 = vld [vmem:[#allocation26_spill] sm:$0xff] }
 0x63b   : > { %vm2804_vm4 = vcmp.lt.s32.totalorder %v16286_v12, 0  ;;  %v3524_v40 = vsel %vm3522_vm1, %v8747_v41, %v3523_v25  ;;  %v3420_v57 = vsel %vm3418_vm6, %v16274_v14, %v3419_v33  ;;  %v3423_v9 = vsel %vm3421_vm7, %v3422_v56, %v16271_v47  ;;  %v16295_v56 = vld [vmem:[#allocation14_spill] sm:$0xff] }
 0x63c   : > { %v3624_v18 = vand.u32 3, %v3623_v43  ;;  %v3528_v55 = vsel %vm3521_vm3, %v3524_v40, %v3527_v38  ;;  %v3424_v21 = vsel %vm3417_vm11, %v3420_v57, %v3423_v9  ;;  %v3099_v3 = vsel %vm13791_vm0, 0, %v3097_v42  ;;  %v8753_v36 = vpop.eup %8752  ;;  %v16307_v38 = vld [vmem:[#allocation48_spill] sm:$0xff]  ;;  %v16308_v57 = vld [vmem:[#allocation41_spill] sm:$0xff] }
 0x63d   : > { %v3304_v20 = vsub.s32 4, %v16287_v17  ;;  %v3529_v60 = vsel %vm3518_vm12, nan, %v3528_v55  ;;  %v3734_v22 = vxor.u32 2147483648, %v8751_v58  ;;  %v3425_v62 = vsel %vm3414_vm2, nan, %v3424_v21  ;;  %v16309_v55 = vld [vmem:[#allocation43_spill] sm:$0xff] }
 0x63e   : > { %v16289_v32 = vand.u32 2147483647, %v16288_v29  ;;  %5885 = vmatprep.subr.mxu0 %v3529_v60  ;;  %vm3626_vm3 = vcmp.eq.s32.totalorder %v3624_v18, 0  ;;  %vm3629_vm8 = vcmp.eq.s32.totalorder %v3624_v18, 2  ;;  %v3103_v5 = vadd.s32 3, %v3099_v3 }
 0x63f   : > { %vm16292_vm10 = vcmp.lt.s32.totalorder %v16288_v29, 0  ;;  %v3731_v15 = vxor.u32 2147483648, %v8753_v36  ;;  %v3735_v2 = vsel %vm3733_vm14, %v3734_v22, %v8753_v36  ;;  %5886 = vmatpush1.msra.mxu0 %v3425_v62  ;;  %v3628_v4 = vsel %vm3626_vm3, %v16281_v46, %v3627_v53  ;;  %v16314_v22 = vld [vmem:[#allocation23_spill] sm:$0xff] }
 0x640   : > { %vm13824_vm1 = vcmp.le.f32.partialorder %v16289_v32, 0.7853982  ;;  %v3305_v31 = vsel %vm16292_vm10, %v3304_v20, %v16287_v17  ;;  %v3631_v8 = vsel %vm3629_vm8, %v3630_v50, %v13752_v61  ;;  %vm3730_vm12 = vcmp.eq.s32.totalorder %v13779_v52, 0 }
 0x641   : > { %vm3625_vm2 = vcmp.lt.s32.totalorder %v3624_v18, 2  ;;  %v3306_v54 = vsel %vm13824_vm1, %v16288_v29, %v16293_v44  ;;  %v3307_v13 = vsel %vm13824_vm1, 0, %v3305_v31  ;;  %v3732_v28 = vsel %vm3730_vm12, %v8751_v58, %v3731_v15 }
 0x642   : > { %v3632_v47 = vsel %vm3625_vm2, %v3628_v4, %v3631_v8  ;;  %v3104_v33 = vand.u32 3, %v3103_v5  ;;  %8758 = vcosq.f32 %v3306_v54  ;;  %vm3726_vm0 = vweird.f32 %v16237_v39  ;;  %v16315_v5 = vld [vmem:[#allocation55_spill] sm:$0xff]  ;;  %v16316_v8 = vld [vmem:[#allocation49_spill] sm:$0xff] }
 0x643   : > { %8760 = vsinq.f32 %v16294_v37  ;;  %v3736_v61 = vsel %vm3729_vm13, %v3732_v28, %v3735_v2  ;;  %vm3622_vm15 = vweird.f32 %v16272_v23  ;;  %v3311_v14 = vadd.s32 3, %v3307_v13  ;;  %v16300_v23 = vld [vmem:[#allocation8_spill] sm:$0xff] }
 0x644   : > { %v3737_v6 = vsel %vm3726_vm0, nan, %v3736_v61  ;;  %8762 = vsinq.f32 %v3306_v54  ;;  %v2992_v53 = vsub.s32 4, %v16295_v56  ;;  %v16297_v0 = vxor.u32 2147483648, %v16296_v16 }
 0x645   : > { %v16299_v7 = vxor.u32 2147483648, %v16298_v59  ;;  %5974 = vmatprep.subr.mxu1 %v3737_v6  ;;  %v3633_v52 = vsel %vm3622_vm15, nan, %v3632_v47  ;;  %v3200_v46 = vsub.s32 4, %v16300_v23  ;;  %vm3102_vm13 = vweird.f32 %v16275_v10 }
 0x646   : > { %v2679_v41 = vsel %vm2596_vm9, %v16297_v0, %v16296_v16  ;;  %v8755_v50 = vpop.eup %8754  ;;  %5975 = vmatpush1.msra.mxu1 %v3633_v52  ;;  %vm3105_vm14 = vcmp.lt.s32.totalorder %v3104_v33, 2  ;;  %vm3106_vm5 = vcmp.eq.s32.totalorder %v3104_v33, 0  ;;  %vm16302_vm11 = vcmp.lt.s32.totalorder %v16301_v26, 0 }
 0x647   : > { %v2887_v39 = vsel %vm2804_vm4, %v16299_v7, %v16298_v59  ;;  %v2993_v19 = vsel %vm16302_vm11, %v2992_v53, %v16295_v56  ;;  %v8757_v27 = vpop.eup %8756  ;;  %vm3109_vm6 = vcmp.eq.s32.totalorder %v3104_v33, 2  ;;  %v3110_v11 = vxor.u32 2147483648, %v8755_v50 }
 0x648   : > { %vm16304_vm7 = vnez %v16303_v1  ;;  %vm16306_vm1 = vcmp.lt.s32.totalorder %v16305_v45, 0  ;;  %v3107_v25 = vxor.u32 2147483648, %v8757_v27  ;;  %v3312_v42 = vand.u32 3, %v3311_v14 }
 0x649   : > { %v2995_v49 = vsel %vm16304_vm7, 0, %v2993_v19  ;;  %v3201_v43 = vsel %vm16306_vm1, %v3200_v46, %v16300_v23  ;;  %v3003_v40 = vxor.u32 2147483648, %v16307_v38  ;;  %v3006_v9 = vxor.u32 2147483648, %v16308_v57 }
 0x64a   : > { %v3111_v18 = vsel %vm3109_vm6, %v3110_v11, %v8757_v27  ;;  %v2999_v58 = vadd.s32 3, %v2995_v49  ;;  %vm16310_vm3 = vnez %v16309_v55  ;;  %v16311_v3 = vand.u32 2147483647, %v16285_v48  ;;  %v16321_v11 = vld [vmem:[#allocation17_spill] sm:$0xff] }
 0x64b   : > { %v3203_v21 = vsel %vm16310_vm3, 0, %v3201_v43  ;;  %v3108_v20 = vsel %vm3106_vm5, %v8755_v50, %v3107_v25  ;;  %v2680_v62 = vsub.s32 4, %v16314_v22  ;;  %v3211_v31 = vxor.u32 2147483648, %v16315_v5 }
 0x64c   : > { %vm13874_vm8 = vcmp.le.f32.partialorder %v16311_v3, 0.7853982  ;;  %v3207_v60 = vadd.s32 3, %v3203_v21  ;;  %v3112_v35 = vsel %vm3105_vm14, %v3108_v20, %v3111_v18  ;;  %v3000_v36 = vand.u32 3, %v2999_v58  ;;  %v16327_v58 = vld [vmem:[#allocation37_spill] sm:$0xff] }
 0x64d   : > { %v2682_v32 = vsel %vm13874_vm8, %v16285_v48, %v2679_v41  ;;  %v3113_v15 = vsel %vm3102_vm13, nan, %v3112_v35  ;;  %v2681_v4 = vsel %vm2596_vm9, %v2680_v62, %v16314_v22  ;;  %v3214_v44 = vxor.u32 2147483648, %v16316_v8  ;;  %v16320_v41 = vld [vmem:[#allocation13_spill] sm:$0xff]  ;;  %v16331_v62 = vld [vmem:[#allocation16_spill] sm:$0xff]  ;;  %v16332_v35 = vld [vmem:[#allocation38_spill] sm:$0xff] }
 0x64e   : > { %8764 = vcosq.f32 %v2682_v32  ;;  %v3208_v2 = vand.u32 3, %v3207_v60  ;;  %5887 = vmatprep.subr.mxu0 %v3113_v15  ;;  %vm3001_vm10 = vcmp.lt.s32.totalorder %v3000_v36, 2  ;;  %vm3002_vm12 = vcmp.eq.s32.totalorder %v3000_v36, 0  ;;  %v16329_v20 = vld [vmem:[#allocation29_spill] sm:$0xff] }
 0x64f   : > { %8766 = vsinq.f32 %v2682_v32  ;;  %vm3005_vm2 = vcmp.eq.s32.totalorder %v3000_v36, 2  ;;  %v3004_v54 = vsel %vm3002_vm12, %v16308_v57, %v3003_v40  ;;  %v2683_v10 = vsel %vm13874_vm8, 0, %v2681_v4  ;;  %v8759_v28 = vpop.eup %8758 }
 0x650   : > { %v3007_v13 = vsel %vm3005_vm2, %v3006_v9, %v16307_v38  ;;  %vm3210_vm0 = vcmp.eq.s32.totalorder %v3208_v2, 0  ;;  %vm3317_vm15 = vcmp.eq.s32.totalorder %v3312_v42, 2  ;;  %vm2998_vm13 = vweird.f32 %v16301_v26  ;;  %v13896_v37 = vpop.eup %8760  ;;  %v16323_v38 = vld [vmem:[#allocation33_spill] sm:$0xff]  ;;  %v16325_v9 = vld [vmem:[#allocation19_spill] sm:$0xff] }
 0x651   : > { %v3008_v47 = vsel %vm3001_vm10, %v3004_v54, %v3007_v13  ;;  %v3212_v33 = vsel %vm3210_vm0, %v16316_v8, %v3211_v31  ;;  %v3318_v61 = vxor.u32 2147483648, %v8759_v28  ;;  %vm3213_vm9 = vcmp.eq.s32.totalorder %v3208_v2, 2  ;;  %v8763_v53 = vpop.eup %8762  ;;  %v16333_v54 = vld [vmem:[#allocation15_spill] sm:$0xff] }
 0x652   : > { %v3009_v6 = vsel %vm2998_vm13, nan, %v3008_v47  ;;  %v16317_v14 = vand.u32 2147483647, %v16286_v12  ;;  %v3215_v16 = vsel %vm3213_vm9, %v3214_v44, %v16315_v5  ;;  %v2687_v0 = vadd.s32 3, %v2683_v10 }
 0x653   : > { %5888 = vmatpush1.msra.mxu0 %v3009_v6  ;;  %v2888_v59 = vsub.s32 4, %v16320_v41  ;;  %v3315_v52 = vxor.u32 2147483648, %v8763_v53  ;;  %v3319_v23 = vsel %vm3317_vm15, %v3318_v61, %v8763_v53  ;;  %vm3310_vm5 = vweird.f32 %v16288_v29  ;;  %v16322_v29 = vld [vmem:[#allocation27_spill] sm:$0xff] }
 0x654   : > { %vm13900_vm14 = vcmp.le.f32.partialorder %v16317_v14, 0.7853982  ;;  %vm3314_vm11 = vcmp.eq.s32.totalorder %v3312_v42, 0  ;;  %vm3209_vm6 = vcmp.lt.s32.totalorder %v3208_v2, 2  ;;  %vm3313_vm7 = vcmp.lt.s32.totalorder %v3312_v42, 2 }
 0x655   : > { %v2890_v7 = vsel %vm13900_vm14, %v16286_v12, %v2887_v39  ;;  %v2889_v46 = vsel %vm2804_vm4, %v2888_v59, %v16320_v41  ;;  %v3316_v50 = vsel %vm3314_vm11, %v8759_v28, %v3315_v52  ;;  %v3216_v26 = vsel %vm3209_vm6, %v3212_v33, %v3215_v16 }
 0x656   : > { %8768 = vcosq.f32 %v2890_v7  ;;  %v3320_v19 = vsel %vm3313_vm7, %v3316_v50, %v3319_v23  ;;  %v2688_v27 = vand.u32 3, %v2687_v0  ;;  %v2891_v39 = vsel %vm13900_vm14, 0, %v2889_v46  ;;  %v5819_v23 = vld [vmem:[%s15491_s4 + $0x8] sm:$0xff] }
 0x657   : > { %8770 = vsinq.f32 %v2890_v7  ;;  %v2576_v1 = vsub.s32 4, %v16321_v11  ;;  %v3321_v49 = vsel %vm3310_vm5, nan, %v3320_v19  ;;  %vm3206_vm1 = vweird.f32 %v16305_v45  ;;  %v13973_v19 = vpop.permute.xlu1 %5838 }
 0x658   : > { %v2784_v43 = vsub.s32 4, %v16322_v29  ;;  %5976 = vmatprep.subr.mxu1 %v3321_v49  ;;  %v3217_v25 = vsel %vm3206_vm1, nan, %v3216_v26  ;;  %vm16324_vm4 = vcmp.lt.s32.totalorder %v16323_v38, 0  ;;  %v2895_v57 = vadd.s32 3, %v2891_v39  ;;  %v5820_v26 = vld [vmem:[%s15491_s4 + $0x10] sm:$0xff] }
 0x659   : > { %v2577_v42 = vsel %vm16324_vm4, %v2576_v1, %v16321_v11  ;;  %5977 = vmatpush1.msra.mxu1 %v3217_v25  ;;  %vm16326_vm3 = vnez %v16325_v9  ;;  %vm16328_vm8 = vcmp.lt.s32.totalorder %v16327_v58, 0  ;;  %vm2686_vm10 = vweird.f32 %v16285_v48  ;;  %v5818_v48 = vld [vmem:[%s15491_s4] sm:$0xff] }
 0x65a   : > { %v2579_v18 = vsel %vm16326_vm3, 0, %v2577_v42  ;;  %v2785_v55 = vsel %vm16328_vm8, %v2784_v43, %v16322_v29  ;;  %vm2690_vm12 = vcmp.eq.s32.totalorder %v2688_v27, 0  ;;  %vm2693_vm2 = vcmp.eq.s32.totalorder %v2688_v27, 2 }
 0x65b   : > { %v8765_v40 = vpop.eup %8764  ;;  %v2583_v17 = vadd.s32 3, %v2579_v18  ;;  %vm16330_vm0 = vnez %v16329_v20  ;;  %v2587_v32 = vxor.u32 2147483648, %v16331_v62  ;;  %v2590_v36 = vxor.u32 2147483648, %v16332_v35 }
 0x65c   : > { %v8767_v21 = vpop.eup %8766  ;;  %v2694_v45 = vxor.u32 2147483648, %v8765_v40  ;;  %v2787_v60 = vsel %vm16330_vm0, 0, %v2785_v55  ;;  %vm2689_vm15 = vcmp.lt.s32.totalorder %v2688_v27, 2  ;;  %v2896_v15 = vand.u32 3, %v2895_v57  ;;  %v5829_v27 = vpop.permute.xlu1 %5828 }
 0x65d   : > { %v2691_v3 = vxor.u32 2147483648, %v8767_v21  ;;  %v2791_v5 = vadd.s32 3, %v2787_v60  ;;  %v2584_v2 = vand.u32 3, %v2583_v17  ;;  %v2795_v44 = vxor.u32 2147483648, %v13896_v37 }
 0x65e   : > { %v2695_v22 = vsel %vm2693_vm2, %v2694_v45, %v8767_v21  ;;  %v2798_v13 = vxor.u32 2147483648, %v16333_v54  ;;  %vm2582_vm13 = vweird.f32 %v16323_v38  ;;  %vm5846_vm11 = vcmask 523264  }
 0x65f   : > { %v2692_v31 = vsel %vm2690_vm12, %v8765_v40, %v2691_v3  ;;  %v2792_v8 = vand.u32 3, %v2791_v5  ;;  %vm2586_vm9 = vcmp.eq.s32.totalorder %v2584_v2, 0  ;;  %vm2589_vm14 = vcmp.eq.s32.totalorder %v2584_v2, 2 }
 0x660   : > { %v2696_v4 = vsel %vm2689_vm15, %v2692_v31, %v2695_v22  ;;  %vm2585_vm5 = vcmp.lt.s32.totalorder %v2584_v2, 2  ;;  %v2588_v47 = vsel %vm2586_vm9, %v16332_v35, %v2587_v32  ;;  %v2591_v33 = vsel %vm2589_vm14, %v2590_v36, %v16331_v62 }
 0x661   : > { %v2697_v10 = vsel %vm2686_vm10, nan, %v2696_v4  ;;  %v2592_v6 = vsel %vm2585_vm5, %v2588_v47, %v2591_v33  ;;  %vm2794_vm6 = vcmp.eq.s32.totalorder %v2792_v8, 0  ;;  %vm2797_vm7 = vcmp.eq.s32.totalorder %v2792_v8, 2 }
 0x662   : > { %5889 = vmatprep.subr.mxu0 %v2697_v10  ;;  %vm2901_vm1 = vcmp.eq.s32.totalorder %v2896_v15, 2  ;;  %v2593_v56 = vsel %vm2582_vm13, nan, %v2592_v6  ;;  %v2796_v53 = vsel %vm2794_vm6, %v16333_v54, %v2795_v44  ;;  %v2799_v16 = vsel %vm2797_vm7, %v2798_v13, %v13896_v37 }
 0x663   : > { %v8769_v28 = vpop.eup %8768  ;;  %5890 = vmatpush1.msra.mxu0 %v2593_v56  ;;  %vm2898_vm4 = vcmp.eq.s32.totalorder %v2896_v15, 0  ;;  %vm2793_vm3 = vcmp.lt.s32.totalorder %v2792_v8, 2  ;;  %vm2897_vm8 = vcmp.lt.s32.totalorder %v2896_v15, 2  ;;  %v16334_v52 = vmov 0.0  }
 0x664   : > { %v2902_v61 = vxor.u32 2147483648, %v8769_v28  ;;  %v8771_v14 = vpop.eup %8770  ;;  %8192 = vmatmul.mubr.msk.f32.vlgmr.msra.gmra.mxu0 %vm5846_vm11, %v5818_v48  ;;  %v2800_v7 = vsel %vm2793_vm3, %v2796_v53, %v2799_v16  ;;  %vm2894_vm10 = vweird.f32 %v16286_v12  ;;  %vm2790_vm12 = vweird.f32 %v16327_v58  ;;  %v5821_v12 = vld [vmem:[%s15491_s4 + $0x18] sm:$0xff] }
 0x665   : > { %v2899_v0 = vxor.u32 2147483648, %v8771_v14  ;;  %5929 = vmatprep.mubr.f32.mxu0 %v16334_v52  ;;  %v2801_v50 = vsel %vm2790_vm12, nan, %v2800_v7  ;;  %v16339_v56 = vmov 1326507024  }
 0x666   : > { %v2903_v41 = vsel %vm2901_vm1, %v2902_v61, %v8771_v14 }
 0x667   : > { %v2900_v59 = vsel %vm2898_vm4, %v8769_v28, %v2899_v0 }
 0x668   : > { %v2904_v46 = vsel %vm2897_vm8, %v2900_v59, %v2903_v41  ;;  %8193 = vmatmul.mubr.msk.f32.gmra.mxu0 %vm5846_vm11, %v5819_v23 }
 0x669   : > { %v2905_v37 = vsel %vm2894_vm10, nan, %v2904_v46  ;;  %5935 = vmatprep.mubr.f32.mxu0 %v16334_v52 }
 0x66a   : > { %5978 = vmatprep.subr.mxu1 %v2905_v37 }
 0x66b   : > { %5979 = vmatpush1.msra.mxu1 %v2801_v50 }
 0x66c   : > { %8196 = vmatmul.mubr.msk.f32.vlgmr.msra.gmra.mxu1 %vm5846_vm11, %v5818_v48  ;;  %8194 = vmatmul.mubr.msk.f32.gmra.mxu0 %vm5846_vm11, %v5820_v26 }
 0x66d   : > { %6018 = vmatprep.mubr.f32.mxu1 %v16334_v52  ;;  %5941 = vmatprep.mubr.f32.mxu0 %v16334_v52 }
 0x670   : > { %8197 = vmatmul.mubr.msk.f32.gmra.mxu1 %vm5846_vm11, %v5819_v23  ;;  %8195 = vmatmul.mubr.msk.f32.gmra.mxu0 %vm5846_vm11, %v5821_v12 }
 0x671   : > { %6024 = vmatprep.mubr.f32.mxu1 %v16334_v52  ;;  %7779 = vmatprep.mubr.f32.mxu0 %v16334_v52 }
 0x674   : > { %8198 = vmatmul.mubr.msk.f32.gmra.mxu1 %vm5846_vm11, %v5820_v26 }
 0x675   : > { %6030 = vmatprep.mubr.f32.mxu1 %v16334_v52 }
 0x678   : > { %8199 = vmatmul.mubr.msk.f32.gmra.mxu1 %vm5846_vm11, %v5821_v12 }
 0x679   : > { %7850 = vmatprep.mubr.f32.mxu1 %v16334_v52 }
 0x724   : > { %v5925_v39 = vpop.f32.mrf.mxu0 }
 0x725   : > { %v13975_v11 = vadd.f32 %v5925_v39, %v5829_v27 }
 0x726   : > { %v5927_v1 = vpop.f32.mrf.mxu0 }
 0x727   : > { %16335 = vst [vmem:[#allocation82_spill] sm:$0xff] %v13975_v11  ;;  %v6037_v49 = vand.u32 2147483647, %v13975_v11  ;;  %v6040_v29 = vand.u32 2139095040, %v13975_v11  ;;  %v13979_v43 = vadd.f32 %v5927_v1, %v5829_v27 }
 0x729   : > { %16336 = vst [vmem:[#allocation73_spill] sm:$0xff] %v13979_v43  ;;  %v6041_v25 = vshrl.u32 %v6040_v29, 23  ;;  %v6044_v38 = vand.u32 8388607, %v6037_v49  ;;  %v15751_v40 = vand.u32 2147483647, %v13979_v43 }
 0x72a   : > { %v6144_v57 = vand.u32 2139095040, %v13979_v43 }
 0x72b   : > { %v8200_v9 = vadd.s32 4294967169, %v6041_v25  ;;  %v6045_v45 = vor.u32 8388608, %v6044_v38  ;;  %v6148_v20 = vand.u32 8388607, %v15751_v40 }
 0x72c   : > { %v6014_v42 = vpop.f32.mrf.mxu1  ;;  %v6145_v58 = vshrl.u32 %v6144_v57, 23 }
 0x72d   : > { %v13985_v18 = vadd.f32 %v6014_v42, %v5829_v27  ;;  %v6047_v55 = vadd.s32 1, %v8200_v9  ;;  %v13993_v31 = vshll.u32 %v6045_v45, 8  ;;  %v6149_v2 = vor.u32 8388608, %v6148_v20 }
 0x72e   : > { %v8204_v17 = vadd.s32 4294967169, %v6145_v58  ;;  %v6016_v22 = vpop.f32.mrf.mxu1 }
 0x72f   : > { %16337 = vst [vmem:[#allocation84_spill] sm:$0xff] %v13985_v18  ;;  %v15755_v21 = vand.u32 2147483647, %v13985_v18  ;;  %v6248_v3 = vand.u32 2139095040, %v13985_v18  ;;  %vm6048_vm2 = vcmp.gt.s32.totalorder %v6047_v55, 0  ;;  %v13995_v4 = vadd.f32 %v6016_v22, %v5829_v27 }
 0x730   : > { %v6049_v62 = vsel %vm6048_vm2, %v6047_v55, 0  ;;  %v6151_v35 = vadd.s32 1, %v8204_v17  ;;  %v14024_v20 = vshll.u32 %v6149_v2, 8 }
 0x731   : > { %v6252_v60 = vand.u32 8388607, %v15755_v21  ;;  %v6249_v32 = vshrl.u32 %v6248_v3, 23  ;;  %v6050_v36 = vshrl.u32 %v6049_v62, 5  ;;  %v6051_v5 = vand.u32 31, %v6049_v62  ;;  %16338 = vst [vmem:[#allocation35_spill] sm:$0xff] %v13995_v4 }
 0x732   : > { %vm6152_vm0 = vcmp.gt.s32.totalorder %v6151_v35, 0 }
 0x733   : > { %v6253_v15 = vor.u32 8388608, %v6252_v60  ;;  %v6052_v8 = vsub.s32 32, %v6051_v5  ;;  %v6054_v44 = vshll.u32 %v15841_v63, %v6051_v5  ;;  %v8208_v54 = vadd.s32 4294967169, %v6249_v32 }
 0x734   : > { %v6057_v13 = vshll.u32 %v15851_v30, %v6051_v5  ;;  %v6060_v10 = vshll.u32 %v15965_v51, %v6051_v5  ;;  %v6063_v28 = vshll.u32 %v15966_v34, %v6051_v5  ;;  %v6066_v47 = vshll.u32 %v15852_v24, %v6051_v5 }
 0x735   : > { %v6055_v33 = vshrl.u32 %v15851_v30, %v6052_v8  ;;  %v6058_v61 = vshrl.u32 %v15965_v51, %v6052_v8  ;;  %v6061_v6 = vshrl.u32 %v15966_v34, %v6052_v8  ;;  %vm6069_vm15 = vcmp.lt.s32.totalorder %v6050_v36, 1 }
 0x736   : > { %v6053_v48 = vshrl.u32 %v15841_v63, %v6052_v8  ;;  %v6064_v14 = vshrl.u32 %v15852_v24, %v6052_v8  ;;  %v6067_v53 = vshrl.u32 %v16339_v56, %v6052_v8  ;;  %vm6070_vm13 = vcmp.lt.s32.totalorder %v6050_v36, 2 }
 0x737   : > { %v6056_v16 = vor.u32 %v6055_v33, %v6054_v44  ;;  %v6059_v0 = vor.u32 %v6058_v61, %v6057_v13  ;;  %v6062_v41 = vor.u32 %v6061_v6, %v6060_v10  ;;  %v6255_v59 = vadd.s32 1, %v8208_v54 }
 0x738   : > { %v6065_v7 = vor.u32 %v6064_v14, %v6063_v28  ;;  %v6068_v52 = vor.u32 %v6067_v53, %v6066_v47  ;;  %vm6071_vm9 = vcmp.lt.s32.totalorder %v6050_v36, 3  ;;  %vm6072_vm14 = vcmp.lt.s32.totalorder %v6050_v36, 4 }
 0x739   : > { %v6073_v23 = vsel %vm6069_vm15, %v6053_v48, %v6056_v16  ;;  %v6074_v46 = vsel %vm6072_vm14, %v6062_v41, 2102212464  ;;  %v6077_v37 = vsel %vm6069_vm15, %v6056_v16, %v6059_v0  ;;  %v6081_v50 = vsel %vm6069_vm15, %v6059_v0, %v6062_v41 }
 0x73a   : > { %v6075_v26 = vsel %vm6071_vm9, %v6059_v0, %v6074_v46  ;;  %v6078_v12 = vsel %vm6072_vm14, %v6065_v7, 920167782  ;;  %v6082_v27 = vsel %vm6072_vm14, %v6068_v52, 1326507024  ;;  %vm6256_vm5 = vcmp.gt.s32.totalorder %v6255_v59, 0 }
 0x73b   : > { %v6079_v39 = vsel %vm6071_vm9, %v6062_v41, %v6078_v12  ;;  %v6083_v1 = vsel %vm6071_vm9, %v6065_v7, %v6082_v27  ;;  %v6257_v29 = vsel %vm6256_vm5, %v6255_v59, 0  ;;  %v6153_v25 = vsel %vm6152_vm0, %v6151_v35, 0 }
 0x73c   : > { %v6076_v38 = vsel %vm6070_vm13, %v6073_v23, %v6075_v26  ;;  %v6080_v42 = vsel %vm6070_vm13, %v6077_v37, %v6079_v39  ;;  %v6084_v57 = vsel %vm6070_vm13, %v6081_v50, %v6083_v1  ;;  %v6258_v9 = vshrl.u32 %v6257_v29, 5 }
 0x73d   : > { %v14016_v58 = vmul.u32.u64.low %v13993_v31, %v6084_v57  ;;  %v14017_v55 = vmul.u32.u64.high %v13993_v31, %v6084_v57, %v14016_v58  ;;  %v14020_v45 = vmul.u32.u64.low %v13993_v31, %v6080_v42  ;;  %v14021_v3 = vmul.u32.u64.high %v13993_v31, %v6080_v42, %v14020_v45 }
 0x73e   : > { %v6259_v17 = vand.u32 31, %v6257_v29  ;;  %v6352_v60 = vand.u32 2139095040, %v13995_v4  ;;  %v6092_v22 = vmul.u32 %v13993_v31, %v6076_v38  ;;  %vm6277_vm11 = vcmp.lt.s32.totalorder %v6258_v9, 1 }
 0x73f   : > { %vm6279_vm6 = vcmp.lt.s32.totalorder %v6258_v9, 3  ;;  %v14028_v62 = vshll.u32 %v6253_v15, 8  ;;  %vm6278_vm7 = vcmp.lt.s32.totalorder %v6258_v9, 2  ;;  %v6155_v5 = vand.u32 31, %v6153_v25 }
 0x740   : > { %v6260_v32 = vsub.s32 32, %v6259_v17  ;;  %v6262_v35 = vshll.u32 %v15841_v63, %v6259_v17  ;;  %v6265_v36 = vshll.u32 %v15851_v30, %v6259_v17  ;;  %vm6094_vm1 = vc.u32 %v14017_v55, %v14020_v45 }
 0x741   : > { %v6095_v2 = vadd.s32 1, %v14021_v3  ;;  %v6268_v8 = vshll.u32 %v15965_v51, %v6259_v17  ;;  %v6271_v31 = vshll.u32 %v15966_v34, %v6259_v17  ;;  %v6274_v47 = vshll.u32 %v15852_v24, %v6259_v17 }
 0x742   : > { %v6261_v44 = vshrl.u32 %v15841_v63, %v6260_v32  ;;  %v6263_v15 = vshrl.u32 %v15851_v30, %v6260_v32  ;;  %v6266_v54 = vshrl.u32 %v15965_v51, %v6260_v32  ;;  %v6269_v13 = vshrl.u32 %v15966_v34, %v6260_v32 }
 0x743   : > { %v6096_v10 = vsel %vm6094_vm1, %v6095_v2, %v14021_v3  ;;  %v6272_v28 = vshrl.u32 %v15852_v24, %v6260_v32  ;;  %v6275_v33 = vshrl.u32 %v16339_v56, %v6260_v32  ;;  %vm6280_vm4 = vcmp.lt.s32.totalorder %v6258_v9, 4 }
 0x744   : > { %v6097_v61 = vadd.s32 %v6096_v10, %v6092_v22  ;;  %v6264_v6 = vor.u32 %v6263_v15, %v6262_v35  ;;  %v6267_v48 = vor.u32 %v6266_v54, %v6265_v36  ;;  %v6270_v14 = vor.u32 %v6269_v13, %v6268_v8 }
 0x745   : > { %v6273_v53 = vor.u32 %v6272_v28, %v6271_v31  ;;  %v6276_v16 = vor.u32 %v6275_v33, %v6274_v47  ;;  %v6156_v0 = vsub.s32 32, %v6155_v5  ;;  %v14053_v39 = vshrl.u32 %v6153_v25, 5 }
 0x746   : > { %v6098_v41 = vadd.s32 536870912, %v6097_v61  ;;  %v6281_v59 = vsel %vm6277_vm11, %v6261_v44, %v6264_v6  ;;  %v6282_v7 = vsel %vm6280_vm4, %v6270_v14, 2102212464  ;;  %v6285_v52 = vsel %vm6277_vm11, %v6264_v6, %v6267_v48 }
 0x747   : > { %v6283_v23 = vsel %vm6279_vm6, %v6267_v48, %v6282_v7  ;;  %v6286_v46 = vsel %vm6280_vm4, %v6273_v53, 920167782  ;;  %v6289_v37 = vsel %vm6277_vm11, %v6267_v48, %v6270_v14  ;;  %v6290_v50 = vsel %vm6280_vm4, %v6276_v16, 1326507024 }
 0x748   : > { %v14049_v26 = vshrl.u32 %v6098_v41, 30  ;;  %v6287_v12 = vsel %vm6279_vm6, %v6270_v14, %v6286_v46  ;;  %v6291_v27 = vsel %vm6279_vm6, %v6273_v53, %v6290_v50  ;;  %v6284_v1 = vsel %vm6278_vm7, %v6281_v59, %v6283_v23  ;;  %v14092_v53 = vpop.permute.xlu0 %5843 }
 0x749   : > { %v6288_v29 = vsel %vm6278_vm7, %v6285_v52, %v6287_v12  ;;  %v6292_v38 = vsel %vm6278_vm7, %v6289_v37, %v6291_v27  ;;  %v6353_v42 = vshrl.u32 %v6352_v60, 23  ;;  %v6159_v17 = vshrl.u32 %v15851_v30, %v6156_v0 }
 0x74a   : > { %16340 = vst [vmem:[#allocation92_spill] sm:$0xff] %v14049_v26  ;;  %v6100_v57 = vshll.u32 %v14049_v26, 30  ;;  %v14060_v58 = vmul.u32.u64.low %v14028_v62, %v6292_v38  ;;  %v14061_v3 = vmul.u32.u64.high %v14028_v62, %v6292_v38, %v14060_v58  ;;  %v6158_v25 = vshll.u32 %v15841_v63, %v6155_v5 }
 0x74b   : > { %v14065_v22 = vmul.u32.u64.low %v14028_v62, %v6288_v29  ;;  %v14066_v32 = vmul.u32.u64.high %v14028_v62, %v6288_v29, %v14065_v22  ;;  %v6162_v35 = vshrl.u32 %v15965_v51, %v6156_v0  ;;  %v6161_v60 = vshll.u32 %v15851_v30, %v6155_v5 }
 0x74c   : > { %v14071_v9 = vsub.s32 %v6097_v61, %v6100_v57  ;;  %v6164_v36 = vshll.u32 %v15965_v51, %v6155_v5  ;;  %v6165_v2 = vshrl.u32 %v15966_v34, %v6156_v0  ;;  %v6300_v8 = vmul.u32 %v14028_v62, %v6284_v1 }
 0x74d   : > { %v6160_v31 = vor.u32 %v6159_v17, %v6158_v25  ;;  %v6167_v44 = vshll.u32 %v15966_v34, %v6155_v5  ;;  %v6168_v15 = vshrl.u32 %v15852_v24, %v6156_v0  ;;  %vm6302_vm3 = vc.u32 %v14061_v3, %v14065_v22 }
 0x74e   : > { %v6103_v54 = vsub.s32 0, %v14071_v9  ;;  %v6163_v13 = vor.u32 %v6162_v35, %v6161_v60  ;;  %v6166_v10 = vor.u32 %v6165_v2, %v6164_v36  ;;  %v6303_v28 = vadd.s32 1, %v14066_v32  ;;  %v14109_v60 = vpop.permute.xlu0 %5833 }
 0x74f   : > { %v6169_v47 = vor.u32 %v6168_v15, %v6167_v44  ;;  %v6170_v33 = vshll.u32 %v15852_v24, %v6155_v5  ;;  %v6171_v61 = vshrl.u32 %v16339_v56, %v6156_v0  ;;  %v6157_v6 = vshrl.u32 %v15841_v63, %v6156_v0 }
 0x750   : > { %v8201_v62 = vmin.u32 %v6103_v54, %v14071_v9  ;;  %vm6173_vm8 = vcmp.lt.s32.totalorder %v14053_v39, 1  ;;  %vm6174_vm10 = vcmp.lt.s32.totalorder %v14053_v39, 2  ;;  %v6304_v48 = vsel %vm6302_vm3, %v6303_v28, %v14066_v32  ;;  %v5931_v32 = vpop.f32.mrf.mxu0 }
 0x751   : > { %v6172_v14 = vor.u32 %v6171_v61, %v6170_v33  ;;  %vm6175_vm12 = vcmp.lt.s32.totalorder %v14053_v39, 3  ;;  %vm6176_vm2 = vcmp.lt.s32.totalorder %v14053_v39, 4  ;;  %v6305_v16 = vadd.s32 %v6304_v48, %v6300_v8 }
 0x752   : > { %v6105_v5 = vclz %v8201_v62  ;;  %v6178_v41 = vsel %vm6176_vm2, %v6166_v10, 2102212464  ;;  %v6181_v59 = vsel %vm6173_vm8, %v6160_v31, %v6163_v13  ;;  %v6177_v7 = vsel %vm6173_vm8, %v6157_v6, %v6160_v31 }
 0x753   : > { %v6182_v52 = vsel %vm6176_vm2, %v6169_v47, 920167782  ;;  %v6185_v0 = vsel %vm6173_vm8, %v6163_v13, %v6166_v10  ;;  %v6186_v23 = vsel %vm6176_vm2, %v6172_v14, 1326507024  ;;  %v6306_v37 = vadd.s32 536870912, %v6305_v16 }
 0x754   : > { %v8202_v46 = vadd.s32 4294967294, %v6105_v5  ;;  %v6183_v50 = vsel %vm6175_vm12, %v6166_v10, %v6182_v52  ;;  %v6187_v12 = vsel %vm6175_vm12, %v6169_v47, %v6186_v23  ;;  %v6179_v27 = vsel %vm6175_vm12, %v6163_v13, %v6178_v41 }
 0x755   : > { %v6184_v1 = vsel %vm6174_vm10, %v6181_v59, %v6183_v50  ;;  %v6188_v29 = vsel %vm6174_vm10, %v6185_v0, %v6187_v12  ;;  %v8212_v38 = vadd.s32 4294967169, %v6353_v42  ;;  %v14098_v57 = vshrl.u32 %v6306_v37, 30 }
 0x756   : > { %vm8203_vm0 = vcmp.lt.s32.totalorder %v8202_v46, 0  ;;  %v14101_v58 = vmul.u32.u64.low %v14024_v20, %v6188_v29  ;;  %v14102_v17 = vmul.u32.u64.high %v14024_v20, %v6188_v29, %v14101_v58  ;;  %v6180_v42 = vsel %vm6174_vm10, %v6177_v7, %v6179_v27 }
 0x757   : > { %16341 = vst [vmem:[#allocation12_spill] sm:$0xff] %v14098_v57  ;;  %v14105_v25 = vmul.u32.u64.low %v14024_v20, %v6184_v1  ;;  %v14106_v35 = vmul.u32.u64.high %v14024_v20, %v6184_v1, %v14105_v25  ;;  %v6108_v36 = vsel %vm8203_vm0, 0, %v8202_v46  ;;  %v6308_v2 = vshll.u32 %v14098_v57, 30 }
 0x758   : > { %v15750_v8 = vand.u32 2147483647, %v13995_v4  ;;  %v6359_v31 = vadd.s32 1, %v8212_v38  ;;  %v14116_v44 = vadd.f32 %v5931_v32, %v14109_v60  ;;  %v6113_v54 = vsub.s32 4294967266, %v6108_v36 }
 0x759   : > { %v14118_v15 = vsub.s32 %v6305_v16, %v6308_v2  ;;  %vm6198_vm15 = vc.u32 %v14102_v17, %v14105_v25  ;;  %v6199_v13 = vadd.s32 1, %v14106_v35  ;;  %v6196_v39 = vmul.u32 %v14024_v20, %v6180_v42 }
 0x75a   : > { %16342 = vst [vmem:[#allocation66_spill] sm:$0xff] %v14116_v44  ;;  %vm6360_vm13 = vcmp.gt.s32.totalorder %v6359_v31, 0  ;;  %v6356_v33 = vand.u32 8388607, %v15750_v8  ;;  %v6456_v62 = vand.u32 2139095040, %v14116_v44  ;;  %v6109_v14 = vsub.s32 32, %v6108_v36 }
 0x75b   : > { %v6311_v10 = vsub.s32 0, %v14118_v15  ;;  %v6361_v28 = vsel %vm6360_vm13, %v6359_v31, 0  ;;  %v6200_v47 = vsel %vm6198_vm15, %v6199_v13, %v14106_v35  ;;  %v6114_v5 = vadd.s32 127, %v6113_v54 }
 0x75c   : > { %v6363_v61 = vand.u32 31, %v6361_v28  ;;  %v6201_v48 = vadd.s32 %v6200_v47, %v6196_v39  ;;  %v6093_v41 = vadd.s32 %v14020_v45, %v14017_v55  ;;  %v6110_v7 = vshll.u32 %v14071_v9, %v6108_v36 }
 0x75d   : > { %v8209_v6 = vmin.u32 %v6311_v10, %v14118_v15  ;;  %v6357_v52 = vor.u32 8388608, %v6356_v33  ;;  %v6457_v23 = vshrl.u32 %v6456_v62, 23  ;;  %v6115_v1 = vshll.u32 %v6114_v5, 23 }
 0x75e   : > { %v6364_v16 = vsub.s32 32, %v6363_v61  ;;  %v6202_v20 = vadd.s32 536870912, %v6201_v48  ;;  %v6111_v27 = vshrl.u32 %v6093_v41, %v6109_v14  ;;  %v6366_v29 = vshll.u32 %v15841_v63, %v6363_v61 }
 0x75f   : > { %v6313_v59 = vclz %v8209_v6  ;;  %v6369_v9 = vshll.u32 %v15851_v30, %v6363_v61  ;;  %v6372_v38 = vshll.u32 %v15965_v51, %v6363_v61  ;;  %v6362_v32 = vshrl.u32 %v6361_v28, 5 }
 0x760   : > { %v6367_v0 = vshrl.u32 %v15851_v30, %v6364_v16  ;;  %v14134_v37 = vshrl.u32 %v6202_v20, 30  ;;  %v6370_v50 = vshrl.u32 %v15965_v51, %v6364_v16  ;;  %v6373_v12 = vshrl.u32 %v15966_v34, %v6364_v16 }
 0x761   : > { %v8210_v46 = vadd.s32 4294967294, %v6313_v59  ;;  %v6376_v55 = vshrl.u32 %v15852_v24, %v6364_v16  ;;  %v6375_v35 = vshll.u32 %v15966_v34, %v6363_v61  ;;  %v6379_v36 = vshrl.u32 %v16339_v56, %v6364_v16 }
 0x762   : > { %16343 = vst [vmem:[#allocation75_spill] sm:$0xff] %v14134_v37  ;;  %v6204_v45 = vshll.u32 %v14134_v37, 30  ;;  %v6368_v2 = vor.u32 %v6367_v0, %v6366_v29  ;;  %v6371_v42 = vor.u32 %v6370_v50, %v6369_v9  ;;  %v6374_v31 = vor.u32 %v6373_v12, %v6372_v38 }
 0x763   : > { %vm8211_vm9 = vcmp.lt.s32.totalorder %v8210_v46, 0  ;;  %v6378_v54 = vshll.u32 %v15852_v24, %v6363_v61  ;;  %v6377_v39 = vor.u32 %v6376_v55, %v6375_v35  ;;  %v6112_v47 = vor.u32 %v6111_v27, %v6110_v7 }
 0x764   : > { %v14143_v58 = vsel %vm8211_vm9, 0, %v8210_v46  ;;  %v14149_v10 = vsub.s32 %v6201_v48, %v6204_v45  ;;  %v6116_v33 = vor.u32 4788187, %v6115_v1  ;;  %v6397_v6 = vshll.u32 %v6357_v52, 8 }
 0x765   : > { %v6321_v13 = vsub.s32 4294967266, %v14143_v58  ;;  %v6380_v62 = vor.u32 %v6379_v36, %v6378_v54  ;;  %vm6381_vm14 = vcmp.lt.s32.totalorder %v6362_v32, 1  ;;  %vm6384_vm5 = vcmp.lt.s32.totalorder %v6362_v32, 4 }
 0x766   : > { %v6207_v28 = vsub.s32 0, %v14149_v10  ;;  %v8216_v14 = vadd.s32 4294967169, %v6457_v23  ;;  %v6365_v5 = vshrl.u32 %v15841_v63, %v6364_v16  ;;  %vm6383_vm11 = vcmp.lt.s32.totalorder %v6362_v32, 3 }
 0x767   : > { %v6386_v41 = vsel %vm6384_vm5, %v6374_v31, 2102212464  ;;  %v6389_v59 = vsel %vm6381_vm14, %v6368_v2, %v6371_v42  ;;  %v6322_v61 = vadd.s32 127, %v6321_v13  ;;  %v6390_v48 = vsel %vm6384_vm5, %v6377_v39, 920167782 }
 0x768   : > { %v8205_v20 = vmin.u32 %v6207_v28, %v14149_v10  ;;  %v6393_v0 = vsel %vm6381_vm14, %v6371_v42, %v6374_v31  ;;  %v6117_v46 = vand.u32 2147483647, %v6116_v33  ;;  %vm6382_vm6 = vcmp.lt.s32.totalorder %v6362_v32, 2 }
 0x769   : > { %v6391_v7 = vsel %vm6383_vm11, %v6374_v31, %v6390_v48  ;;  %v6394_v50 = vsel %vm6384_vm5, %v6380_v62, 1326507024  ;;  %v6385_v52 = vsel %vm6381_vm14, %v6365_v5, %v6368_v2  ;;  %v6387_v12 = vsel %vm6383_vm11, %v6371_v42, %v6386_v41  ;;  %v6020_v41 = vpop.f32.mrf.mxu1 }
 0x76a   : > { %v6392_v27 = vsel %vm6382_vm6, %v6389_v59, %v6391_v7  ;;  %v6395_v1 = vsel %vm6383_vm11, %v6377_v39, %v6394_v50  ;;  %v6209_v23 = vclz %v8205_v20  ;;  %v6317_v45 = vsub.s32 32, %v14143_v58 }
 0x76b   : > { %v6396_v16 = vsel %vm6382_vm6, %v6393_v0, %v6395_v1  ;;  %v14156_v29 = vmul.u32.u64.low %v6397_v6, %v6392_v27  ;;  %v14157_v55 = vmul.u32.u64.high %v6397_v6, %v6392_v27, %v14156_v29  ;;  %v6323_v9 = vshll.u32 %v6322_v61, 23 }
 0x76c   : > { %v14161_v38 = vmul.u32.u64.low %v6397_v6, %v6396_v16  ;;  %v14162_v35 = vmul.u32.u64.high %v6397_v6, %v6396_v16, %v14161_v38  ;;  %v15754_v36 = vand.u32 2147483647, %v14116_v44  ;;  %v6463_v2 = vadd.s32 1, %v8216_v14 }
 0x76d   : > { %v6119_v42 = vcvt.s32.f32 %v6112_v47  ;;  %v6301_v31 = vadd.s32 %v14065_v22, %v14061_v3  ;;  %v6388_v54 = vsel %vm6382_vm6, %v6385_v52, %v6387_v12  ;;  %v8206_v13 = vadd.s32 4294967294, %v6209_v23  ;;  %v5933_v3 = vpop.f32.mrf.mxu0 }
 0x76e   : > { %v6407_v39 = vadd.s32 1, %v14157_v55  ;;  %vm6464_vm7 = vcmp.gt.s32.totalorder %v6463_v2, 0  ;;  %v14171_v28 = vor.u32 4788187, %v6323_v9  ;;  %v6404_v5 = vmul.u32 %v6397_v6, %v6388_v54 }
 0x76f   : > { %v14169_v33 = vmul.f32 %v6119_v42, %v6117_v46  ;;  %v6319_v62 = vshrl.u32 %v6301_v31, %v6317_v45  ;;  %vm6406_vm1 = vc.u32 %v14162_v35, %v14156_v29  ;;  %v6460_v47 = vand.u32 8388607, %v15754_v36 }
 0x770   : > { %v6465_v14 = vsel %vm6464_vm7, %v6463_v2, 0  ;;  %v6318_v22 = vshll.u32 %v14118_v15, %v14143_v58  ;;  %v6408_v32 = vsel %vm6406_vm1, %v6407_v39, %v14157_v55  ;;  %vm8207_vm4 = vcmp.lt.s32.totalorder %v8206_v13, 0 }
 0x771   : > { %v6409_v59 = vadd.s32 %v6408_v32, %v6404_v5  ;;  %v6467_v61 = vand.u32 31, %v6465_v14  ;;  %v6121_v20 = vxor.u32 2147483648, %v14169_v33  ;;  %v6325_v48 = vand.u32 2147483647, %v14171_v28 }
 0x772   : > { %v6320_v6 = vor.u32 %v6319_v62, %v6318_v22  ;;  %v14183_v0 = vadd.f32 %v5933_v3, %v14109_v60  ;;  %v6461_v7 = vor.u32 8388608, %v6460_v47  ;;  %v14186_v52 = vadd.f32 %v6020_v41, %v14109_v60 }
 0x773   : > { %v6410_v46 = vadd.s32 536870912, %v6409_v59  ;;  %v6468_v50 = vsub.s32 32, %v6467_v61  ;;  %v14188_v15 = vsel %vm8207_vm4, 0, %v8206_v13  ;;  %v6466_v58 = vshrl.u32 %v6465_v14, 5 }
 0x774   : > { %16344 = vst [vmem:[#allocation74_spill] sm:$0xff] %v14186_v52  ;;  %v6470_v12 = vshll.u32 %v15841_v63, %v6467_v61  ;;  %v6473_v27 = vshll.u32 %v15851_v30, %v6467_v61  ;;  %v6476_v55 = vshll.u32 %v15965_v51, %v6467_v61  ;;  %v6479_v9 = vshll.u32 %v15966_v34, %v6467_v61 }
 0x775   : > { %v14192_v1 = vshrl.u32 %v6410_v46, 30  ;;  %v6471_v23 = vshrl.u32 %v15851_v30, %v6468_v50  ;;  %v6474_v16 = vshrl.u32 %v15965_v51, %v6468_v50  ;;  %v6477_v45 = vshrl.u32 %v15966_v34, %v6468_v50 }
 0x776   : > { %v6480_v38 = vshrl.u32 %v15852_v24, %v6468_v50  ;;  %v6482_v2 = vshll.u32 %v15852_v24, %v6467_v61  ;;  %v6483_v13 = vshrl.u32 %v16339_v56, %v6468_v50  ;;  %v6213_v39 = vsub.s32 32, %v14188_v15 }
 0x777   : > { %16345 = vst [vmem:[#allocation87_spill] sm:$0xff] %v14192_v1  ;;  %v6412_v42 = vshll.u32 %v14192_v1, 30  ;;  %v6472_v31 = vor.u32 %v6471_v23, %v6470_v12  ;;  %v6475_v54 = vor.u32 %v6474_v16, %v6473_v27  ;;  %v6478_v62 = vor.u32 %v6477_v45, %v6476_v55 }
 0x778   : > { %v6481_v28 = vor.u32 %v6480_v38, %v6479_v9  ;;  %v6560_v5 = vand.u32 2139095040, %v14183_v0  ;;  %v6484_v14 = vor.u32 %v6483_v13, %v6482_v2  ;;  %vm6485_vm3 = vcmp.lt.s32.totalorder %v6466_v58, 1 }
 0x779   : > { %v14205_v47 = vsub.s32 %v6409_v59, %v6412_v42  ;;  %v6501_v3 = vshll.u32 %v6461_v7, 8  ;;  %v6469_v22 = vshrl.u32 %v15841_v63, %v6468_v50  ;;  %vm6487_vm8 = vcmp.lt.s32.totalorder %v6466_v58, 3 }
 0x77a   : > { %vm6488_vm10 = vcmp.lt.s32.totalorder %v6466_v58, 4  ;;  %v6493_v32 = vsel %vm6485_vm3, %v6472_v31, %v6475_v54  ;;  %v6497_v12 = vsel %vm6485_vm3, %v6475_v54, %v6478_v62  ;;  %vm6486_vm12 = vcmp.lt.s32.totalorder %v6466_v58, 2 }
 0x77b   : > { %v6415_v41 = vsub.s32 0, %v14205_v47  ;;  %v6490_v61 = vsel %vm6488_vm10, %v6478_v62, 2102212464  ;;  %v6494_v46 = vsel %vm6488_vm10, %v6481_v28, 920167782  ;;  %v6489_v27 = vsel %vm6485_vm3, %v6469_v22, %v6472_v31 }
 0x77c   : > { %v6495_v23 = vsel %vm6487_vm8, %v6478_v62, %v6494_v46  ;;  %v6498_v16 = vsel %vm6488_vm10, %v6484_v14, 1326507024  ;;  %v6491_v55 = vsel %vm6487_vm8, %v6475_v54, %v6490_v61  ;;  %v6217_v7 = vsub.s32 4294967266, %v14188_v15 }
 0x77d   : > { %v8213_v59 = vmin.u32 %v6415_v41, %v14205_v47  ;;  %v6496_v45 = vsel %vm6486_vm12, %v6493_v32, %v6495_v23  ;;  %v6499_v9 = vsel %vm6487_vm8, %v6481_v28, %v6498_v16  ;;  %vm15790_vm2 = vcmp.lt.s32.totalorder %v13975_v11, 0 }
 0x77e   : > { %v6500_v50 = vsel %vm6486_vm12, %v6497_v12, %v6499_v9  ;;  %v14211_v38 = vmul.u32.u64.low %v6501_v3, %v6496_v45  ;;  %v14212_v2 = vmul.u32.u64.high %v6501_v3, %v6496_v45, %v14211_v38  ;;  %v6327_v42 = vcvt.s32.f32 %v6320_v6  ;;  %v6022_v45 = vpop.f32.mrf.mxu1 }
 0x77f   : > { %v14215_v13 = vmul.u32.u64.low %v6501_v3, %v6500_v50  ;;  %v14216_v8 = vmul.u32.u64.high %v6501_v3, %v6500_v50, %v14215_v13  ;;  %v6197_v58 = vadd.s32 %v14105_v25, %v14102_v17  ;;  %v6492_v31 = vsel %vm6486_vm12, %v6489_v27, %v6491_v55 }
 0x780   : > { %v6664_v54 = vand.u32 2139095040, %v14186_v52  ;;  %v6561_v62 = vshrl.u32 %v6560_v5, 23  ;;  %vm14223_vm0 = vcmp.le.f32.partialorder %v6037_v49, 0.7853982  ;;  %v16346_v28 = vmov 0 }
 0x781   : > { %v16347_v28 = vsel %vm14223_vm0, 4294967295, %v16346_v28  ;;  %v6122_v6 = vsel %vm15790_vm2, %v6121_v20, %v14169_v33  ;;  %v6328_v14 = vmul.f32 %v6327_v42, %v6325_v48  ;;  %v6417_v22 = vclz %v8213_v59 }
 0x782   : > { %16348 = vst [vmem:[#allocation88_spill] sm:$0xff] %v16347_v28  ;;  %v6215_v32 = vshrl.u32 %v6197_v58, %v6213_v39  ;;  %v6218_v41 = vadd.s32 127, %v6217_v7  ;;  %v6511_v17 = vadd.s32 1, %v14212_v2  ;;  %v6665_v25 = vshrl.u32 %v6664_v54, 23 }
 0x783   : > { %v6508_v61 = vmul.u32 %v6501_v3, %v6492_v31  ;;  %vm6510_vm15 = vc.u32 %v14216_v8, %v14211_v38  ;;  %v15753_v5 = vand.u32 2147483647, %v14186_v52  ;;  %v15752_v49 = vand.u32 2147483647, %v14183_v0 }
 0x784   : > { %v6214_v46 = vshll.u32 %v14149_v10, %v14188_v15  ;;  %v6512_v12 = vsel %vm6510_vm15, %v6511_v17, %v14212_v2  ;;  %v8224_v33 = vadd.s32 4294967169, %v6665_v25  ;;  %v8220_v20 = vadd.s32 4294967169, %v6561_v62 }
 0x785   : > { %v14240_v48 = vsel %vm14223_vm0, %v13975_v11, %v6122_v6  ;;  %v6329_v39 = vxor.u32 2147483648, %v6328_v14  ;;  %v8214_v3 = vadd.s32 4294967294, %v6417_v22  ;;  %v6513_v27 = vadd.s32 %v6512_v12, %v6508_v61 }
 0x786   : > { %v14242_v23 = vor.u32 %v6215_v32, %v6214_v46  ;;  %v6219_v16 = vshll.u32 %v6218_v41, 23  ;;  %v6671_v59 = vadd.s32 1, %v8224_v33  ;;  %vm15782_vm13 = vcmp.lt.s32.totalorder %v13985_v18, 0 }
 0x787   : > { %v6514_v55 = vadd.s32 536870912, %v6513_v27  ;;  %v6668_v10 = vand.u32 8388607, %v15753_v5  ;;  %v14249_v15 = vand.u32 8388607, %v15752_v49  ;;  %8772 = vcosq.f32 %v14240_v48 }
 0x788   : > { %v14254_v9 = vadd.s32 %v14156_v29, %v14162_v35  ;;  %vm6672_vm9 = vcmp.gt.s32.totalorder %v6671_v59, 0  ;;  %v6567_v7 = vadd.s32 1, %v8220_v20  ;;  %v14258_v50 = vsel %vm15782_vm13, %v6329_v39, %v6328_v14 }
 0x789   : > { %vm8215_vm14 = vcmp.lt.s32.totalorder %v8214_v3, 0  ;;  %v14260_v2 = vshrl.u32 %v6514_v55, 30  ;;  %v6673_v42 = vsel %vm6672_vm9, %v6671_v59, 0  ;;  %v14262_v13 = vor.u32 4788187, %v6219_v16 }
 0x78a   : > { %v6675_v31 = vand.u32 31, %v6673_v42  ;;  %v14266_v54 = vadd.f32 %v6022_v45, %v14109_v60  ;;  %v14269_v29 = vadd.s32 %v14211_v38, %v14216_v8  ;;  %v6669_v62 = vor.u32 8388608, %v6668_v10 }
 0x78b   : > { %16349 = vst [vmem:[#allocation94_spill] sm:$0xff] %v14260_v2  ;;  %v6516_v35 = vshll.u32 %v14260_v2, 30  ;;  %v6565_v6 = vor.u32 8388608, %v14249_v15  ;;  %v14273_v14 = vsel %vm8215_vm14, 0, %v8214_v3  ;;  %v6674_v22 = vshrl.u32 %v6673_v42, 5 }
 0x78c   : > { %16350 = vst [vmem:[#allocation93_spill] sm:$0xff] %v14266_v54  ;;  %v6676_v32 = vsub.s32 32, %v6675_v31  ;;  %vm6568_vm5 = vcmp.gt.s32.totalorder %v6567_v7, 0  ;;  %v6678_v17 = vshll.u32 %v15841_v63, %v6675_v31  ;;  %v6681_v60 = vshll.u32 %v15851_v30, %v6675_v31 }
 0x78d   : > { %v14275_v41 = vsub.s32 %v6513_v27, %v6516_v35  ;;  %v6684_v25 = vshll.u32 %v15965_v51, %v6675_v31  ;;  %v6687_v46 = vshll.u32 %v15966_v34, %v6675_v31  ;;  %v6690_v20 = vshll.u32 %v15852_v24, %v6675_v31 }
 0x78e   : > { %v6679_v8 = vshrl.u32 %v15851_v30, %v6676_v32  ;;  %v6682_v38 = vshrl.u32 %v15965_v51, %v6676_v32  ;;  %v6685_v61 = vshrl.u32 %v15966_v34, %v6676_v32  ;;  %v6688_v33 = vshrl.u32 %v15852_v24, %v6676_v32 }
 0x78f   : > { %v6519_v12 = vsub.s32 0, %v14275_v41  ;;  %v6691_v39 = vshrl.u32 %v16339_v56, %v6676_v32  ;;  %v6709_v59 = vshll.u32 %v6669_v62, 8  ;;  %v6425_v55 = vsub.s32 4294967266, %v14273_v14 }
 0x790   : > { %v6680_v3 = vor.u32 %v6679_v8, %v6678_v17  ;;  %v6683_v27 = vor.u32 %v6682_v38, %v6681_v60  ;;  %v6686_v16 = vor.u32 %v6685_v61, %v6684_v25  ;;  %v6689_v15 = vor.u32 %v6688_v33, %v6687_v46 }
 0x791   : > { %v8217_v10 = vmin.u32 %v6519_v12, %v14275_v41  ;;  %v6692_v45 = vor.u32 %v6691_v39, %v6690_v20  ;;  %v6677_v42 = vshrl.u32 %v15841_v63, %v6676_v32  ;;  %vm6693_vm11 = vcmp.lt.s32.totalorder %v6674_v22, 1 }
 0x792   : > { %vm6696_vm6 = vcmp.lt.s32.totalorder %v6674_v22, 4  ;;  %v6569_v35 = vsel %vm6568_vm5, %v6567_v7, 0  ;;  %vm6694_vm7 = vcmp.lt.s32.totalorder %v6674_v22, 2  ;;  %v6701_v49 = vsel %vm6693_vm11, %v6680_v3, %v6683_v27 }
 0x793   : > { %v6521_v40 = vclz %v8217_v10  ;;  %v6698_v31 = vsel %vm6696_vm6, %v6686_v16, 2102212464  ;;  %vm6695_vm1 = vcmp.lt.s32.totalorder %v6674_v22, 3  ;;  %v6702_v17 = vsel %vm6696_vm6, %v6689_v15, 920167782 }
 0x794   : > { %v6705_v60 = vsel %vm6693_vm11, %v6683_v27, %v6686_v16  ;;  %v6706_v62 = vsel %vm6696_vm6, %v6692_v45, 1326507024  ;;  %v14292_v25 = vpop.eup %8772  ;;  %v6697_v38 = vsel %vm6693_vm11, %v6677_v42, %v6680_v3  ;;  %v6703_v61 = vsel %vm6695_vm1, %v6686_v16, %v6702_v17 }
 0x795   : > { %16351 = vst [vmem:[#allocation69_spill] sm:$0xff] %v14292_v25  ;;  %v8218_v8 = vadd.s32 4294967294, %v6521_v40  ;;  %v6707_v46 = vsel %vm6695_vm1, %v6689_v15, %v6706_v62  ;;  %v6699_v12 = vsel %vm6695_vm1, %v6683_v27, %v6698_v31  ;;  %v6704_v32 = vsel %vm6694_vm7, %v6701_v49, %v6703_v61 }
 0x796   : > { %v6708_v33 = vsel %vm6694_vm7, %v6705_v60, %v6707_v46  ;;  %v6571_v7 = vand.u32 31, %v6569_v35  ;;  %v14302_v45 = vmul.u32.u64.low %v6709_v59, %v6704_v32  ;;  %v14303_v36 = vmul.u32.u64.high %v6709_v59, %v6704_v32, %v14302_v45 }
 0x797   : > { %vm8219_vm4 = vcmp.lt.s32.totalorder %v8218_v8, 0  ;;  %v14297_v39 = vmul.u32.u64.low %v6709_v59, %v6708_v33  ;;  %v14298_v10 = vmul.u32.u64.high %v6709_v59, %v6708_v33, %v14297_v39  ;;  %v6700_v49 = vsel %vm6694_vm7, %v6697_v38, %v6699_v12 }
 0x798   : > { %v14300_v5 = vsel %vm8219_vm4, 0, %v8218_v8  ;;  %v6572_v40 = vsub.s32 32, %v6571_v7  ;;  %v14308_v27 = vshll.u32 %v6565_v6, 8  ;;  %v14311_v15 = vadd.s32 127, %v6425_v55 }
 0x799   : > { %v6529_v3 = vsub.s32 4294967266, %v14300_v5  ;;  %v6574_v42 = vshll.u32 %v15841_v63, %v6571_v7  ;;  %vm6718_vm3 = vc.u32 %v14298_v10, %v14302_v45  ;;  %v6570_v60 = vshrl.u32 %v6569_v35, 5 }
 0x79a   : > { %v6575_v31 = vshrl.u32 %v15851_v30, %v6572_v40  ;;  %v6578_v17 = vshrl.u32 %v15965_v51, %v6572_v40  ;;  %v6577_v62 = vshll.u32 %v15851_v30, %v6571_v7  ;;  %v6768_v22 = vand.u32 2139095040, %v14266_v54 }
 0x79b   : > { %v6530_v6 = vadd.s32 127, %v6529_v3  ;;  %v6716_v8 = vmul.u32 %v6709_v59, %v6700_v49  ;;  %v6719_v38 = vadd.s32 1, %v14303_v36  ;;  %v6580_v46 = vshll.u32 %v15965_v51, %v6571_v7 }
 0x79c   : > { %v6576_v55 = vor.u32 %v6575_v31, %v6574_v42  ;;  %v6579_v61 = vor.u32 %v6578_v17, %v6577_v62  ;;  %v6581_v12 = vshrl.u32 %v15966_v34, %v6572_v40  ;;  %v6583_v32 = vshll.u32 %v15966_v34, %v6571_v7 }
 0x79d   : > { %v6720_v33 = vsel %vm6718_vm3, %v6719_v38, %v14303_v36  ;;  %v6584_v35 = vshrl.u32 %v15852_v24, %v6572_v40  ;;  %v6586_v39 = vshll.u32 %v15852_v24, %v6571_v7  ;;  %v6587_v21 = vshrl.u32 %v16339_v56, %v6572_v40 }
 0x79e   : > { %v6721_v3 = vadd.s32 %v6720_v33, %v6716_v8  ;;  %v6582_v59 = vor.u32 %v6581_v12, %v6580_v46  ;;  %vm6589_vm8 = vcmp.lt.s32.totalorder %v6570_v60, 1  ;;  %v6769_v49 = vshrl.u32 %v6768_v22, 23 }
 0x79f   : > { %v6525_v42 = vsub.s32 32, %v14300_v5  ;;  %v6526_v31 = vshll.u32 %v14275_v41, %v14300_v5  ;;  %v6585_v17 = vor.u32 %v6584_v35, %v6583_v32  ;;  %v6588_v62 = vor.u32 %v6587_v21, %v6586_v39  ;;  %v5937_v39 = vpop.f32.mrf.mxu0 }
 0x7a0   : > { %v6531_v58 = vshll.u32 %v6530_v6, 23  ;;  %v6722_v16 = vadd.s32 536870912, %v6721_v3  ;;  %v6573_v36 = vshrl.u32 %v15841_v63, %v6572_v40  ;;  %vm6592_vm10 = vcmp.lt.s32.totalorder %v6570_v60, 4 }
 0x7a1   : > { %vm6591_vm12 = vcmp.lt.s32.totalorder %v6570_v60, 3  ;;  %v6594_v7 = vsel %vm6592_vm10, %v6582_v59, 2102212464  ;;  %v6597_v38 = vsel %vm6589_vm8, %v6576_v55, %v6579_v61  ;;  %v6598_v8 = vsel %vm6592_vm10, %v6585_v17, 920167782 }
 0x7a2   : > { %v14333_v46 = vshrl.u32 %v6722_v16, 30  ;;  %vm6590_vm15 = vcmp.lt.s32.totalorder %v6570_v60, 2  ;;  %v6599_v22 = vsel %vm6591_vm12, %v6582_v59, %v6598_v8  ;;  %v6601_v12 = vsel %vm6589_vm8, %v6579_v61, %v6582_v59 }
 0x7a3   : > { %v6527_v5 = vshrl.u32 %v14269_v29, %v6525_v42  ;;  %v6600_v21 = vsel %vm6590_vm15, %v6597_v38, %v6599_v22  ;;  %v6602_v41 = vsel %vm6592_vm10, %v6588_v62, 1326507024  ;;  %v8228_v6 = vadd.s32 4294967169, %v6769_v49 }
 0x7a4   : > { %16352 = vst [vmem:[#allocation45_spill] sm:$0xff] %v14333_v46  ;;  %v6724_v40 = vshll.u32 %v14333_v46, 30  ;;  %v6593_v32 = vsel %vm6589_vm8, %v6573_v36, %v6576_v55  ;;  %v6595_v33 = vsel %vm6591_vm12, %v6579_v61, %v6594_v7  ;;  %v6603_v35 = vsel %vm6591_vm12, %v6585_v17, %v6602_v41 }
 0x7a5   : > { %v6532_v20 = vor.u32 4788187, %v6531_v58  ;;  %v6604_v16 = vsel %vm6590_vm15, %v6601_v12, %v6603_v35  ;;  %v14342_v8 = vmul.u32.u64.low %v14308_v27, %v6600_v21  ;;  %v14343_v25 = vmul.u32.u64.high %v14308_v27, %v6600_v21, %v14342_v8 }
 0x7a6   : > { %v6221_v29 = vand.u32 2147483647, %v14262_v13  ;;  %v14347_v59 = vsub.s32 %v6721_v3, %v6724_v40  ;;  %v14350_v49 = vmul.u32.u64.low %v14308_v27, %v6604_v16  ;;  %v14351_v42 = vmul.u32.u64.high %v14308_v27, %v6604_v16, %v14350_v49 }
 0x7a7   : > { %v6528_v55 = vor.u32 %v6527_v5, %v6526_v31  ;;  %v6596_v61 = vsel %vm6590_vm15, %v6593_v32, %v6595_v33  ;;  %v6775_v17 = vadd.s32 1, %v8228_v6  ;;  %v14355_v58 = vadd.f32 %v5937_v39, %v13973_v19 }
 0x7a8   : > { %v6422_v62 = vshll.u32 %v14205_v47, %v14273_v14  ;;  %v16353_v36 = vsub.s32 32, %v14273_v14  ;;  %v6427_v3 = vshll.u32 %v14311_v15, 23  ;;  %v6727_v7 = vsub.s32 0, %v14347_v59 }
 0x7a9   : > { %v6533_v38 = vand.u32 2147483647, %v6532_v20  ;;  %v6615_v31 = vadd.s32 1, %v14343_v25  ;;  %v16354_v60 = vand.u32 2147483647, %v14266_v54  ;;  %vm6776_vm9 = vcmp.gt.s32.totalorder %v6775_v17, 0 }
 0x7aa   : > { %v6423_v13 = vshrl.u32 %v14254_v9, %v16353_v36  ;;  %v8225_v12 = vmin.u32 %v6727_v7, %v14347_v59  ;;  %v6612_v5 = vmul.u32 %v14308_v27, %v6596_v61  ;;  %vm6614_vm14 = vc.u32 %v14351_v42, %v14342_v8 }
 0x7ab   : > { %v6772_v22 = vand.u32 8388607, %v16354_v60  ;;  %v6777_v47 = vsel %vm6776_vm9, %v6775_v17, 0  ;;  %v16355_v9 = vcvt.s32.f32 %v14242_v23  ;;  %v6535_v15 = vcvt.s32.f32 %v6528_v55 }
 0x7ac   : > { %v6616_v20 = vsel %vm6614_vm14, %v6615_v31, %v14343_v25  ;;  %v6779_v21 = vand.u32 31, %v6777_v47  ;;  %v14376_v41 = vor.u32 %v6423_v13, %v6422_v62  ;;  %v14378_v6 = vor.u32 4788187, %v6427_v3 }
 0x7ad   : > { %v14373_v14 = vmul.f32 %v16355_v9, %v6221_v29  ;;  %v6729_v40 = vclz %v8225_v12  ;;  %v6617_v32 = vadd.s32 %v6616_v20, %v6612_v5  ;;  %v14380_v33 = vmul.f32 %v6535_v15, %v6533_v38 }
 0x7ae   : > { %v6773_v27 = vor.u32 8388608, %v6772_v22  ;;  %v6780_v35 = vsub.s32 32, %v6779_v21  ;;  %v6872_v39 = vand.u32 2139095040, %v14355_v58  ;;  %v14383_v29 = vshrl.u32 %v6777_v47, 5 }
 0x7af   : > { %v8226_v16 = vadd.s32 4294967294, %v6729_v40  ;;  %v6618_v23 = vadd.s32 536870912, %v6617_v32  ;;  %v6782_v49 = vshll.u32 %v15841_v63, %v6779_v21  ;;  %v6785_v55 = vshll.u32 %v15851_v30, %v6779_v21 }
 0x7b0   : > { %v6783_v25 = vshrl.u32 %v15851_v30, %v6780_v35  ;;  %v6786_v61 = vshrl.u32 %v15965_v51, %v6780_v35  ;;  %v6789_v17 = vshrl.u32 %v15966_v34, %v6780_v35  ;;  %v6792_v36 = vshrl.u32 %v15852_v24, %v6780_v35 }
 0x7b1   : > { %vm8227_vm5 = vcmp.lt.s32.totalorder %v8226_v16, 0  ;;  %v14390_v62 = vshrl.u32 %v6618_v23, 30  ;;  %v6795_v13 = vshrl.u32 %v16339_v56, %v6780_v35  ;;  %v6788_v7 = vshll.u32 %v15965_v51, %v6779_v21 }
 0x7b2   : > { %v6732_v3 = vsel %vm8227_vm5, 0, %v8226_v16  ;;  %v6791_v38 = vshll.u32 %v15966_v34, %v6779_v21  ;;  %v6794_v31 = vshll.u32 %v15852_v24, %v6779_v21  ;;  %v6784_v12 = vor.u32 %v6783_v25, %v6782_v49 }
 0x7b3   : > { %v6737_v60 = vsub.s32 4294967266, %v6732_v3  ;;  %v6620_v22 = vshll.u32 %v14390_v62, 30  ;;  %v6787_v5 = vor.u32 %v6786_v61, %v6785_v55  ;;  %v6717_v47 = vadd.s32 %v14302_v45, %v14298_v10 }
 0x7b4   : > { %v6790_v9 = vor.u32 %v6789_v17, %v6788_v7  ;;  %v6793_v15 = vor.u32 %v6792_v36, %v6791_v38  ;;  %v6796_v20 = vor.u32 %v6795_v13, %v6794_v31  ;;  %vm15804_vm11 = vcmp.lt.s32.totalorder %v14116_v44, 0 }
 0x7b5   : > { %v6537_v40 = vxor.u32 2147483648, %v14380_v33  ;;  %v6733_v16 = vsub.s32 32, %v6732_v3  ;;  %v14402_v23 = vsub.s32 %v6617_v32, %v6620_v22  ;;  %v6873_v28 = vshrl.u32 %v6872_v39, 23 }
 0x7b6   : > { %v16356_v21 = vand.u32 2147483647, %v13985_v18  ;;  %v16357_v11 = vmov 0  ;;  %v6738_v49 = vadd.s32 127, %v6737_v60  ;;  %v6781_v10 = vshrl.u32 %v15841_v63, %v6780_v35 }
 0x7b7   : > { %vm6797_vm7 = vcmp.lt.s32.totalorder %v14383_v29, 1  ;;  %v6813_v45 = vshll.u32 %v6773_v27, 8  ;;  %v6623_v25 = vsub.s32 0, %v14402_v23  ;;  %vm6798_vm1 = vcmp.lt.s32.totalorder %v14383_v29, 2 }
 0x7b8   : > { %vm14406_vm6 = vcmp.le.f32.partialorder %v16356_v21, 0.7853982  ;;  %vm6800_vm4 = vcmp.lt.s32.totalorder %v14383_v29, 4  ;;  %v6805_v32 = vsel %vm6797_vm7, %v6784_v12, %v6787_v5  ;;  %v16360_v39 = vand.u32 2147483647, %v14116_v44 }
 0x7b9   : > { %v16358_v11 = vsel %vm14406_vm6, 4294967295, %v16357_v11  ;;  %v16361_v55 = vmov 0  ;;  %v6802_v61 = vsel %vm6800_vm4, %v6790_v9, 2102212464  ;;  %v6806_v35 = vsel %vm6800_vm4, %v6793_v15, 920167782 }
 0x7ba   : > { %16359 = vst [vmem:[#allocation52_spill] sm:$0xff] %v16358_v11  ;;  %vm14419_vm3 = vcmp.le.f32.partialorder %v16360_v39, 0.7853982  ;;  %v6809_v27 = vsel %vm6797_vm7, %v6787_v5, %v6790_v9  ;;  %v6810_v17 = vsel %vm6800_vm4, %v6796_v20, 1326507024  ;;  %v6735_v36 = vshrl.u32 %v6717_v47, %v6733_v16 }
 0x7bb   : > { %v16362_v55 = vsel %vm14419_vm3, 4294967295, %v16361_v55  ;;  %v8221_v13 = vmin.u32 %v6623_v25, %v14402_v23  ;;  %vm6799_vm8 = vcmp.lt.s32.totalorder %v14383_v29, 3  ;;  %v8232_v7 = vadd.s32 4294967169, %v6873_v28 }
 0x7bc   : > { %16363 = vst [vmem:[#allocation76_spill] sm:$0xff] %v16362_v55  ;;  %v6739_v38 = vshll.u32 %v6738_v49, 23  ;;  %v6801_v31 = vsel %vm6797_vm7, %v6781_v10, %v6784_v12  ;;  %v6807_v60 = vsel %vm6799_vm8, %v6790_v9, %v6806_v35  ;;  %v6811_v22 = vsel %vm6799_vm8, %v6793_v15, %v6810_v17 }
 0x7bd   : > { %v6625_v21 = vclz %v8221_v13  ;;  %v6803_v39 = vsel %vm6799_vm8, %v6787_v5, %v6802_v61  ;;  %v6808_v57 = vsel %vm6798_vm1, %v6805_v32, %v6807_v60  ;;  %v6812_v20 = vsel %vm6798_vm1, %v6809_v27, %v6811_v22  ;;  %v6026_v32 = vpop.f32.mrf.mxu1 }
 0x7be   : > { %v14433_v47 = vmul.u32.u64.low %v6813_v45, %v6812_v20  ;;  %v14434_v16 = vmul.u32.u64.high %v6813_v45, %v6812_v20, %v14433_v47  ;;  %v14436_v25 = vmul.u32.u64.low %v6813_v45, %v6808_v57  ;;  %v14437_v26 = vmul.u32.u64.high %v6813_v45, %v6808_v57, %v14436_v25 }
 0x7bf   : > { %8774 = vsinq.f32 %v14240_v48  ;;  %v6429_v28 = vand.u32 2147483647, %v14378_v6  ;;  %v15764_v12 = vand.u32 2147483647, %v14355_v58  ;;  %v6879_v5 = vadd.s32 1, %v8232_v7 }
 0x7c0   : > { %v6538_v9 = vsel %vm15804_vm11, %v6537_v40, %v14380_v33  ;;  %v6734_v15 = vshll.u32 %v14347_v59, %v6732_v3  ;;  %v6740_v49 = vor.u32 4788187, %v6739_v38  ;;  %v6804_v10 = vsel %vm6798_vm1, %v6801_v31, %v6803_v39 }
 0x7c1   : > { %v6333_v57 = vsel %vm14406_vm6, %v13985_v18, %v14258_v50  ;;  %v6225_v48 = vxor.u32 2147483648, %v14373_v14  ;;  %v6431_v6 = vcvt.s32.f32 %v14376_v41  ;;  %vm6880_vm10 = vcmp.gt.s32.totalorder %v6879_v5, 0 }
 0x7c2   : > { %v6736_v61 = vor.u32 %v6735_v36, %v6734_v15  ;;  %v8222_v35 = vadd.s32 4294967294, %v6625_v21  ;;  %vm6822_vm12 = vc.u32 %v14434_v16, %v14436_v25  ;;  %v6823_v59 = vadd.s32 1, %v14437_v26 }
 0x7c3   : > { %v14458_v33 = vmul.f32 %v6431_v6, %v6429_v28  ;;  %v14463_v29 = vsel %vm14419_vm3, %v14116_v44, %v6538_v9  ;;  %v6820_v50 = vmul.u32 %v6813_v45, %v6804_v10  ;;  %v6876_v41 = vand.u32 8388607, %v15764_v12 }
 0x7c4   : > { %v6741_v3 = vand.u32 2147483647, %v6740_v49  ;;  %v6824_v40 = vsel %vm6822_vm12, %v6823_v59, %v14437_v26  ;;  %v6881_v27 = vsel %vm6880_vm10, %v6879_v5, 0  ;;  %v14469_v17 = vadd.f32 %v6026_v32, %v13973_v19 }
 0x7c5   : > { %8776 = vcosq.f32 %v6333_v57  ;;  %vm15802_vm15 = vcmp.lt.s32.totalorder %v13979_v43, 0  ;;  %v6825_v36 = vadd.s32 %v6824_v40, %v6820_v50  ;;  %v6743_v13 = vcvt.s32.f32 %v6736_v61 }
 0x7c6   : > { %8778 = vsinq.f32 %v6333_v57  ;;  %vm8223_vm9 = vcmp.lt.s32.totalorder %v8222_v35, 0  ;;  %v6883_v7 = vand.u32 31, %v6881_v27  ;;  %v14475_v45 = vsel %vm15802_vm15, %v6225_v48, %v14373_v14 }
 0x7c7   : > { %16364 = vst [vmem:[#allocation91_spill] sm:$0xff] %v14475_v45  ;;  %8780 = vcosq.f32 %v14463_v29  ;;  %v6826_v26 = vadd.s32 536870912, %v6825_v36  ;;  %v14479_v31 = vmul.f32 %v6743_v13, %v6741_v3  ;;  %v6877_v60 = vor.u32 8388608, %v6876_v41 }
 0x7c8   : > { %v6884_v22 = vsub.s32 32, %v6883_v7  ;;  %v7080_v21 = vand.u32 2139095040, %v14469_v17  ;;  %v14482_v39 = vsel %vm8223_vm9, 0, %v8222_v35  ;;  %v14486_v47 = vshrl.u32 %v6881_v27, 5 }
 0x7c9   : > { %v14484_v20 = vshrl.u32 %v6826_v26, 30  ;;  %v6886_v14 = vshll.u32 %v15841_v63, %v6883_v7  ;;  %v6889_v5 = vshll.u32 %v15851_v30, %v6883_v7  ;;  %v6892_v10 = vshll.u32 %v15965_v51, %v6883_v7 }
 0x7ca   : > { %v6887_v28 = vshrl.u32 %v15851_v30, %v6884_v22  ;;  %v6890_v9 = vshrl.u32 %v15965_v51, %v6884_v22  ;;  %v6893_v15 = vshrl.u32 %v15966_v34, %v6884_v22  ;;  %v6895_v57 = vshll.u32 %v15966_v34, %v6883_v7 }
 0x7cb   : > { %16365 = vst [vmem:[#allocation67_spill] sm:$0xff] %v14484_v20  ;;  %v6828_v49 = vshll.u32 %v14484_v20, 30  ;;  %v6896_v48 = vshrl.u32 %v15852_v24, %v6884_v22  ;;  %v6898_v35 = vshll.u32 %v15852_v24, %v6883_v7  ;;  %v6899_v59 = vshrl.u32 %v16339_v56, %v6884_v22 }
 0x7cc   : > { %v14497_v6 = vpop.eup %8774  ;;  %v6888_v32 = vor.u32 %v6887_v28, %v6886_v14  ;;  %v6891_v61 = vor.u32 %v6890_v9, %v6889_v5  ;;  %vm15803_vm14 = vcmp.lt.s32.totalorder %v14186_v52, 0  ;;  %v6613_v50 = vadd.s32 %v14342_v8, %v14351_v42 }
 0x7cd   : > { %16366 = vst [vmem:[#allocation68_spill] sm:$0xff] %v14497_v6  ;;  %v14504_v41 = vsub.s32 %v6825_v36, %v6828_v49  ;;  %v6894_v3 = vor.u32 %v6893_v15, %v6892_v10  ;;  %v6897_v40 = vor.u32 %v6896_v48, %v6895_v57  ;;  %v6745_v27 = vxor.u32 2147483648, %v14479_v31  ;;  %v5939_v10 = vpop.f32.mrf.mxu0 }
 0x7ce   : > { %v6900_v13 = vor.u32 %v6899_v59, %v6898_v35  ;;  %v6917_v26 = vshll.u32 %v6877_v60, 8  ;;  %v7081_v12 = vshrl.u32 %v7080_v21, 23  ;;  %vm15798_vm5 = vcmp.lt.s32.totalorder %v13995_v4, 0 }
 0x7cf   : > { %v6633_v7 = vsub.s32 4294967266, %v14482_v39  ;;  %v6831_v14 = vsub.s32 0, %v14504_v41  ;;  %vm6901_vm7 = vcmp.lt.s32.totalorder %v14486_v47, 1  ;;  %vm6904_vm1 = vcmp.lt.s32.totalorder %v14486_v47, 4 }
 0x7d0   : > { %v6885_v8 = vshrl.u32 %v15841_v63, %v6884_v22  ;;  %vm6903_vm4 = vcmp.lt.s32.totalorder %v14486_v47, 3  ;;  %v6909_v42 = vsel %vm6901_vm7, %v6888_v32, %v6891_v61  ;;  %v6910_v36 = vsel %vm6904_vm1, %v6897_v40, 920167782 }
 0x7d1   : > { %vm6902_vm8 = vcmp.lt.s32.totalorder %v14486_v47, 2  ;;  %v6906_v60 = vsel %vm6904_vm1, %v6894_v3, 2102212464  ;;  %v6911_v21 = vsel %vm6903_vm4, %v6894_v3, %v6910_v36  ;;  %v6913_v28 = vsel %vm6901_vm7, %v6891_v61, %v6894_v3 }
 0x7d2   : > { %v14521_v5 = vpop.eup %8776  ;;  %v8229_v9 = vmin.u32 %v6831_v14, %v14504_v41  ;;  %v6912_v22 = vsel %vm6902_vm8, %v6909_v42, %v6911_v21  ;;  %v6914_v15 = vsel %vm6904_vm1, %v6900_v13, 1326507024  ;;  %v8240_v49 = vadd.s32 4294967169, %v7081_v12 }
 0x7d3   : > { %16367 = vst [vmem:[#allocation81_spill] sm:$0xff] %v14521_v5  ;;  %v14526_v57 = vpop.eup %8778  ;;  %v6915_v48 = vsel %vm6903_vm4, %v6897_v40, %v6914_v15  ;;  %v14530_v35 = vmul.u32.u64.low %v6917_v26, %v6912_v22  ;;  %v14531_v59 = vmul.u32.u64.high %v6917_v26, %v6912_v22, %v14530_v35  ;;  %v15765_v3 = vand.u32 2147483647, %v14469_v17 }
 0x7d4   : > { %16368 = vst [vmem:[#allocation79_spill] sm:$0xff] %v14526_v57  ;;  %v14535_v36 = vpop.eup %8780  ;;  %v6905_v14 = vsel %vm6901_vm7, %v6885_v8, %v6888_v32  ;;  %v6907_v12 = vsel %vm6903_vm4, %v6891_v61, %v6906_v60  ;;  %v6916_v13 = vsel %vm6902_vm8, %v6913_v28, %v6915_v48  ;;  %v7087_v42 = vadd.s32 1, %v8240_v49  ;;  %v6028_v61 = vpop.f32.mrf.mxu1 }
 0x7d5   : > { %16369 = vst [vmem:[#allocation80_spill] sm:$0xff] %v14535_v36  ;;  %v6629_v40 = vsub.s32 32, %v14482_v39  ;;  %v14544_v21 = vmul.u32.u64.low %v6917_v26, %v6916_v13  ;;  %v14545_v22 = vmul.u32.u64.high %v6917_v26, %v6916_v13, %v14544_v21  ;;  %v14548_v15 = vadd.f32 %v5939_v10, %v13973_v19 }
 0x7d6   : > { %v6746_v38 = vsel %vm15803_vm14, %v6745_v27, %v14479_v31  ;;  %v14553_v32 = vadd.s32 127, %v6633_v7  ;;  %v6833_v8 = vclz %v8229_v9  ;;  %vm7088_vm10 = vcmp.gt.s32.totalorder %v7087_v42, 0 }
 0x7d7   : > { %v6908_v60 = vsel %vm6902_vm8, %v6905_v14, %v6907_v12  ;;  %v6927_v28 = vadd.s32 1, %v14531_v59  ;;  %v7084_v49 = vand.u32 8388607, %v15765_v3  ;;  %v7089_v48 = vsel %vm7088_vm10, %v7087_v42, 0 }
 0x7d8   : > { %v16370_v10 = vxor.u32 2147483648, %v14458_v33  ;;  %8782 = vsinq.f32 %v14463_v29  ;;  %v16372_v27 = vand.u32 2147483647, %v14186_v52  ;;  %v16373_v47 = vmov 0 }
 0x7d9   : > { %v7091_v7 = vand.u32 31, %v7089_v48  ;;  %v14581_v12 = vshrl.u32 %v6613_v50, %v6629_v40  ;;  %v8230_v29 = vadd.s32 4294967294, %v6833_v8  ;;  %v6924_v13 = vmul.u32 %v6917_v26, %v6908_v60 }
 0x7da   : > { %v14565_v31 = vsel %vm15798_vm5, %v16370_v10, %v14458_v33  ;;  %vm14570_vm12 = vcmp.le.f32.partialorder %v16372_v27, 0.7853982  ;;  %v14584_v33 = vadd.f32 %v6028_v61, %v13973_v19  ;;  %vm6926_vm9 = vc.u32 %v14545_v22, %v14530_v35 }
 0x7db   : > { %16371 = vst [vmem:[#allocation59_spill] sm:$0xff] %v14565_v31  ;;  %v16374_v47 = vsel %vm14570_vm12, 4294967295, %v16373_v47  ;;  %v14577_v9 = vsel %vm14570_vm12, %v14186_v52, %v6746_v38  ;;  %v7092_v42 = vsub.s32 32, %v7091_v7  ;;  %v6635_v21 = vshll.u32 %v14553_v32, 23 }
 0x7dc   : > { %16375 = vst [vmem:[#allocation78_spill] sm:$0xff] %v16374_v47  ;;  %v6928_v10 = vsel %vm6926_vm9, %v6927_v28, %v14531_v59  ;;  %v7085_v38 = vor.u32 8388608, %v7084_v49  ;;  %v6976_v27 = vand.u32 2139095040, %v14548_v15  ;;  %v7090_v14 = vshrl.u32 %v7089_v48, 5 }
 0x7dd   : > { %v6929_v3 = vadd.s32 %v6928_v10, %v6924_v13  ;;  %v7095_v50 = vshrl.u32 %v15851_v30, %v7092_v42  ;;  %v7098_v19 = vshrl.u32 %v15965_v51, %v7092_v42  ;;  %v7094_v40 = vshll.u32 %v15841_v63, %v7091_v7 }
 0x7de   : > { %v7097_v26 = vshll.u32 %v15851_v30, %v7091_v7  ;;  %v7100_v8 = vshll.u32 %v15965_v51, %v7091_v7  ;;  %v7101_v61 = vshrl.u32 %v15966_v34, %v7092_v42  ;;  %vm8231_vm7 = vcmp.lt.s32.totalorder %v8230_v29, 0 }
 0x7df   : > { %v6930_v32 = vadd.s32 536870912, %v6929_v3  ;;  %v7103_v59 = vshll.u32 %v15966_v34, %v7091_v7  ;;  %v7104_v60 = vshrl.u32 %v15852_v24, %v7092_v42  ;;  %v7096_v28 = vor.u32 %v7095_v50, %v7094_v40 }
 0x7e0   : > { %v7099_v49 = vor.u32 %v7098_v19, %v7097_v26  ;;  %v7102_v48 = vor.u32 %v7101_v61, %v7100_v8  ;;  %v7106_v57 = vshll.u32 %v15852_v24, %v7091_v7  ;;  %v7107_v6 = vshrl.u32 %v16339_v56, %v7092_v42 }
 0x7e1   : > { %v14600_v10 = vshrl.u32 %v6930_v32, 30  ;;  %v7105_v5 = vor.u32 %v7104_v60, %v7103_v59  ;;  %v6836_v11 = vsel %vm8231_vm7, 0, %v8230_v29  ;;  %vm7112_vm1 = vcmp.lt.s32.totalorder %v7090_v14, 4 }
 0x7e2   : > { %v7125_v18 = vshll.u32 %v7085_v38, 8  ;;  %v6977_v31 = vshrl.u32 %v6976_v27, 23  ;;  %v7108_v4 = vor.u32 %v7107_v6, %v7106_v57  ;;  %vm7109_vm4 = vcmp.lt.s32.totalorder %v7090_v14, 1 }
 0x7e3   : > { %v6932_v1 = vshll.u32 %v14600_v10, 30  ;;  %v7114_v50 = vsel %vm7112_vm1, %v7102_v48, 2102212464  ;;  %v7093_v19 = vshrl.u32 %v15841_v63, %v7092_v42  ;;  %vm7111_vm8 = vcmp.lt.s32.totalorder %v7090_v14, 3 }
 0x7e4   : > { %v7117_v40 = vsel %vm7109_vm4, %v7096_v28, %v7099_v49  ;;  %v7118_v26 = vsel %vm7112_vm1, %v7105_v5, 920167782  ;;  %vm7110_vm10 = vcmp.lt.s32.totalorder %v7090_v14, 2  ;;  %v7121_v29 = vsel %vm7109_vm4, %v7099_v49, %v7102_v48 }
 0x7e5   : > { %v14608_v8 = vsub.s32 %v6929_v3, %v6932_v1  ;;  %v7119_v7 = vsel %vm7111_vm8, %v7102_v48, %v7118_v26  ;;  %v14610_v61 = vpop.eup %8782  ;;  %v7113_v38 = vsel %vm7109_vm4, %v7093_v19, %v7096_v28  ;;  %v7115_v27 = vsel %vm7111_vm8, %v7099_v49, %v7114_v50 }
 0x7e6   : > { %16376 = vst [vmem:[#allocation70_spill] sm:$0xff] %v14610_v61  ;;  %v7120_v6 = vsel %vm7110_vm10, %v7117_v40, %v7119_v7  ;;  %v7122_v57 = vsel %vm7112_vm1, %v7108_v4, 1326507024  ;;  %v6837_v1 = vsub.s32 32, %v6836_v11  ;;  %v6841_v3 = vsub.s32 4294967266, %v6836_v11 }
 0x7e7   : > { %v6935_v32 = vsub.s32 0, %v14608_v8  ;;  %v7123_v42 = vsel %vm7111_vm8, %v7105_v5, %v7122_v57  ;;  %v14615_v59 = vmul.u32.u64.low %v7125_v18, %v7120_v6  ;;  %v14616_v60 = vmul.u32.u64.high %v7125_v18, %v7120_v6, %v14615_v59 }
 0x7e8   : > { %v7124_v26 = vsel %vm7110_vm10, %v7121_v29, %v7123_v42  ;;  %v8236_v48 = vadd.s32 4294967169, %v6977_v31  ;;  %v7116_v28 = vsel %vm7110_vm10, %v7113_v38, %v7115_v27  ;;  %8784 = vcosq.f32 %v14577_v9 }
 0x7e9   : > { %v8233_v13 = vmin.u32 %v6935_v32, %v14608_v8  ;;  %v14622_v49 = vmul.u32.u64.low %v7125_v18, %v7124_v26  ;;  %v14623_v50 = vmul.u32.u64.high %v7125_v18, %v7124_v26, %v14622_v49  ;;  %v14626_v4 = vor.u32 4788187, %v6635_v21 }
 0x7ea   : > { %v6821_v5 = vadd.s32 %v14436_v25, %v14434_v16  ;;  %v6983_v19 = vadd.s32 1, %v8236_v48  ;;  %v16377_v40 = vshll.u32 %v14402_v23, %v14482_v39  ;;  %v7135_v14 = vadd.s32 1, %v14616_v60 }
 0x7eb   : > { %v6937_v7 = vclz %v8233_v13  ;;  %v16378_v29 = vand.u32 2147483647, %v14548_v15  ;;  %v14639_v6 = vadd.s32 127, %v6841_v3  ;;  %v7132_v21 = vmul.u32 %v7125_v18, %v7116_v28 }
 0x7ec   : > { %v14634_v31 = vor.u32 %v14581_v12, %v16377_v40  ;;  %v6839_v27 = vshrl.u32 %v6821_v5, %v6837_v1  ;;  %vm6984_vm9 = vcmp.gt.s32.totalorder %v6983_v19, 0  ;;  %vm7134_vm7 = vc.u32 %v14623_v50, %v14615_v59 }
 0x7ed   : > { %v6980_v38 = vand.u32 8388607, %v16378_v29  ;;  %v8234_v57 = vadd.s32 4294967294, %v6937_v7  ;;  %v6985_v16 = vsel %vm6984_vm9, %v6983_v19, 0  ;;  %v7184_v23 = vand.u32 2139095040, %v14584_v33 }
 0x7ee   : > { %v6838_v39 = vshll.u32 %v14504_v41, %v6836_v11  ;;  %v7136_v12 = vsel %vm7134_vm7, %v7135_v14, %v14616_v60  ;;  %v6987_v13 = vand.u32 31, %v6985_v16  ;;  %v6925_v32 = vadd.s32 %v14530_v35, %v14545_v22 }
 0x7ef   : > { %vm8235_vm1 = vcmp.lt.s32.totalorder %v8234_v57, 0  ;;  %v7137_v18 = vadd.s32 %v7136_v12, %v7132_v21  ;;  %v6843_v3 = vshll.u32 %v14639_v6, 23  ;;  %v6981_v5 = vor.u32 8388608, %v6980_v38 }
 0x7f0   : > { %v14650_v1 = vor.u32 %v6839_v27, %v6838_v39  ;;  %v6940_v26 = vsel %vm8235_vm1, 0, %v8234_v57  ;;  %v6988_v48 = vsub.s32 32, %v6987_v13  ;;  %v7185_v11 = vshrl.u32 %v7184_v23, 23 }
 0x7f1   : > { %v6945_v28 = vsub.s32 4294967266, %v6940_v26  ;;  %v7138_v49 = vadd.s32 536870912, %v7137_v18  ;;  %v14653_v41 = vshrl.u32 %v6985_v16, 5  ;;  %v6990_v60 = vshll.u32 %v15841_v63, %v6987_v13 }
 0x7f2   : > { %v6991_v35 = vshrl.u32 %v15851_v30, %v6988_v48  ;;  %v6994_v22 = vshrl.u32 %v15965_v51, %v6988_v48  ;;  %v6941_v19 = vsub.s32 32, %v6940_v26  ;;  %v6993_v7 = vshll.u32 %v15851_v30, %v6987_v13 }
 0x7f3   : > { %v14658_v40 = vshrl.u32 %v7138_v49, 30  ;;  %v6997_v14 = vshrl.u32 %v15966_v34, %v6988_v48  ;;  %v6946_v29 = vadd.s32 127, %v6945_v28  ;;  %v6996_v27 = vshll.u32 %v15965_v51, %v6987_v13 }
 0x7f4   : > { %v6999_v38 = vshll.u32 %v15966_v34, %v6987_v13  ;;  %v7000_v6 = vshrl.u32 %v15852_v24, %v6988_v48  ;;  %v6992_v57 = vor.u32 %v6991_v35, %v6990_v60  ;;  %v6995_v16 = vor.u32 %v6994_v22, %v6993_v7 }
 0x7f5   : > { %v7140_v21 = vshll.u32 %v14658_v40, 30  ;;  %v14666_v23 = vshll.u32 %v6981_v5, 8  ;;  %v6998_v39 = vor.u32 %v6997_v14, %v6996_v27  ;;  %v7002_v49 = vshll.u32 %v15852_v24, %v6987_v13  ;;  %v14670_v42 = vpop.eup %8784 }
 0x7f6   : > { %v7001_v12 = vor.u32 %v7000_v6, %v6999_v38  ;;  %v7003_v25 = vshrl.u32 %v16339_v56, %v6988_v48  ;;  %16379 = vst [vmem:[#allocation86_spill] sm:$0xff] %v14670_v42  ;;  %v6942_v28 = vshll.u32 %v14608_v8, %v6940_v26  ;;  %v6943_v45 = vshrl.u32 %v6925_v32, %v6941_v19 }
 0x7f7   : > { %v14673_v47 = vsub.s32 %v7137_v18, %v7140_v21  ;;  %v8244_v43 = vadd.s32 4294967169, %v7185_v11  ;;  %v6947_v37 = vshll.u32 %v6946_v29, 23  ;;  %v6989_v60 = vshrl.u32 %v15841_v63, %v6988_v48 }
 0x7f8   : > { %v7004_v35 = vor.u32 %v7003_v25, %v7002_v49  ;;  %vm7005_vm4 = vcmp.lt.s32.totalorder %v14653_v41, 1  ;;  %vm7007_vm8 = vcmp.lt.s32.totalorder %v14653_v41, 3  ;;  %vm7008_vm10 = vcmp.lt.s32.totalorder %v14653_v41, 4 }
 0x7f9   : > { %v7143_v5 = vsub.s32 0, %v14673_v47  ;;  %v7013_v13 = vsel %vm7005_vm4, %v6992_v57, %v6995_v16  ;;  %v7010_v8 = vsel %vm7008_vm10, %v6998_v39, 2102212464  ;;  %v7014_v32 = vsel %vm7008_vm10, %v7001_v12, 920167782 }
 0x7fa   : > { %v7017_v18 = vsel %vm7005_vm4, %v6995_v16, %v6998_v39  ;;  %v7018_v26 = vsel %vm7008_vm10, %v7004_v35, 1326507024  ;;  %v6944_v11 = vor.u32 %v6943_v45, %v6942_v28  ;;  %vm7006_vm9 = vcmp.lt.s32.totalorder %v14653_v41, 2  ;;  %v5943_v35 = vpop.f32.mrf.mxu0 }
 0x7fb   : > { %v8241_v25 = vmin.u32 %v7143_v5, %v14673_v47  ;;  %v7015_v48 = vsel %vm7007_vm8, %v6998_v39, %v7014_v32  ;;  %v6948_v22 = vor.u32 4788187, %v6947_v37  ;;  %v7019_v7 = vsel %vm7007_vm8, %v7001_v12, %v7018_v26  ;;  %v6032_v5 = vpop.f32.mrf.mxu1 }
 0x7fc   : > { %v7016_v19 = vsel %vm7006_vm9, %v7013_v13, %v7015_v48  ;;  %v7191_v14 = vadd.s32 1, %v8244_v43  ;;  %v7009_v27 = vsel %vm7005_vm4, %v6989_v60, %v6992_v57  ;;  %v7011_v45 = vsel %vm7007_vm8, %v6995_v16, %v7010_v8 }
 0x7fd   : > { %v7145_v29 = vclz %v8241_v25  ;;  %v7020_v38 = vsel %vm7006_vm9, %v7017_v18, %v7019_v7  ;;  %v14703_v21 = vmul.u32.u64.low %v14666_v23, %v7016_v19  ;;  %v14704_v39 = vmul.u32.u64.high %v14666_v23, %v7016_v19, %v14703_v21 }
 0x7fe   : > { %v14699_v6 = vmul.u32.u64.low %v14666_v23, %v7020_v38  ;;  %v14700_v37 = vmul.u32.u64.high %v14666_v23, %v7020_v38, %v14699_v6  ;;  %v6639_v43 = vcvt.s32.f32 %v14634_v31  ;;  %v14708_v12 = vor.u32 4788187, %v6843_v3 }
 0x7ff   : > { %v8242_v57 = vadd.s32 4294967294, %v7145_v29  ;;  %vm7192_vm7 = vcmp.gt.s32.totalorder %v7191_v14, 0  ;;  %8786 = vsinq.f32 %v14577_v9  ;;  %v6949_v16 = vand.u32 2147483647, %v6948_v22 }
 0x800   : > { %v16380_v49 = vand.u32 2147483647, %v14584_v33  ;;  %v7193_v60 = vsel %vm7192_vm7, %v7191_v14, 0  ;;  %v16381_v13 = vand.u32 2147483647, %v14626_v4  ;;  %v7012_v31 = vsel %vm7006_vm9, %v7009_v27, %v7011_v45 }
 0x801   : > { %vm8243_vm1 = vcmp.lt.s32.totalorder %v8242_v57, 0  ;;  %v7195_v3 = vand.u32 31, %v7193_v60  ;;  %v6951_v18 = vcvt.s32.f32 %v6944_v11  ;;  %vm7030_vm4 = vc.u32 %v14700_v37, %v14703_v21 }
 0x802   : > { %v7188_v28 = vand.u32 8388607, %v16380_v49  ;;  %v14715_v8 = vmul.f32 %v6639_v43, %v16381_v13  ;;  %v14720_v9 = vsel %vm8243_vm1, 0, %v8242_v57  ;;  %v7031_v25 = vadd.s32 1, %v14704_v39 }
 0x803   : > { %v14727_v4 = vadd.f32 %v5943_v35, %v14092_v53  ;;  %v14730_v48 = vadd.f32 %v6032_v5, %v14092_v53  ;;  %v6952_v41 = vmul.f32 %v6951_v18, %v6949_v16  ;;  %v7028_v22 = vmul.u32 %v14666_v23, %v7012_v31 }
 0x804   : > { %v7189_v19 = vor.u32 8388608, %v7188_v28  ;;  %v7196_v11 = vsub.s32 32, %v7195_v3  ;;  %v7153_v7 = vsub.s32 4294967266, %v14720_v9  ;;  %v7032_v14 = vsel %vm7030_vm4, %v7031_v25, %v14704_v39 }
 0x805   : > { %v7194_v29 = vshrl.u32 %v7193_v60, 5  ;;  %v7198_v27 = vshll.u32 %v15841_v63, %v7195_v3  ;;  %v7033_v45 = vadd.s32 %v7032_v14, %v7028_v22  ;;  %v7201_v6 = vshll.u32 %v15851_v30, %v7195_v3 }
 0x806   : > { %v7199_v38 = vshrl.u32 %v15851_v30, %v7196_v11  ;;  %v7202_v43 = vshrl.u32 %v15965_v51, %v7196_v11  ;;  %v7204_v57 = vshll.u32 %v15965_v51, %v7195_v3  ;;  %v7205_v23 = vshrl.u32 %v15966_v34, %v7196_v11 }
 0x807   : > { %v7207_v16 = vshll.u32 %v15966_v34, %v7195_v3  ;;  %v7208_v49 = vshrl.u32 %v15852_v24, %v7196_v11  ;;  %vm6871_vm8 = vcmp.lt.s32.totalorder %v14355_v58, 0  ;;  %v7133_v39 = vadd.s32 %v14615_v59, %v14623_v50 }
 0x808   : > { %v7034_v28 = vadd.s32 536870912, %v7033_v45  ;;  %v7200_v60 = vor.u32 %v7199_v38, %v7198_v27  ;;  %v7203_v35 = vor.u32 %v7202_v43, %v7201_v6  ;;  %v6953_v5 = vxor.u32 2147483648, %v6952_v41 }
 0x809   : > { %v7206_v13 = vor.u32 %v7205_v23, %v7204_v57  ;;  %v7209_v31 = vor.u32 %v7208_v49, %v7207_v16  ;;  %v7229_v18 = vshll.u32 %v7189_v19, 8  ;;  %v7210_v22 = vshll.u32 %v15852_v24, %v7195_v3 }
 0x80a   : > { %v14746_v25 = vshrl.u32 %v7034_v28, 30  ;;  %v7211_v14 = vshrl.u32 %v16339_v56, %v7196_v11  ;;  %v7288_v32 = vand.u32 2139095040, %v14727_v4  ;;  %v7149_v26 = vsub.s32 32, %v14720_v9 }
 0x80b   : > { %v7154_v42 = vadd.s32 127, %v7153_v7  ;;  %vm7213_vm10 = vcmp.lt.s32.totalorder %v7194_v29, 1  ;;  %vm7216_vm9 = vcmp.lt.s32.totalorder %v7194_v29, 4  ;;  %v16382_v59 = vand.u32 2147483647, %v14355_v58 }
 0x80c   : > { %v7036_v19 = vshll.u32 %v14746_v25, 30  ;;  %v7212_v27 = vor.u32 %v7211_v14, %v7210_v22  ;;  %v7218_v38 = vsel %vm7216_vm9, %v7206_v13, 2102212464  ;;  %v7221_v3 = vsel %vm7213_vm10, %v7200_v60, %v7203_v35  ;;  %v14760_v6 = vpop.eup %8786 }
 0x80d   : > { %vm14754_vm7 = vcmp.le.f32.partialorder %v16382_v59, 0.7853982  ;;  %16385 = vst [vmem:[#allocation85_spill] sm:$0xff] %v14760_v6  ;;  %v7197_v43 = vshrl.u32 %v15841_v63, %v7196_v11  ;;  %vm7215_vm1 = vcmp.lt.s32.totalorder %v7194_v29, 3  ;;  %v7222_v7 = vsel %vm7216_vm9, %v7209_v31, 920167782 }
 0x80e   : > { %v7225_v57 = vsel %vm7213_vm10, %v7203_v35, %v7206_v13  ;;  %v14764_v23 = vsub.s32 %v7033_v45, %v7036_v19  ;;  %vm7214_vm4 = vcmp.lt.s32.totalorder %v7194_v29, 2  ;;  %v7223_v16 = vsel %vm7215_vm1, %v7206_v13, %v7222_v7 }
 0x80f   : > { %v7226_v49 = vsel %vm7216_vm9, %v7212_v27, 1326507024  ;;  %vm15809_vm13 = vcmp.lt.s32.totalorder %v14183_v0, 0  ;;  %v7217_v28 = vsel %vm7213_vm10, %v7197_v43, %v7200_v60  ;;  %v7219_v22 = vsel %vm7215_vm1, %v7203_v35, %v7218_v38 }
 0x810   : > { %v7224_v14 = vsel %vm7214_vm4, %v7221_v3, %v7223_v16  ;;  %v7227_v59 = vsel %vm7215_vm1, %v7209_v31, %v7226_v49  ;;  %v7039_v6 = vsub.s32 0, %v14764_v23  ;;  %v6954_v45 = vsel %vm6871_vm8, %v6953_v5, %v6952_v41 }
 0x811   : > { %v7228_v11 = vsel %vm7214_vm4, %v7225_v57, %v7227_v59  ;;  %v14771_v52 = vmul.u32.u64.low %v7229_v18, %v7224_v14  ;;  %v14772_v36 = vmul.u32.u64.high %v7229_v18, %v7224_v14, %v14771_v52  ;;  %v7289_v27 = vshrl.u32 %v7288_v32, 23 }
 0x812   : > { %v14777_v13 = vmul.u32.u64.low %v7229_v18, %v7228_v11  ;;  %v14778_v19 = vmul.u32.u64.high %v7229_v18, %v7228_v11, %v14777_v13  ;;  %v7151_v60 = vshrl.u32 %v7133_v39, %v7149_v26  ;;  %v7155_v35 = vshll.u32 %v7154_v42, 23 }
 0x813   : > { %v8237_v38 = vmin.u32 %v7039_v6, %v14764_v23  ;;  %v7220_v31 = vsel %vm7214_vm4, %v7217_v28, %v7219_v22  ;;  %v6641_v3 = vxor.u32 2147483648, %v14715_v8  ;;  %v16386_v43 = vand.u32 2147483647, %v14708_v12 }
 0x814   : > { %v16387_v7 = vcvt.s32.f32 %v14650_v1  ;;  %v15788_v41 = vand.u32 2147483647, %v14727_v4  ;;  %v8248_v5 = vadd.s32 4294967169, %v7289_v27  ;;  %v7150_v32 = vshll.u32 %v14673_v47, %v14720_v9  ;;  %v5945_v9 = vpop.f32.mrf.mxu0 }
 0x815   : > { %v7041_v26 = vclz %v8237_v38  ;;  %v7239_v42 = vadd.s32 1, %v14772_v36  ;;  %v7496_v29 = vand.u32 2139095040, %v14730_v48  ;;  %v14797_v39 = vsel %vm14754_vm7, %v14355_v58, %v6954_v45 }
 0x816   : > { %v14787_v57 = vmul.f32 %v16387_v7, %v16386_v43  ;;  %v7236_v12 = vmul.u32 %v7229_v18, %v7220_v31  ;;  %vm7238_vm10 = vc.u32 %v14778_v19, %v14771_v52  ;;  %v7295_v1 = vadd.s32 1, %v8248_v5 }
 0x817   : > { %v7152_v6 = vor.u32 %v7151_v60, %v7150_v32  ;;  %v7156_v16 = vor.u32 4788187, %v7155_v35  ;;  %v8238_v49 = vadd.s32 4294967294, %v7041_v26  ;;  %v7240_v47 = vsel %vm7238_vm10, %v7239_v42, %v14772_v36 }
 0x818   : > { %v7241_v28 = vadd.s32 %v7240_v47, %v7236_v12  ;;  %v7292_v22 = vand.u32 8388607, %v15788_v41  ;;  %vm7296_vm9 = vcmp.gt.s32.totalorder %v7295_v1, 0  ;;  %v15787_v14 = vand.u32 2147483647, %v14730_v48 }
 0x819   : > { %v14808_v18 = vsel %vm15809_vm13, %v6641_v3, %v14715_v8  ;;  %v7297_v11 = vsel %vm7296_vm9, %v7295_v1, 0  ;;  %v7497_v45 = vshrl.u32 %v7496_v29, 23  ;;  %vm8239_vm1 = vcmp.lt.s32.totalorder %v8238_v49, 0 }
 0x81a   : > { %v7242_v13 = vadd.s32 536870912, %v7241_v28  ;;  %v7299_v36 = vand.u32 31, %v7297_v11  ;;  %v14812_v27 = vadd.f32 %v5945_v9, %v14092_v53  ;;  %8788 = vcosq.f32 %v14797_v39 }
 0x81b   : > { %v7157_v60 = vand.u32 2147483647, %v7156_v16  ;;  %v7159_v35 = vcvt.s32.f32 %v7152_v6  ;;  %v7029_v38 = vadd.s32 %v14703_v21, %v14700_v37  ;;  %v7293_v8 = vor.u32 8388608, %v7292_v22 }
 0x81c   : > { %v14817_v31 = vshrl.u32 %v7242_v13, 30  ;;  %v7300_v3 = vsub.s32 32, %v7299_v36  ;;  %v14821_v43 = vand.u32 8388607, %v15787_v14  ;;  %v14823_v7 = vsel %vm8239_vm1, 0, %v8238_v49 }
 0x81d   : > { %v7298_v5 = vshrl.u32 %v7297_v11, 5  ;;  %v7302_v32 = vshll.u32 %v15841_v63, %v7299_v36  ;;  %v8256_v26 = vadd.s32 4294967169, %v7497_v45  ;;  %v7305_v37 = vshll.u32 %v15851_v30, %v7299_v36 }
 0x81e   : > { %v7244_v42 = vshll.u32 %v14817_v31, 30  ;;  %v7303_v29 = vshrl.u32 %v15851_v30, %v7300_v3  ;;  %v7306_v21 = vshrl.u32 %v15965_v51, %v7300_v3  ;;  %v7308_v12 = vshll.u32 %v15965_v51, %v7299_v36 }
 0x81f   : > { %v7309_v1 = vshrl.u32 %v15966_v34, %v7300_v3  ;;  %v7311_v6 = vshll.u32 %v15966_v34, %v7299_v36  ;;  %v7312_v16 = vshrl.u32 %v15852_v24, %v7300_v3  ;;  %v14834_v49 = vmul.f32 %v7159_v35, %v7157_v60 }
 0x820   : > { %v14836_v47 = vsub.s32 %v7241_v28, %v7244_v42  ;;  %v7304_v9 = vor.u32 %v7303_v29, %v7302_v32  ;;  %v7307_v22 = vor.u32 %v7306_v21, %v7305_v37  ;;  %v7333_v13 = vshll.u32 %v7293_v8, 8 }
 0x821   : > { %v7310_v11 = vor.u32 %v7309_v1, %v7308_v12  ;;  %v7313_v45 = vor.u32 %v7312_v16, %v7311_v6  ;;  %v7501_v14 = vor.u32 8388608, %v14821_v43  ;;  %vm15808_vm4 = vcmp.lt.s32.totalorder %v14266_v54, 0 }
 0x822   : > { %v7045_v41 = vsub.s32 32, %v14823_v7  ;;  %v7247_v59 = vsub.s32 0, %v14836_v47  ;;  %v7314_v61 = vshll.u32 %v15852_v24, %v7299_v36  ;;  %v7315_v60 = vshrl.u32 %v16339_v56, %v7300_v3 }
 0x823   : > { %v7049_v28 = vsub.s32 4294967266, %v14823_v7  ;;  %vm7317_vm10 = vcmp.lt.s32.totalorder %v7298_v5, 1  ;;  %vm7320_vm9 = vcmp.lt.s32.totalorder %v7298_v5, 4  ;;  %v7503_v35 = vadd.s32 1, %v8256_v26 }
 0x824   : > { %v8245_v32 = vmin.u32 %v7247_v59, %v14836_v47  ;;  %v7316_v8 = vor.u32 %v7315_v60, %v7314_v61  ;;  %v7322_v42 = vsel %vm7320_vm9, %v7310_v11, 2102212464  ;;  %v7325_v43 = vsel %vm7317_vm10, %v7304_v9, %v7307_v22 }
 0x825   : > { %v7301_v29 = vshrl.u32 %v15841_v63, %v7300_v3  ;;  %vm7319_vm1 = vcmp.lt.s32.totalorder %v7298_v5, 3  ;;  %v7326_v37 = vsel %vm7320_vm9, %v7313_v45, 920167782  ;;  %v7329_v21 = vsel %vm7317_vm10, %v7307_v22, %v7310_v11 }
 0x826   : > { %v7249_v12 = vclz %v8245_v32  ;;  %vm7318_vm2 = vcmp.lt.s32.totalorder %v7298_v5, 2  ;;  %v7327_v36 = vsel %vm7319_vm1, %v7310_v11, %v7326_v37  ;;  %v7330_v1 = vsel %vm7320_vm9, %v7316_v8, 1326507024 }
 0x827   : > { %v7321_v6 = vsel %vm7317_vm10, %v7301_v29, %v7304_v9  ;;  %v7323_v16 = vsel %vm7319_vm1, %v7307_v22, %v7322_v42  ;;  %v7328_v46 = vsel %vm7318_vm2, %v7325_v43, %v7327_v36  ;;  %v7331_v55 = vsel %vm7319_vm1, %v7313_v45, %v7330_v1  ;;  %v14848_v26 = vpop.eup %8788 }
 0x828   : > { %v8246_v59 = vadd.s32 4294967294, %v7249_v12  ;;  %v7332_v61 = vsel %vm7318_vm2, %v7329_v21, %v7331_v55  ;;  %v14851_v60 = vmul.u32.u64.low %v7333_v13, %v7328_v46  ;;  %v14852_v44 = vmul.u32.u64.high %v7333_v13, %v7328_v46, %v14851_v60 }
 0x829   : > { %v7047_v3 = vshrl.u32 %v7029_v38, %v7045_v41  ;;  %v14855_v2 = vmul.u32.u64.low %v7333_v13, %v7332_v61  ;;  %v14856_v32 = vmul.u32.u64.high %v7333_v13, %v7332_v61, %v14855_v2  ;;  %vm7504_vm5 = vcmp.gt.s32.totalorder %v7503_v35, 0 }
 0x82a   : > { %v14858_v11 = vadd.s32 127, %v7049_v28  ;;  %vm8247_vm10 = vcmp.lt.s32.totalorder %v8246_v59, 0  ;;  %v7324_v9 = vsel %vm7318_vm2, %v7321_v6, %v7323_v16  ;;  %v7505_v22 = vsel %vm7504_vm5, %v7503_v35, 0 }
 0x82b   : > { %v16388_v45 = vxor.u32 2147483648, %v14787_v57  ;;  %8790 = vsinq.f32 %v14797_v39  ;;  %v7161_v46 = vxor.u32 2147483648, %v14834_v49  ;;  %v7507_v41 = vand.u32 31, %v7505_v22 }
 0x82c   : > { %v7046_v2 = vshll.u32 %v14764_v23, %v14823_v7  ;;  %v7237_v38 = vadd.s32 %v14771_v52, %v14778_v19  ;;  %v7343_v5 = vadd.s32 1, %v14852_v44  ;;  %v15799_v28 = vand.u32 2147483647, %v14812_v27 }
 0x82d   : > { %v14866_v55 = vsel %vm15808_vm4, %v16388_v45, %v14787_v57  ;;  %v14876_v35 = vsel %vm8247_vm10, 0, %v8246_v59  ;;  %v7340_v8 = vmul.u32 %v7333_v13, %v7324_v9  ;;  %vm7342_vm2 = vc.u32 %v14856_v32, %v14851_v60 }
 0x82e   : > { %16389 = vst [vmem:[#allocation62_spill] sm:$0xff] %v14866_v55  ;;  %v7508_v57 = vsub.s32 32, %v7507_v41  ;;  %v14880_v39 = vor.u32 %v7047_v3, %v7046_v2  ;;  %v7051_v42 = vshll.u32 %v14858_v11, 23  ;;  %v7344_v23 = vsel %vm7342_vm2, %v7343_v5, %v14852_v44 }
 0x82f   : > { %v14884_v7 = vshll.u32 %v7501_v14, 8  ;;  %v7345_v52 = vadd.s32 %v7344_v23, %v7340_v8  ;;  %v7510_v19 = vshll.u32 %v15841_v63, %v7507_v41  ;;  %v7257_v13 = vsub.s32 4294967266, %v14876_v35 }
 0x830   : > { %v7511_v43 = vshrl.u32 %v15851_v30, %v7508_v57  ;;  %v7514_v29 = vshrl.u32 %v15965_v51, %v7508_v57  ;;  %v7513_v37 = vshll.u32 %v15851_v30, %v7507_v41  ;;  %v7516_v21 = vshll.u32 %v15965_v51, %v7507_v41 }
 0x831   : > { %v7517_v12 = vshrl.u32 %v15966_v34, %v7508_v57  ;;  %vm15810_vm5 = vcmp.lt.s32.totalorder %v14469_v17, 0  ;;  %v7346_v44 = vadd.s32 536870912, %v7345_v52  ;;  %v7506_v14 = vshrl.u32 %v7505_v22, 5 }
 0x832   : > { %v7512_v36 = vor.u32 %v7511_v43, %v7510_v19  ;;  %v7392_v1 = vand.u32 2139095040, %v14812_v27  ;;  %v7515_v6 = vor.u32 %v7514_v29, %v7513_v37  ;;  %v7519_v59 = vshll.u32 %v15966_v34, %v7507_v41 }
 0x833   : > { %v7518_v16 = vor.u32 %v7517_v12, %v7516_v21  ;;  %v7520_v61 = vshrl.u32 %v15852_v24, %v7508_v57  ;;  %v14897_v3 = vshrl.u32 %v7346_v44, 30  ;;  %v7522_v11 = vshll.u32 %v15852_v24, %v7507_v41 }
 0x834   : > { %v7523_v9 = vshrl.u32 %v16339_v56, %v7508_v57  ;;  %v7396_v45 = vand.u32 8388607, %v15799_v28  ;;  %v7253_v22 = vsub.s32 32, %v14876_v35  ;;  %v7258_v2 = vadd.s32 127, %v7257_v13 }
 0x835   : > { %v7509_v5 = vshrl.u32 %v15841_v63, %v7508_v57  ;;  %v7521_v8 = vor.u32 %v7520_v61, %v7519_v59  ;;  %v7348_v23 = vshll.u32 %v14897_v3, 30  ;;  %vm7525_vm9 = vcmp.lt.s32.totalorder %v7506_v14, 1 }
 0x836   : > { %v7524_v19 = vor.u32 %v7523_v9, %v7522_v11  ;;  %vm7528_vm1 = vcmp.lt.s32.totalorder %v7506_v14, 4  ;;  %vm7527_vm10 = vcmp.lt.s32.totalorder %v7506_v14, 3  ;;  %v7533_v29 = vsel %vm7525_vm9, %v7512_v36, %v7515_v6 }
 0x837   : > { %v7530_v43 = vsel %vm7528_vm1, %v7518_v16, 2102212464  ;;  %v7534_v41 = vsel %vm7528_vm1, %v7521_v8, 920167782  ;;  %v14906_v37 = vsub.s32 %v7345_v52, %v7348_v23  ;;  %vm7526_vm2 = vcmp.lt.s32.totalorder %v7506_v14, 2  ;;  %v6034_v52 = vpop.f32.mrf.mxu1 }
 0x838   : > { %v7535_v21 = vsel %vm7527_vm10, %v7518_v16, %v7534_v41  ;;  %v7537_v12 = vsel %vm7525_vm9, %v7515_v6, %v7518_v16  ;;  %v14908_v44 = vpop.eup %8790  ;;  %v7529_v13 = vsel %vm7525_vm9, %v7509_v5, %v7512_v36  ;;  %v7531_v28 = vsel %vm7527_vm10, %v7515_v6, %v7530_v43 }
 0x839   : > { %v7536_v57 = vsel %vm7526_vm2, %v7533_v29, %v7535_v21  ;;  %v7538_v59 = vsel %vm7528_vm1, %v7524_v19, 1326507024  ;;  %v7351_v61 = vsub.s32 0, %v14906_v37  ;;  %v14920_v16 = vsel %vm15810_vm5, %v7161_v46, %v14834_v49 }
 0x83a   : > { %v7539_v11 = vsel %vm7527_vm10, %v7521_v8, %v7538_v59  ;;  %v14913_v9 = vmul.u32.u64.low %v14884_v7, %v7536_v57  ;;  %v14914_v55 = vmul.u32.u64.high %v14884_v7, %v7536_v57, %v14913_v9  ;;  %v14922_v23 = vor.u32 4788187, %v7051_v42 }
 0x83b   : > { %v7540_v36 = vsel %vm7526_vm2, %v7537_v12, %v7539_v11  ;;  %v7393_v6 = vshrl.u32 %v7392_v1, 23  ;;  %v7255_v5 = vshrl.u32 %v7237_v38, %v7253_v22  ;;  %v8249_v19 = vmin.u32 %v7351_v61, %v14906_v37 }
 0x83c   : > { %v14927_v8 = vmul.u32.u64.low %v14884_v7, %v7540_v36  ;;  %v14928_v43 = vmul.u32.u64.high %v14884_v7, %v7540_v36, %v14927_v8  ;;  %v7259_v29 = vshll.u32 %v7258_v2, 23  ;;  %v7532_v41 = vsel %vm7526_vm2, %v7529_v13, %v7531_v28 }
 0x83d   : > { %v8252_v21 = vadd.s32 4294967169, %v7393_v6  ;;  %v14932_v57 = vadd.f32 %v6034_v52, %v14092_v53  ;;  %v7353_v46 = vclz %v8249_v19  ;;  %v7551_v42 = vadd.s32 1, %v14914_v55 }
 0x83e   : > { %v7397_v1 = vor.u32 8388608, %v7396_v45  ;;  %v7254_v22 = vshll.u32 %v14836_v47, %v14876_v35  ;;  %v7341_v28 = vadd.s32 %v14851_v60, %v14856_v32  ;;  %v7548_v53 = vmul.u32 %v14884_v7, %v7532_v41 }
 0x83f   : > { %v7399_v12 = vadd.s32 1, %v8252_v21  ;;  %v7600_v2 = vand.u32 2139095040, %v14932_v57  ;;  %v8250_v14 = vadd.s32 4294967294, %v7353_v46  ;;  %vm7550_vm9 = vc.u32 %v14928_v43, %v14913_v9 }
 0x840   : > { %v14945_v13 = vor.u32 %v7255_v5, %v7254_v22  ;;  %v14947_v45 = vor.u32 4788187, %v7259_v29  ;;  %v7552_v59 = vsel %vm7550_vm9, %v7551_v42, %v14914_v55  ;;  %v14950_v61 = vshll.u32 %v7397_v1, 8 }
 0x841   : > { %vm7400_vm1 = vcmp.gt.s32.totalorder %v7399_v12, 0  ;;  %vm8251_vm10 = vcmp.lt.s32.totalorder %v8250_v14, 0  ;;  %v7553_v47 = vadd.s32 %v7552_v59, %v7548_v53  ;;  %v15805_v32 = vand.u32 2147483647, %v14932_v57 }
 0x842   : > { %v7401_v35 = vsel %vm7400_vm1, %v7399_v12, 0  ;;  %v7356_v11 = vsel %vm8251_vm10, 0, %v8250_v14  ;;  %v7601_v7 = vshrl.u32 %v7600_v2, 23  ;;  %vm7287_vm9 = vcmp.lt.s32.totalorder %v14727_v4, 0 }
 0x843   : > { %v7403_v60 = vand.u32 31, %v7401_v35  ;;  %v7357_v52 = vsub.s32 32, %v7356_v11  ;;  %v7361_v36 = vsub.s32 4294967266, %v7356_v11  ;;  %v7554_v6 = vadd.s32 536870912, %v7553_v47 }
 0x844   : > { %v14953_v5 = vshrl.u32 %v7401_v35, 5  ;;  %v7358_v19 = vshll.u32 %v14906_v37, %v7356_v11  ;;  %vm6975_vm13 = vcmp.lt.s32.totalorder %v14548_v15, 0  ;;  %v6966_v50 = vxor.u32 2147483648, %v14908_v44 }
 0x845   : > { %v7404_v8 = vsub.s32 32, %v7403_v60  ;;  %v7406_v55 = vshll.u32 %v15841_v63, %v7403_v60  ;;  %v7409_v29 = vshll.u32 %v15851_v30, %v7403_v60  ;;  %v7359_v41 = vshrl.u32 %v7341_v28, %v7357_v52 }
 0x846   : > { %v7362_v21 = vadd.s32 127, %v7361_v36  ;;  %v14958_v46 = vshrl.u32 %v7554_v6, 30  ;;  %v7412_v42 = vshll.u32 %v15965_v51, %v7403_v60  ;;  %v7415_v2 = vshll.u32 %v15966_v34, %v7403_v60 }
 0x847   : > { %v7407_v1 = vshrl.u32 %v15851_v30, %v7404_v8  ;;  %v7410_v22 = vshrl.u32 %v15965_v51, %v7404_v8  ;;  %v7413_v12 = vshrl.u32 %v15966_v34, %v7404_v8  ;;  %v7360_v37 = vor.u32 %v7359_v41, %v7358_v19 }
 0x848   : > { %v7363_v14 = vshll.u32 %v7362_v21, 23  ;;  %v7556_v53 = vshll.u32 %v14958_v46, 30  ;;  %v7416_v59 = vshrl.u32 %v15852_v24, %v7404_v8  ;;  %v16390_v28 = vand.u32 2147483647, %v14469_v17 }
 0x849   : > { %v7405_v11 = vshrl.u32 %v15841_v63, %v7404_v8  ;;  %v7408_v52 = vor.u32 %v7407_v1, %v7406_v55  ;;  %v7411_v36 = vor.u32 %v7410_v22, %v7409_v29  ;;  %v14976_v6 = vand.u32 8388607, %v15805_v32 }
 0x84a   : > { %vm14969_vm2 = vcmp.le.f32.partialorder %v16390_v28, 0.7853982  ;;  %v7364_v19 = vor.u32 4788187, %v7363_v14  ;;  %v14979_v41 = vsub.s32 %v7553_v47, %v7556_v53  ;;  %v7414_v21 = vor.u32 %v7413_v12, %v7412_v42 }
 0x84b   : > { %v7417_v49 = vor.u32 %v7416_v59, %v7415_v2  ;;  %v7367_v38 = vcvt.s32.f32 %v7360_v37  ;;  %v7418_v28 = vshll.u32 %v15852_v24, %v7403_v60  ;;  %v7419_v20 = vshrl.u32 %v16339_v56, %v7404_v8 }
 0x84c   : > { %vm7421_vm1 = vcmp.lt.s32.totalorder %v14953_v5, 1  ;;  %v7365_v55 = vand.u32 2147483647, %v7364_v19  ;;  %v7559_v29 = vsub.s32 0, %v14979_v41  ;;  %vm7422_vm10 = vcmp.lt.s32.totalorder %v14953_v5, 2 }
 0x84d   : > { %vm7424_vm15 = vcmp.lt.s32.totalorder %v14953_v5, 4  ;;  %v16393_v1 = vand.u32 2147483647, %v14727_v4  ;;  %v7420_v42 = vor.u32 %v7419_v20, %v7418_v28  ;;  %vm7423_vm11 = vcmp.lt.s32.totalorder %v14953_v5, 3 }
 0x84e   : > { %v7429_v60 = vsel %vm7421_vm1, %v7408_v52, %v7411_v36  ;;  %v7430_v8 = vsel %vm7424_vm15, %v7417_v49, 920167782  ;;  %v7368_v22 = vmul.f32 %v7367_v38, %v7365_v55  ;;  %v8257_v12 = vmin.u32 %v7559_v29, %v14979_v41 }
 0x84f   : > { %vm14989_vm14 = vcmp.le.f32.partialorder %v16393_v1, 0.7853982  ;;  %v7426_v2 = vsel %vm7424_vm15, %v7414_v21, 2102212464  ;;  %v7431_v37 = vsel %vm7423_vm11, %v7414_v21, %v7430_v8  ;;  %v7433_v53 = vsel %vm7421_vm1, %v7411_v36, %v7414_v21 }
 0x850   : > { %v7432_v14 = vsel %vm7422_vm10, %v7429_v60, %v7431_v37  ;;  %v7434_v59 = vsel %vm7424_vm15, %v7420_v42, 1326507024  ;;  %v8260_v19 = vadd.s32 4294967169, %v7601_v7  ;;  %v7369_v20 = vxor.u32 2147483648, %v7368_v22 }
 0x851   : > { %v7561_v28 = vclz %v8257_v12  ;;  %v7425_v1 = vsel %vm7421_vm1, %v7405_v11, %v7408_v52  ;;  %v7435_v32 = vsel %vm7423_vm11, %v7417_v49, %v7434_v59  ;;  %v7427_v54 = vsel %vm7423_vm11, %v7411_v36, %v7426_v2 }
 0x852   : > { %v7436_v38 = vsel %vm7422_vm10, %v7433_v53, %v7435_v32  ;;  %v15006_v55 = vmul.u32.u64.low %v14950_v61, %v7432_v14  ;;  %v15007_v29 = vmul.u32.u64.high %v14950_v61, %v7432_v14, %v15006_v55  ;;  %v15014_v7 = vsel %vm14969_vm2, %v14469_v17, %v14920_v16 }
 0x853   : > { %v8258_v21 = vadd.s32 4294967294, %v7561_v28  ;;  %v15017_v42 = vmul.u32.u64.low %v14950_v61, %v7436_v38  ;;  %v15018_v11 = vmul.u32.u64.high %v14950_v61, %v7436_v38, %v15017_v42  ;;  %v16396_v49 = vand.u32 2147483647, %v14922_v23 }
 0x854   : > { %v16397_v32 = vcvt.s32.f32 %v14880_v39  ;;  %v7263_v36 = vcvt.s32.f32 %v14945_v13  ;;  %v7370_v60 = vsel %vm7287_vm9, %v7369_v20, %v7368_v22  ;;  %v7607_v8 = vadd.s32 1, %v8260_v19 }
 0x855   : > { %v7261_v16 = vand.u32 2147483647, %v14947_v45  ;;  %vm8259_vm11 = vcmp.lt.s32.totalorder %v8258_v21, 0  ;;  %v7428_v12 = vsel %vm7422_vm10, %v7425_v1, %v7427_v54  ;;  %v7371_v2 = vsub.s32 4, %v14897_v3 }
 0x856   : > { %v15024_v52 = vmul.f32 %v16397_v32, %v16396_v49  ;;  %v7564_v37 = vsel %vm8259_vm11, 0, %v8258_v21  ;;  %v7447_v23 = vadd.s32 1, %v15007_v29  ;;  %v7605_v39 = vor.u32 8388608, %v14976_v6 }
 0x857   : > { %vm7608_vm15 = vcmp.gt.s32.totalorder %v7607_v8, 0  ;;  %v7373_v14 = vsel %vm14989_vm14, %v14727_v4, %v7370_v60  ;;  %v7549_v22 = vadd.s32 %v14913_v9, %v14928_v43  ;;  %v7565_v53 = vsub.s32 32, %v7564_v37 }
 0x858   : > { %v7569_v59 = vsub.s32 4294967266, %v7564_v37  ;;  %v7566_v5 = vshll.u32 %v14979_v41, %v7564_v37  ;;  %v7444_v54 = vmul.u32 %v14950_v61, %v7428_v12  ;;  %vm7446_vm1 = vc.u32 %v15018_v11, %v15006_v55 }
 0x859   : > { %v7609_v19 = vsel %vm7608_vm15, %v7607_v8, 0  ;;  %v7567_v20 = vshrl.u32 %v7549_v22, %v7565_v53  ;;  %v7448_v28 = vsel %vm7446_vm1, %v7447_v23, %v15007_v29  ;;  %8792 = vcosq.f32 %v7373_v14 }
 0x85a   : > { %v7570_v6 = vadd.s32 127, %v7569_v59  ;;  %v15045_v1 = vshrl.u32 %v7609_v19, 5  ;;  %v7449_v38 = vadd.s32 %v7448_v28, %v7444_v54  ;;  %v7611_v21 = vand.u32 31, %v7609_v19 }
 0x85b   : > { %v15047_v9 = vshll.u32 %v7605_v39, 8  ;;  %8794 = vsinq.f32 %v7373_v14  ;;  %v7568_v43 = vor.u32 %v7567_v20, %v7566_v5  ;;  %v15052_v61 = vsel %vm7287_vm9, %v7371_v2, %v14897_v3 }
 0x85c   : > { %v7571_v41 = vshll.u32 %v7570_v6, 23  ;;  %vm7495_vm10 = vcmp.lt.s32.totalorder %v14730_v48, 0  ;;  %v7450_v42 = vadd.s32 536870912, %v7449_v38  ;;  %v7612_v49 = vsub.s32 32, %v7611_v21 }
 0x85d   : > { %v7614_v29 = vshll.u32 %v15841_v63, %v7611_v21  ;;  %vm7629_vm11 = vcmp.lt.s32.totalorder %v15045_v1, 1  ;;  %v7575_v60 = vcvt.s32.f32 %v7568_v43  ;;  %v7617_v8 = vshll.u32 %v15851_v30, %v7611_v21 }
 0x85e   : > { %v7572_v32 = vor.u32 4788187, %v7571_v41  ;;  %v7620_v12 = vshll.u32 %v15965_v51, %v7611_v21  ;;  %v15059_v37 = vshrl.u32 %v7450_v42, 30  ;;  %v7615_v23 = vshrl.u32 %v15851_v30, %v7612_v49 }
 0x85f   : > { %v7618_v3 = vshrl.u32 %v15965_v51, %v7612_v49  ;;  %v7623_v2 = vshll.u32 %v15966_v34, %v7611_v21  ;;  %v16398_v39 = vand.u32 2147483647, %v14730_v48  ;;  %v7621_v53 = vshrl.u32 %v15966_v34, %v7612_v49 }
 0x860   : > { %v7573_v22 = vand.u32 2147483647, %v7572_v32  ;;  %v7624_v59 = vshrl.u32 %v15852_v24, %v7612_v49  ;;  %v7626_v5 = vshll.u32 %v15852_v24, %v7611_v21  ;;  %v7452_v54 = vshll.u32 %v15059_v37, 30 }
 0x861   : > { %vm15066_vm9 = vcmp.le.f32.partialorder %v16398_v39, 0.7853982  ;;  %v7616_v30 = vor.u32 %v7615_v23, %v7614_v29  ;;  %v7619_v19 = vor.u32 %v7618_v3, %v7617_v8  ;;  %v7627_v51 = vshrl.u32 %v16339_v56, %v7612_v49 }
 0x862   : > { %v7576_v20 = vmul.f32 %v7575_v60, %v7573_v22  ;;  %v7622_v6 = vor.u32 %v7621_v53, %v7620_v12  ;;  %v7625_v28 = vor.u32 %v7624_v59, %v7623_v2  ;;  %vm7630_vm15 = vcmp.lt.s32.totalorder %v15045_v1, 2 }
 0x863   : > { %v15076_v43 = vsub.s32 %v7449_v38, %v7452_v54  ;;  %v7628_v41 = vor.u32 %v7627_v51, %v7626_v5  ;;  %vm7631_vm1 = vcmp.lt.s32.totalorder %v15045_v1, 3  ;;  %vm7632_vm4 = vcmp.lt.s32.totalorder %v15045_v1, 4 }
 0x864   : > { %v7577_v34 = vxor.u32 2147483648, %v7576_v20  ;;  %v7634_v24 = vsel %vm7632_vm4, %v7622_v6, 2102212464  ;;  %v7637_v21 = vsel %vm7629_vm11, %v7616_v30, %v7619_v19  ;;  %v7638_v42 = vsel %vm7632_vm4, %v7625_v28, 920167782 }
 0x865   : > { %v7455_v56 = vsub.s32 0, %v15076_v43  ;;  %v7613_v29 = vshrl.u32 %v15841_v63, %v7612_v49  ;;  %v7639_v32 = vsel %vm7631_vm1, %v7622_v6, %v7638_v42  ;;  %v7641_v38 = vsel %vm7629_vm11, %v7619_v19, %v7622_v6 }
 0x866   : > { %v7578_v60 = vsel %vm7495_vm10, %v7577_v34, %v7576_v20  ;;  %v7640_v8 = vsel %vm7630_vm15, %v7637_v21, %v7639_v32  ;;  %v7642_v12 = vsel %vm7632_vm4, %v7628_v41, 1326507024  ;;  %v7374_v23 = vsel %vm14989_vm14, 0, %v15052_v61  ;;  %v8793_v39 = vpop.eup %8792 }
 0x867   : > { %v8253_v63 = vmin.u32 %v7455_v56, %v15076_v43  ;;  %v7633_v49 = vsel %vm7629_vm11, %v7613_v29, %v7616_v30  ;;  %v7635_v3 = vsel %vm7631_vm1, %v7619_v19, %v7634_v24  ;;  %v7643_v2 = vsel %vm7631_vm1, %v7625_v28, %v7642_v12 }
 0x868   : > { %v7644_v22 = vsel %vm7630_vm15, %v7641_v38, %v7643_v2  ;;  %v15106_v47 = vmul.u32.u64.low %v15047_v9, %v7640_v8  ;;  %v15107_v61 = vmul.u32.u64.high %v15047_v9, %v7640_v8, %v15106_v47  ;;  %v7579_v53 = vsub.s32 4, %v14958_v46  ;;  %v8795_v59 = vpop.eup %8794 }
 0x869   : > { %v7581_v5 = vsel %vm15066_vm9, %v14730_v48, %v7578_v60  ;;  %v7457_v54 = vclz %v8253_v63  ;;  %v15115_v30 = vmul.u32.u64.low %v15047_v9, %v7644_v22  ;;  %v15116_v19 = vmul.u32.u64.high %v15047_v9, %v7644_v22, %v15115_v30 }
 0x86a   : > { %8796 = vcosq.f32 %v15014_v7  ;;  %vm7183_vm14 = vcmp.lt.s32.totalorder %v14584_v33, 0  ;;  %v7264_v51 = vmul.f32 %v7263_v36, %v7261_v16  ;;  %v7636_v20 = vsel %vm7630_vm15, %v7633_v49, %v7635_v3 }
 0x86b   : > { %8798 = vsinq.f32 %v15014_v7  ;;  %v7057_v6 = vxor.u32 2147483648, %v15024_v52  ;;  %v8254_v28 = vadd.s32 4294967294, %v7457_v54  ;;  %v7378_v41 = vadd.s32 3, %v7374_v23 }
 0x86c   : > { %8800 = vcosq.f32 %v7581_v5  ;;  %v7655_v34 = vadd.s32 1, %v15107_v61  ;;  %v7475_v24 = vsub.s32 4, %v15059_v37  ;;  %v7580_v45 = vsel %vm7495_vm10, %v7579_v53, %v14958_v46 }
 0x86d   : > { %8802 = vsinq.f32 %v7581_v5  ;;  %vm8255_vm4 = vcmp.lt.s32.totalorder %v8254_v28, 0  ;;  %v7652_v13 = vmul.u32 %v15047_v9, %v7636_v20  ;;  %vm7654_vm11 = vc.u32 %v15116_v19, %v15106_v47 }
 0x86e   : > { %v7265_v7 = vxor.u32 2147483648, %v7264_v51  ;;  %vm7391_vm15 = vcmp.lt.s32.totalorder %v14812_v27, 0  ;;  %v7460_v36 = vsel %vm8255_vm4, 0, %v8254_v28  ;;  %v7656_v16 = vsel %vm7654_vm11, %v7655_v34, %v15107_v61 }
 0x86f   : > { %v7445_v1 = vadd.s32 %v15006_v55, %v15018_v11  ;;  %v7461_v21 = vsub.s32 32, %v7460_v36  ;;  %v7465_v42 = vsub.s32 4294967266, %v7460_v36  ;;  %v7657_v56 = vadd.s32 %v7656_v16, %v7652_v13 }
 0x870   : > { %v7058_v46 = vsel %vm6975_vm13, %v7057_v6, %v15024_v52  ;;  %v7476_v9 = vsel %vm7391_vm15, %v7475_v24, %v15059_v37  ;;  %v7379_v29 = vand.u32 3, %v7378_v41  ;;  %v7582_v32 = vsel %vm15066_vm9, 0, %v7580_v45 }
 0x871   : > { %v7462_v38 = vshll.u32 %v15076_v43, %v7460_v36  ;;  %v7463_v60 = vshrl.u32 %v7445_v1, %v7461_v21  ;;  %v7466_v8 = vadd.s32 127, %v7465_v42  ;;  %v7658_v55 = vadd.s32 536870912, %v7657_v56 }
 0x872   : > { %v7266_v11 = vsel %vm7183_vm14, %v7265_v7, %v7264_v51  ;;  %v16401_v12 = vand.u32 2147483647, %v14812_v27  ;;  %v7382_v23 = vxor.u32 2147483648, %v8795_v59  ;;  %v7385_v37 = vxor.u32 2147483648, %v8793_v39 }
 0x873   : > { %v7464_v63 = vor.u32 %v7463_v60, %v7462_v38  ;;  %v7467_v49 = vshll.u32 %v7466_v8, 23  ;;  %v7659_v14 = vshrl.u32 %v7658_v55, 30  ;;  %v16404_v3 = vand.u32 2147483647, %v14548_v15 }
 0x874   : > { %vm15153_vm10 = vcmp.le.f32.partialorder %v16401_v12, 0.7853982  ;;  %v7586_v22 = vadd.s32 3, %v7582_v32  ;;  %v7059_v61 = vsub.s32 4, %v14746_v25  ;;  %vm7381_vm1 = vcmp.eq.s32.totalorder %v7379_v29, 0 }
 0x875   : > { %vm15159_vm9 = vcmp.le.f32.partialorder %v16404_v3, 0.7853982  ;;  %v7478_v2 = vsel %vm15153_vm10, 0, %v7476_v9  ;;  %v7468_v5 = vor.u32 4788187, %v7467_v49  ;;  %v7660_v54 = vshll.u32 %v7659_v14, 30 }
 0x876   : > { %v7061_v53 = vsel %vm15159_vm9, %v14548_v15, %v7058_v46  ;;  %vm7384_vm4 = vcmp.eq.s32.totalorder %v7379_v29, 2  ;;  %vm7380_vm11 = vcmp.lt.s32.totalorder %v7379_v29, 2  ;;  %v7383_v30 = vsel %vm7381_vm1, %v8793_v39, %v7382_v23 }
 0x877   : > { %v7386_v51 = vsel %vm7384_vm4, %v7385_v37, %v8795_v59  ;;  %8804 = vcosq.f32 %v7061_v53  ;;  %v15169_v20 = vpop.eup %8796  ;;  %v7469_v6 = vand.u32 2147483647, %v7468_v5  ;;  %v7471_v28 = vcvt.s32.f32 %v7464_v63 }
 0x878   : > { %v15171_v41 = vsub.s32 %v7657_v56, %v7660_v54  ;;  %v7482_v34 = vadd.s32 3, %v7478_v2  ;;  %v15173_v24 = vpop.eup %8798  ;;  %v7683_v45 = vsub.s32 4, %v7659_v14  ;;  %v7587_v13 = vand.u32 3, %v7586_v22 }
 0x879   : > { %v7060_v7 = vsel %vm6975_vm13, %v7059_v61, %v14746_v25  ;;  %8806 = vsinq.f32 %v7061_v53  ;;  %v8801_v36 = vpop.eup %8800  ;;  %v7472_v39 = vmul.f32 %v7471_v28, %v7469_v6  ;;  %vm15811_vm1 = vcmp.lt.s32.totalorder %v14932_v57, 0 }
 0x87a   : > { %v7663_v59 = vsub.s32 0, %v15171_v41  ;;  %v7387_v16 = vsel %vm7380_vm11, %v7383_v30, %v7386_v51  ;;  %v8803_v1 = vpop.eup %8802  ;;  %v7653_v21 = vadd.s32 %v15106_v47, %v15116_v19  ;;  %v16407_v42 = vand.u32 2147483647, %v14932_v57 }
 0x87b   : > { %vm7377_vm13 = vweird.f32 %v14727_v4  ;;  %v7267_v25 = vsub.s32 4, %v14817_v31  ;;  %v7473_v46 = vxor.u32 2147483648, %v7472_v39  ;;  %v15192_v32 = vand.u32 3, %v7482_v34 }
 0x87c   : > { %vm15185_vm4 = vcmp.le.f32.partialorder %v16407_v42, 0.7853982  ;;  %v8261_v9 = vmin.u32 %v7663_v59, %v15171_v41  ;;  %v7062_v29 = vsel %vm15159_vm9, 0, %v7060_v7  ;;  %v7684_v47 = vsel %vm15811_vm1, %v7683_v45, %v7659_v14 }
 0x87d   : > { %v15198_v19 = vsel %vm7377_vm13, nan, %v7387_v16  ;;  %vm7588_vm11 = vcmp.lt.s32.totalorder %v7587_v13, 2  ;;  %v7593_v38 = vxor.u32 2147483648, %v8801_v36  ;;  %v7474_v4 = vsel %vm7391_vm15, %v7473_v46, %v7472_v39 }
 0x87e   : > { %v7665_v60 = vclz %v8261_v9  ;;  %v7590_v8 = vxor.u32 2147483648, %v8803_v1  ;;  %v16410_v55 = vand.u32 2147483647, %v14584_v33  ;;  %v7477_v23 = vsel %vm15153_vm10, %v14812_v27, %v7474_v4 }
 0x87f   : > { %v7066_v37 = vadd.s32 3, %v7062_v29  ;;  %v7268_v63 = vsel %vm7183_vm14, %v7267_v25, %v14817_v31  ;;  %8808 = vcosq.f32 %v7477_v23  ;;  %vm7589_vm15 = vcmp.eq.s32.totalorder %v7587_v13, 0 }
 0x880   : > { %vm15204_vm5 = vcmp.le.f32.partialorder %v16410_v55, 0.7853982  ;;  %v8262_v14 = vadd.s32 4294967294, %v7665_v60  ;;  %vm7592_vm9 = vcmp.eq.s32.totalorder %v7587_v13, 2  ;;  %8810 = vsinq.f32 %v7477_v23 }
 0x881   : > { %v7269_v49 = vsel %vm15204_vm5, %v14584_v33, %v7266_v11  ;;  %v7686_v3 = vsel %vm15185_vm4, 0, %v7684_v47  ;;  %v7594_v43 = vsel %vm7592_vm9, %v7593_v38, %v8803_v1  ;;  %v6955_v52 = vsub.s32 4, %v14600_v10 }
 0x882   : > { %vm8263_vm10 = vcmp.lt.s32.totalorder %v8262_v14, 0  ;;  %v7591_v2 = vsel %vm7589_vm15, %v8801_v36, %v7590_v8  ;;  %v7270_v31 = vsel %vm15204_vm5, 0, %v7268_v63  ;;  %8812 = vcosq.f32 %v7269_v49 }
 0x883   : > { %v7668_v22 = vsel %vm8263_vm10, 0, %v8262_v14  ;;  %v7067_v61 = vand.u32 3, %v7066_v37  ;;  %8814 = vsinq.f32 %v7269_v49  ;;  %v6956_v11 = vsel %vm6871_vm8, %v6955_v52, %v14600_v10 }
 0x884   : > { %v8805_v53 = vpop.eup %8804  ;;  %v7669_v5 = vsub.s32 32, %v7668_v22  ;;  %v7673_v54 = vsub.s32 4294967266, %v7668_v22  ;;  %v15225_v30 = vadd.s32 3, %v7686_v3  ;;  %v6958_v51 = vsel %vm14754_vm7, 0, %v6956_v11 }
 0x885   : > { %v7670_v6 = vshll.u32 %v15171_v41, %v7668_v22  ;;  %v15231_v28 = vsel %vm7588_vm11, %v7591_v2, %v7594_v43  ;;  %v7073_v34 = vxor.u32 2147483648, %v8805_v53  ;;  %v7274_v45 = vadd.s32 3, %v7270_v31 }
 0x886   : > { %v8807_v7 = vpop.eup %8806  ;;  %v7671_v36 = vshrl.u32 %v7653_v21, %v7669_v5  ;;  %v7674_v39 = vadd.s32 127, %v7673_v54  ;;  %v6962_v59 = vadd.s32 3, %v6958_v51  ;;  %v7163_v10 = vsub.s32 4, %v14658_v40 }
 0x887   : > { %vm7488_vm8 = vcmp.eq.s32.totalorder %v15192_v32, 2  ;;  %vm7068_vm5 = vcmp.lt.s32.totalorder %v7067_v61, 2  ;;  %v7070_v16 = vxor.u32 2147483648, %v8807_v7  ;;  %v6969_v1 = vxor.u32 2147483648, %v14848_v26 }
 0x888   : > { %v7672_v41 = vor.u32 %v7671_v36, %v7670_v6  ;;  %v7675_v13 = vshll.u32 %v7674_v39, 23  ;;  %v6963_v42 = vand.u32 3, %v6962_v59  ;;  %vm16413_vm13 = vcmp.lt.s32.totalorder %v14469_v17, 0  ;;  %v16421_v39 = vld [vmem:[#allocation93_spill] sm:$0xff] }
 0x889   : > { %v7164_v21 = vsel %vm16413_vm13, %v7163_v10, %v14658_v40  ;;  %vm7484_vm11 = vcmp.lt.s32.totalorder %v15192_v32, 2  ;;  %vm7069_vm15 = vcmp.eq.s32.totalorder %v7067_v61, 0  ;;  %vm7072_vm9 = vcmp.eq.s32.totalorder %v7067_v61, 2  ;;  %v16425_v10 = vld [vmem:[#allocation67_spill] sm:$0xff] }
 0x88a   : > { %v15243_v25 = vand.u32 3, %v7274_v45  ;;  %v7166_v46 = vsel %vm14969_vm2, 0, %v7164_v21  ;;  %v7676_v9 = vor.u32 4788187, %v7675_v13  ;;  %vm7481_vm10 = vweird.f32 %v14812_v27 }
 0x88b   : > { %v7071_v29 = vsel %vm7069_vm15, %v8805_v53, %v7070_v16  ;;  %v7074_v47 = vsel %vm7072_vm9, %v7073_v34, %v8807_v7  ;;  %vm6961_vm1 = vweird.f32 %v14355_v58  ;;  %v7679_v38 = vcvt.s32.f32 %v7672_v41 }
 0x88c   : > { %vm6965_vm14 = vcmp.eq.s32.totalorder %v6963_v42, 0  ;;  %vm6968_vm7 = vcmp.eq.s32.totalorder %v6963_v42, 2  ;;  %v7170_v40 = vadd.s32 3, %v7166_v46  ;;  %v7677_v4 = vand.u32 2147483647, %v7676_v9  ;;  %v8809_v35 = vpop.eup %8808 }
 0x88d   : > { %v6967_v60 = vsel %vm6965_vm14, %v14848_v26, %v6966_v50  ;;  %v6970_v8 = vsel %vm6968_vm7, %v6969_v1, %v14908_v44  ;;  %v6643_v55 = vsub.s32 4, %v14390_v62  ;;  %vm7277_vm2 = vcmp.eq.s32.totalorder %v15243_v25, 0  ;;  %v8811_v23 = vpop.eup %8810 }
 0x88e   : > { %vm7280_vm13 = vcmp.eq.s32.totalorder %v15243_v25, 2  ;;  %vm6964_vm15 = vcmp.lt.s32.totalorder %v6963_v42, 2  ;;  %v7174_v12 = vxor.u32 2147483648, %v15173_v24  ;;  %v7680_v37 = vmul.f32 %v7679_v38, %v7677_v4 }
 0x88f   : > { %v7489_v63 = vxor.u32 2147483648, %v8809_v35  ;;  %v7075_v49 = vsel %vm7068_vm5, %v7071_v29, %v7074_v47  ;;  %v6971_v14 = vsel %vm6964_vm15, %v6967_v60, %v6970_v8  ;;  %v8813_v3 = vpop.eup %8812  ;;  %v7486_v26 = vxor.u32 2147483648, %v8811_v23  ;;  %v16429_v29 = vld [vmem:[#allocation66_spill] sm:$0xff] }
 0x890   : > { %vm7585_vm7 = vweird.f32 %v14730_v48  ;;  %v7171_v44 = vand.u32 3, %v7170_v40  ;;  %v7177_v43 = vxor.u32 2147483648, %v15169_v20  ;;  %vm16414_vm14 = vcmp.lt.s32.totalorder %v14183_v0, 0  ;;  %v8815_v2 = vpop.eup %8814  ;;  %v16433_v60 = vld [vmem:[#allocation70_spill] sm:$0xff] }
 0x891   : > { %v6644_v52 = vsel %vm16414_vm14, %v6643_v55, %v14390_v62  ;;  %v7681_v31 = vxor.u32 2147483648, %v7680_v37  ;;  %v7490_v22 = vsel %vm7488_vm8, %v7489_v63, %v8811_v23  ;;  %v7281_v11 = vxor.u32 2147483648, %v8813_v3  ;;  %v16434_v55 = vld [vmem:[#allocation80_spill] sm:$0xff] }
 0x892   : > { %v16415_v61 = vand.u32 2147483647, %v14183_v0  ;;  %vm16418_vm9 = vcmp.eq.s32.totalorder %v15192_v32, 0  ;;  %vm16419_vm15 = vweird.f32 %v14548_v15  ;;  %v6972_v62 = vsel %vm6961_vm1, nan, %v6971_v14  ;;  %v16438_v14 = vld [vmem:[#allocation73_spill] sm:$0xff] }
 0x893   : > { %v7487_v5 = vsel %vm16418_vm9, %v8809_v35, %v7486_v26  ;;  %v7076_v54 = vsel %vm16419_vm15, nan, %v7075_v49  ;;  %vm16420_vm8 = vcmp.lt.s32.totalorder %v14932_v57, 0  ;;  %v7278_v45 = vxor.u32 2147483648, %v8815_v2 }
 0x894   : > { %vm15265_vm5 = vcmp.le.f32.partialorder %v16415_v61, 0.7853982  ;;  %v7682_v6 = vsel %vm16420_vm8, %v7681_v31, %v7680_v37  ;;  %v7491_v34 = vsel %vm7484_vm11, %v7487_v5, %v7490_v22  ;;  %vm7173_vm1 = vcmp.eq.s32.totalorder %v7171_v44, 0  ;;  %v16437_v37 = vld [vmem:[#allocation75_spill] sm:$0xff] }
 0x895   : > { %v6645_v51 = vsel %vm15265_vm5, %v14183_v0, %v14808_v18  ;;  %v6646_v7 = vsel %vm15265_vm5, 0, %v6644_v52  ;;  %v7492_v15 = vsel %vm7481_vm10, nan, %v7491_v34  ;;  %v7685_v58 = vsel %vm15185_vm4, %v14932_v57, %v7682_v6  ;;  %v16444_v31 = vld [vmem:[#allocation91_spill] sm:$0xff]  ;;  %v16446_v34 = vld [vmem:[#allocation86_spill] sm:$0xff] }
 0x896   : > { %vm7176_vm14 = vcmp.eq.s32.totalorder %v7171_v44, 2  ;;  %7739 = vmatprep.subr.mxu0 %v7492_v15  ;;  %8816 = vcosq.f32 %v7685_v58  ;;  %v7282_v18 = vsel %vm7280_vm13, %v7281_v11, %v8815_v2  ;;  %v7175_v32 = vsel %vm7173_vm1, %v15169_v20, %v7174_v12  ;;  %v16426_v20 = vld [vmem:[#allocation62_spill] sm:$0xff] }
 0x897   : > { %v7178_v36 = vsel %vm7176_vm14, %v7177_v43, %v15173_v24  ;;  %8818 = vsinq.f32 %v7685_v58  ;;  %7740 = vmatpush1.msra.mxu0 %v15198_v19  ;;  %v6650_v27 = vadd.s32 3, %v6646_v7  ;;  %v16422_v59 = vand.u32 2147483647, %v16421_v39  ;;  %v16427_v19 = vld [vmem:[#allocation94_spill] sm:$0xff] }
 0x898   : > { %v6851_v16 = vsub.s32 4, %v16425_v10  ;;  %7741 = vmatprep.subr.mxu0 %v7076_v54  ;;  %v7279_v50 = vsel %vm7277_vm2, %v8813_v3, %v7278_v45  ;;  %8820 = vcosq.f32 %v6645_v51  ;;  %v6539_v1 = vsub.s32 4, %v16427_v19  ;;  %v16435_v12 = vld [vmem:[#allocation74_spill] sm:$0xff] }
 0x899   : > { %vm15297_vm11 = vcmp.le.f32.partialorder %v16422_v59, 0.7853982  ;;  %v15310_v41 = vand.u32 3, %v15225_v30  ;;  %7742 = vmatpush1.msra.mxu0 %v6972_v62  ;;  %vm7172_vm4 = vcmp.lt.s32.totalorder %v7171_v44, 2  ;;  %8822 = vsinq.f32 %v6645_v51  ;;  %v16445_v51 = vld [vmem:[#allocation85_spill] sm:$0xff] }
 0x89a   : > { %v6853_v24 = vsel %vm15297_vm11, %v16421_v39, %v16426_v20  ;;  %vm16428_vm10 = vcmp.lt.s32.totalorder %v16421_v39, 0  ;;  %v15318_v42 = vsel %vm7585_vm7, nan, %v15231_v28  ;;  %vm7276_vm2 = vcmp.lt.s32.totalorder %v15243_v25, 2  ;;  %v16432_v28 = vld [vmem:[#allocation45_spill] sm:$0xff]  ;;  %v16451_v20 = vld [vmem:[#allocation87_spill] sm:$0xff] }
 0x89b   : > { %v6852_v13 = vsel %vm16428_vm10, %v6851_v16, %v16425_v10  ;;  %v7179_v21 = vsel %vm7172_vm4, %v7175_v32, %v7178_v36  ;;  %v7283_v30 = vsel %vm7276_vm2, %v7279_v50, %v7282_v18  ;;  %v15323_v9 = vand.u32 3, %v6650_v27  ;;  %v16447_v27 = vld [vmem:[#allocation35_spill] sm:$0xff] }
 0x89c   : > { %v6854_v46 = vsel %vm15297_vm11, 0, %v6852_v13  ;;  %8824 = vcosq.f32 %v6853_v24  ;;  %vm16430_vm13 = vcmp.lt.s32.totalorder %v16429_v29, 0  ;;  %v6747_v4 = vsub.s32 4, %v16432_v28 }
 0x89d   : > { %v6540_v47 = vsel %vm16430_vm13, %v6539_v1, %v16427_v19  ;;  %8826 = vsinq.f32 %v6853_v24  ;;  %v6858_v38 = vadd.s32 3, %v6854_v46  ;;  %vm7696_vm7 = vcmp.eq.s32.totalorder %v15310_v41, 2  ;;  %v16452_v19 = vld [vmem:[#allocation59_spill] sm:$0xff] }
 0x89e   : > { %v6542_v48 = vsel %vm14419_vm3, 0, %v6540_v47  ;;  %vm7273_vm5 = vweird.f32 %v14584_v33  ;;  %vm7169_vm9 = vweird.f32 %v14469_v17  ;;  %vm7693_vm15 = vcmp.eq.s32.totalorder %v15310_v41, 0 }
 0x89f   : > { %v6546_v25 = vadd.s32 3, %v6542_v48  ;;  %v6550_v8 = vxor.u32 2147483648, %v16433_v60  ;;  %v6553_v35 = vxor.u32 2147483648, %v16434_v55  ;;  %vm16436_vm8 = vcmp.lt.s32.totalorder %v16435_v12, 0 }
 0x8a0   : > { %v6748_v23 = vsel %vm16436_vm8, %v6747_v4, %v16432_v28  ;;  %v6227_v63 = vsub.s32 4, %v16437_v37  ;;  %vm7692_vm3 = vcmp.lt.s32.totalorder %v15310_v41, 2  ;;  %v15342_v49 = vsel %vm7273_vm5, nan, %v7283_v30 }
 0x8a1   : > { %v15344_v33 = vsel %vm7169_vm9, nan, %v7179_v21  ;;  %v6547_v17 = vand.u32 3, %v6546_v25  ;;  %v16439_v3 = vand.u32 2147483647, %v16438_v14  ;;  %vm7689_vm14 = vweird.f32 %v14932_v57 }
 0x8a2   : > { %vm6653_vm11 = vcmp.eq.s32.totalorder %v15323_v9, 0  ;;  %v15354_v44 = vand.u32 3, %v6858_v38  ;;  %v6750_v52 = vsel %vm14570_vm12, 0, %v6748_v23  ;;  %vm16443_vm4 = vcmp.lt.s32.totalorder %v16438_v14, 0 }
 0x8a3   : > { %vm15348_vm1 = vcmp.le.f32.partialorder %v16439_v3, 0.7853982  ;;  %v6228_v2 = vsel %vm16443_vm4, %v6227_v63, %v16437_v37  ;;  %vm6652_vm10 = vcmp.lt.s32.totalorder %v15323_v9, 2  ;;  %vm6656_vm2 = vcmp.eq.s32.totalorder %v15323_v9, 2  ;;  %v8817_v54 = vpop.eup %8816 }
 0x8a4   : > { %v6229_v22 = vsel %vm15348_vm1, %v16438_v14, %v16444_v31  ;;  %vm6545_vm13 = vweird.f32 %v16429_v29  ;;  %vm6549_vm5 = vcmp.eq.s32.totalorder %v6547_v17, 0  ;;  %vm6552_vm9 = vcmp.eq.s32.totalorder %v6547_v17, 2  ;;  %v8819_v7 = vpop.eup %8818 }
 0x8a5   : > { %v6754_v11 = vadd.s32 3, %v6750_v52  ;;  %vm6649_vm12 = vweird.f32 %v14183_v0  ;;  %v6551_v61 = vsel %vm6549_vm5, %v16434_v55, %v6550_v8  ;;  %v6554_v53 = vsel %vm6552_vm9, %v6553_v35, %v16433_v60  ;;  %v8821_v58 = vpop.eup %8820 }
 0x8a6   : > { %v6230_v5 = vsel %vm15348_vm1, 0, %v6228_v2  ;;  %8828 = vcosq.f32 %v6229_v22  ;;  %v6758_v6 = vxor.u32 2147483648, %v16445_v51  ;;  %v6761_v45 = vxor.u32 2147483648, %v16446_v34  ;;  %v8823_v10 = vpop.eup %8822 }
 0x8a7   : > { %v6755_v62 = vand.u32 3, %v6754_v11  ;;  %8830 = vsinq.f32 %v6229_v22  ;;  %v7697_v15 = vxor.u32 2147483648, %v8817_v54  ;;  %vm6860_vm8 = vcmp.lt.s32.totalorder %v15354_v44, 2  ;;  %v16459_v22 = vld [vmem:[#allocation84_spill] sm:$0xff] }
 0x8a8   : > { %vm6861_vm4 = vcmp.eq.s32.totalorder %v15354_v44, 0  ;;  %vm6548_vm5 = vcmp.lt.s32.totalorder %v6547_v17, 2  ;;  %v7694_v18 = vxor.u32 2147483648, %v8819_v7  ;;  %v6234_v36 = vadd.s32 3, %v6230_v5 }
 0x8a9   : > { %v6555_v32 = vsel %vm6548_vm5, %v6551_v61, %v6554_v53  ;;  %v16448_v59 = vand.u32 2147483647, %v16447_v27  ;;  %v7698_v16 = vsel %vm7696_vm7, %v7697_v15, %v8819_v7  ;;  %v6657_v50 = vxor.u32 2147483648, %v8821_v58  ;;  %v8825_v46 = vpop.eup %8824 }
 0x8aa   : > { %v6435_v24 = vsub.s32 4, %v16451_v20  ;;  %v7695_v13 = vsel %vm7693_vm15, %v8817_v54, %v7694_v18  ;;  %v6654_v21 = vxor.u32 2147483648, %v8823_v10  ;;  %vm6757_vm9 = vcmp.eq.s32.totalorder %v6755_v62, 0  ;;  %v8827_v48 = vpop.eup %8826 }
 0x8ab   : > { %vm15379_vm1 = vcmp.le.f32.partialorder %v16448_v59, 0.7853982  ;;  %vm6760_vm5 = vcmp.eq.s32.totalorder %v6755_v62, 2  ;;  %v7699_v30 = vsel %vm7692_vm3, %v7695_v13, %v7698_v16  ;;  %v6658_v47 = vsel %vm6656_vm2, %v6657_v50, %v8823_v10  ;;  %v16464_v59 = vld [vmem:[#allocation79_spill] sm:$0xff]  ;;  %v16465_v10 = vld [vmem:[#allocation81_spill] sm:$0xff] }
 0x8ac   : > { %v6437_v1 = vsel %vm15379_vm1, %v16447_v27, %v16452_v19  ;;  %v6759_v38 = vsel %vm6757_vm9, %v16446_v34, %v6758_v6  ;;  %v6762_v40 = vsel %vm6760_vm5, %v6761_v45, %v16445_v51  ;;  %v7700_v28 = vsel %vm7689_vm14, nan, %v7699_v30  ;;  %v16462_v6 = vld [vmem:[#allocation68_spill] sm:$0xff]  ;;  %v16463_v45 = vld [vmem:[#allocation69_spill] sm:$0xff] }
 0x8ad   : > { %v6655_v4 = vsel %vm6653_vm11, %v8821_v58, %v6654_v21  ;;  %vm6864_vm7 = vcmp.eq.s32.totalorder %v15354_v44, 2  ;;  %v6865_v25 = vxor.u32 2147483648, %v8825_v46  ;;  %7810 = vmatprep.subr.mxu1 %v7700_v28  ;;  %v6862_v60 = vxor.u32 2147483648, %v8827_v48 }
 0x8ae   : > { %v6659_v41 = vsel %vm6652_vm10, %v6655_v4, %v6658_v47  ;;  %v6556_v8 = vsel %vm6545_vm13, nan, %v6555_v32  ;;  %vm6756_vm15 = vcmp.lt.s32.totalorder %v6755_v62, 2  ;;  %7811 = vmatpush1.msra.mxu1 %v15318_v42  ;;  %8832 = vcosq.f32 %v6437_v1  ;;  %v16454_v42 = vld [vmem:[#allocation92_spill] sm:$0xff] }
 0x8af   : > { %v6660_v57 = vsel %vm6649_vm12, nan, %v6659_v41  ;;  %v6866_v55 = vsel %vm6864_vm7, %v6865_v25, %v8827_v48  ;;  %v6763_v35 = vsel %vm6756_vm15, %v6759_v38, %v6762_v40  ;;  %7812 = vmatprep.subr.mxu1 %v15342_v49  ;;  %v6863_v9 = vsel %vm6861_vm4, %v8825_v46, %v6862_v60  ;;  %v16455_v49 = vld [vmem:[#allocation12_spill] sm:$0xff] }
 0x8b0   : > { %7743 = vmatprep.subr.mxu0 %v6660_v57  ;;  %v6235_v23 = vand.u32 3, %v6234_v36  ;;  %vm16453_vm3 = vcmp.lt.s32.totalorder %v16447_v27, 0  ;;  %8834 = vsinq.f32 %v6437_v1  ;;  %7813 = vmatpush1.msra.mxu1 %v15344_v33  ;;  %vm6857_vm14 = vweird.f32 %v16421_v39  ;;  %v16456_v33 = vld [vmem:[#allocation82_spill] sm:$0xff]  ;;  %v7701_v1 = vld [vmem:[%s15493_s6] sm:$0x1] }
 0x8b1   : > { %v6436_v29 = vsel %vm16453_vm3, %v6435_v24, %v16451_v20  ;;  %v6867_v0 = vsel %vm6860_vm8, %v6863_v9, %v6866_v55  ;;  %7744 = vmatpush1.msra.mxu0 %v6556_v8  ;;  %v6123_v37 = vsub.s32 4, %v16454_v42  ;;  %vm6753_vm11 = vweird.f32 %v16435_v12  ;;  %v7706_v55 = vpop.permute.xlu0 %7705 }
 0x8b2   : > { %v6868_v63 = vsel %vm6857_vm14, nan, %v6867_v0  ;;  %v6331_v17 = vsub.s32 4, %v16455_v49  ;;  %v6764_v26 = vsel %vm6753_vm11, nan, %v6763_v35  ;;  %v6438_v43 = vsel %vm15379_vm1, 0, %v6436_v29 }
 0x8b3   : > { %v8829_v3 = vpop.eup %8828  ;;  %7814 = vmatprep.subr.mxu1 %v6868_v63  ;;  %vm16457_vm10 = vcmp.lt.s32.totalorder %v16456_v33, 0  ;;  %vm6236_vm2 = vcmp.lt.s32.totalorder %v6235_v23, 2  ;;  %vm6237_vm13 = vcmp.eq.s32.totalorder %v6235_v23, 0  ;;  %vm6240_vm12 = vcmp.eq.s32.totalorder %v6235_v23, 2 }
 0x8b4   : > { %v6124_v39 = vsel %vm16457_vm10, %v6123_v37, %v16454_v42  ;;  %v8831_v44 = vpop.eup %8830  ;;  %7815 = vmatpush1.msra.mxu1 %v6764_v26  ;;  %v6241_v52 = vxor.u32 2147483648, %v8829_v3  ;;  %vm16460_vm8 = vcmp.lt.s32.totalorder %v16459_v22, 0  ;;  %v6442_v53 = vadd.s32 3, %v6438_v43 }
 0x8b5   : > { %v6238_v2 = vxor.u32 2147483648, %v8831_v44  ;;  %v6126_v31 = vsel %vm14223_vm0, 0, %v6124_v39  ;;  %v6332_v11 = vsel %vm16460_vm8, %v6331_v17, %v16455_v49  ;;  %v6134_v34 = vxor.u32 2147483648, %v16462_v6 }
 0x8b6   : > { %v6242_v61 = vsel %vm6240_vm12, %v6241_v52, %v8831_v44  ;;  %v6130_v5 = vadd.s32 3, %v6126_v31  ;;  %v6334_v62 = vsel %vm14406_vm6, 0, %v6332_v11  ;;  %v6137_v7 = vxor.u32 2147483648, %v16463_v45 }
 0x8b7   : > { %v6239_v51 = vsel %vm6237_vm13, %v8829_v3, %v6238_v2  ;;  %v6338_v15 = vadd.s32 3, %v6334_v62  ;;  %vm6233_vm4 = vweird.f32 %v16438_v14  ;;  %v6342_v56 = vxor.u32 2147483648, %v16464_v59 }
 0x8b8   : > { %v6243_v58 = vsel %vm6236_vm2, %v6239_v51, %v6242_v61  ;;  %v6131_v18 = vand.u32 3, %v6130_v5  ;;  %v6345_v16 = vxor.u32 2147483648, %v16465_v10  ;;  %v6443_v50 = vand.u32 3, %v6442_v53 }
 0x8b9   : > { %v6244_v32 = vsel %vm6233_vm4, nan, %v6243_v58  ;;  %v6339_v36 = vand.u32 3, %v6338_v15  ;;  %vm6129_vm9 = vweird.f32 %v16456_v33  ;;  %vm16466_vm11 = vcmask 261120  }
 0x8ba   : > { %7745 = vmatprep.subr.mxu0 %v6244_v32  ;;  %vm6133_vm0 = vcmp.eq.s32.totalorder %v6131_v18, 0  ;;  %vm6136_vm6 = vcmp.eq.s32.totalorder %v6131_v18, 2  ;;  %vm6132_vm1 = vcmp.lt.s32.totalorder %v6131_v18, 2  ;;  %vm6448_vm15 = vcmp.eq.s32.totalorder %v6443_v50, 2  ;;  %vm16467_vm12 = vmmov %vm16466_vm11 }
 0x8bb   : > { %v6135_v20 = vsel %vm6133_vm0, %v16463_v45, %v6134_v34  ;;  %v6138_v24 = vsel %vm6136_vm6, %v6137_v7, %v16462_v6  ;;  %v8833_v19 = vpop.eup %8832  ;;  %vm6341_vm5 = vcmp.eq.s32.totalorder %v6339_v36, 0  ;;  %vm6344_vm7 = vcmp.eq.s32.totalorder %v6339_v36, 2 }
 0x8bc   : > { %v6139_v14 = vsel %vm6132_vm1, %v6135_v20, %v6138_v24  ;;  %v6449_v21 = vxor.u32 2147483648, %v8833_v19  ;;  %v6343_v30 = vsel %vm6341_vm5, %v16465_v10, %v6342_v56  ;;  %v6346_v47 = vsel %vm6344_vm7, %v6345_v16, %v16464_v59 }
 0x8bd   : > { %v8835_v13 = vpop.eup %8834  ;;  %v6140_v46 = vsel %vm6129_vm9, nan, %v6139_v14  ;;  %vm6445_vm3 = vcmp.eq.s32.totalorder %v6443_v50, 0  ;;  %vm6340_vm14 = vcmp.lt.s32.totalorder %v6339_v36, 2  ;;  %vm6444_vm10 = vcmp.lt.s32.totalorder %v6443_v50, 2 }
 0x8be   : > { %v6446_v38 = vxor.u32 2147483648, %v8835_v13  ;;  %7746 = vmatpush1.msra.mxu0 %v6140_v46  ;;  %v6450_v40 = vsel %vm6448_vm15, %v6449_v21, %v8835_v13  ;;  %v6347_v28 = vsel %vm6340_vm14, %v6343_v30, %v6346_v47  ;;  %vm6441_vm2 = vweird.f32 %v16447_v27 }
 0x8bf   : > { %8264 = vmatmul.mubr.msk.f32.vlgmr.msra.gmra.mxu0 %vm16466_vm11, %v7701_v1  ;;  %vm6337_vm13 = vweird.f32 %v16459_v22  ;;  %v7708_v60 = vlaneseq  ;;  %v8906_v35 = vmov 1966171168  }
 0x8c0   : > { %v6447_v48 = vsel %vm6445_vm3, %v8833_v19, %v6446_v38  ;;  %v6348_v41 = vsel %vm6337_vm13, nan, %v6347_v28  ;;  %v7864_v9 = vunpack.c.l.s4 %v8906_v35 }
 0x8c1   : > { %v6451_v4 = vsel %vm6444_vm10, %v6447_v48, %v6450_v40  ;;  %v7709_v8 = vshrl.u32 %v7708_v60, 7  ;;  %vm7888_vm8 = vcmp.lt.s32.totalorder %v7708_v60, 512 }
 0x8c2   : > { %v6452_v25 = vsel %vm6441_vm2, nan, %v6451_v4  ;;  %v7865_v0 = vunpack.c.0.s8 %v7864_v9 }
 0x8c3   : > { %7816 = vmatprep.subr.mxu1 %v6452_v25  ;;  %v7710_v57 = vsub.s32 0, %v7709_v8 }
 0x8c4   : > { %7817 = vmatpush1.msra.mxu1 %v6348_v41  ;;  %v7868_v49 = vsub.s32 %v7865_v0, %v7709_v8 }
 0x8c5   : > { %8265 = vmatmul.mubr.msk.f32.vlgmr.msra.gmra.mxu1 %vm16467_vm12, %v7701_v1  ;;  %v7711_v29 = vrot.slane %v7706_v55, %v7710_v57 }
 0x97f   : > { %v7781_v23 = vpop.f32.mrf.mxu0 }
 0x980   : > { %v7782_v37 = vadd.f32 %v7781_v23, %v7711_v29 }
 0x981   : > { %v7783_v27 = vpop.f32.mrf.mxu0 }
 0x982   : > { %v7784_v42 = vadd.f32 %v7783_v27, %v7711_v29 }
 0x984   : > { %v7861_v17 = vcombine.low %v7782_v37, %v7784_v42 }
 0x985   : > { %v7852_v63 = vpop.f32.mrf.mxu1 }
 0x986   : > { %v7853_v26 = vadd.f32 %v7852_v63, %v7711_v29  ;;  %v7869_v33 = vrot.slane %v7861_v17, %v7868_v49 }
 0x987   : > { %v7854_v3 = vpop.f32.mrf.mxu1 }
 0x988   : > { %v7855_v43 = vadd.f32 %v7854_v3, %v7711_v29 }
 0x98a   : > { %v7862_v39 = vcombine.low %v7853_v26, %v7855_v43 }
 0x98c   : > { %v7876_v44 = vrot.slane %v7862_v39, %v7868_v49 }
 0x98e   : > { %v7877_v52 = vcombine.low %v7869_v33, %v7876_v44 }
 0x990   : > { %v7884_v2 = vrot.slane %v7877_v52, %v7868_v49 }
 0x992   : > { %7890 = vst.msk [vmem:[%s301_s28] sm:$0xf] %vm7888_vm8, %v7884_v2 }
 0x993   : > { %8849 = shalt.err (!%p8846_p3)
}
 0x994   : > { %s8850_s23 = scalar_lea.hbm %s7904_s18, 64  ;;  %s8854_s26 = scalar_lea.hbm %s15495_s8, 128 }
 0x995   : > { %p8851_p4 = scmp.ne.s32.totalorder %s7904_s18, %s8850_s23  ;;  %p8855_p9 = scmp.lt.s32.totalorder %s7904_s18, %s15495_s8 }
 0x996   : > { %p8856_p10 = scmp.lt.s32.totalorder %s8854_s26, %s8850_s23 }
 0x997   : > { %p8852_p7 = pnand %p8851_p4, %p8994_p5 }
 0x998   : > { %p8857_p11 = por %p8856_p10, %p8855_p9 }
 0x999   : > { %p8853_p8 = pneg %p8852_p7 }
 0x99b   : > { %p8858_p12 = pnand %p8857_p11, %p8853_p8 }
 0x99d   : > { %8861 = shalt.err (!%p8858_p12)
}
 0x99e   : > { %8528 = dma.vmem_to_hbm [thread:$0]  (%p8994_p5), %s7907_s11, 64, %s7904_s18, %s7892_s19  }
 0x99f PF: > { %p8534_p13 = scmp.ge.s32.totalorder %s8896_s10, 2  ;;  %s7918_s13 = sand.u32 1, %s8884_s29  }
 0x9a0   : > { %s7919_s14 = scalar_lea.sflag [#allocation4], %s7918_s13 }
 0x9a1   : > { %p8531_p0 = pnand %p8534_p13, %p8998_p6 }
 0x9a3   : > { %p8532_p1 = pneg %p8531_p0 }
 0x9a5   : > { %8879 = dma.done.wait (%p8532_p1), %s7919_s14, 64  }
 0x9a6   : > { %8881 = vsyncadd (%p8532_p1), %s7919_s14, 4294967232  ;;  %p20_p2 = scmp.ge.s32.totalorder %s8981_s12, 4   ;;  %s16468_s29 = smov %s8888_s30 }
 0x9a7   : > { %s16469_s30 = smov %s8892_s9  ;;  %s16470_s9 = smov %s8992_s15 }
 0x9a8   : > { %s16471_s10 = smov %s8981_s12  ;;  %22 = sbr.rel (!%p20_p2) target bundleno = 6 (0x6), region = 87 }
 0x9ad   :  { %7924 = vsyncpa [#allocation4], 1 }
 0x9ae   :  { %7926 = vsyncpa [#allocation4 + $0x1], 1 }

</bundles_post_ra>
